<compile_context>
chip_gen: v7x
topology: tpu7x:2x2x1
jax: 0.10.0
libtpu: 0.0.40
codegen_flags: <defaults>
</compile_context>

<pallas_src>
import functools

import numpy as np
import jax
import jax.numpy as jnp
from jax.experimental import pallas as pl
from jax.experimental.pallas import tpu as pltpu

# Explicit scoped-VMEM budget; the kernels below need only a few MiB, so this
# is safe on v5e/v6e (128 MiB physical) and v7x (64 MiB physical).
_VMEM_LIMIT = 32 * 1024 * 1024


def _round_up(a, m):
    return -(-a // m) * m


def _pick_tile(d, unit, cap):
    """Pick (tile, padded_dim): tile is a multiple of `unit` (<= cap), tile
    divides padded_dim, padding is near-minimal, and the largest tile within
    ~12.5% extra padding is preferred (fewer grid steps)."""
    if d <= unit:
        return unit, unit
    cands = []
    t = unit
    while t <= cap:
        cands.append((t, _round_up(d, t)))
        t += unit
    best_p = min(p for _, p in cands)
    slack = best_p + max(best_p // 8, unit)
    tile = max(t for t, p in cands if p <= slack)
    return tile, _round_up(d, tile)


# ----------------------------------------------------------------------------
# Pallas kernels
# ----------------------------------------------------------------------------
def _mm_kernel(x_ref, w_ref, b_ref, o_ref, acc_ref, *, relu):
    """Tiled matmul (bf16 MXU operands, f32 accumulation) with K-axis
    accumulation and fused bias + optional ReLU epilogue in f32."""
    k = pl.program_id(2)

    @pl.when(k == 0)
    def _():
        acc_ref[...] = jnp.zeros_like(acc_ref)

    acc_ref[...] += jnp.dot(x_ref[...], w_ref[...],
                            preferred_element_type=jnp.float32)

    @pl.when(k == pl.num_programs(2) - 1)
    def _():
        y = acc_ref[...] + b_ref[...]          # f32 epilogue on the accumulator
        if relu:
            y = jnp.maximum(y, 0.0)
        o_ref[...] = y.astype(o_ref.dtype)     # cast (e.g. to bf16) only at store


def _maxpool_kernel(ee_ref, eo_ref, oe_ref, oo_ref, o_ref):
    """MaxPool2d(3, stride=2) from four stride-2 phase planes.

    ee: even rows / even cols, shape (1, OH+1, OW+1, C)
    eo: even rows / odd  cols, shape (1, OH+1, OW,   C)
    oe: odd  rows / even cols, shape (1, OH,   OW+1, C)
    oo: odd  rows / odd  cols, shape (1, OH,   OW,   C)
    Only unit (static) shifts are needed inside the kernel.
    """
    ee = ee_ref[0]
    eo = eo_ref[0]
    oe = oe_ref[0]
    oo = oo_ref[0]
    OH, OW = oo.shape[0], oo.shape[1]

    m = oo
    m = jnp.maximum(m, eo[:OH])
    m = jnp.maximum(m, eo[1:OH + 1])
    m = jnp.maximum(m, oe[:, :OW])
    m = jnp.maximum(m, oe[:, 1:OW + 1])
    m = jnp.maximum(m, ee[:OH, :OW])
    m = jnp.maximum(m, ee[:OH, 1:OW + 1])
    m = jnp.maximum(m, ee[1:OH + 1, :OW])
    m = jnp.maximum(m, ee[1:OH + 1, 1:OW + 1])
    o_ref[0] = m


def _avgpool_kernel(x_ref, p_ref, o_ref):
    """Adaptive-avg-pool as a tiny matmul against a pooling matrix."""
    o_ref[...] = jnp.dot(x_ref[...], p_ref[...],
                         preferred_element_type=jnp.float32).astype(o_ref.dtype)


# ----------------------------------------------------------------------------
# Wrappers around pallas_call
# ----------------------------------------------------------------------------
def matmul_bias_act(x, w, b, relu=False, out_dtype=None):
    """y = [relu](x @ w + b) via the tiled Pallas TPU matmul kernel.

    Operands are cast to bf16 for the MXU; accumulation / bias / ReLU are f32.
    """
    M, K = x.shape
    K2, N = w.shape
    assert K == K2
    out_dtype = out_dtype if out_dtype is not None else x.dtype

    tm, Mp = _pick_tile(M, 16, 256)    # sublane dim: 16-multiples (bf16 safe)
    tn, Np = _pick_tile(N, 128, 256)   # lane dim
    tk, Kp = _pick_tile(K, 128, 512)   # contraction dim

    xb = x.astype(jnp.bfloat16)
    wb = w.astype(jnp.bfloat16)
    xp = jnp.pad(xb, ((0, Mp - M), (0, Kp - K)))
    wp = jnp.pad(wb, ((0, Kp - K), (0, Np - N)))
    bp = jnp.pad(b.astype(jnp.float32), ((0, Np - N),)).reshape(1, Np)

    grid = (Mp // tm, Np // tn, Kp // tk)
    out_isz = jnp.dtype(out_dtype).itemsize
    cost = pl.CostEstimate(
        flops=2 * Mp * Np * Kp,
        transcendentals=0,
        bytes_accessed=Mp * Kp * 2 + Kp * Np * 2 + Mp * Np * out_isz + Np * 4)

    out = pl.pallas_call(
        functools.partial(_mm_kernel, relu=relu),
        out_shape=jax.ShapeDtypeStruct((Mp, Np), out_dtype),
        grid_spec=pltpu.PrefetchScalarGridSpec(
            num_scalar_prefetch=0,
            grid=grid,
            in_specs=[
                pl.BlockSpec((tm, tk), lambda i, j, k: (i, k)),
                pl.BlockSpec((tk, tn), lambda i, j, k: (k, j)),
                pl.BlockSpec((1, tn), lambda i, j, k: (0, j)),   # const over k: no re-DMA
            ],
            out_specs=pl.BlockSpec((tm, tn), lambda i, j, k: (i, j)),
            scratch_shapes=[pltpu.VMEM((tm, tn), jnp.float32)],
        ),
        compiler_params=pltpu.CompilerParams(
            dimension_semantics=("parallel", "parallel", "arbitrary"),
            vmem_limit_bytes=_VMEM_LIMIT),
        cost_estimate=cost,
    )(xp, wp, bp)
    return out[:M, :N]


def maxpool_3x3_s2(x):
    """MaxPool2d(kernel_size=3, stride=2) on NHWC.

    The stride-2 decimation is folded into four phase planes (total HBM traffic
    ~1x the input instead of the 9x stacked-window amplification); the kernel
    only does unit-shift maxima and is tiled (double-buffered) over the batch.
    """
    N, H, W, C = x.shape
    OH = (H - 3) // 2 + 1
    OW = (W - 3) // 2 + 1
    ee = x[:, 0:2 * OH + 1:2, 0:2 * OW + 1:2, :]   # (N, OH+1, OW+1, C)
    eo = x[:, 0:2 * OH + 1:2, 1:2 * OW:2, :]       # (N, OH+1, OW,   C)
    oe = x[:, 1:2 * OH:2, 0:2 * OW + 1:2, :]       # (N, OH,   OW+1, C)
    oo = x[:, 1:2 * OH:2, 1:2 * OW:2, :]           # (N, OH,   OW,   C)

    out = pl.pallas_call(
        _maxpool_kernel,
        out_shape=jax.ShapeDtypeStruct((N, OH, OW, C), x.dtype),
        grid_spec=pltpu.PrefetchScalarGridSpec(
            num_scalar_prefetch=0,
            grid=(N,),
            in_specs=[
                pl.BlockSpec((1, OH + 1, OW + 1, C), lambda n: (n, 0, 0, 0)),
                pl.BlockSpec((1, OH + 1, OW, C), lambda n: (n, 0, 0, 0)),
                pl.BlockSpec((1, OH, OW + 1, C), lambda n: (n, 0, 0, 0)),
                pl.BlockSpec((1, OH, OW, C), lambda n: (n, 0, 0, 0)),
            ],
            out_specs=pl.BlockSpec((1, OH, OW, C), lambda n: (n, 0, 0, 0)),
        ),
        compiler_params=pltpu.CompilerParams(
            dimension_semantics=("parallel",),
            vmem_limit_bytes=_VMEM_LIMIT),
    )(ee, eo, oe, oo)
    return out


def conv2d(x, w, b, stride, padding, relu=True):
    """PyTorch-style Conv2d (cross-correlation) on NHWC via im2col + matmul.

    w layout: [kh, kw, C_in, C_out].  Patches are materialized in bf16 (half
    the f32 traffic).
    """
    # TODO(synk): fuse im2col into the matmul grid (per-tap accumulation with
    # Element-offset BlockSpecs) to eliminate the kh*kw HBM amplification.
    N, H, W, C = x.shape
    kh, kw, _, Cout = w.shape
    xp = jnp.pad(x, ((0, 0), (padding, padding), (padding, padding), (0, 0)))
    Hp, Wp = H + 2 * padding, W + 2 * padding
    OH = (Hp - kh) // stride + 1
    OW = (Wp - kw) // stride + 1
    cols = []
    for i in range(kh):
        for j in range(kw):
            cols.append(xp[:, i:i + (OH - 1) * stride + 1:stride,
                           j:j + (OW - 1) * stride + 1:stride, :])
    patches = jnp.stack(cols, axis=3)                 # [N, OH, OW, kh*kw, C]
    patches = patches.reshape(N * OH * OW, kh * kw * C)
    wf = w.reshape(kh * kw * C, Cout)
    y = matmul_bias_act(patches, wf, b, relu=relu, out_dtype=jnp.bfloat16)
    return y.reshape(N, OH, OW, Cout)


def _adaptive_pool_matrix(in_size, out_size):
    P = np.zeros((in_size, out_size), dtype=np.float32)
    for o in range(out_size):
        s = (o * in_size) // out_size
        e = -(-((o + 1) * in_size) // out_size)      # ceil
        P[s:e, o] = 1.0 / (e - s)
    return P


def adaptive_avg_pool_6x6_flatten(x):
    """AdaptiveAvgPool2d((6,6)) + torch.flatten(x, 1), matching NCHW flatten order."""
    N, H, W, C = x.shape
    Ph = _adaptive_pool_matrix(H, 6)
    Pw = _adaptive_pool_matrix(W, 6)
    P = np.kron(Ph, Pw)                               # [H*W, 36]
    HW = H * W
    KP = _round_up(HW, 8)
    P = jnp.asarray(np.pad(P, ((0, KP - HW), (0, 0))), dtype=jnp.bfloat16)

    xf = jnp.transpose(x, (0, 3, 1, 2)).reshape(N * C, HW)
    xf = jnp.pad(xf, ((0, 0), (0, KP - HW)))
    R = N * C
    TR, Rp = _pick_tile(R, 16, 256)
    xfp = jnp.pad(xf, ((0, Rp - R), (0, 0)))

    out = pl.pallas_call(
        _avgpool_kernel,
        out_shape=jax.ShapeDtypeStruct((Rp, 36), x.dtype),
        grid_spec=pltpu.PrefetchScalarGridSpec(
            num_scalar_prefetch=0,
            grid=(Rp // TR,),
            in_specs=[pl.BlockSpec((TR, KP), lambda r: (r, 0)),
                      pl.BlockSpec((KP, 36), lambda r: (0, 0))],
            out_specs=pl.BlockSpec((TR, 36), lambda r: (r, 0)),
        ),
        compiler_params=pltpu.CompilerParams(
            dimension_semantics=("parallel",),
            vmem_limit_bytes=_VMEM_LIMIT),
    )(xfp, P)
    return out[:R].reshape(N, C * 36)                 # (c, h, w) flatten order


# ----------------------------------------------------------------------------
# AlexNet parameters + forward
# ----------------------------------------------------------------------------
def init_params(key, num_classes=1000):
    convs = [
        (11, 11, 3, 64),
        (5, 5, 64, 192),
        (3, 3, 192, 384),
        (3, 3, 384, 256),
        (3, 3, 256, 256),
    ]
    fcs = [(256 * 6 * 6, 4096), (4096, 4096), (4096, num_classes)]
    params = {}
    keys = jax.random.split(key, 2 * (len(convs) + len(fcs)))
    ki = 0
    for idx, (kh, kw, ci, co) in enumerate(convs):
        fan_in = kh * kw * ci
        params[f"conv{idx}_w"] = jax.random.normal(
            keys[ki], (kh, kw, ci, co), jnp.float32) / np.sqrt(fan_in)
        ki += 1
        params[f"conv{idx}_b"] = 0.01 * jax.random.normal(
            keys[ki], (co,), jnp.float32)
        ki += 1
    for idx, (fi, fo) in enumerate(fcs):
        params[f"fc{idx}_w"] = jax.random.normal(
            keys[ki], (fi, fo), jnp.float32) / np.sqrt(fi)
        ki += 1
        params[f"fc{idx}_b"] = 0.01 * jax.random.normal(
            keys[ki], (fo,), jnp.float32)
        ki += 1
    return params


def alexnet_forward(params, x_nchw):
    x = jnp.transpose(x_nchw, (0, 2, 3, 1)).astype(jnp.bfloat16)  # NCHW -> NHWC, bf16
    # features
    x = conv2d(x, params["conv0_w"], params["conv0_b"], stride=4, padding=2)
    x = maxpool_3x3_s2(x)
    x = conv2d(x, params["conv1_w"], params["conv1_b"], stride=1, padding=2)
    x = maxpool_3x3_s2(x)
    x = conv2d(x, params["conv2_w"], params["conv2_b"], stride=1, padding=1)
    x = conv2d(x, params["conv3_w"], params["conv3_b"], stride=1, padding=1)
    x = conv2d(x, params["conv4_w"], params["conv4_b"], stride=1, padding=1)
    x = maxpool_3x3_s2(x)
    # avgpool + flatten
    x = adaptive_avg_pool_6x6_flatten(x)      # [N, 256*6*6]
    # classifier
    # TODO(synk): nn.Dropout is treated as identity (inference semantics);
    # training-mode random masking is not implemented.
    x = matmul_bias_act(x, params["fc0_w"], params["fc0_b"], relu=True,
                        out_dtype=jnp.bfloat16)
    x = matmul_bias_act(x, params["fc1_w"], params["fc1_b"], relu=True,
                        out_dtype=jnp.bfloat16)
    x = matmul_bias_act(x, params["fc2_w"], params["fc2_b"], relu=False,
                        out_dtype=jnp.float32)
    return x


if __name__ == "__main__":
    key = jax.random.PRNGKey(0)
    pkey, xkey = jax.random.split(key)
    num_classes = 1000
    params = init_params(pkey, num_classes=num_classes)
    # Smallest spatial size for which every stage produces a valid (>=1) map.
    x = jax.random.normal(xkey, (2, 3, 63, 63), jnp.float32)  # NCHW
    fwd = jax.jit(alexnet_forward)
    out = jax.block_until_ready(fwd(params, x))
    assert out.shape == (2, num_classes), out.shape
    assert out.dtype == jnp.float32, out.dtype
    assert bool(jnp.all(jnp.isfinite(out)))
    print("KERNEL_OK")
</pallas_src>

<mosaic_0001>
module attributes {stable_mosaic.version = 11 : i64} {
  func.func @_mm_kernel(%arg0: i32, %arg1: i32, %arg2: i32, %arg3: memref<256x512xbf16, #tpu.memory_space<vmem>>, %arg4: memref<512x128xbf16, #tpu.memory_space<vmem>>, %arg5: memref<1x128xf32, #tpu.memory_space<vmem>>, %arg6: memref<256x128xbf16, #tpu.memory_space<vmem>>, %arg7: memref<256x128xf32, #tpu.memory_space<vmem>>) attributes {dimension_semantics = [#tpu.dimension_semantics<parallel>, #tpu.dimension_semantics<parallel>, #tpu.dimension_semantics<arbitrary>], iteration_bounds = array<i64: 2, 1, 1>, scalar_prefetch = 0 : i64, scratch_operands = 1 : i64, tpu.core_type = #tpu.core_type<tc>, window_params = [{transform_indices = @transform_0, window_bounds = array<i64: 256, 512>}, {transform_indices = @transform_1, window_bounds = array<i64: 512, 128>}, {transform_indices = @transform_2, window_bounds = array<i64: 1, 128>}, {transform_indices = @transform_3, window_bounds = array<i64: 256, 128>}]} {
    %c0_i32 = arith.constant 0 : i32
    %0 = arith.cmpi eq, %arg2, %c0_i32 : i32
    %1 = arith.extui %0 : i1 to i32
    %c0_i32_0 = arith.constant 0 : i32
    %2 = arith.cmpi ne, %1, %c0_i32_0 : i32
    scf.if %2 {
      %cst_10 = arith.constant 0.000000e+00 : f32
      %12 = vector.broadcast %cst_10 : f32 to vector<256x128xf32>
      %c0_11 = arith.constant 0 : index
      %c0_12 = arith.constant 0 : index
      %13 = vector.load %arg7[%c0_11, %c0_12] : memref<256x128xf32, #tpu.memory_space<vmem>>, vector<256x128xf32>
      tpu.vector_store %arg7[%c0_11, %c0_12], %12 {strides = array<i32>} : memref<256x128xf32, #tpu.memory_space<vmem>>, vector<256x128xf32>,
    } else {
    }
    %c0 = arith.constant 0 : index
    %c0_1 = arith.constant 0 : index
    %3 = vector.load %arg7[%c0, %c0_1] : memref<256x128xf32, #tpu.memory_space<vmem>>, vector<256x128xf32>
    %c0_2 = arith.constant 0 : index
    %c0_3 = arith.constant 0 : index
    %4 = vector.load %arg3[%c0_2, %c0_3] : memref<256x512xbf16, #tpu.memory_space<vmem>>, vector<256x512xbf16>
    %c0_4 = arith.constant 0 : index
    %c0_5 = arith.constant 0 : index
    %5 = vector.load %arg4[%c0_4, %c0_5] : memref<512x128xbf16, #tpu.memory_space<vmem>>, vector<512x128xbf16>
    %cst = arith.constant dense<0.000000e+00> : vector<256x128xf32>
    %6 = tpu.matmul %4, %5, %cst {dimension_numbers = #tpu.dot_dimension_numbers<[1], [0], [0], [1], [0, 0, 1, 1], [], []>} : vector<256x512xbf16>, vector<512x128xbf16>, vector<256x128xf32> -> vector<256x128xf32>
    %7 = arith.addf %3, %6 : vector<256x128xf32>
    %c0_6 = arith.constant 0 : index
    %c0_7 = arith.constant 0 : index
    %8 = vector.load %arg7[%c0_6, %c0_7] : memref<256x128xf32, #tpu.memory_space<vmem>>, vector<256x128xf32>
    tpu.vector_store %arg7[%c0_6, %c0_7], %7 {strides = array<i32>} : memref<256x128xf32, #tpu.memory_space<vmem>>, vector<256x128xf32>,
    %c0_i32_8 = arith.constant 0 : i32
    %9 = arith.cmpi eq, %arg2, %c0_i32_8 : i32
    %10 = arith.extui %9 : i1 to i32
    %c0_i32_9 = arith.constant 0 : i32
    %11 = arith.cmpi ne, %10, %c0_i32_9 : i32
    scf.if %11 {
      %c0_10 = arith.constant 0 : index
      %c0_11 = arith.constant 0 : index
      %12 = vector.load %arg7[%c0_10, %c0_11] : memref<256x128xf32, #tpu.memory_space<vmem>>, vector<256x128xf32>
      %c0_12 = arith.constant 0 : index
      %c0_13 = arith.constant 0 : index
      %13 = vector.load %arg5[%c0_12, %c0_13] : memref<1x128xf32, #tpu.memory_space<vmem>>, vector<1x128xf32>
      %14 = vector.broadcast %13 : vector<1x128xf32> to vector<256x128xf32>
      %15 = arith.addf %12, %14 : vector<256x128xf32>
      %cst_14 = arith.constant 0.000000e+00 : f32
      %16 = vector.broadcast %cst_14 : f32 to vector<256x128xf32>
      %17 = arith.maximumf %15, %16 : vector<256x128xf32>
      %18 = arith.truncf %17 : vector<256x128xf32> to vector<256x128xbf16>
      %c0_15 = arith.constant 0 : index
      %c0_16 = arith.constant 0 : index
      %19 = vector.load %arg6[%c0_15, %c0_16] : memref<256x128xbf16, #tpu.memory_space<vmem>>, vector<256x128xbf16>
      tpu.vector_store %arg6[%c0_15, %c0_16], %18 {strides = array<i32>} : memref<256x128xbf16, #tpu.memory_space<vmem>>, vector<256x128xbf16>,
    } else {
    }
    return
  }
  func.func @transform_0(%arg0: i32, %arg1: i32, %arg2: i32) -> (i32, i32) {
    %c0_i32 = arith.constant 0 : i32
    return %arg0, %arg2 : i32, i32
  }
  func.func @transform_1(%arg0: i32, %arg1: i32, %arg2: i32) -> (i32, i32) {
    %c0_i32 = arith.constant 0 : i32
    return %arg2, %arg1 : i32, i32
  }
  func.func @transform_2(%arg0: i32, %arg1: i32, %arg2: i32) -> (i32, i32) {
    %c0_i32 = arith.constant 0 : i32
    %c0_i32_0 = arith.constant 0 : i32
    return %c0_i32, %arg1 : i32, i32
  }
  func.func @transform_3(%arg0: i32, %arg1: i32, %arg2: i32) -> (i32, i32) {
    %c0_i32 = arith.constant 0 : i32
    return %arg0, %arg1 : i32, i32
  }
}

module attributes {stable_mosaic.version = 11 : i64} {
  func.func @_maxpool_kernel(%arg0: i32, %arg1: memref<1x8x8x64xbf16, #tpu.memory_space<vmem>>, %arg2: memref<1x8x7x64xbf16, #tpu.memory_space<vmem>>, %arg3: memref<1x7x8x64xbf16, #tpu.memory_space<vmem>>, %arg4: memref<1x7x7x64xbf16, #tpu.memory_space<vmem>>, %arg5: memref<1x7x7x64xbf16, #tpu.memory_space<vmem>>) attributes {dimension_semantics = [#tpu.dimension_semantics<parallel>], iteration_bounds = array<i64: 2>, scalar_prefetch = 0 : i64, scratch_operands = 0 : i64, tpu.core_type = #tpu.core_type<tc>, window_params = [{transform_indices = @transform_0, window_bounds = array<i64: 1, 8, 8, 64>}, {transform_indices = @transform_1, window_bounds = array<i64: 1, 8, 7, 64>}, {transform_indices = @transform_2, window_bounds = array<i64: 1, 7, 8, 64>}, {transform_indices = @transform_3, window_bounds = array<i64: 1, 7, 7, 64>}, {transform_indices = @transform_4, window_bounds = array<i64: 1, 7, 7, 64>}]} {
    %c0 = arith.constant 0 : index
    %c0_0 = arith.constant 0 : index
    %c0_1 = arith.constant 0 : index
    %c0_2 = arith.constant 0 : index
    %0 = vector.load %arg1[%c0, %c0_0, %c0_1, %c0_2] : memref<1x8x8x64xbf16, #tpu.memory_space<vmem>>, vector<1x8x8x64xbf16>
    %1 = vector.shape_cast %0 : vector<1x8x8x64xbf16> to vector<8x8x64xbf16>
    %c0_3 = arith.constant 0 : index
    %c0_4 = arith.constant 0 : index
    %c0_5 = arith.constant 0 : index
    %c0_6 = arith.constant 0 : index
    %2 = vector.load %arg2[%c0_3, %c0_4, %c0_5, %c0_6] : memref<1x8x7x64xbf16, #tpu.memory_space<vmem>>, vector<1x8x7x64xbf16>
    %3 = vector.shape_cast %2 : vector<1x8x7x64xbf16> to vector<8x7x64xbf16>
    %c0_7 = arith.constant 0 : index
    %c0_8 = arith.constant 0 : index
    %c0_9 = arith.constant 0 : index
    %c0_10 = arith.constant 0 : index
    %4 = vector.load %arg3[%c0_7, %c0_8, %c0_9, %c0_10] : memref<1x7x8x64xbf16, #tpu.memory_space<vmem>>, vector<1x7x8x64xbf16>
    %5 = vector.shape_cast %4 : vector<1x7x8x64xbf16> to vector<7x8x64xbf16>
    %c0_11 = arith.constant 0 : index
    %c0_12 = arith.constant 0 : index
    %c0_13 = arith.constant 0 : index
    %c0_14 = arith.constant 0 : index
    %6 = vector.load %arg4[%c0_11, %c0_12, %c0_13, %c0_14] : memref<1x7x7x64xbf16, #tpu.memory_space<vmem>>, vector<1x7x7x64xbf16>
    %7 = vector.shape_cast %6 : vector<1x7x7x64xbf16> to vector<7x7x64xbf16>
    %8 = vector.extract_strided_slice %3 {offsets = [0, 0, 0], sizes = [7, 7, 64], strides = [1, 1, 1]} : vector<8x7x64xbf16> to vector<7x7x64xbf16>
    %9 = arith.maximumf %7, %8 : vector<7x7x64xbf16>
    %10 = vector.extract_strided_slice %3 {offsets = [1, 0, 0], sizes = [7, 7, 64], strides = [1, 1, 1]} : vector<8x7x64xbf16> to vector<7x7x64xbf16>
    %11 = arith.maximumf %9, %10 : vector<7x7x64xbf16>
    %12 = vector.extract_strided_slice %5 {offsets = [0, 0, 0], sizes = [7, 7, 64], strides = [1, 1, 1]} : vector<7x8x64xbf16> to vector<7x7x64xbf16>
    %13 = arith.maximumf %11, %12 : vector<7x7x64xbf16>
    %14 = vector.extract_strided_slice %5 {offsets = [0, 1, 0], sizes = [7, 7, 64], strides = [1, 1, 1]} : vector<7x8x64xbf16> to vector<7x7x64xbf16>
    %15 = arith.maximumf %13, %14 : vector<7x7x64xbf16>
    %16 = vector.extract_strided_slice %1 {offsets = [0, 0, 0], sizes = [7, 7, 64], strides = [1, 1, 1]} : vector<8x8x64xbf16> to vector<7x7x64xbf16>
    %17 = arith.maximumf %15, %16 : vector<7x7x64xbf16>
    %18 = vector.extract_strided_slice %1 {offsets = [0, 1, 0], sizes = [7, 7, 64], strides = [1, 1, 1]} : vector<8x8x64xbf16> to vector<7x7x64xbf16>
    %19 = arith.maximumf %17, %18 : vector<7x7x64xbf16>
    %20 = vector.extract_strided_slice %1 {offsets = [1, 0, 0], sizes = [7, 7, 64], strides = [1, 1, 1]} : vector<8x8x64xbf16> to vector<7x7x64xbf16>
    %21 = arith.maximumf %19, %20 : vector<7x7x64xbf16>
    %22 = vector.extract_strided_slice %1 {offsets = [1, 1, 0], sizes = [7, 7, 64], strides = [1, 1, 1]} : vector<8x8x64xbf16> to vector<7x7x64xbf16>
    %23 = arith.maximumf %21, %22 : vector<7x7x64xbf16>
    %c0_15 = arith.constant 0 : index
    %c0_16 = arith.constant 0 : index
    %c0_17 = arith.constant 0 : index
    %c0_18 = arith.constant 0 : index
    %24 = vector.load %arg5[%c0_15, %c0_16, %c0_17, %c0_18] : memref<1x7x7x64xbf16, #tpu.memory_space<vmem>>, vector<1x7x7x64xbf16>
    %25 = vector.shape_cast %24 : vector<1x7x7x64xbf16> to vector<7x7x64xbf16>
    %26 = vector.shape_cast %23 : vector<7x7x64xbf16> to vector<1x7x7x64xbf16>
    tpu.vector_store %arg5[%c0_15, %c0_16, %c0_17, %c0_18], %26 {strides = array<i32>} : memref<1x7x7x64xbf16, #tpu.memory_space<vmem>>, vector<1x7x7x64xbf16>,
    return
  }
  func.func @transform_0(%arg0: i32) -> (i32, i32, i32, i32) {
    %c0_i32 = arith.constant 0 : i32
    %c0_i32_0 = arith.constant 0 : i32
    %c0_i32_1 = arith.constant 0 : i32
    %c0_i32_2 = arith.constant 0 : i32
    return %arg0, %c0_i32, %c0_i32_0, %c0_i32_1 : i32, i32, i32, i32
  }
  func.func @transform_1(%arg0: i32) -> (i32, i32, i32, i32) {
    %c0_i32 = arith.constant 0 : i32
    %c0_i32_0 = arith.constant 0 : i32
    %c0_i32_1 = arith.constant 0 : i32
    %c0_i32_2 = arith.constant 0 : i32
    return %arg0, %c0_i32, %c0_i32_0, %c0_i32_1 : i32, i32, i32, i32
  }
  func.func @transform_2(%arg0: i32) -> (i32, i32, i32, i32) {
    %c0_i32 = arith.constant 0 : i32
    %c0_i32_0 = arith.constant 0 : i32
    %c0_i32_1 = arith.constant 0 : i32
    %c0_i32_2 = arith.constant 0 : i32
    return %arg0, %c0_i32, %c0_i32_0, %c0_i32_1 : i32, i32, i32, i32
  }
  func.func @transform_3(%arg0: i32) -> (i32, i32, i32, i32) {
    %c0_i32 = arith.constant 0 : i32
    %c0_i32_0 = arith.constant 0 : i32
    %c0_i32_1 = arith.constant 0 : i32
    %c0_i32_2 = arith.constant 0 : i32
    return %arg0, %c0_i32, %c0_i32_0, %c0_i32_1 : i32, i32, i32, i32
  }
  func.func @transform_4(%arg0: i32) -> (i32, i32, i32, i32) {
    %c0_i32 = arith.constant 0 : i32
    %c0_i32_0 = arith.constant 0 : i32
    %c0_i32_1 = arith.constant 0 : i32
    %c0_i32_2 = arith.constant 0 : i32
    return %arg0, %c0_i32, %c0_i32_0, %c0_i32_1 : i32, i32, i32, i32
  }
}

module attributes {stable_mosaic.version = 11 : i64} {
  func.func @_mm_kernel(%arg0: i32, %arg1: i32, %arg2: i32, %arg3: memref<128x256xbf16, #tpu.memory_space<vmem>>, %arg4: memref<256x256xbf16, #tpu.memory_space<vmem>>, %arg5: memref<1x256xf32, #tpu.memory_space<vmem>>, %arg6: memref<128x256xbf16, #tpu.memory_space<vmem>>, %arg7: memref<128x256xf32, #tpu.memory_space<vmem>>) attributes {dimension_semantics = [#tpu.dimension_semantics<parallel>, #tpu.dimension_semantics<parallel>, #tpu.dimension_semantics<arbitrary>], iteration_bounds = array<i64: 1, 1, 7>, scalar_prefetch = 0 : i64, scratch_operands = 1 : i64, tpu.core_type = #tpu.core_type<tc>, window_params = [{transform_indices = @transform_0, window_bounds = array<i64: 128, 256>}, {transform_indices = @transform_1, window_bounds = array<i64: 256, 256>}, {transform_indices = @transform_2, window_bounds = array<i64: 1, 256>}, {transform_indices = @transform_3, window_bounds = array<i64: 128, 256>}]} {
    %c0_i32 = arith.constant 0 : i32
    %0 = arith.cmpi eq, %arg2, %c0_i32 : i32
    %1 = arith.extui %0 : i1 to i32
    %c0_i32_0 = arith.constant 0 : i32
    %2 = arith.cmpi ne, %1, %c0_i32_0 : i32
    scf.if %2 {
      %cst_9 = arith.constant 0.000000e+00 : f32
      %12 = vector.broadcast %cst_9 : f32 to vector<128x256xf32>
      %c0_10 = arith.constant 0 : index
      %c0_11 = arith.constant 0 : index
      %13 = vector.load %arg7[%c0_10, %c0_11] : memref<128x256xf32, #tpu.memory_space<vmem>>, vector<128x256xf32>
      tpu.vector_store %arg7[%c0_10, %c0_11], %12 {strides = array<i32>} : memref<128x256xf32, #tpu.memory_space<vmem>>, vector<128x256xf32>,
    } else {
    }
    %c0 = arith.constant 0 : index
    %c0_1 = arith.constant 0 : index
    %3 = vector.load %arg7[%c0, %c0_1] : memref<128x256xf32, #tpu.memory_space<vmem>>, vector<128x256xf32>
    %c0_2 = arith.constant 0 : index
    %c0_3 = arith.constant 0 : index
    %4 = vector.load %arg3[%c0_2, %c0_3] : memref<128x256xbf16, #tpu.memory_space<vmem>>, vector<128x256xbf16>
    %c0_4 = arith.constant 0 : index
    %c0_5 = arith.constant 0 : index
    %5 = vector.load %arg4[%c0_4, %c0_5] : memref<256x256xbf16, #tpu.memory_space<vmem>>, vector<256x256xbf16>
    %cst = arith.constant dense<0.000000e+00> : vector<128x256xf32>
    %6 = tpu.matmul %4, %5, %cst {dimension_numbers = #tpu.dot_dimension_numbers<[1], [0], [0], [1], [0, 0, 1, 1], [], []>} : vector<128x256xbf16>, vector<256x256xbf16>, vector<128x256xf32> -> vector<128x256xf32>
    %7 = arith.addf %3, %6 : vector<128x256xf32>
    %c0_6 = arith.constant 0 : index
    %c0_7 = arith.constant 0 : index
    %8 = vector.load %arg7[%c0_6, %c0_7] : memref<128x256xf32, #tpu.memory_space<vmem>>, vector<128x256xf32>
    tpu.vector_store %arg7[%c0_6, %c0_7], %7 {strides = array<i32>} : memref<128x256xf32, #tpu.memory_space<vmem>>, vector<128x256xf32>,
    %c6_i32 = arith.constant 6 : i32
    %9 = arith.cmpi eq, %arg2, %c6_i32 : i32
    %10 = arith.extui %9 : i1 to i32
    %c0_i32_8 = arith.constant 0 : i32
    %11 = arith.cmpi ne, %10, %c0_i32_8 : i32
    scf.if %11 {
      %c0_9 = arith.constant 0 : index
      %c0_10 = arith.constant 0 : index
      %12 = vector.load %arg7[%c0_9, %c0_10] : memref<128x256xf32, #tpu.memory_space<vmem>>, vector<128x256xf32>
      %c0_11 = arith.constant 0 : index
      %c0_12 = arith.constant 0 : index
      %13 = vector.load %arg5[%c0_11, %c0_12] : memref<1x256xf32, #tpu.memory_space<vmem>>, vector<1x256xf32>
      %14 = vector.broadcast %13 : vector<1x256xf32> to vector<128x256xf32>
      %15 = arith.addf %12, %14 : vector<128x256xf32>
      %cst_13 = arith.constant 0.000000e+00 : f32
      %16 = vector.broadcast %cst_13 : f32 to vector<128x256xf32>
      %17 = arith.maximumf %15, %16 : vector<128x256xf32>
      %18 = arith.truncf %17 : vector<128x256xf32> to vector<128x256xbf16>
      %c0_14 = arith.constant 0 : index
      %c0_15 = arith.constant 0 : index
      %19 = vector.load %arg6[%c0_14, %c0_15] : memref<128x256xbf16, #tpu.memory_space<vmem>>, vector<128x256xbf16>
      tpu.vector_store %arg6[%c0_14, %c0_15], %18 {strides = array<i32>} : memref<128x256xbf16, #tpu.memory_space<vmem>>, vector<128x256xbf16>,
    } else {
    }
    return
  }
  func.func @transform_0(%arg0: i32, %arg1: i32, %arg2: i32) -> (i32, i32) {
    %c0_i32 = arith.constant 0 : i32
    return %arg0, %arg2 : i32, i32
  }
  func.func @transform_1(%arg0: i32, %arg1: i32, %arg2: i32) -> (i32, i32) {
    %c0_i32 = arith.constant 0 : i32
    return %arg2, %arg1 : i32, i32
  }
  func.func @transform_2(%arg0: i32, %arg1: i32, %arg2: i32) -> (i32, i32) {
    %c0_i32 = arith.constant 0 : i32
    %c0_i32_0 = arith.constant 0 : i32
    return %c0_i32, %arg1 : i32, i32
  }
  func.func @transform_3(%arg0: i32, %arg1: i32, %arg2: i32) -> (i32, i32) {
    %c0_i32 = arith.constant 0 : i32
    return %arg0, %arg1 : i32, i32
  }
}

module attributes {stable_mosaic.version = 11 : i64} {
  func.func @_maxpool_kernel(%arg0: i32, %arg1: memref<1x4x4x192xbf16, #tpu.memory_space<vmem>>, %arg2: memref<1x4x3x192xbf16, #tpu.memory_space<vmem>>, %arg3: memref<1x3x4x192xbf16, #tpu.memory_space<vmem>>, %arg4: memref<1x3x3x192xbf16, #tpu.memory_space<vmem>>, %arg5: memref<1x3x3x192xbf16, #tpu.memory_space<vmem>>) attributes {dimension_semantics = [#tpu.dimension_semantics<parallel>], iteration_bounds = array<i64: 2>, scalar_prefetch = 0 : i64, scratch_operands = 0 : i64, tpu.core_type = #tpu.core_type<tc>, window_params = [{transform_indices = @transform_0, window_bounds = array<i64: 1, 4, 4, 192>}, {transform_indices = @transform_1, window_bounds = array<i64: 1, 4, 3, 192>}, {transform_indices = @transform_2, window_bounds = array<i64: 1, 3, 4, 192>}, {transform_indices = @transform_3, window_bounds = array<i64: 1, 3, 3, 192>}, {transform_indices = @transform_4, window_bounds = array<i64: 1, 3, 3, 192>}]} {
    %c0 = arith.constant 0 : index
    %c0_0 = arith.constant 0 : index
    %c0_1 = arith.constant 0 : index
    %c0_2 = arith.constant 0 : index
    %0 = vector.load %arg1[%c0, %c0_0, %c0_1, %c0_2] : memref<1x4x4x192xbf16, #tpu.memory_space<vmem>>, vector<1x4x4x192xbf16>
    %1 = vector.shape_cast %0 : vector<1x4x4x192xbf16> to vector<4x4x192xbf16>
    %c0_3 = arith.constant 0 : index
    %c0_4 = arith.constant 0 : index
    %c0_5 = arith.constant 0 : index
    %c0_6 = arith.constant 0 : index
    %2 = vector.load %arg2[%c0_3, %c0_4, %c0_5, %c0_6] : memref<1x4x3x192xbf16, #tpu.memory_space<vmem>>, vector<1x4x3x192xbf16>
    %3 = vector.shape_cast %2 : vector<1x4x3x192xbf16> to vector<4x3x192xbf16>
    %c0_7 = arith.constant 0 : index
    %c0_8 = arith.constant 0 : index
    %c0_9 = arith.constant 0 : index
    %c0_10 = arith.constant 0 : index
    %4 = vector.load %arg3[%c0_7, %c0_8, %c0_9, %c0_10] : memref<1x3x4x192xbf16, #tpu.memory_space<vmem>>, vector<1x3x4x192xbf16>
    %5 = vector.shape_cast %4 : vector<1x3x4x192xbf16> to vector<3x4x192xbf16>
    %c0_11 = arith.constant 0 : index
    %c0_12 = arith.constant 0 : index
    %c0_13 = arith.constant 0 : index
    %c0_14 = arith.constant 0 : index
    %6 = vector.load %arg4[%c0_11, %c0_12, %c0_13, %c0_14] : memref<1x3x3x192xbf16, #tpu.memory_space<vmem>>, vector<1x3x3x192xbf16>
    %7 = vector.shape_cast %6 : vector<1x3x3x192xbf16> to vector<3x3x192xbf16>
    %8 = vector.extract_strided_slice %3 {offsets = [0, 0, 0], sizes = [3, 3, 192], strides = [1, 1, 1]} : vector<4x3x192xbf16> to vector<3x3x192xbf16>
    %9 = arith.maximumf %7, %8 : vector<3x3x192xbf16>
    %10 = vector.extract_strided_slice %3 {offsets = [1, 0, 0], sizes = [3, 3, 192], strides = [1, 1, 1]} : vector<4x3x192xbf16> to vector<3x3x192xbf16>
    %11 = arith.maximumf %9, %10 : vector<3x3x192xbf16>
    %12 = vector.extract_strided_slice %5 {offsets = [0, 0, 0], sizes = [3, 3, 192], strides = [1, 1, 1]} : vector<3x4x192xbf16> to vector<3x3x192xbf16>
    %13 = arith.maximumf %11, %12 : vector<3x3x192xbf16>
    %14 = vector.extract_strided_slice %5 {offsets = [0, 1, 0], sizes = [3, 3, 192], strides = [1, 1, 1]} : vector<3x4x192xbf16> to vector<3x3x192xbf16>
    %15 = arith.maximumf %13, %14 : vector<3x3x192xbf16>
    %16 = vector.extract_strided_slice %1 {offsets = [0, 0, 0], sizes = [3, 3, 192], strides = [1, 1, 1]} : vector<4x4x192xbf16> to vector<3x3x192xbf16>
    %17 = arith.maximumf %15, %16 : vector<3x3x192xbf16>
    %18 = vector.extract_strided_slice %1 {offsets = [0, 1, 0], sizes = [3, 3, 192], strides = [1, 1, 1]} : vector<4x4x192xbf16> to vector<3x3x192xbf16>
    %19 = arith.maximumf %17, %18 : vector<3x3x192xbf16>
    %20 = vector.extract_strided_slice %1 {offsets = [1, 0, 0], sizes = [3, 3, 192], strides = [1, 1, 1]} : vector<4x4x192xbf16> to vector<3x3x192xbf16>
    %21 = arith.maximumf %19, %20 : vector<3x3x192xbf16>
    %22 = vector.extract_strided_slice %1 {offsets = [1, 1, 0], sizes = [3, 3, 192], strides = [1, 1, 1]} : vector<4x4x192xbf16> to vector<3x3x192xbf16>
    %23 = arith.maximumf %21, %22 : vector<3x3x192xbf16>
    %c0_15 = arith.constant 0 : index
    %c0_16 = arith.constant 0 : index
    %c0_17 = arith.constant 0 : index
    %c0_18 = arith.constant 0 : index
    %24 = vector.load %arg5[%c0_15, %c0_16, %c0_17, %c0_18] : memref<1x3x3x192xbf16, #tpu.memory_space<vmem>>, vector<1x3x3x192xbf16>
    %25 = vector.shape_cast %24 : vector<1x3x3x192xbf16> to vector<3x3x192xbf16>
    %26 = vector.shape_cast %23 : vector<3x3x192xbf16> to vector<1x3x3x192xbf16>
    tpu.vector_store %arg5[%c0_15, %c0_16, %c0_17, %c0_18], %26 {strides = array<i32>} : memref<1x3x3x192xbf16, #tpu.memory_space<vmem>>, vector<1x3x3x192xbf16>,
    return
  }
  func.func @transform_0(%arg0: i32) -> (i32, i32, i32, i32) {
    %c0_i32 = arith.constant 0 : i32
    %c0_i32_0 = arith.constant 0 : i32
    %c0_i32_1 = arith.constant 0 : i32
    %c0_i32_2 = arith.constant 0 : i32
    return %arg0, %c0_i32, %c0_i32_0, %c0_i32_1 : i32, i32, i32, i32
  }
  func.func @transform_1(%arg0: i32) -> (i32, i32, i32, i32) {
    %c0_i32 = arith.constant 0 : i32
    %c0_i32_0 = arith.constant 0 : i32
    %c0_i32_1 = arith.constant 0 : i32
    %c0_i32_2 = arith.constant 0 : i32
    return %arg0, %c0_i32, %c0_i32_0, %c0_i32_1 : i32, i32, i32, i32
  }
  func.func @transform_2(%arg0: i32) -> (i32, i32, i32, i32) {
    %c0_i32 = arith.constant 0 : i32
    %c0_i32_0 = arith.constant 0 : i32
    %c0_i32_1 = arith.constant 0 : i32
    %c0_i32_2 = arith.constant 0 : i32
    return %arg0, %c0_i32, %c0_i32_0, %c0_i32_1 : i32, i32, i32, i32
  }
  func.func @transform_3(%arg0: i32) -> (i32, i32, i32, i32) {
    %c0_i32 = arith.constant 0 : i32
    %c0_i32_0 = arith.constant 0 : i32
    %c0_i32_1 = arith.constant 0 : i32
    %c0_i32_2 = arith.constant 0 : i32
    return %arg0, %c0_i32, %c0_i32_0, %c0_i32_1 : i32, i32, i32, i32
  }
  func.func @transform_4(%arg0: i32) -> (i32, i32, i32, i32) {
    %c0_i32 = arith.constant 0 : i32
    %c0_i32_0 = arith.constant 0 : i32
    %c0_i32_1 = arith.constant 0 : i32
    %c0_i32_2 = arith.constant 0 : i32
    return %arg0, %c0_i32, %c0_i32_0, %c0_i32_1 : i32, i32, i32, i32
  }
}

module attributes {stable_mosaic.version = 11 : i64} {
  func.func @_mm_kernel(%arg0: i32, %arg1: i32, %arg2: i32, %arg3: memref<48x384xbf16, #tpu.memory_space<vmem>>, %arg4: memref<384x256xbf16, #tpu.memory_space<vmem>>, %arg5: memref<1x256xf32, #tpu.memory_space<vmem>>, %arg6: memref<48x256xbf16, #tpu.memory_space<vmem>>, %arg7: memref<48x256xf32, #tpu.memory_space<vmem>>) attributes {dimension_semantics = [#tpu.dimension_semantics<parallel>, #tpu.dimension_semantics<parallel>, #tpu.dimension_semantics<arbitrary>], iteration_bounds = array<i64: 1, 2, 5>, scalar_prefetch = 0 : i64, scratch_operands = 1 : i64, tpu.core_type = #tpu.core_type<tc>, window_params = [{transform_indices = @transform_0, window_bounds = array<i64: 48, 384>}, {transform_indices = @transform_1, window_bounds = array<i64: 384, 256>}, {transform_indices = @transform_2, window_bounds = array<i64: 1, 256>}, {transform_indices = @transform_3, window_bounds = array<i64: 48, 256>}]} {
    %c0_i32 = arith.constant 0 : i32
    %0 = arith.cmpi eq, %arg2, %c0_i32 : i32
    %1 = arith.extui %0 : i1 to i32
    %c0_i32_0 = arith.constant 0 : i32
    %2 = arith.cmpi ne, %1, %c0_i32_0 : i32
    scf.if %2 {
      %cst_9 = arith.constant 0.000000e+00 : f32
      %12 = vector.broadcast %cst_9 : f32 to vector<48x256xf32>
      %c0_10 = arith.constant 0 : index
      %c0_11 = arith.constant 0 : index
      %13 = vector.load %arg7[%c0_10, %c0_11] : memref<48x256xf32, #tpu.memory_space<vmem>>, vector<48x256xf32>
      tpu.vector_store %arg7[%c0_10, %c0_11], %12 {strides = array<i32>} : memref<48x256xf32, #tpu.memory_space<vmem>>, vector<48x256xf32>,
    } else {
    }
    %c0 = arith.constant 0 : index
    %c0_1 = arith.constant 0 : index
    %3 = vector.load %arg7[%c0, %c0_1] : memref<48x256xf32, #tpu.memory_space<vmem>>, vector<48x256xf32>
    %c0_2 = arith.constant 0 : index
    %c0_3 = arith.constant 0 : index
    %4 = vector.load %arg3[%c0_2, %c0_3] : memref<48x384xbf16, #tpu.memory_space<vmem>>, vector<48x384xbf16>
    %c0_4 = arith.constant 0 : index
    %c0_5 = arith.constant 0 : index
    %5 = vector.load %arg4[%c0_4, %c0_5] : memref<384x256xbf16, #tpu.memory_space<vmem>>, vector<384x256xbf16>
    %cst = arith.constant dense<0.000000e+00> : vector<48x256xf32>
    %6 = tpu.matmul %4, %5, %cst {dimension_numbers = #tpu.dot_dimension_numbers<[1], [0], [0], [1], [0, 0, 1, 1], [], []>} : vector<48x384xbf16>, vector<384x256xbf16>, vector<48x256xf32> -> vector<48x256xf32>
    %7 = arith.addf %3, %6 : vector<48x256xf32>
    %c0_6 = arith.constant 0 : index
    %c0_7 = arith.constant 0 : index
    %8 = vector.load %arg7[%c0_6, %c0_7] : memref<48x256xf32, #tpu.memory_space<vmem>>, vector<48x256xf32>
    tpu.vector_store %arg7[%c0_6, %c0_7], %7 {strides = array<i32>} : memref<48x256xf32, #tpu.memory_space<vmem>>, vector<48x256xf32>,
    %c4_i32 = arith.constant 4 : i32
    %9 = arith.cmpi eq, %arg2, %c4_i32 : i32
    %10 = arith.extui %9 : i1 to i32
    %c0_i32_8 = arith.constant 0 : i32
    %11 = arith.cmpi ne, %10, %c0_i32_8 : i32
    scf.if %11 {
      %c0_9 = arith.constant 0 : index
      %c0_10 = arith.constant 0 : index
      %12 = vector.load %arg7[%c0_9, %c0_10] : memref<48x256xf32, #tpu.memory_space<vmem>>, vector<48x256xf32>
      %c0_11 = arith.constant 0 : index
      %c0_12 = arith.constant 0 : index
      %13 = vector.load %arg5[%c0_11, %c0_12] : memref<1x256xf32, #tpu.memory_space<vmem>>, vector<1x256xf32>
      %14 = vector.broadcast %13 : vector<1x256xf32> to vector<48x256xf32>
      %15 = arith.addf %12, %14 : vector<48x256xf32>
      %cst_13 = arith.constant 0.000000e+00 : f32
      %16 = vector.broadcast %cst_13 : f32 to vector<48x256xf32>
      %17 = arith.maximumf %15, %16 : vector<48x256xf32>
      %18 = arith.truncf %17 : vector<48x256xf32> to vector<48x256xbf16>
      %c0_14 = arith.constant 0 : index
      %c0_15 = arith.constant 0 : index
      %19 = vector.load %arg6[%c0_14, %c0_15] : memref<48x256xbf16, #tpu.memory_space<vmem>>, vector<48x256xbf16>
      tpu.vector_store %arg6[%c0_14, %c0_15], %18 {strides = array<i32>} : memref<48x256xbf16, #tpu.memory_space<vmem>>, vector<48x256xbf16>,
    } else {
    }
    return
  }
  func.func @transform_0(%arg0: i32, %arg1: i32, %arg2: i32) -> (i32, i32) {
    %c0_i32 = arith.constant 0 : i32
    return %arg0, %arg2 : i32, i32
  }
  func.func @transform_1(%arg0: i32, %arg1: i32, %arg2: i32) -> (i32, i32) {
    %c0_i32 = arith.constant 0 : i32
    return %arg2, %arg1 : i32, i32
  }
  func.func @transform_2(%arg0: i32, %arg1: i32, %arg2: i32) -> (i32, i32) {
    %c0_i32 = arith.constant 0 : i32
    %c0_i32_0 = arith.constant 0 : i32
    return %c0_i32, %arg1 : i32, i32
  }
  func.func @transform_3(%arg0: i32, %arg1: i32, %arg2: i32) -> (i32, i32) {
    %c0_i32 = arith.constant 0 : i32
    return %arg0, %arg1 : i32, i32
  }
}

module attributes {stable_mosaic.version = 11 : i64} {
  func.func @_mm_kernel(%arg0: i32, %arg1: i32, %arg2: i32, %arg3: memref<48x512xbf16, #tpu.memory_space<vmem>>, %arg4: memref<512x256xbf16, #tpu.memory_space<vmem>>, %arg5: memref<1x256xf32, #tpu.memory_space<vmem>>, %arg6: memref<48x256xbf16, #tpu.memory_space<vmem>>, %arg7: memref<48x256xf32, #tpu.memory_space<vmem>>) attributes {dimension_semantics = [#tpu.dimension_semantics<parallel>, #tpu.dimension_semantics<parallel>, #tpu.dimension_semantics<arbitrary>], iteration_bounds = array<i64: 1, 1, 7>, scalar_prefetch = 0 : i64, scratch_operands = 1 : i64, tpu.core_type = #tpu.core_type<tc>, window_params = [{transform_indices = @transform_0, window_bounds = array<i64: 48, 512>}, {transform_indices = @transform_1, window_bounds = array<i64: 512, 256>}, {transform_indices = @transform_2, window_bounds = array<i64: 1, 256>}, {transform_indices = @transform_3, window_bounds = array<i64: 48, 256>}]} {
    %c0_i32 = arith.constant 0 : i32
    %0 = arith.cmpi eq, %arg2, %c0_i32 : i32
    %1 = arith.extui %0 : i1 to i32
    %c0_i32_0 = arith.constant 0 : i32
    %2 = arith.cmpi ne, %1, %c0_i32_0 : i32
    scf.if %2 {
      %cst_9 = arith.constant 0.000000e+00 : f32
      %12 = vector.broadcast %cst_9 : f32 to vector<48x256xf32>
      %c0_10 = arith.constant 0 : index
      %c0_11 = arith.constant 0 : index
      %13 = vector.load %arg7[%c0_10, %c0_11] : memref<48x256xf32, #tpu.memory_space<vmem>>, vector<48x256xf32>
      tpu.vector_store %arg7[%c0_10, %c0_11], %12 {strides = array<i32>} : memref<48x256xf32, #tpu.memory_space<vmem>>, vector<48x256xf32>,
    } else {
    }
    %c0 = arith.constant 0 : index
    %c0_1 = arith.constant 0 : index
    %3 = vector.load %arg7[%c0, %c0_1] : memref<48x256xf32, #tpu.memory_space<vmem>>, vector<48x256xf32>
    %c0_2 = arith.constant 0 : index
    %c0_3 = arith.constant 0 : index
    %4 = vector.load %arg3[%c0_2, %c0_3] : memref<48x512xbf16, #tpu.memory_space<vmem>>, vector<48x512xbf16>
    %c0_4 = arith.constant 0 : index
    %c0_5 = arith.constant 0 : index
    %5 = vector.load %arg4[%c0_4, %c0_5] : memref<512x256xbf16, #tpu.memory_space<vmem>>, vector<512x256xbf16>
    %cst = arith.constant dense<0.000000e+00> : vector<48x256xf32>
    %6 = tpu.matmul %4, %5, %cst {dimension_numbers = #tpu.dot_dimension_numbers<[1], [0], [0], [1], [0, 0, 1, 1], [], []>} : vector<48x512xbf16>, vector<512x256xbf16>, vector<48x256xf32> -> vector<48x256xf32>
    %7 = arith.addf %3, %6 : vector<48x256xf32>
    %c0_6 = arith.constant 0 : index
    %c0_7 = arith.constant 0 : index
    %8 = vector.load %arg7[%c0_6, %c0_7] : memref<48x256xf32, #tpu.memory_space<vmem>>, vector<48x256xf32>
    tpu.vector_store %arg7[%c0_6, %c0_7], %7 {strides = array<i32>} : memref<48x256xf32, #tpu.memory_space<vmem>>, vector<48x256xf32>,
    %c6_i32 = arith.constant 6 : i32
    %9 = arith.cmpi eq, %arg2, %c6_i32 : i32
    %10 = arith.extui %9 : i1 to i32
    %c0_i32_8 = arith.constant 0 : i32
    %11 = arith.cmpi ne, %10, %c0_i32_8 : i32
    scf.if %11 {
      %c0_9 = arith.constant 0 : index
      %c0_10 = arith.constant 0 : index
      %12 = vector.load %arg7[%c0_9, %c0_10] : memref<48x256xf32, #tpu.memory_space<vmem>>, vector<48x256xf32>
      %c0_11 = arith.constant 0 : index
      %c0_12 = arith.constant 0 : index
      %13 = vector.load %arg5[%c0_11, %c0_12] : memref<1x256xf32, #tpu.memory_space<vmem>>, vector<1x256xf32>
      %14 = vector.broadcast %13 : vector<1x256xf32> to vector<48x256xf32>
      %15 = arith.addf %12, %14 : vector<48x256xf32>
      %cst_13 = arith.constant 0.000000e+00 : f32
      %16 = vector.broadcast %cst_13 : f32 to vector<48x256xf32>
      %17 = arith.maximumf %15, %16 : vector<48x256xf32>
      %18 = arith.truncf %17 : vector<48x256xf32> to vector<48x256xbf16>
      %c0_14 = arith.constant 0 : index
      %c0_15 = arith.constant 0 : index
      %19 = vector.load %arg6[%c0_14, %c0_15] : memref<48x256xbf16, #tpu.memory_space<vmem>>, vector<48x256xbf16>
      tpu.vector_store %arg6[%c0_14, %c0_15], %18 {strides = array<i32>} : memref<48x256xbf16, #tpu.memory_space<vmem>>, vector<48x256xbf16>,
    } else {
    }
    return
  }
  func.func @transform_0(%arg0: i32, %arg1: i32, %arg2: i32) -> (i32, i32) {
    %c0_i32 = arith.constant 0 : i32
    return %arg0, %arg2 : i32, i32
  }
  func.func @transform_1(%arg0: i32, %arg1: i32, %arg2: i32) -> (i32, i32) {
    %c0_i32 = arith.constant 0 : i32
    return %arg2, %arg1 : i32, i32
  }
  func.func @transform_2(%arg0: i32, %arg1: i32, %arg2: i32) -> (i32, i32) {
    %c0_i32 = arith.constant 0 : i32
    %c0_i32_0 = arith.constant 0 : i32
    return %c0_i32, %arg1 : i32, i32
  }
  func.func @transform_3(%arg0: i32, %arg1: i32, %arg2: i32) -> (i32, i32) {
    %c0_i32 = arith.constant 0 : i32
    return %arg0, %arg1 : i32, i32
  }
}

module attributes {stable_mosaic.version = 11 : i64} {
  func.func @_mm_kernel(%arg0: i32, %arg1: i32, %arg2: i32, %arg3: memref<48x512xbf16, #tpu.memory_space<vmem>>, %arg4: memref<512x256xbf16, #tpu.memory_space<vmem>>, %arg5: memref<1x256xf32, #tpu.memory_space<vmem>>, %arg6: memref<48x256xbf16, #tpu.memory_space<vmem>>, %arg7: memref<48x256xf32, #tpu.memory_space<vmem>>) attributes {dimension_semantics = [#tpu.dimension_semantics<parallel>, #tpu.dimension_semantics<parallel>, #tpu.dimension_semantics<arbitrary>], iteration_bounds = array<i64: 1, 1, 5>, scalar_prefetch = 0 : i64, scratch_operands = 1 : i64, tpu.core_type = #tpu.core_type<tc>, window_params = [{transform_indices = @transform_0, window_bounds = array<i64: 48, 512>}, {transform_indices = @transform_1, window_bounds = array<i64: 512, 256>}, {transform_indices = @transform_2, window_bounds = array<i64: 1, 256>}, {transform_indices = @transform_3, window_bounds = array<i64: 48, 256>}]} {
    %c0_i32 = arith.constant 0 : i32
    %0 = arith.cmpi eq, %arg2, %c0_i32 : i32
    %1 = arith.extui %0 : i1 to i32
    %c0_i32_0 = arith.constant 0 : i32
    %2 = arith.cmpi ne, %1, %c0_i32_0 : i32
    scf.if %2 {
      %cst_9 = arith.constant 0.000000e+00 : f32
      %12 = vector.broadcast %cst_9 : f32 to vector<48x256xf32>
      %c0_10 = arith.constant 0 : index
      %c0_11 = arith.constant 0 : index
      %13 = vector.load %arg7[%c0_10, %c0_11] : memref<48x256xf32, #tpu.memory_space<vmem>>, vector<48x256xf32>
      tpu.vector_store %arg7[%c0_10, %c0_11], %12 {strides = array<i32>} : memref<48x256xf32, #tpu.memory_space<vmem>>, vector<48x256xf32>,
    } else {
    }
    %c0 = arith.constant 0 : index
    %c0_1 = arith.constant 0 : index
    %3 = vector.load %arg7[%c0, %c0_1] : memref<48x256xf32, #tpu.memory_space<vmem>>, vector<48x256xf32>
    %c0_2 = arith.constant 0 : index
    %c0_3 = arith.constant 0 : index
    %4 = vector.load %arg3[%c0_2, %c0_3] : memref<48x512xbf16, #tpu.memory_space<vmem>>, vector<48x512xbf16>
    %c0_4 = arith.constant 0 : index
    %c0_5 = arith.constant 0 : index
    %5 = vector.load %arg4[%c0_4, %c0_5] : memref<512x256xbf16, #tpu.memory_space<vmem>>, vector<512x256xbf16>
    %cst = arith.constant dense<0.000000e+00> : vector<48x256xf32>
    %6 = tpu.matmul %4, %5, %cst {dimension_numbers = #tpu.dot_dimension_numbers<[1], [0], [0], [1], [0, 0, 1, 1], [], []>} : vector<48x512xbf16>, vector<512x256xbf16>, vector<48x256xf32> -> vector<48x256xf32>
    %7 = arith.addf %3, %6 : vector<48x256xf32>
    %c0_6 = arith.constant 0 : index
    %c0_7 = arith.constant 0 : index
    %8 = vector.load %arg7[%c0_6, %c0_7] : memref<48x256xf32, #tpu.memory_space<vmem>>, vector<48x256xf32>
    tpu.vector_store %arg7[%c0_6, %c0_7], %7 {strides = array<i32>} : memref<48x256xf32, #tpu.memory_space<vmem>>, vector<48x256xf32>,
    %c4_i32 = arith.constant 4 : i32
    %9 = arith.cmpi eq, %arg2, %c4_i32 : i32
    %10 = arith.extui %9 : i1 to i32
    %c0_i32_8 = arith.constant 0 : i32
    %11 = arith.cmpi ne, %10, %c0_i32_8 : i32
    scf.if %11 {
      %c0_9 = arith.constant 0 : index
      %c0_10 = arith.constant 0 : index
      %12 = vector.load %arg7[%c0_9, %c0_10] : memref<48x256xf32, #tpu.memory_space<vmem>>, vector<48x256xf32>
      %c0_11 = arith.constant 0 : index
      %c0_12 = arith.constant 0 : index
      %13 = vector.load %arg5[%c0_11, %c0_12] : memref<1x256xf32, #tpu.memory_space<vmem>>, vector<1x256xf32>
      %14 = vector.broadcast %13 : vector<1x256xf32> to vector<48x256xf32>
      %15 = arith.addf %12, %14 : vector<48x256xf32>
      %cst_13 = arith.constant 0.000000e+00 : f32
      %16 = vector.broadcast %cst_13 : f32 to vector<48x256xf32>
      %17 = arith.maximumf %15, %16 : vector<48x256xf32>
      %18 = arith.truncf %17 : vector<48x256xf32> to vector<48x256xbf16>
      %c0_14 = arith.constant 0 : index
      %c0_15 = arith.constant 0 : index
      %19 = vector.load %arg6[%c0_14, %c0_15] : memref<48x256xbf16, #tpu.memory_space<vmem>>, vector<48x256xbf16>
      tpu.vector_store %arg6[%c0_14, %c0_15], %18 {strides = array<i32>} : memref<48x256xbf16, #tpu.memory_space<vmem>>, vector<48x256xbf16>,
    } else {
    }
    return
  }
  func.func @transform_0(%arg0: i32, %arg1: i32, %arg2: i32) -> (i32, i32) {
    %c0_i32 = arith.constant 0 : i32
    return %arg0, %arg2 : i32, i32
  }
  func.func @transform_1(%arg0: i32, %arg1: i32, %arg2: i32) -> (i32, i32) {
    %c0_i32 = arith.constant 0 : i32
    return %arg2, %arg1 : i32, i32
  }
  func.func @transform_2(%arg0: i32, %arg1: i32, %arg2: i32) -> (i32, i32) {
    %c0_i32 = arith.constant 0 : i32
    %c0_i32_0 = arith.constant 0 : i32
    return %c0_i32, %arg1 : i32, i32
  }
  func.func @transform_3(%arg0: i32, %arg1: i32, %arg2: i32) -> (i32, i32) {
    %c0_i32 = arith.constant 0 : i32
    return %arg0, %arg1 : i32, i32
  }
}

module attributes {stable_mosaic.version = 11 : i64} {
  func.func @_maxpool_kernel(%arg0: i32, %arg1: memref<1x2x2x256xbf16, #tpu.memory_space<vmem>>, %arg2: memref<1x2x1x256xbf16, #tpu.memory_space<vmem>>, %arg3: memref<1x1x2x256xbf16, #tpu.memory_space<vmem>>, %arg4: memref<1x1x1x256xbf16, #tpu.memory_space<vmem>>, %arg5: memref<1x1x1x256xbf16, #tpu.memory_space<vmem>>) attributes {dimension_semantics = [#tpu.dimension_semantics<parallel>], iteration_bounds = array<i64: 2>, scalar_prefetch = 0 : i64, scratch_operands = 0 : i64, tpu.core_type = #tpu.core_type<tc>, window_params = [{transform_indices = @transform_0, window_bounds = array<i64: 1, 2, 2, 256>}, {transform_indices = @transform_1, window_bounds = array<i64: 1, 2, 1, 256>}, {transform_indices = @transform_2, window_bounds = array<i64: 1, 1, 2, 256>}, {transform_indices = @transform_3, window_bounds = array<i64: 1, 1, 1, 256>}, {transform_indices = @transform_4, window_bounds = array<i64: 1, 1, 1, 256>}]} {
    %c0 = arith.constant 0 : index
    %c0_0 = arith.constant 0 : index
    %c0_1 = arith.constant 0 : index
    %c0_2 = arith.constant 0 : index
    %0 = vector.load %arg1[%c0, %c0_0, %c0_1, %c0_2] : memref<1x2x2x256xbf16, #tpu.memory_space<vmem>>, vector<1x2x2x256xbf16>
    %1 = vector.shape_cast %0 : vector<1x2x2x256xbf16> to vector<2x2x256xbf16>
    %c0_3 = arith.constant 0 : index
    %c0_4 = arith.constant 0 : index
    %c0_5 = arith.constant 0 : index
    %c0_6 = arith.constant 0 : index
    %2 = vector.load %arg2[%c0_3, %c0_4, %c0_5, %c0_6] : memref<1x2x1x256xbf16, #tpu.memory_space<vmem>>, vector<1x2x1x256xbf16>
    %3 = vector.shape_cast %2 : vector<1x2x1x256xbf16> to vector<2x1x256xbf16>
    %c0_7 = arith.constant 0 : index
    %c0_8 = arith.constant 0 : index
    %c0_9 = arith.constant 0 : index
    %c0_10 = arith.constant 0 : index
    %4 = vector.load %arg3[%c0_7, %c0_8, %c0_9, %c0_10] : memref<1x1x2x256xbf16, #tpu.memory_space<vmem>>, vector<1x1x2x256xbf16>
    %5 = vector.shape_cast %4 : vector<1x1x2x256xbf16> to vector<1x2x256xbf16>
    %c0_11 = arith.constant 0 : index
    %c0_12 = arith.constant 0 : index
    %c0_13 = arith.constant 0 : index
    %c0_14 = arith.constant 0 : index
    %6 = vector.load %arg4[%c0_11, %c0_12, %c0_13, %c0_14] : memref<1x1x1x256xbf16, #tpu.memory_space<vmem>>, vector<1x1x1x256xbf16>
    %7 = vector.shape_cast %6 : vector<1x1x1x256xbf16> to vector<1x1x256xbf16>
    %8 = vector.extract_strided_slice %3 {offsets = [0, 0, 0], sizes = [1, 1, 256], strides = [1, 1, 1]} : vector<2x1x256xbf16> to vector<1x1x256xbf16>
    %9 = arith.maximumf %7, %8 : vector<1x1x256xbf16>
    %10 = vector.extract_strided_slice %3 {offsets = [1, 0, 0], sizes = [1, 1, 256], strides = [1, 1, 1]} : vector<2x1x256xbf16> to vector<1x1x256xbf16>
    %11 = arith.maximumf %9, %10 : vector<1x1x256xbf16>
    %12 = vector.extract_strided_slice %5 {offsets = [0, 0, 0], sizes = [1, 1, 256], strides = [1, 1, 1]} : vector<1x2x256xbf16> to vector<1x1x256xbf16>
    %13 = arith.maximumf %11, %12 : vector<1x1x256xbf16>
    %14 = vector.extract_strided_slice %5 {offsets = [0, 1, 0], sizes = [1, 1, 256], strides = [1, 1, 1]} : vector<1x2x256xbf16> to vector<1x1x256xbf16>
    %15 = arith.maximumf %13, %14 : vector<1x1x256xbf16>
    %16 = vector.extract_strided_slice %1 {offsets = [0, 0, 0], sizes = [1, 1, 256], strides = [1, 1, 1]} : vector<2x2x256xbf16> to vector<1x1x256xbf16>
    %17 = arith.maximumf %15, %16 : vector<1x1x256xbf16>
    %18 = vector.extract_strided_slice %1 {offsets = [0, 1, 0], sizes = [1, 1, 256], strides = [1, 1, 1]} : vector<2x2x256xbf16> to vector<1x1x256xbf16>
    %19 = arith.maximumf %17, %18 : vector<1x1x256xbf16>
    %20 = vector.extract_strided_slice %1 {offsets = [1, 0, 0], sizes = [1, 1, 256], strides = [1, 1, 1]} : vector<2x2x256xbf16> to vector<1x1x256xbf16>
    %21 = arith.maximumf %19, %20 : vector<1x1x256xbf16>
    %22 = vector.extract_strided_slice %1 {offsets = [1, 1, 0], sizes = [1, 1, 256], strides = [1, 1, 1]} : vector<2x2x256xbf16> to vector<1x1x256xbf16>
    %23 = arith.maximumf %21, %22 : vector<1x1x256xbf16>
    %c0_15 = arith.constant 0 : index
    %c0_16 = arith.constant 0 : index
    %c0_17 = arith.constant 0 : index
    %c0_18 = arith.constant 0 : index
    %24 = vector.load %arg5[%c0_15, %c0_16, %c0_17, %c0_18] : memref<1x1x1x256xbf16, #tpu.memory_space<vmem>>, vector<1x1x1x256xbf16>
    %25 = vector.shape_cast %24 : vector<1x1x1x256xbf16> to vector<1x1x256xbf16>
    %26 = vector.shape_cast %23 : vector<1x1x256xbf16> to vector<1x1x1x256xbf16>
    tpu.vector_store %arg5[%c0_15, %c0_16, %c0_17, %c0_18], %26 {strides = array<i32>} : memref<1x1x1x256xbf16, #tpu.memory_space<vmem>>, vector<1x1x1x256xbf16>,
    return
  }
  func.func @transform_0(%arg0: i32) -> (i32, i32, i32, i32) {
    %c0_i32 = arith.constant 0 : i32
    %c0_i32_0 = arith.constant 0 : i32
    %c0_i32_1 = arith.constant 0 : i32
    %c0_i32_2 = arith.constant 0 : i32
    return %arg0, %c0_i32, %c0_i32_0, %c0_i32_1 : i32, i32, i32, i32
  }
  func.func @transform_1(%arg0: i32) -> (i32, i32, i32, i32) {
    %c0_i32 = arith.constant 0 : i32
    %c0_i32_0 = arith.constant 0 : i32
    %c0_i32_1 = arith.constant 0 : i32
    %c0_i32_2 = arith.constant 0 : i32
    return %arg0, %c0_i32, %c0_i32_0, %c0_i32_1 : i32, i32, i32, i32
  }
  func.func @transform_2(%arg0: i32) -> (i32, i32, i32, i32) {
    %c0_i32 = arith.constant 0 : i32
    %c0_i32_0 = arith.constant 0 : i32
    %c0_i32_1 = arith.constant 0 : i32
    %c0_i32_2 = arith.constant 0 : i32
    return %arg0, %c0_i32, %c0_i32_0, %c0_i32_1 : i32, i32, i32, i32
  }
  func.func @transform_3(%arg0: i32) -> (i32, i32, i32, i32) {
    %c0_i32 = arith.constant 0 : i32
    %c0_i32_0 = arith.constant 0 : i32
    %c0_i32_1 = arith.constant 0 : i32
    %c0_i32_2 = arith.constant 0 : i32
    return %arg0, %c0_i32, %c0_i32_0, %c0_i32_1 : i32, i32, i32, i32
  }
  func.func @transform_4(%arg0: i32) -> (i32, i32, i32, i32) {
    %c0_i32 = arith.constant 0 : i32
    %c0_i32_0 = arith.constant 0 : i32
    %c0_i32_1 = arith.constant 0 : i32
    %c0_i32_2 = arith.constant 0 : i32
    return %arg0, %c0_i32, %c0_i32_0, %c0_i32_1 : i32, i32, i32, i32
  }
}

module attributes {stable_mosaic.version = 11 : i64} {
  func.func @_avgpool_kernel(%arg0: i32, %arg1: memref<256x8xbf16, #tpu.memory_space<vmem>>, %arg2: memref<8x36xbf16, #tpu.memory_space<vmem>>, %arg3: memref<256x36xbf16, #tpu.memory_space<vmem>>) attributes {dimension_semantics = [#tpu.dimension_semantics<parallel>], iteration_bounds = array<i64: 2>, scalar_prefetch = 0 : i64, scratch_operands = 0 : i64, tpu.core_type = #tpu.core_type<tc>, window_params = [{transform_indices = @transform_0, window_bounds = array<i64: 256, 8>}, {pipeline_mode = #tpu.pipeline_mode<synchronous>, transform_indices = @transform_1, window_bounds = array<i64: 8, 36>}, {transform_indices = @transform_2, window_bounds = array<i64: 256, 36>}]} {
    %c0 = arith.constant 0 : index
    %c0_0 = arith.constant 0 : index
    %0 = vector.load %arg1[%c0, %c0_0] : memref<256x8xbf16, #tpu.memory_space<vmem>>, vector<256x8xbf16>
    %c0_1 = arith.constant 0 : index
    %c0_2 = arith.constant 0 : index
    %1 = vector.load %arg2[%c0_1, %c0_2] : memref<8x36xbf16, #tpu.memory_space<vmem>>, vector<8x36xbf16>
    %cst = arith.constant dense<0.000000e+00> : vector<256x36xf32>
    %2 = tpu.matmul %0, %1, %cst {dimension_numbers = #tpu.dot_dimension_numbers<[1], [0], [0], [1], [0, 0, 1, 1], [], []>} : vector<256x8xbf16>, vector<8x36xbf16>, vector<256x36xf32> -> vector<256x36xf32>
    %3 = arith.truncf %2 : vector<256x36xf32> to vector<256x36xbf16>
    %c0_3 = arith.constant 0 : index
    %c0_4 = arith.constant 0 : index
    %4 = vector.load %arg3[%c0_3, %c0_4] : memref<256x36xbf16, #tpu.memory_space<vmem>>, vector<256x36xbf16>
    tpu.vector_store %arg3[%c0_3, %c0_4], %3 {strides = array<i32>} : memref<256x36xbf16, #tpu.memory_space<vmem>>, vector<256x36xbf16>,
    return
  }
  func.func @transform_0(%arg0: i32) -> (i32, i32) {
    %c0_i32 = arith.constant 0 : i32
    %c0_i32_0 = arith.constant 0 : i32
    return %arg0, %c0_i32 : i32, i32
  }
  func.func @transform_1(%arg0: i32) -> (i32, i32) {
    %c0_i32 = arith.constant 0 : i32
    %c0_i32_0 = arith.constant 0 : i32
    %c0_i32_1 = arith.constant 0 : i32
    return %c0_i32, %c0_i32_0 : i32, i32
  }
  func.func @transform_2(%arg0: i32) -> (i32, i32) {
    %c0_i32 = arith.constant 0 : i32
    %c0_i32_0 = arith.constant 0 : i32
    return %arg0, %c0_i32 : i32, i32
  }
}

module attributes {stable_mosaic.version = 11 : i64} {
  func.func @_mm_kernel(%arg0: i32, %arg1: i32, %arg2: i32, %arg3: memref<16x512xbf16, #tpu.memory_space<vmem>>, %arg4: memref<512x256xbf16, #tpu.memory_space<vmem>>, %arg5: memref<1x256xf32, #tpu.memory_space<vmem>>, %arg6: memref<16x256xbf16, #tpu.memory_space<vmem>>, %arg7: memref<16x256xf32, #tpu.memory_space<vmem>>) attributes {dimension_semantics = [#tpu.dimension_semantics<parallel>, #tpu.dimension_semantics<parallel>, #tpu.dimension_semantics<arbitrary>], iteration_bounds = array<i64: 1, 16, 18>, scalar_prefetch = 0 : i64, scratch_operands = 1 : i64, tpu.core_type = #tpu.core_type<tc>, window_params = [{transform_indices = @transform_0, window_bounds = array<i64: 16, 512>}, {transform_indices = @transform_1, window_bounds = array<i64: 512, 256>}, {transform_indices = @transform_2, window_bounds = array<i64: 1, 256>}, {transform_indices = @transform_3, window_bounds = array<i64: 16, 256>}]} {
    %c0_i32 = arith.constant 0 : i32
    %0 = arith.cmpi eq, %arg2, %c0_i32 : i32
    %1 = arith.extui %0 : i1 to i32
    %c0_i32_0 = arith.constant 0 : i32
    %2 = arith.cmpi ne, %1, %c0_i32_0 : i32
    scf.if %2 {
      %cst_9 = arith.constant 0.000000e+00 : f32
      %12 = vector.broadcast %cst_9 : f32 to vector<16x256xf32>
      %c0_10 = arith.constant 0 : index
      %c0_11 = arith.constant 0 : index
      %13 = vector.load %arg7[%c0_10, %c0_11] : memref<16x256xf32, #tpu.memory_space<vmem>>, vector<16x256xf32>
      tpu.vector_store %arg7[%c0_10, %c0_11], %12 {strides = array<i32>} : memref<16x256xf32, #tpu.memory_space<vmem>>, vector<16x256xf32>,
    } else {
    }
    %c0 = arith.constant 0 : index
    %c0_1 = arith.constant 0 : index
    %3 = vector.load %arg7[%c0, %c0_1] : memref<16x256xf32, #tpu.memory_space<vmem>>, vector<16x256xf32>
    %c0_2 = arith.constant 0 : index
    %c0_3 = arith.constant 0 : index
    %4 = vector.load %arg3[%c0_2, %c0_3] : memref<16x512xbf16, #tpu.memory_space<vmem>>, vector<16x512xbf16>
    %c0_4 = arith.constant 0 : index
    %c0_5 = arith.constant 0 : index
    %5 = vector.load %arg4[%c0_4, %c0_5] : memref<512x256xbf16, #tpu.memory_space<vmem>>, vector<512x256xbf16>
    %cst = arith.constant dense<0.000000e+00> : vector<16x256xf32>
    %6 = tpu.matmul %4, %5, %cst {dimension_numbers = #tpu.dot_dimension_numbers<[1], [0], [0], [1], [0, 0, 1, 1], [], []>} : vector<16x512xbf16>, vector<512x256xbf16>, vector<16x256xf32> -> vector<16x256xf32>
    %7 = arith.addf %3, %6 : vector<16x256xf32>
    %c0_6 = arith.constant 0 : index
    %c0_7 = arith.constant 0 : index
    %8 = vector.load %arg7[%c0_6, %c0_7] : memref<16x256xf32, #tpu.memory_space<vmem>>, vector<16x256xf32>
    tpu.vector_store %arg7[%c0_6, %c0_7], %7 {strides = array<i32>} : memref<16x256xf32, #tpu.memory_space<vmem>>, vector<16x256xf32>,
    %c17_i32 = arith.constant 17 : i32
    %9 = arith.cmpi eq, %arg2, %c17_i32 : i32
    %10 = arith.extui %9 : i1 to i32
    %c0_i32_8 = arith.constant 0 : i32
    %11 = arith.cmpi ne, %10, %c0_i32_8 : i32
    scf.if %11 {
      %c0_9 = arith.constant 0 : index
      %c0_10 = arith.constant 0 : index
      %12 = vector.load %arg7[%c0_9, %c0_10] : memref<16x256xf32, #tpu.memory_space<vmem>>, vector<16x256xf32>
      %c0_11 = arith.constant 0 : index
      %c0_12 = arith.constant 0 : index
      %13 = vector.load %arg5[%c0_11, %c0_12] : memref<1x256xf32, #tpu.memory_space<vmem>>, vector<1x256xf32>
      %14 = vector.broadcast %13 : vector<1x256xf32> to vector<16x256xf32>
      %15 = arith.addf %12, %14 : vector<16x256xf32>
      %cst_13 = arith.constant 0.000000e+00 : f32
      %16 = vector.broadcast %cst_13 : f32 to vector<16x256xf32>
      %17 = arith.maximumf %15, %16 : vector<16x256xf32>
      %18 = arith.truncf %17 : vector<16x256xf32> to vector<16x256xbf16>
      %c0_14 = arith.constant 0 : index
      %c0_15 = arith.constant 0 : index
      %19 = vector.load %arg6[%c0_14, %c0_15] : memref<16x256xbf16, #tpu.memory_space<vmem>>, vector<16x256xbf16>
      tpu.vector_store %arg6[%c0_14, %c0_15], %18 {strides = array<i32>} : memref<16x256xbf16, #tpu.memory_space<vmem>>, vector<16x256xbf16>,
    } else {
    }
    return
  }
  func.func @transform_0(%arg0: i32, %arg1: i32, %arg2: i32) -> (i32, i32) {
    %c0_i32 = arith.constant 0 : i32
    return %arg0, %arg2 : i32, i32
  }
  func.func @transform_1(%arg0: i32, %arg1: i32, %arg2: i32) -> (i32, i32) {
    %c0_i32 = arith.constant 0 : i32
    return %arg2, %arg1 : i32, i32
  }
  func.func @transform_2(%arg0: i32, %arg1: i32, %arg2: i32) -> (i32, i32) {
    %c0_i32 = arith.constant 0 : i32
    %c0_i32_0 = arith.constant 0 : i32
    return %c0_i32, %arg1 : i32, i32
  }
  func.func @transform_3(%arg0: i32, %arg1: i32, %arg2: i32) -> (i32, i32) {
    %c0_i32 = arith.constant 0 : i32
    return %arg0, %arg1 : i32, i32
  }
}

module attributes {stable_mosaic.version = 11 : i64} {
  func.func @_mm_kernel(%arg0: i32, %arg1: i32, %arg2: i32, %arg3: memref<16x512xbf16, #tpu.memory_space<vmem>>, %arg4: memref<512x256xbf16, #tpu.memory_space<vmem>>, %arg5: memref<1x256xf32, #tpu.memory_space<vmem>>, %arg6: memref<16x256xbf16, #tpu.memory_space<vmem>>, %arg7: memref<16x256xf32, #tpu.memory_space<vmem>>) attributes {dimension_semantics = [#tpu.dimension_semantics<parallel>, #tpu.dimension_semantics<parallel>, #tpu.dimension_semantics<arbitrary>], iteration_bounds = array<i64: 1, 16, 8>, scalar_prefetch = 0 : i64, scratch_operands = 1 : i64, tpu.core_type = #tpu.core_type<tc>, window_params = [{transform_indices = @transform_0, window_bounds = array<i64: 16, 512>}, {transform_indices = @transform_1, window_bounds = array<i64: 512, 256>}, {transform_indices = @transform_2, window_bounds = array<i64: 1, 256>}, {transform_indices = @transform_3, window_bounds = array<i64: 16, 256>}]} {
    %c0_i32 = arith.constant 0 : i32
    %0 = arith.cmpi eq, %arg2, %c0_i32 : i32
    %1 = arith.extui %0 : i1 to i32
    %c0_i32_0 = arith.constant 0 : i32
    %2 = arith.cmpi ne, %1, %c0_i32_0 : i32
    scf.if %2 {
      %cst_9 = arith.constant 0.000000e+00 : f32
      %12 = vector.broadcast %cst_9 : f32 to vector<16x256xf32>
      %c0_10 = arith.constant 0 : index
      %c0_11 = arith.constant 0 : index
      %13 = vector.load %arg7[%c0_10, %c0_11] : memref<16x256xf32, #tpu.memory_space<vmem>>, vector<16x256xf32>
      tpu.vector_store %arg7[%c0_10, %c0_11], %12 {strides = array<i32>} : memref<16x256xf32, #tpu.memory_space<vmem>>, vector<16x256xf32>,
    } else {
    }
    %c0 = arith.constant 0 : index
    %c0_1 = arith.constant 0 : index
    %3 = vector.load %arg7[%c0, %c0_1] : memref<16x256xf32, #tpu.memory_space<vmem>>, vector<16x256xf32>
    %c0_2 = arith.constant 0 : index
    %c0_3 = arith.constant 0 : index
    %4 = vector.load %arg3[%c0_2, %c0_3] : memref<16x512xbf16, #tpu.memory_space<vmem>>, vector<16x512xbf16>
    %c0_4 = arith.constant 0 : index
    %c0_5 = arith.constant 0 : index
    %5 = vector.load %arg4[%c0_4, %c0_5] : memref<512x256xbf16, #tpu.memory_space<vmem>>, vector<512x256xbf16>
    %cst = arith.constant dense<0.000000e+00> : vector<16x256xf32>
    %6 = tpu.matmul %4, %5, %cst {dimension_numbers = #tpu.dot_dimension_numbers<[1], [0], [0], [1], [0, 0, 1, 1], [], []>} : vector<16x512xbf16>, vector<512x256xbf16>, vector<16x256xf32> -> vector<16x256xf32>
    %7 = arith.addf %3, %6 : vector<16x256xf32>
    %c0_6 = arith.constant 0 : index
    %c0_7 = arith.constant 0 : index
    %8 = vector.load %arg7[%c0_6, %c0_7] : memref<16x256xf32, #tpu.memory_space<vmem>>, vector<16x256xf32>
    tpu.vector_store %arg7[%c0_6, %c0_7], %7 {strides = array<i32>} : memref<16x256xf32, #tpu.memory_space<vmem>>, vector<16x256xf32>,
    %c7_i32 = arith.constant 7 : i32
    %9 = arith.cmpi eq, %arg2, %c7_i32 : i32
    %10 = arith.extui %9 : i1 to i32
    %c0_i32_8 = arith.constant 0 : i32
    %11 = arith.cmpi ne, %10, %c0_i32_8 : i32
    scf.if %11 {
      %c0_9 = arith.constant 0 : index
      %c0_10 = arith.constant 0 : index
      %12 = vector.load %arg7[%c0_9, %c0_10] : memref<16x256xf32, #tpu.memory_space<vmem>>, vector<16x256xf32>
      %c0_11 = arith.constant 0 : index
      %c0_12 = arith.constant 0 : index
      %13 = vector.load %arg5[%c0_11, %c0_12] : memref<1x256xf32, #tpu.memory_space<vmem>>, vector<1x256xf32>
      %14 = vector.broadcast %13 : vector<1x256xf32> to vector<16x256xf32>
      %15 = arith.addf %12, %14 : vector<16x256xf32>
      %cst_13 = arith.constant 0.000000e+00 : f32
      %16 = vector.broadcast %cst_13 : f32 to vector<16x256xf32>
      %17 = arith.maximumf %15, %16 : vector<16x256xf32>
      %18 = arith.truncf %17 : vector<16x256xf32> to vector<16x256xbf16>
      %c0_14 = arith.constant 0 : index
      %c0_15 = arith.constant 0 : index
      %19 = vector.load %arg6[%c0_14, %c0_15] : memref<16x256xbf16, #tpu.memory_space<vmem>>, vector<16x256xbf16>
      tpu.vector_store %arg6[%c0_14, %c0_15], %18 {strides = array<i32>} : memref<16x256xbf16, #tpu.memory_space<vmem>>, vector<16x256xbf16>,
    } else {
    }
    return
  }
  func.func @transform_0(%arg0: i32, %arg1: i32, %arg2: i32) -> (i32, i32) {
    %c0_i32 = arith.constant 0 : i32
    return %arg0, %arg2 : i32, i32
  }
  func.func @transform_1(%arg0: i32, %arg1: i32, %arg2: i32) -> (i32, i32) {
    %c0_i32 = arith.constant 0 : i32
    return %arg2, %arg1 : i32, i32
  }
  func.func @transform_2(%arg0: i32, %arg1: i32, %arg2: i32) -> (i32, i32) {
    %c0_i32 = arith.constant 0 : i32
    %c0_i32_0 = arith.constant 0 : i32
    return %c0_i32, %arg1 : i32, i32
  }
  func.func @transform_3(%arg0: i32, %arg1: i32, %arg2: i32) -> (i32, i32) {
    %c0_i32 = arith.constant 0 : i32
    return %arg0, %arg1 : i32, i32
  }
}

module attributes {stable_mosaic.version = 11 : i64} {
  func.func @_mm_kernel(%arg0: i32, %arg1: i32, %arg2: i32, %arg3: memref<16x512xbf16, #tpu.memory_space<vmem>>, %arg4: memref<512x256xbf16, #tpu.memory_space<vmem>>, %arg5: memref<1x256xf32, #tpu.memory_space<vmem>>, %arg6: memref<16x256xf32, #tpu.memory_space<vmem>>, %arg7: memref<16x256xf32, #tpu.memory_space<vmem>>) attributes {dimension_semantics = [#tpu.dimension_semantics<parallel>, #tpu.dimension_semantics<parallel>, #tpu.dimension_semantics<arbitrary>], iteration_bounds = array<i64: 1, 4, 8>, scalar_prefetch = 0 : i64, scratch_operands = 1 : i64, tpu.core_type = #tpu.core_type<tc>, window_params = [{transform_indices = @transform_0, window_bounds = array<i64: 16, 512>}, {transform_indices = @transform_1, window_bounds = array<i64: 512, 256>}, {transform_indices = @transform_2, window_bounds = array<i64: 1, 256>}, {transform_indices = @transform_3, window_bounds = array<i64: 16, 256>}]} {
    %c0_i32 = arith.constant 0 : i32
    %0 = arith.cmpi eq, %arg2, %c0_i32 : i32
    %1 = arith.extui %0 : i1 to i32
    %c0_i32_0 = arith.constant 0 : i32
    %2 = arith.cmpi ne, %1, %c0_i32_0 : i32
    scf.if %2 {
      %cst_9 = arith.constant 0.000000e+00 : f32
      %12 = vector.broadcast %cst_9 : f32 to vector<16x256xf32>
      %c0_10 = arith.constant 0 : index
      %c0_11 = arith.constant 0 : index
      %13 = vector.load %arg7[%c0_10, %c0_11] : memref<16x256xf32, #tpu.memory_space<vmem>>, vector<16x256xf32>
      tpu.vector_store %arg7[%c0_10, %c0_11], %12 {strides = array<i32>} : memref<16x256xf32, #tpu.memory_space<vmem>>, vector<16x256xf32>,
    } else {
    }
    %c0 = arith.constant 0 : index
    %c0_1 = arith.constant 0 : index
    %3 = vector.load %arg7[%c0, %c0_1] : memref<16x256xf32, #tpu.memory_space<vmem>>, vector<16x256xf32>
    %c0_2 = arith.constant 0 : index
    %c0_3 = arith.constant 0 : index
    %4 = vector.load %arg3[%c0_2, %c0_3] : memref<16x512xbf16, #tpu.memory_space<vmem>>, vector<16x512xbf16>
    %c0_4 = arith.constant 0 : index
    %c0_5 = arith.constant 0 : index
    %5 = vector.load %arg4[%c0_4, %c0_5] : memref<512x256xbf16, #tpu.memory_space<vmem>>, vector<512x256xbf16>
    %cst = arith.constant dense<0.000000e+00> : vector<16x256xf32>
    %6 = tpu.matmul %4, %5, %cst {dimension_numbers = #tpu.dot_dimension_numbers<[1], [0], [0], [1], [0, 0, 1, 1], [], []>} : vector<16x512xbf16>, vector<512x256xbf16>, vector<16x256xf32> -> vector<16x256xf32>
    %7 = arith.addf %3, %6 : vector<16x256xf32>
    %c0_6 = arith.constant 0 : index
    %c0_7 = arith.constant 0 : index
    %8 = vector.load %arg7[%c0_6, %c0_7] : memref<16x256xf32, #tpu.memory_space<vmem>>, vector<16x256xf32>
    tpu.vector_store %arg7[%c0_6, %c0_7], %7 {strides = array<i32>} : memref<16x256xf32, #tpu.memory_space<vmem>>, vector<16x256xf32>,
    %c7_i32 = arith.constant 7 : i32
    %9 = arith.cmpi eq, %arg2, %c7_i32 : i32
    %10 = arith.extui %9 : i1 to i32
    %c0_i32_8 = arith.constant 0 : i32
    %11 = arith.cmpi ne, %10, %c0_i32_8 : i32
    scf.if %11 {
      %c0_9 = arith.constant 0 : index
      %c0_10 = arith.constant 0 : index
      %12 = vector.load %arg7[%c0_9, %c0_10] : memref<16x256xf32, #tpu.memory_space<vmem>>, vector<16x256xf32>
      %c0_11 = arith.constant 0 : index
      %c0_12 = arith.constant 0 : index
      %13 = vector.load %arg5[%c0_11, %c0_12] : memref<1x256xf32, #tpu.memory_space<vmem>>, vector<1x256xf32>
      %14 = vector.broadcast %13 : vector<1x256xf32> to vector<16x256xf32>
      %15 = arith.addf %12, %14 : vector<16x256xf32>
      %c0_13 = arith.constant 0 : index
      %c0_14 = arith.constant 0 : index
      %16 = vector.load %arg6[%c0_13, %c0_14] : memref<16x256xf32, #tpu.memory_space<vmem>>, vector<16x256xf32>
      tpu.vector_store %arg6[%c0_13, %c0_14], %15 {strides = array<i32>} : memref<16x256xf32, #tpu.memory_space<vmem>>, vector<16x256xf32>,
    } else {
    }
    return
  }
  func.func @transform_0(%arg0: i32, %arg1: i32, %arg2: i32) -> (i32, i32) {
    %c0_i32 = arith.constant 0 : i32
    return %arg0, %arg2 : i32, i32
  }
  func.func @transform_1(%arg0: i32, %arg1: i32, %arg2: i32) -> (i32, i32) {
    %c0_i32 = arith.constant 0 : i32
    return %arg2, %arg1 : i32, i32
  }
  func.func @transform_2(%arg0: i32, %arg1: i32, %arg2: i32) -> (i32, i32) {
    %c0_i32 = arith.constant 0 : i32
    %c0_i32_0 = arith.constant 0 : i32
    return %c0_i32, %arg1 : i32, i32
  }
  func.func @transform_3(%arg0: i32, %arg1: i32, %arg2: i32) -> (i32, i32) {
    %c0_i32 = arith.constant 0 : i32
    return %arg0, %arg1 : i32, i32
  }
}

</mosaic_0001>

<bundles_post_ra>
// kernel: alexnet_forward.13
= control target key start
LH: loop header
LB: loop body
LE: loop exit
PB: predicated region body
PF: predicated region fallthrough
CT: control target
= control target key end

     0   :  { %s667_s15 = smov 0   ;;  %s813_s0 = inlined_call_operand.vmem [shape: bf16[2,8,8,64], index: 0, kind: input, shape index: {}]   ;;  %s814_s1 = inlined_call_operand.vmem [shape: bf16[2,8,7,64], index: 1, kind: input, shape index: {}]   ;;  %s815_s2 = inlined_call_operand.vmem [shape: bf16[2,7,8,64], index: 2, kind: input, shape index: {}]   ;;  %s816_s3 = inlined_call_operand.vmem [shape: bf16[2,7,7,64], index: 3, kind: input, shape index: {}]   ;;  %s817_s4 = inlined_call_operand.vmem [shape: bf16[2,7,7,64], index: 4, kind: output, shape index: {}]  }
   0x1 LB: > { %s609_s16 = sadd.s32 4294967295, %s640_s15   ;;  %p613_p0 = scmp.ge.s32.totalorder %s640_s15, 1  ;;  %s640_s15 = sphi %s667_s15, %s14_s15  }
   0x2   : > { %p192_p1 = scmp.lt.s32.totalorder %s640_s15, 3 }
   0x4   : > { %p193_p2 = pnand %p613_p0, %p192_p1 }
   0x5   : > { %p233_p3 = scmp.lt.s32.totalorder (!%p193_p2), %s609_s16, 1  ;;  %vm494_vm0 = vcmask (!%p193_p2), 519168   ;;  %vm495_vm1 = vsmask.f32 (!%p193_p2), 3328 }
   0x6   : > { %196 = sbr.rel (%p193_p2) target bundleno = 67 (0x43), region = 36  ;;  %vm748_vm2 = vmand (!%p193_p2), %vm494_vm0, %vm495_vm1 }
   0xd   : > { %s821_s16 = smov (!%p233_p3, %s609_s16), 1 }
   0xe   : > { %s623_s17 = sshll.u32 %s821_s16, 5  ;;  %s675_s18 = smul.u32 28, %s821_s16 }
   0xf   : > { %s680_s21 = scalar_lea.vmem %s813_s0, %s623_s17  ;;  %s685_s24 = scalar_lea.vmem %s814_s1, %s623_s17 }
  0x10   : > { %s691_s27 = scalar_lea.vmem %s815_s2, %s675_s18  ;;  %s697_s30 = scalar_lea.vmem %s816_s3, %s675_s18  ;;  %v700_v0 = vld [vmem:[%s680_s21] sm:$0xf]  ;;  %v703_v1 = vld [vmem:[%s680_s21 + $0x4] sm:$0xf]  ;;  %v714_v13 = vld [vmem:[%s680_s21 + $0x8] sm:$0xf] }
  0x11   : > { %v266_v2 = vld [vmem:[%s685_s24] sm:$0xf]  ;;  %v267_v5 = vld [vmem:[%s685_s24 + $0x4] sm:$0xf]  ;;  %v394_v9 = vshrl.u32 %v700_v0, 16  ;;  %v397_v10 = vshll.u32 %v700_v0, 16  ;;  %s739_s7 = scalar_lea.vmem %s817_s4, %s675_s18 }
  0x12   : > { %v274_v3 = vld [vmem:[%s691_s27] sm:$0xf]  ;;  %v403_v11 = vshrl.u32 %v703_v1, 16  ;;  %v406_v12 = vshll.u32 %v703_v1, 16  ;;  %v275_v21 = vld [vmem:[%s691_s27 + $0x4] sm:$0xf] }
  0x13   : > { %v281_v4 = vld [vmem:[%s697_s30] sm:$0xf]  ;;  %v310_v7 = vshrl.u32 %v274_v3, 16  ;;  %v313_v8 = vshll.u32 %v274_v3, 16  ;;  %v396_v17 = vrot.slane %v394_v9, 4  ;;  %v399_v18 = vrot.slane %v397_v10, 5 }
  0x14   : > { %v288_v6 = vmax.bf16 %v281_v4, %v266_v2  ;;  %v405_v19 = vrot.slane %v403_v11, 4  ;;  %v408_v20 = vrot.slane %v406_v12, 5  ;;  %v412_v22 = vshrl.u32 %v714_v13, 16  ;;  %v282_v25 = vld [vmem:[%s697_s30 + $0x4] sm:$0xf] }
  0x15   : > { %v312_v15 = vrot.slane %v310_v7, 4  ;;  %v315_v16 = vrot.slane %v313_v8, 5  ;;  %v319_v26 = vshrl.u32 %v275_v21, 16  ;;  %v322_v27 = vshll.u32 %v275_v21, 16  ;;  %v268_v30 = vld [vmem:[%s685_s24 + $0x8] sm:$0xf] }
  0x16   : > { %v295_v14 = vmax.bf16 %v288_v6, %v267_v5  ;;  %v400_v28 = vor.u32 %v399_v18, %v396_v17  ;;  %v409_v29 = vor.u32 %v408_v20, %v405_v19  ;;  %v289_v31 = vmax.bf16 %v282_v25, %v267_v5  ;;  %v721_v33 = vld [vmem:[%s680_s21 + $0xc] sm:$0xf]  ;;  %v276_v38 = vld [vmem:[%s691_s27 + $0x8] sm:$0xf]  ;;  %v733_v62 = vld [vmem:[%s680_s21 + $0x10] sm:$0xf] }
  0x17   : > { %v316_v24 = vor.u32 %v315_v16, %v312_v15  ;;  %v414_v32 = vrot.slane %v412_v22, 4  ;;  %v321_v35 = vrot.slane %v319_v26, 4  ;;  %v324_v36 = vrot.slane %v322_v27, 5  ;;  %v283_v42 = vld [vmem:[%s697_s30 + $0x8] sm:$0xf] }
  0x18   : > { %v302_v23 = vmax.bf16 %v295_v14, %v274_v3  ;;  %v415_v37 = vshll.u32 %v714_v13, 16  ;;  %v401_v39 = vrot.slane %v400_v28, 4  ;;  %v410_v40 = vrot.slane %v409_v29, 4  ;;  %v269_v47 = vld [vmem:[%s685_s24 + $0xc] sm:$0xf] }
  0x19   : > { %v317_v34 = vrot.slane %v316_v24, 4  ;;  %v296_v41 = vmax.bf16 %v289_v31, %v268_v30  ;;  %v328_v43 = vshrl.u32 %v276_v38, 16  ;;  %v325_v45 = vor.u32 %v324_v36, %v321_v35  ;;  %v277_v57 = vld [vmem:[%s691_s27 + $0xc] sm:$0xf]  ;;  %v270_v5 = vld [vmem:[%s685_s24 + $0x10] sm:$0xf] }
  0x1a   : > { %v417_v46 = vrot.slane %v415_v37, 5  ;;  %v290_v48 = vmax.bf16 %v283_v42, %v268_v30  ;;  %v331_v51 = vshll.u32 %v276_v38, 16  ;;  %v421_v52 = vshrl.u32 %v721_v33, 16  ;;  %v284_v58 = vld [vmem:[%s697_s30 + $0xc] sm:$0xf] }
  0x1b   : > { %v379_v44 = vmax.bf16 %v317_v34, %v302_v23  ;;  %v303_v49 = vmax.bf16 %v296_v41, %v275_v21  ;;  %v330_v50 = vrot.slane %v328_v43, 4  ;;  %v326_v54 = vrot.slane %v325_v45, 4  ;;  %v285_v15 = vld [vmem:[%s697_s30 + $0x10] sm:$0xf]  ;;  %v497_v17 = vld [vmem:[%s739_s7] sm:$0xf] }
  0x1c   : > { %v418_v55 = vor.u32 %v417_v46, %v414_v32  ;;  %v297_v56 = vmax.bf16 %v290_v48, %v269_v47  ;;  %v333_v59 = vrot.slane %v331_v51, 5  ;;  %v423_v60 = vrot.slane %v421_v52, 4  ;;  %v278_v22 = vld [vmem:[%s691_s27 + $0x10] sm:$0xf]  ;;  %v756_v29 = vld [vmem:[%s680_s21 + $0x14] sm:$0xf] }
  0x1d   : > { %v386_v53 = vmax.bf16 %v379_v44, %v700_v0  ;;  %v424_v61 = vshll.u32 %v721_v33, 16  ;;  %v291_v63 = vmax.bf16 %v284_v58, %v269_v47  ;;  %v380_v2 = vmax.bf16 %v326_v54, %v303_v49  ;;  %v271_v35 = vld [vmem:[%s685_s24 + $0x14] sm:$0xf]  ;;  %v500_v37 = vld [vmem:[%s739_s7 + $0x4] sm:$0xf] }
  0x1e   : > { %v419_v3 = vrot.slane %v418_v55, 4  ;;  %v304_v4 = vmax.bf16 %v297_v56, %v276_v38  ;;  %v334_v6 = vor.u32 %v333_v59, %v330_v50  ;;  %v337_v9 = vshrl.u32 %v277_v57, 16  ;;  %v286_v46 = vld [vmem:[%s697_s30 + $0x14] sm:$0xf]  ;;  %v772_v55 = vld [vmem:[%s680_s21 + $0x18] sm:$0xf] }
  0x1f   : > { %v463_v0 = vmax.bf16 %v401_v39, %v386_v53  ;;  %v426_v7 = vrot.slane %v424_v61, 5  ;;  %v298_v8 = vmax.bf16 %v291_v63, %v270_v5  ;;  %v387_v11 = vmax.bf16 %v380_v2, %v703_v1  ;;  %v279_v51 = vld [vmem:[%s691_s27 + $0x14] sm:$0xf] }
  0x20   : > { %v340_v12 = vshll.u32 %v277_v57, 16  ;;  %v430_v14 = vshrl.u32 %v733_v62, 16  ;;  %v335_v18 = vrot.slane %v334_v6, 4  ;;  %v339_v21 = vrot.slane %v337_v9, 4 }
  0x21   : > { %v470_v10 = vmax.bf16 %v463_v0, %v703_v1  ;;  %v427_v19 = vor.u32 %v426_v7, %v423_v60  ;;  %v305_v20 = vmax.bf16 %v298_v8, %v277_v57  ;;  %v464_v23 = vmax.bf16 %v410_v40, %v387_v11  ;;  %v503_v57 = vld [vmem:[%s739_s7 + $0x8] sm:$0xf]  ;;  %v272_v0 = vld [vmem:[%s685_s24 + $0x18] sm:$0xf] }
  0x22   : > { %v342_v24 = vrot.slane %v340_v12, 5  ;;  %v432_v25 = vrot.slane %v430_v14, 4  ;;  %v381_v26 = vmax.bf16 %v335_v18, %v304_v4  ;;  %v433_v28 = vshll.u32 %v733_v62, 16  ;;  %v280_v12 = vld [vmem:[%s691_s27 + $0x18] sm:$0xf] }
  0x23   : > { %v487_v1 = vmax.bf16 %v470_v10, %v410_v40  ;;  %v428_v27 = vrot.slane %v427_v19, 4  ;;  %v292_v30 = vmax.bf16 %v285_v15, %v270_v5  ;;  %v471_v32 = vmax.bf16 %v464_v23, %v714_v13  ;;  %v287_v14 = vld [vmem:[%s697_s30 + $0x18] sm:$0xf]  ;;  %v265_v19 = vld [vmem:[%s680_s21 + $0x1c] sm:$0xf] }
  0x24   : > { %v343_v34 = vor.u32 %v342_v24, %v339_v21  ;;  %v346_v36 = vshrl.u32 %v278_v22, 16  ;;  %v388_v38 = vmax.bf16 %v381_v26, %v714_v13  ;;  %v435_v39 = vrot.slane %v433_v28, 5  ;;  %v273_v23 = vld [vmem:[%s685_s24 + $0x1c] sm:$0xf]  ;;  %v506_v24 = vld [vmem:[%s739_s7 + $0xc] sm:$0xf] }
  0x25   : > { %v498_v31 = vsel %vm748_vm2, %v487_v1, %v497_v17  ;;  %v299_v40 = vmax.bf16 %v292_v30, %v271_v35  ;;  %v349_v41 = vshll.u32 %v278_v22, 16  ;;  %v488_v42 = vmax.bf16 %v471_v32, %v419_v3 }
  0x26   : > { %499 = vst [vmem:[%s739_s7] sm:$0xf] %v498_v31  ;;  %v344_v43 = vrot.slane %v343_v34, 4  ;;  %v348_v44 = vrot.slane %v346_v36, 4  ;;  %v439_v45 = vshrl.u32 %v756_v29, 16  ;;  %v465_v47 = vmax.bf16 %v419_v3, %v388_v38 }
  0x27   : > { %v436_v48 = vor.u32 %v435_v39, %v432_v25  ;;  %v306_v49 = vmax.bf16 %v299_v40, %v278_v22  ;;  %v351_v50 = vrot.slane %v349_v41, 5  ;;  %v501_v13 = vsel %vm748_vm2, %v488_v42, %v500_v37 }
  0x28   : > { %v382_v52 = vmax.bf16 %v344_v43, %v305_v20  ;;  %v441_v53 = vrot.slane %v439_v45, 4  ;;  %v442_v54 = vshll.u32 %v756_v29, 16  ;;  %502 = vst [vmem:[%s739_s7 + $0x4] sm:$0xf] %v501_v13  ;;  %v472_v56 = vmax.bf16 %v465_v47, %v721_v33 }
  0x29   : > { %v437_v58 = vrot.slane %v436_v48, 4  ;;  %v352_v59 = vor.u32 %v351_v50, %v348_v44  ;;  %v293_v60 = vmax.bf16 %v286_v46, %v271_v35  ;;  %v355_v2 = vshrl.u32 %v279_v51, 16  ;;  %v509_v46 = vld [vmem:[%s739_s7 + $0x10] sm:$0xf] }
  0x2a   : > { %v389_v61 = vmax.bf16 %v382_v52, %v721_v33  ;;  %v444_v63 = vrot.slane %v442_v54, 5  ;;  %v358_v3 = vshll.u32 %v279_v51, 16  ;;  %v489_v4 = vmax.bf16 %v472_v56, %v428_v27 }
  0x2b   : > { %v353_v5 = vrot.slane %v352_v59, 4  ;;  %v300_v6 = vmax.bf16 %v293_v60, %v272_v0  ;;  %v448_v7 = vshrl.u32 %v772_v55, 16  ;;  %v357_v10 = vrot.slane %v355_v2, 4 }
  0x2c   : > { %v466_v8 = vmax.bf16 %v428_v27, %v389_v61  ;;  %v445_v9 = vor.u32 %v444_v63, %v441_v53  ;;  %v360_v11 = vrot.slane %v358_v3, 5  ;;  %v504_v33 = vsel %vm748_vm2, %v489_v4, %v503_v57  ;;  %v512_v57 = vld [vmem:[%s739_s7 + $0x14] sm:$0xf] }
  0x2d   : > { %v383_v15 = vmax.bf16 %v353_v5, %v306_v49  ;;  %v307_v17 = vmax.bf16 %v300_v6, %v279_v51  ;;  %v450_v18 = vrot.slane %v448_v7, 4  ;;  %505 = vst [vmem:[%s739_s7 + $0x8] sm:$0xf] %v504_v33  ;;  %v451_v1 = vshll.u32 %v772_v55, 16 }
  0x2e   : > { %v473_v20 = vmax.bf16 %v466_v8, %v733_v62  ;;  %v446_v21 = vrot.slane %v445_v9, 4  ;;  %v361_v22 = vor.u32 %v360_v11, %v357_v10  ;;  %v294_v26 = vmax.bf16 %v287_v14, %v272_v0  ;;  %v515_v0 = vld [vmem:[%s739_s7 + $0x18] sm:$0xf] }
  0x2f   : > { %v390_v25 = vmax.bf16 %v383_v15, %v733_v62  ;;  %v364_v27 = vshrl.u32 %v280_v12, 16  ;;  %v367_v28 = vshll.u32 %v280_v12, 16  ;;  %v453_v32 = vrot.slane %v451_v1, 5 }
  0x30   : > { %v490_v30 = vmax.bf16 %v473_v20, %v437_v58  ;;  %v362_v31 = vrot.slane %v361_v22, 4  ;;  %v478_v34 = vshrl.u32 %v265_v19, 16  ;;  %v301_v36 = vmax.bf16 %v294_v26, %v273_v23 }
  0x31   : > { %v467_v35 = vmax.bf16 %v437_v58, %v390_v25  ;;  %v366_v37 = vrot.slane %v364_v27, 4  ;;  %v369_v38 = vrot.slane %v367_v28, 5  ;;  %v454_v41 = vor.u32 %v453_v32, %v450_v18 }
  0x32   : > { %v507_v39 = vsel %vm748_vm2, %v490_v30, %v506_v24  ;;  %v384_v40 = vmax.bf16 %v362_v31, %v307_v17  ;;  %v480_v42 = vrot.slane %v478_v34, 4  ;;  %v308_v43 = vmax.bf16 %v301_v36, %v280_v12 }
  0x33   : > { %508 = vst [vmem:[%s739_s7 + $0xc] sm:$0xf] %v507_v39  ;;  %v474_v62 = vmax.bf16 %v467_v35, %v756_v29  ;;  %v370_v44 = vor.u32 %v369_v38, %v366_v37  ;;  %v481_v45 = vshll.u32 %v265_v19, 16  ;;  %v455_v52 = vrot.slane %v454_v41, 4 }
  0x34   : > { %v391_v47 = vmax.bf16 %v384_v40, %v756_v29 }
  0x35   : > { %v491_v48 = vmax.bf16 %v474_v62, %v446_v21  ;;  %v371_v49 = vrot.slane %v370_v44, 4  ;;  %v483_v50 = vrot.slane %v481_v45, 5 }
  0x36   : > { %v468_v51 = vmax.bf16 %v446_v21, %v391_v47 }
  0x37   : > { %v510_v13 = vsel %vm748_vm2, %v491_v48, %v509_v46  ;;  %v385_v53 = vmax.bf16 %v371_v49, %v308_v43  ;;  %v484_v54 = vor.u32 %v483_v50, %v480_v42 }
  0x38   : > { %511 = vst [vmem:[%s739_s7 + $0x10] sm:$0xf] %v510_v13  ;;  %v475_v56 = vmax.bf16 %v468_v51, %v772_v55 }
  0x39   : > { %v392_v58 = vmax.bf16 %v385_v53, %v772_v55  ;;  %v485_v60 = vrot.slane %v484_v54, 4 }
  0x3a   : > { %v492_v29 = vmax.bf16 %v475_v56, %v455_v52 }
  0x3b   : > { %v469_v59 = vmax.bf16 %v455_v52, %v392_v58 }
  0x3c   : > { %v513_v61 = vsel %vm748_vm2, %v492_v29, %v512_v57 }
  0x3d   : > { %514 = vst [vmem:[%s739_s7 + $0x14] sm:$0xf] %v513_v61  ;;  %v476_v63 = vmax.bf16 %v469_v59, %v265_v19 }
  0x3f   : > { %v493_v2 = vmax.bf16 %v485_v60, %v476_v63 }
  0x41   : > { %v516_v3 = vsel %vm748_vm2, %v493_v2, %v515_v0 }
  0x42   : > { %517 = vst [vmem:[%s739_s7 + $0x18] sm:$0xf] %v516_v3 }
  0x43 PF: > { %s14_s15 = sadd.s32 1, %s640_s15  }
  0x44   : > { %p11_p4 = scmp.ge.s32.totalorder %s14_s15, 4  }
  0x46   :  { %13 = sbr.rel (!%p11_p4) target bundleno = 1 (0x1), region = 75 }

// kernel: alexnet_forward.12
= control target key start
LH: loop header
LB: loop body
LE: loop exit
PB: predicated region body
PF: predicated region fallthrough
CT: control target
= control target key end

     0   :  { %s2433_s12 = smov 0   ;;  %s2435_s13 = smov 0   ;;  %s2690_s0 = inlined_call_operand.vmem [shape: bf16[512,512], index: 0, kind: input, shape index: {}]   ;;  %s2691_s1 = inlined_call_operand.vmem [shape: bf16[512,128], index: 1, kind: input, shape index: {}]   ;;  %s2692_s2 = inlined_call_operand.vmem [shape: f32[1,128], index: 2, kind: input, shape index: {}]   ;;  %s2693_s3 = inlined_call_operand.vmem [shape: bf16[512,128], index: 3, kind: output, shape index: {}]  }
   0x1   :  { %s2437_s14 = smov 0  }
   0x2 LB: > { %s32_s15 = sadd.s32 1, %s2407_s13  ;;  %p1748_p0 = scmp.ge.s32.totalorder %s2411_s14, 1  ;;  %s2411_s14 = sphi %s2437_s14, %s13_s14   ;;  %s2407_s13 = sphi %s2435_s13, %s2695_s13   ;;  %s2403_s12 = sphi %s2433_s12, %s2694_s12  }
   0x3   : > { %p34_p1 = scmp.ge.s32.totalorder %s32_s15, 2  ;;  %p191_p2 = scmp.lt.s32.totalorder %s2411_s14, 3 }
   0x5   : > { %s2697_s15 = smov (%p34_p1, %s32_s15), 0  ;;  %p192_p3 = pnand %p1748_p0, %p191_p2 }
   0x6   : > { %v2261_v0 = vld [vmem:[%s2691_s1 + $0x40] sm:$0xff] (!%p192_p3)   ;;  %v2265_v4 = vld [vmem:[%s2691_s1 + $0x48] sm:$0xff] (!%p192_p3)   ;;  %v2269_v8 = vld [vmem:[%s2691_s1 + $0x50] sm:$0xff] (!%p192_p3)   ;;  %s1749_s25 = sshll.u32 (!%p192_p3), %s2403_s12, 5 }
   0x7   : > { %195 = sbr.rel (%p192_p3) target bundleno = 387 (0x183), region = 32  ;;  %v2262_v1 = vld [vmem:[%s2691_s1 + $0xc0] sm:$0xff] (!%p192_p3)   ;;  %2013 = vmatprep.subr.bf16.mxu0 (!%p192_p3), %v2261_v0  ;;  %v2266_v5 = vld [vmem:[%s2691_s1 + $0xc8] sm:$0xff] (!%p192_p3)   ;;  %v2270_v9 = vld [vmem:[%s2691_s1 + $0xd0] sm:$0xff] (!%p192_p3)   ;;  %p236_p4 = scmp.lt.s32.totalorder (!%p192_p3), %s1749_s25, 63 }
   0x8   : > { %v2263_v2 = vld [vmem:[%s2691_s1] sm:$0xff] (!%p192_p3)   ;;  %2125 = vmatprep.subr.bf16.mxu1 (!%p192_p3), %v2262_v1  ;;  %v2267_v6 = vld [vmem:[%s2691_s1 + $0x8] sm:$0xff] (!%p192_p3)   ;;  %v2271_v10 = vld [vmem:[%s2691_s1 + $0x10] sm:$0xff] (!%p192_p3)  }
   0x9   : > { %v2264_v3 = vld [vmem:[%s2691_s1 + $0x80] sm:$0xff] (!%p192_p3)   ;;  %2014 = vmatpush3.bf16.msra.mxu0 (!%p192_p3), %v2263_v2  ;;  %v2268_v7 = vld [vmem:[%s2691_s1 + $0x88] sm:$0xff] (!%p192_p3)   ;;  %v2272_v11 = vld [vmem:[%s2691_s1 + $0x90] sm:$0xff] (!%p192_p3)  }
   0xa   : > { %2126 = vmatpush3.bf16.msra.mxu1 (!%p192_p3), %v2264_v3  ;;  %2015 = vmatprep.subr.bf16.mxu0 (!%p192_p3), %v2265_v4  ;;  %v2273_v12 = vld [vmem:[%s2691_s1 + $0x58] sm:$0xff] (!%p192_p3)   ;;  %v2277_v16 = vld [vmem:[%s2691_s1 + $0x60] sm:$0xff] (!%p192_p3)   ;;  %v2281_v20 = vld [vmem:[%s2691_s1 + $0x68] sm:$0xff] (!%p192_p3)  }
   0xb   : > { %2127 = vmatprep.subr.bf16.mxu1 (!%p192_p3), %v2266_v5  ;;  %v2274_v13 = vld [vmem:[%s2691_s1 + $0xd8] sm:$0xff] (!%p192_p3)   ;;  %v2278_v17 = vld [vmem:[%s2691_s1 + $0xe0] sm:$0xff] (!%p192_p3)   ;;  %v2282_v21 = vld [vmem:[%s2691_s1 + $0xe8] sm:$0xff] (!%p192_p3)  }
   0xc   : > { %v2275_v14 = vld [vmem:[%s2691_s1 + $0x18] sm:$0xff] (!%p192_p3)   ;;  %v2279_v18 = vld [vmem:[%s2691_s1 + $0x20] sm:$0xff] (!%p192_p3)   ;;  %v2283_v22 = vld [vmem:[%s2691_s1 + $0x28] sm:$0xff] (!%p192_p3)  }
   0xd   : > { %2016 = vmatpush3.bf16.msra.mxu0 (!%p192_p3), %v2267_v6  ;;  %v2276_v15 = vld [vmem:[%s2691_s1 + $0x98] sm:$0xff] (!%p192_p3)   ;;  %v2280_v19 = vld [vmem:[%s2691_s1 + $0xa0] sm:$0xff] (!%p192_p3)   ;;  %v2284_v23 = vld [vmem:[%s2691_s1 + $0xa8] sm:$0xff] (!%p192_p3)  }
   0xe   : > { %2128 = vmatpush3.bf16.msra.mxu1 %v2268_v7  ;;  %2017 = vmatprep.subr.bf16.mxu0 %v2269_v8  ;;  %s2699_s25 = smov (!%p236_p4, %s1749_s25), 63  ;;  %v2285_v24 = vld [vmem:[%s2691_s1 + $0x70] sm:$0xff]   ;;  %v2289_v28 = vld [vmem:[%s2691_s1 + $0x78] sm:$0xff]  }
   0xf   : > { %2129 = vmatprep.subr.bf16.mxu1 %v2270_v9  ;;  %v2286_v25 = vld [vmem:[%s2691_s1 + $0xf0] sm:$0xff]   ;;  %s1885_s24 = sshll.u32 %s2699_s25, 4  ;;  %v2290_v29 = vld [vmem:[%s2691_s1 + $0xf8] sm:$0xff]   ;;  %s1753_s17 = sshll.u32 %s2699_s25, 2 }
  0x10   : > { %v2287_v26 = vld [vmem:[%s2691_s1 + $0x30] sm:$0xff]   ;;  %s2550_s12 = scalar_lea.vmem %s2690_s0, %s1885_s24  ;;  %v2291_v30 = vld [vmem:[%s2691_s1 + $0x38] sm:$0xff]   ;;  %s2633_s20 = scalar_lea.vmem %s2693_s3, %s1753_s17 }
  0x11   : > { %2018 = vmatpush3.bf16.msra.mxu0 %v2271_v10  ;;  %v2288_v27 = vld [vmem:[%s2691_s1 + $0xb0] sm:$0xff]   ;;  %v2292_v31 = vld [vmem:[%s2691_s1 + $0xb8] sm:$0xff]  }
  0x12   : > { %2130 = vmatpush3.bf16.msra.mxu1 %v2272_v11  ;;  %2019 = vmatprep.subr.bf16.mxu0 %v2273_v12  ;;  %v2293_v32 = vld [vmem:[%s2550_s12] ss:$16 sps:$4 sm:$0xff]   ;;  %v2295_v33 = vld [vmem:[%s2550_s12 + $0x4] ss:$16 sps:$4 sm:$0xff]   ;;  %v2296_v34 = vld [vmem:[%s2550_s12 + $0x8] ss:$16 sps:$4 sm:$0xff]  }
  0x13   : > { %2131 = vmatprep.subr.bf16.mxu1 %v2274_v13  ;;  %v2298_v35 = vld [vmem:[%s2550_s12 + $0xc] ss:$16 sps:$4 sm:$0xff]   ;;  %1008 = vmatprep.mubr.bf16.mxu0 %v2295_v33  ;;  %v2299_v36 = vld [vmem:[%s2550_s12 + $0x24] ss:$16 sps:$4 sm:$0xff]   ;;  %v2303_v38 = vld [vmem:[%s2550_s12 + $0x20] ss:$16 sps:$4 sm:$0xff]  }
  0x14   : > { %1169 = vmatprep.mubr.bf16.mxu1 %v2298_v35  ;;  %v2301_v37 = vld [vmem:[%s2550_s12 + $0x2c] ss:$16 sps:$4 sm:$0xff]   ;;  %v2304_v39 = vld [vmem:[%s2550_s12 + $0x28] ss:$16 sps:$4 sm:$0xff]   ;;  %v2305_v40 = vld [vmem:[%s2550_s12 + $0x44] ss:$16 sps:$4 sm:$0xff]  }
  0x15   : > { %2020 = vmatpush3.bf16.msra.mxu0 %v2275_v14  ;;  %v2307_v41 = vld [vmem:[%s2550_s12 + $0x4c] ss:$16 sps:$4 sm:$0xff]   ;;  %v2309_v42 = vld [vmem:[%s2550_s12 + $0x40] ss:$16 sps:$4 sm:$0xff]   ;;  %v2310_v43 = vld [vmem:[%s2550_s12 + $0x48] ss:$16 sps:$4 sm:$0xff]  }
  0x16   : > { %2132 = vmatpush3.bf16.msra.mxu1 %v2276_v15  ;;  %2021 = vmatprep.subr.bf16.mxu0 %v2277_v16  ;;  %v2311_v44 = vld [vmem:[%s2550_s12 + $0x64] ss:$16 sps:$4 sm:$0xff]   ;;  %v2313_v45 = vld [vmem:[%s2550_s12 + $0x6c] ss:$16 sps:$4 sm:$0xff]   ;;  %v2315_v46 = vld [vmem:[%s2550_s12 + $0x60] ss:$16 sps:$4 sm:$0xff]  }
  0x17   : > { %2133 = vmatprep.subr.bf16.mxu1 %v2278_v17  ;;  %v2316_v47 = vld [vmem:[%s2550_s12 + $0x68] ss:$16 sps:$4 sm:$0xff]   ;;  %v2317_v48 = vld [vmem:[%s2550_s12 + $0x84] ss:$16 sps:$4 sm:$0xff]   ;;  %v2319_v49 = vld [vmem:[%s2550_s12 + $0x8c] ss:$16 sps:$4 sm:$0xff]  }
  0x18   : > { %v2321_v50 = vld [vmem:[%s2550_s12 + $0x80] ss:$16 sps:$4 sm:$0xff]   ;;  %v2322_v51 = vld [vmem:[%s2550_s12 + $0x88] ss:$16 sps:$4 sm:$0xff]   ;;  %v2323_v52 = vld [vmem:[%s2550_s12 + $0xa4] ss:$16 sps:$4 sm:$0xff]  }
  0x19   : > { %2022 = vmatpush3.bf16.msra.mxu0 %v2279_v18  ;;  %v2325_v53 = vld [vmem:[%s2550_s12 + $0xac] ss:$16 sps:$4 sm:$0xff]   ;;  %v2327_v54 = vld [vmem:[%s2550_s12 + $0xa0] ss:$16 sps:$4 sm:$0xff]   ;;  %v2328_v55 = vld [vmem:[%s2550_s12 + $0xa8] ss:$16 sps:$4 sm:$0xff]  }
  0x1a   : > { %2134 = vmatpush3.bf16.msra.mxu1 %v2280_v19  ;;  %2023 = vmatprep.subr.bf16.mxu0 %v2281_v20  ;;  %v2329_v56 = vld [vmem:[%s2550_s12 + $0xc4] ss:$16 sps:$4 sm:$0xff]   ;;  %v2331_v57 = vld [vmem:[%s2550_s12 + $0xcc] ss:$16 sps:$4 sm:$0xff]   ;;  %v2333_v58 = vld [vmem:[%s2550_s12 + $0xc0] ss:$16 sps:$4 sm:$0xff]  }
  0x1b   : > { %2135 = vmatprep.subr.bf16.mxu1 %v2282_v21  ;;  %v2334_v59 = vld [vmem:[%s2550_s12 + $0xc8] ss:$16 sps:$4 sm:$0xff]   ;;  %v2335_v60 = vld [vmem:[%s2550_s12 + $0xe4] ss:$16 sps:$4 sm:$0xff]   ;;  %v2337_v61 = vld [vmem:[%s2550_s12 + $0xec] ss:$16 sps:$4 sm:$0xff]  }
  0x1c   : > { %v2339_v62 = vld [vmem:[%s2550_s12 + $0xe0] ss:$16 sps:$4 sm:$0xff]   ;;  %v2340_v63 = vld [vmem:[%s2550_s12 + $0xe8] ss:$16 sps:$4 sm:$0xff]   ;;  %v2341_v0 = vld [vmem:[%s2550_s12 + $0x104] ss:$16 sps:$4 sm:$0xff]  }
  0x1d   : > { %2024 = vmatpush3.bf16.msra.mxu0 %v2283_v22  ;;  %v2343_v1 = vld [vmem:[%s2550_s12 + $0x10c] ss:$16 sps:$4 sm:$0xff]   ;;  %v2345_v2 = vld [vmem:[%s2550_s12 + $0x100] ss:$16 sps:$4 sm:$0xff]   ;;  %v2346_v3 = vld [vmem:[%s2550_s12 + $0x108] ss:$16 sps:$4 sm:$0xff]  }
  0x1e   : > { %2136 = vmatpush3.bf16.msra.mxu1 %v2284_v23  ;;  %2025 = vmatprep.subr.bf16.mxu0 %v2285_v24  ;;  %v2347_v4 = vld [vmem:[%s2550_s12 + $0x124] ss:$16 sps:$4 sm:$0xff]   ;;  %v2349_v5 = vld [vmem:[%s2550_s12 + $0x12c] ss:$16 sps:$4 sm:$0xff]   ;;  %v2351_v6 = vld [vmem:[%s2550_s12 + $0x120] ss:$16 sps:$4 sm:$0xff]  }
  0x1f   : > { %2137 = vmatprep.subr.bf16.mxu1 %v2286_v25  ;;  %v2352_v7 = vld [vmem:[%s2550_s12 + $0x128] ss:$16 sps:$4 sm:$0xff]   ;;  %v2353_v8 = vld [vmem:[%s2550_s12 + $0x144] ss:$16 sps:$4 sm:$0xff]   ;;  %v2355_v9 = vld [vmem:[%s2550_s12 + $0x14c] ss:$16 sps:$4 sm:$0xff]  }
  0x20   : > { %v2357_v10 = vld [vmem:[%s2550_s12 + $0x140] ss:$16 sps:$4 sm:$0xff]   ;;  %v2358_v11 = vld [vmem:[%s2550_s12 + $0x148] ss:$16 sps:$4 sm:$0xff]   ;;  %v2359_v12 = vld [vmem:[%s2550_s12 + $0x164] ss:$16 sps:$4 sm:$0xff]  }
  0x21   : > { %2026 = vmatpush3.bf16.msra.mxu0 %v2287_v26  ;;  %v2361_v13 = vld [vmem:[%s2550_s12 + $0x16c] ss:$16 sps:$4 sm:$0xff]   ;;  %v2363_v14 = vld [vmem:[%s2550_s12 + $0x160] ss:$16 sps:$4 sm:$0xff]   ;;  %v2364_v15 = vld [vmem:[%s2550_s12 + $0x168] ss:$16 sps:$4 sm:$0xff]  }
  0x22   : > { %2138 = vmatpush3.bf16.msra.mxu1 %v2288_v27  ;;  %2027 = vmatprep.subr.bf16.mxu0 %v2289_v28  ;;  %v2365_v16 = vld [vmem:[%s2550_s12 + $0x184] ss:$16 sps:$4 sm:$0xff]   ;;  %v2367_v17 = vld [vmem:[%s2550_s12 + $0x18c] ss:$16 sps:$4 sm:$0xff]   ;;  %v2369_v18 = vld [vmem:[%s2550_s12 + $0x180] ss:$16 sps:$4 sm:$0xff]  }
  0x23   : > { %2139 = vmatprep.subr.bf16.mxu1 %v2290_v29  ;;  %v2370_v19 = vld [vmem:[%s2550_s12 + $0x188] ss:$16 sps:$4 sm:$0xff]   ;;  %v2371_v20 = vld [vmem:[%s2550_s12 + $0x1a4] ss:$16 sps:$4 sm:$0xff]   ;;  %v2373_v21 = vld [vmem:[%s2550_s12 + $0x1ac] ss:$16 sps:$4 sm:$0xff]  }
  0x24   : > { %v2375_v22 = vld [vmem:[%s2550_s12 + $0x1a0] ss:$16 sps:$4 sm:$0xff]   ;;  %v2376_v23 = vld [vmem:[%s2550_s12 + $0x1a8] ss:$16 sps:$4 sm:$0xff]   ;;  %v2377_v24 = vld [vmem:[%s2550_s12 + $0x1c4] ss:$16 sps:$4 sm:$0xff]  }
  0x25   : > { %2028 = vmatpush3.bf16.msra.mxu0 %v2291_v30  ;;  %v2379_v25 = vld [vmem:[%s2550_s12 + $0x1cc] ss:$16 sps:$4 sm:$0xff]   ;;  %v2381_v26 = vld [vmem:[%s2550_s12 + $0x1c0] ss:$16 sps:$4 sm:$0xff]   ;;  %v2382_v27 = vld [vmem:[%s2550_s12 + $0x1c8] ss:$16 sps:$4 sm:$0xff]  }
  0x26   : > { %2140 = vmatpush3.bf16.msra.mxu1 %v2292_v31  ;;  %v2383_v28 = vld [vmem:[%s2550_s12 + $0x1e4] ss:$16 sps:$4 sm:$0xff]   ;;  %v2385_v29 = vld [vmem:[%s2550_s12 + $0x1ec] ss:$16 sps:$4 sm:$0xff]   ;;  %v2387_v30 = vld [vmem:[%s2550_s12 + $0x1e0] ss:$16 sps:$4 sm:$0xff]  }
  0x27   : > { %v2388_v31 = vld [vmem:[%s2550_s12 + $0x1e8] ss:$16 sps:$4 sm:$0xff]  }
  0x28   : > { %1009 = vmatmul.mubr.bf16.vlgmr.msra.gmra.mrb[0].mxu0 %v2293_v32 }
  0x29   : > { %1170 = vmatmul.mubr.bf16.vlgmr.msra.gmra.mrb[0].mxu1 %v2296_v34  ;;  %1016 = vmatprep.mubr.bf16.mxu0 %v2299_v36 }
  0x2a   : > { %1177 = vmatprep.mubr.bf16.mxu1 %v2301_v37 }
  0x30   : > { %1017 = vmatmul.mubr.bf16.gmra.mrb[4].mxu0 %v2303_v38 }
  0x31   : > { %1178 = vmatmul.mubr.bf16.gmra.mrb[4].mxu1 %v2304_v39  ;;  %1024 = vmatprep.mubr.bf16.mxu0 %v2305_v40 }
  0x32   : > { %1185 = vmatprep.mubr.bf16.mxu1 %v2307_v41  ;;  %v2625_v41 = vld [vmem:[%s2692_s2] ss:$0 sm:$0xff] }
  0x38   : > { %1025 = vmatmul.mubr.bf16.gmra.mrb[8].mxu0 %v2309_v42 }
  0x39   : > { %1186 = vmatmul.mubr.bf16.gmra.mrb[8].mxu1 %v2310_v43  ;;  %1032 = vmatprep.mubr.bf16.mxu0 %v2311_v44 }
  0x3a   : > { %1193 = vmatprep.mubr.bf16.mxu1 %v2313_v45 }
  0x40   : > { %1033 = vmatmul.mubr.bf16.gmra.mrb[12].mxu0 %v2315_v46 }
  0x41   : > { %1194 = vmatmul.mubr.bf16.gmra.mrb[12].mxu1 %v2316_v47  ;;  %1040 = vmatprep.mubr.bf16.mxu0 %v2317_v48 }
  0x42   : > { %1201 = vmatprep.mubr.bf16.mxu1 %v2319_v49 }
  0x48   : > { %1041 = vmatmul.mubr.bf16.gmra.mrb[16].mxu0 %v2321_v50 }
  0x49   : > { %1202 = vmatmul.mubr.bf16.gmra.mrb[16].mxu1 %v2322_v51  ;;  %1048 = vmatprep.mubr.bf16.mxu0 %v2323_v52 }
  0x4a   : > { %1209 = vmatprep.mubr.bf16.mxu1 %v2325_v53 }
  0x50   : > { %1049 = vmatmul.mubr.bf16.gmra.mrb[20].mxu0 %v2327_v54 }
  0x51   : > { %1210 = vmatmul.mubr.bf16.gmra.mrb[20].mxu1 %v2328_v55  ;;  %1056 = vmatprep.mubr.bf16.mxu0 %v2329_v56 }
  0x52   : > { %1217 = vmatprep.mubr.bf16.mxu1 %v2331_v57 }
  0x58   : > { %1057 = vmatmul.mubr.bf16.gmra.mrb[24].mxu0 %v2333_v58 }
  0x59   : > { %1218 = vmatmul.mubr.bf16.gmra.mrb[24].mxu1 %v2334_v59  ;;  %1064 = vmatprep.mubr.bf16.mxu0 %v2335_v60 }
  0x5a   : > { %1225 = vmatprep.mubr.bf16.mxu1 %v2337_v61 }
  0x60   : > { %1065 = vmatmul.mubr.bf16.gmra.mrb[28].mxu0 %v2339_v62 }
  0x61   : > { %1226 = vmatmul.mubr.bf16.gmra.mrb[28].mxu1 %v2340_v63  ;;  %1072 = vmatprep.mubr.bf16.mxu0 %v2341_v0 }
  0x62   : > { %1233 = vmatprep.mubr.bf16.mxu1 %v2343_v1 }
  0x68   : > { %1073 = vmatmul.mubr.bf16.gmra.mrb[32].mxu0 %v2345_v2 }
  0x69   : > { %1234 = vmatmul.mubr.bf16.gmra.mrb[32].mxu1 %v2346_v3  ;;  %1080 = vmatprep.mubr.bf16.mxu0 %v2347_v4 }
  0x6a   : > { %1241 = vmatprep.mubr.bf16.mxu1 %v2349_v5 }
  0x70   : > { %1081 = vmatmul.mubr.bf16.gmra.mrb[36].mxu0 %v2351_v6 }
  0x71   : > { %1242 = vmatmul.mubr.bf16.gmra.mrb[36].mxu1 %v2352_v7  ;;  %1088 = vmatprep.mubr.bf16.mxu0 %v2353_v8 }
  0x72   : > { %1249 = vmatprep.mubr.bf16.mxu1 %v2355_v9 }
  0x78   : > { %1089 = vmatmul.mubr.bf16.gmra.mrb[40].mxu0 %v2357_v10 }
  0x79   : > { %1250 = vmatmul.mubr.bf16.gmra.mrb[40].mxu1 %v2358_v11  ;;  %1096 = vmatprep.mubr.bf16.mxu0 %v2359_v12 }
  0x7a   : > { %1257 = vmatprep.mubr.bf16.mxu1 %v2361_v13 }
  0x80   : > { %1097 = vmatmul.mubr.bf16.gmra.mrb[44].mxu0 %v2363_v14 }
  0x81   : > { %1258 = vmatmul.mubr.bf16.gmra.mrb[44].mxu1 %v2364_v15  ;;  %1104 = vmatprep.mubr.bf16.mxu0 %v2365_v16 }
  0x82   : > { %1265 = vmatprep.mubr.bf16.mxu1 %v2367_v17 }
  0x88   : > { %1105 = vmatmul.mubr.bf16.gmra.mrb[48].mxu0 %v2369_v18 }
  0x89   : > { %1266 = vmatmul.mubr.bf16.gmra.mrb[48].mxu1 %v2370_v19  ;;  %1112 = vmatprep.mubr.bf16.mxu0 %v2371_v20 }
  0x8a   : > { %1273 = vmatprep.mubr.bf16.mxu1 %v2373_v21 }
  0x90   : > { %1113 = vmatmul.mubr.bf16.gmra.mrb[52].mxu0 %v2375_v22 }
  0x91   : > { %1274 = vmatmul.mubr.bf16.gmra.mrb[52].mxu1 %v2376_v23  ;;  %1120 = vmatprep.mubr.bf16.mxu0 %v2377_v24 }
  0x92   : > { %1281 = vmatprep.mubr.bf16.mxu1 %v2379_v25 }
  0x98   : > { %1121 = vmatmul.mubr.bf16.gmra.mrb[56].mxu0 %v2381_v26 }
  0x99   : > { %1282 = vmatmul.mubr.bf16.gmra.mrb[56].mxu1 %v2382_v27  ;;  %1128 = vmatprep.mubr.bf16.mxu0 %v2383_v28 }
  0x9a   : > { %1289 = vmatprep.mubr.bf16.mxu1 %v2385_v29 }
  0xa0   : > { %1129 = vmatmul.mubr.bf16.gmra.mrb[60].mxu0 %v2387_v30 }
  0xa1   : > { %1290 = vmatmul.mubr.bf16.gmra.mrb[60].mxu1 %v2388_v31 }
  0xfb   : > { %v2029_v32 = vpop.f32.mrb[0].mxu0 }
  0xfc   : > { %v2141_v33 = vpop.f32.mrb[0].mxu1  ;;  %v2030_v34 = vpop.f32.mrb[1].mxu0 }
  0xfd   : > { %v2031_v35 = vadd.f32 %v2030_v34, %v2029_v32  ;;  %v2142_v36 = vpop.f32.mrb[1].mxu1  ;;  %v2032_v37 = vpop.f32.mrb[2].mxu0 }
  0xfe   : > { %v2143_v38 = vadd.f32 %v2142_v36, %v2141_v33  ;;  %v2144_v39 = vpop.f32.mrb[2].mxu1  ;;  %v2033_v40 = vpop.f32.mrb[3].mxu0 }
  0xff   : > { %v2034_v42 = vadd.f32 %v2033_v40, %v2032_v37  ;;  %v2145_v43 = vpop.f32.mrb[3].mxu1 }
 0x100   : > { %v1172_v44 = vadd.f32 %v2143_v38, %v2031_v35  ;;  %v2146_v45 = vadd.f32 %v2145_v43, %v2144_v39 }
 0x102   : > { %v1404_v46 = vadd.f32 %v2625_v41, %v1172_v44  ;;  %v1175_v47 = vadd.f32 %v2146_v45, %v2034_v42 }
 0x103   : > { %v2035_v48 = vpop.f32.mrb[4].mxu0 }
 0x104   : > { %v1405_v49 = vadd.f32 %v2625_v41, %v1175_v47  ;;  %v2147_v50 = vpop.f32.mrb[4].mxu1  ;;  %v2036_v51 = vpop.f32.mrb[5].mxu0  ;;  %v1436_v55 = vmax.f32 %v1404_v46, 0.0 }
 0x105   : > { %v2037_v52 = vadd.f32 %v2036_v51, %v2035_v48  ;;  %v2148_v53 = vpop.f32.mrb[5].mxu1  ;;  %v2038_v54 = vpop.f32.mrb[6].mxu0 }
 0x106   : > { %v1437_v56 = vmax.f32 %v1405_v49, 0.0  ;;  %v2149_v57 = vadd.f32 %v2148_v53, %v2147_v50  ;;  %v2150_v58 = vpop.f32.mrb[6].mxu1  ;;  %v2039_v59 = vpop.f32.mrb[7].mxu0 }
 0x107   : > { %v2040_v60 = vadd.f32 %v2039_v59, %v2038_v54  ;;  %v2151_v61 = vpop.f32.mrb[7].mxu1 }
 0x108   : > { %v1921_v62 = vpack.c.bf16 %v1437_v56, %v1436_v55  ;;  %v1180_v63 = vadd.f32 %v2149_v57, %v2037_v52  ;;  %v2152_v0 = vadd.f32 %v2151_v61, %v2150_v58 }
 0x10a   : > { %1922 = vst [vmem:[%s2633_s20] sm:$0xff] %v1921_v62   ;;  %v1406_v1 = vadd.f32 %v2625_v41, %v1180_v63  ;;  %v1183_v2 = vadd.f32 %v2152_v0, %v2040_v60 }
 0x10b   : > { %v2041_v3 = vpop.f32.mrb[8].mxu0 }
 0x10c   : > { %v1407_v4 = vadd.f32 %v2625_v41, %v1183_v2  ;;  %v2153_v5 = vpop.f32.mrb[8].mxu1  ;;  %v2042_v6 = vpop.f32.mrb[9].mxu0  ;;  %v1438_v10 = vmax.f32 %v1406_v1, 0.0 }
 0x10d   : > { %v2043_v7 = vadd.f32 %v2042_v6, %v2041_v3  ;;  %v2154_v8 = vpop.f32.mrb[9].mxu1  ;;  %v2044_v9 = vpop.f32.mrb[10].mxu0 }
 0x10e   : > { %v1439_v11 = vmax.f32 %v1407_v4, 0.0  ;;  %v2155_v12 = vadd.f32 %v2154_v8, %v2153_v5  ;;  %v2156_v13 = vpop.f32.mrb[10].mxu1  ;;  %v2045_v14 = vpop.f32.mrb[11].mxu0 }
 0x10f   : > { %v2046_v15 = vadd.f32 %v2045_v14, %v2044_v9  ;;  %v2157_v16 = vpop.f32.mrb[11].mxu1 }
 0x110   : > { %v1926_v17 = vpack.c.bf16 %v1439_v11, %v1438_v10  ;;  %v1188_v18 = vadd.f32 %v2155_v12, %v2043_v7  ;;  %v2158_v19 = vadd.f32 %v2157_v16, %v2156_v13 }
 0x112   : > { %1998 = vst [vmem:[%s2633_s20 + $0x8] sm:$0xff] %v1926_v17   ;;  %v1408_v20 = vadd.f32 %v2625_v41, %v1188_v18  ;;  %v1191_v21 = vadd.f32 %v2158_v19, %v2046_v15 }
 0x113   : > { %v2047_v22 = vpop.f32.mrb[12].mxu0 }
 0x114   : > { %v1409_v23 = vadd.f32 %v2625_v41, %v1191_v21  ;;  %v2159_v24 = vpop.f32.mrb[12].mxu1  ;;  %v2048_v25 = vpop.f32.mrb[13].mxu0  ;;  %v1440_v29 = vmax.f32 %v1408_v20, 0.0 }
 0x115   : > { %v2049_v26 = vadd.f32 %v2048_v25, %v2047_v22  ;;  %v2160_v27 = vpop.f32.mrb[13].mxu1  ;;  %v2050_v28 = vpop.f32.mrb[14].mxu0 }
 0x116   : > { %v1441_v30 = vmax.f32 %v1409_v23, 0.0  ;;  %v2161_v31 = vadd.f32 %v2160_v27, %v2159_v24  ;;  %v2162_v32 = vpop.f32.mrb[14].mxu1  ;;  %v2051_v33 = vpop.f32.mrb[15].mxu0 }
 0x117   : > { %v2052_v34 = vadd.f32 %v2051_v33, %v2050_v28  ;;  %v2163_v35 = vpop.f32.mrb[15].mxu1 }
 0x118   : > { %v1931_v36 = vpack.c.bf16 %v1441_v30, %v1440_v29  ;;  %v1196_v37 = vadd.f32 %v2161_v31, %v2049_v26  ;;  %v2164_v38 = vadd.f32 %v2163_v35, %v2162_v32 }
 0x11a   : > { %1999 = vst [vmem:[%s2633_s20 + $0x10] sm:$0xff] %v1931_v36   ;;  %v1410_v39 = vadd.f32 %v2625_v41, %v1196_v37  ;;  %v1199_v40 = vadd.f32 %v2164_v38, %v2052_v34 }
 0x11b   : > { %v2053_v42 = vpop.f32.mrb[16].mxu0 }
 0x11c   : > { %v1411_v43 = vadd.f32 %v2625_v41, %v1199_v40  ;;  %v2165_v44 = vpop.f32.mrb[16].mxu1  ;;  %v2054_v45 = vpop.f32.mrb[17].mxu0  ;;  %v1442_v49 = vmax.f32 %v1410_v39, 0.0 }
 0x11d   : > { %v2055_v46 = vadd.f32 %v2054_v45, %v2053_v42  ;;  %v2166_v47 = vpop.f32.mrb[17].mxu1  ;;  %v2056_v48 = vpop.f32.mrb[18].mxu0 }
 0x11e   : > { %v1443_v50 = vmax.f32 %v1411_v43, 0.0  ;;  %v2167_v51 = vadd.f32 %v2166_v47, %v2165_v44  ;;  %v2168_v52 = vpop.f32.mrb[18].mxu1  ;;  %v2057_v53 = vpop.f32.mrb[19].mxu0 }
 0x11f   : > { %v2058_v54 = vadd.f32 %v2057_v53, %v2056_v48  ;;  %v2169_v55 = vpop.f32.mrb[19].mxu1 }
 0x120   : > { %v1936_v56 = vpack.c.bf16 %v1443_v50, %v1442_v49  ;;  %v1204_v57 = vadd.f32 %v2167_v51, %v2055_v46  ;;  %v2170_v58 = vadd.f32 %v2169_v55, %v2168_v52 }
 0x122   : > { %2000 = vst [vmem:[%s2633_s20 + $0x18] sm:$0xff] %v1936_v56   ;;  %v1412_v59 = vadd.f32 %v2625_v41, %v1204_v57  ;;  %v1207_v60 = vadd.f32 %v2170_v58, %v2058_v54 }
 0x123   : > { %v2059_v61 = vpop.f32.mrb[20].mxu0 }
 0x124   : > { %v1413_v62 = vadd.f32 %v2625_v41, %v1207_v60  ;;  %v2171_v63 = vpop.f32.mrb[20].mxu1  ;;  %v2060_v0 = vpop.f32.mrb[21].mxu0  ;;  %v1444_v4 = vmax.f32 %v1412_v59, 0.0 }
 0x125   : > { %v2061_v1 = vadd.f32 %v2060_v0, %v2059_v61  ;;  %v2172_v2 = vpop.f32.mrb[21].mxu1  ;;  %v2062_v3 = vpop.f32.mrb[22].mxu0 }
 0x126   : > { %v1445_v5 = vmax.f32 %v1413_v62, 0.0  ;;  %v2173_v6 = vadd.f32 %v2172_v2, %v2171_v63  ;;  %v2174_v7 = vpop.f32.mrb[22].mxu1  ;;  %v2063_v8 = vpop.f32.mrb[23].mxu0 }
 0x127   : > { %v2064_v9 = vadd.f32 %v2063_v8, %v2062_v3  ;;  %v2175_v10 = vpop.f32.mrb[23].mxu1 }
 0x128   : > { %v1941_v11 = vpack.c.bf16 %v1445_v5, %v1444_v4  ;;  %v1212_v12 = vadd.f32 %v2173_v6, %v2061_v1  ;;  %v2176_v13 = vadd.f32 %v2175_v10, %v2174_v7 }
 0x12a   : > { %2001 = vst [vmem:[%s2633_s20 + $0x20] sm:$0xff] %v1941_v11   ;;  %v1414_v14 = vadd.f32 %v2625_v41, %v1212_v12  ;;  %v1215_v15 = vadd.f32 %v2176_v13, %v2064_v9 }
 0x12b   : > { %v2065_v16 = vpop.f32.mrb[24].mxu0 }
 0x12c   : > { %v1415_v17 = vadd.f32 %v2625_v41, %v1215_v15  ;;  %v2177_v18 = vpop.f32.mrb[24].mxu1  ;;  %v2066_v19 = vpop.f32.mrb[25].mxu0  ;;  %v1446_v23 = vmax.f32 %v1414_v14, 0.0 }
 0x12d   : > { %v2067_v20 = vadd.f32 %v2066_v19, %v2065_v16  ;;  %v2178_v21 = vpop.f32.mrb[25].mxu1  ;;  %v2068_v22 = vpop.f32.mrb[26].mxu0 }
 0x12e   : > { %v1447_v24 = vmax.f32 %v1415_v17, 0.0  ;;  %v2179_v25 = vadd.f32 %v2178_v21, %v2177_v18  ;;  %v2180_v26 = vpop.f32.mrb[26].mxu1  ;;  %v2069_v27 = vpop.f32.mrb[27].mxu0 }
 0x12f   : > { %v2070_v28 = vadd.f32 %v2069_v27, %v2068_v22  ;;  %v2181_v29 = vpop.f32.mrb[27].mxu1 }
 0x130   : > { %v1946_v30 = vpack.c.bf16 %v1447_v24, %v1446_v23  ;;  %v1220_v31 = vadd.f32 %v2179_v25, %v2067_v20  ;;  %v2182_v32 = vadd.f32 %v2181_v29, %v2180_v26 }
 0x132   : > { %2002 = vst [vmem:[%s2633_s20 + $0x28] sm:$0xff] %v1946_v30   ;;  %v1416_v33 = vadd.f32 %v2625_v41, %v1220_v31  ;;  %v1223_v34 = vadd.f32 %v2182_v32, %v2070_v28 }
 0x133   : > { %v2071_v35 = vpop.f32.mrb[28].mxu0 }
 0x134   : > { %v1417_v36 = vadd.f32 %v2625_v41, %v1223_v34  ;;  %v2183_v37 = vpop.f32.mrb[28].mxu1  ;;  %v2072_v38 = vpop.f32.mrb[29].mxu0  ;;  %v1448_v43 = vmax.f32 %v1416_v33, 0.0 }
 0x135   : > { %v2073_v39 = vadd.f32 %v2072_v38, %v2071_v35  ;;  %v2184_v40 = vpop.f32.mrb[29].mxu1  ;;  %v2074_v42 = vpop.f32.mrb[30].mxu0 }
 0x136   : > { %v1449_v44 = vmax.f32 %v1417_v36, 0.0  ;;  %v2185_v45 = vadd.f32 %v2184_v40, %v2183_v37  ;;  %v2186_v46 = vpop.f32.mrb[30].mxu1  ;;  %v2075_v47 = vpop.f32.mrb[31].mxu0 }
 0x137   : > { %v2076_v48 = vadd.f32 %v2075_v47, %v2074_v42  ;;  %v2187_v49 = vpop.f32.mrb[31].mxu1 }
 0x138   : > { %v1951_v50 = vpack.c.bf16 %v1449_v44, %v1448_v43  ;;  %v1228_v51 = vadd.f32 %v2185_v45, %v2073_v39  ;;  %v2188_v52 = vadd.f32 %v2187_v49, %v2186_v46 }
 0x13a   : > { %2003 = vst [vmem:[%s2633_s20 + $0x30] sm:$0xff] %v1951_v50   ;;  %v1418_v53 = vadd.f32 %v2625_v41, %v1228_v51  ;;  %v1231_v54 = vadd.f32 %v2188_v52, %v2076_v48 }
 0x13b   : > { %v2077_v55 = vpop.f32.mrb[32].mxu0 }
 0x13c   : > { %v1419_v56 = vadd.f32 %v2625_v41, %v1231_v54  ;;  %v2189_v57 = vpop.f32.mrb[32].mxu1  ;;  %v2078_v58 = vpop.f32.mrb[33].mxu0  ;;  %v1450_v62 = vmax.f32 %v1418_v53, 0.0 }
 0x13d   : > { %v2079_v59 = vadd.f32 %v2078_v58, %v2077_v55  ;;  %v2190_v60 = vpop.f32.mrb[33].mxu1  ;;  %v2080_v61 = vpop.f32.mrb[34].mxu0 }
 0x13e   : > { %v1451_v63 = vmax.f32 %v1419_v56, 0.0  ;;  %v2191_v0 = vadd.f32 %v2190_v60, %v2189_v57  ;;  %v2192_v1 = vpop.f32.mrb[34].mxu1  ;;  %v2081_v2 = vpop.f32.mrb[35].mxu0 }
 0x13f   : > { %v2082_v3 = vadd.f32 %v2081_v2, %v2080_v61  ;;  %v2193_v4 = vpop.f32.mrb[35].mxu1 }
 0x140   : > { %v1956_v5 = vpack.c.bf16 %v1451_v63, %v1450_v62  ;;  %v1236_v6 = vadd.f32 %v2191_v0, %v2079_v59  ;;  %v2194_v7 = vadd.f32 %v2193_v4, %v2192_v1 }
 0x142   : > { %2004 = vst [vmem:[%s2633_s20 + $0x38] sm:$0xff] %v1956_v5   ;;  %v1420_v8 = vadd.f32 %v2625_v41, %v1236_v6  ;;  %v1239_v9 = vadd.f32 %v2194_v7, %v2082_v3 }
 0x143   : > { %v2083_v10 = vpop.f32.mrb[36].mxu0 }
 0x144   : > { %v1421_v11 = vadd.f32 %v2625_v41, %v1239_v9  ;;  %v2195_v12 = vpop.f32.mrb[36].mxu1  ;;  %v2084_v13 = vpop.f32.mrb[37].mxu0  ;;  %v1452_v17 = vmax.f32 %v1420_v8, 0.0 }
 0x145   : > { %v2085_v14 = vadd.f32 %v2084_v13, %v2083_v10  ;;  %v2196_v15 = vpop.f32.mrb[37].mxu1  ;;  %v2086_v16 = vpop.f32.mrb[38].mxu0 }
 0x146   : > { %v1453_v18 = vmax.f32 %v1421_v11, 0.0  ;;  %v2197_v19 = vadd.f32 %v2196_v15, %v2195_v12  ;;  %v2198_v20 = vpop.f32.mrb[38].mxu1  ;;  %v2087_v21 = vpop.f32.mrb[39].mxu0 }
 0x147   : > { %v2088_v22 = vadd.f32 %v2087_v21, %v2086_v16  ;;  %v2199_v23 = vpop.f32.mrb[39].mxu1 }
 0x148   : > { %v1961_v24 = vpack.c.bf16 %v1453_v18, %v1452_v17  ;;  %v1244_v25 = vadd.f32 %v2197_v19, %v2085_v14  ;;  %v2200_v26 = vadd.f32 %v2199_v23, %v2198_v20 }
 0x14a   : > { %2005 = vst [vmem:[%s2633_s20 + $0x40] sm:$0xff] %v1961_v24   ;;  %v1422_v27 = vadd.f32 %v2625_v41, %v1244_v25  ;;  %v1247_v28 = vadd.f32 %v2200_v26, %v2088_v22 }
 0x14b   : > { %v2089_v29 = vpop.f32.mrb[40].mxu0 }
 0x14c   : > { %v1423_v30 = vadd.f32 %v2625_v41, %v1247_v28  ;;  %v2201_v31 = vpop.f32.mrb[40].mxu1  ;;  %v2090_v32 = vpop.f32.mrb[41].mxu0  ;;  %v1454_v36 = vmax.f32 %v1422_v27, 0.0 }
 0x14d   : > { %v2091_v33 = vadd.f32 %v2090_v32, %v2089_v29  ;;  %v2202_v34 = vpop.f32.mrb[41].mxu1  ;;  %v2092_v35 = vpop.f32.mrb[42].mxu0 }
 0x14e   : > { %v1455_v37 = vmax.f32 %v1423_v30, 0.0  ;;  %v2203_v38 = vadd.f32 %v2202_v34, %v2201_v31  ;;  %v2204_v39 = vpop.f32.mrb[42].mxu1  ;;  %v2093_v40 = vpop.f32.mrb[43].mxu0 }
 0x14f   : > { %v2094_v42 = vadd.f32 %v2093_v40, %v2092_v35  ;;  %v2205_v43 = vpop.f32.mrb[43].mxu1 }
 0x150   : > { %v1966_v44 = vpack.c.bf16 %v1455_v37, %v1454_v36  ;;  %v1252_v45 = vadd.f32 %v2203_v38, %v2091_v33  ;;  %v2206_v46 = vadd.f32 %v2205_v43, %v2204_v39 }
 0x152   : > { %2006 = vst [vmem:[%s2633_s20 + $0x48] sm:$0xff] %v1966_v44   ;;  %v1424_v47 = vadd.f32 %v2625_v41, %v1252_v45  ;;  %v1255_v48 = vadd.f32 %v2206_v46, %v2094_v42 }
 0x153   : > { %v2095_v49 = vpop.f32.mrb[44].mxu0 }
 0x154   : > { %v1425_v50 = vadd.f32 %v2625_v41, %v1255_v48  ;;  %v2207_v51 = vpop.f32.mrb[44].mxu1  ;;  %v2096_v52 = vpop.f32.mrb[45].mxu0  ;;  %v1456_v56 = vmax.f32 %v1424_v47, 0.0 }
 0x155   : > { %v2097_v53 = vadd.f32 %v2096_v52, %v2095_v49  ;;  %v2208_v54 = vpop.f32.mrb[45].mxu1  ;;  %v2098_v55 = vpop.f32.mrb[46].mxu0 }
 0x156   : > { %v1457_v57 = vmax.f32 %v1425_v50, 0.0  ;;  %v2209_v58 = vadd.f32 %v2208_v54, %v2207_v51  ;;  %v2210_v59 = vpop.f32.mrb[46].mxu1  ;;  %v2099_v60 = vpop.f32.mrb[47].mxu0 }
 0x157   : > { %v2100_v61 = vadd.f32 %v2099_v60, %v2098_v55  ;;  %v2211_v62 = vpop.f32.mrb[47].mxu1 }
 0x158   : > { %v1971_v63 = vpack.c.bf16 %v1457_v57, %v1456_v56  ;;  %v1260_v0 = vadd.f32 %v2209_v58, %v2097_v53  ;;  %v2212_v1 = vadd.f32 %v2211_v62, %v2210_v59 }
 0x15a   : > { %2007 = vst [vmem:[%s2633_s20 + $0x50] sm:$0xff] %v1971_v63   ;;  %v1426_v2 = vadd.f32 %v2625_v41, %v1260_v0  ;;  %v1263_v3 = vadd.f32 %v2212_v1, %v2100_v61 }
 0x15b   : > { %v2101_v4 = vpop.f32.mrb[48].mxu0 }
 0x15c   : > { %v1427_v5 = vadd.f32 %v2625_v41, %v1263_v3  ;;  %v2213_v6 = vpop.f32.mrb[48].mxu1  ;;  %v2102_v7 = vpop.f32.mrb[49].mxu0  ;;  %v1458_v11 = vmax.f32 %v1426_v2, 0.0 }
 0x15d   : > { %v2103_v8 = vadd.f32 %v2102_v7, %v2101_v4  ;;  %v2214_v9 = vpop.f32.mrb[49].mxu1  ;;  %v2104_v10 = vpop.f32.mrb[50].mxu0 }
 0x15e   : > { %v1459_v12 = vmax.f32 %v1427_v5, 0.0  ;;  %v2215_v13 = vadd.f32 %v2214_v9, %v2213_v6  ;;  %v2216_v14 = vpop.f32.mrb[50].mxu1  ;;  %v2105_v15 = vpop.f32.mrb[51].mxu0 }
 0x15f   : > { %v2106_v16 = vadd.f32 %v2105_v15, %v2104_v10  ;;  %v2217_v17 = vpop.f32.mrb[51].mxu1 }
 0x160   : > { %v1976_v18 = vpack.c.bf16 %v1459_v12, %v1458_v11  ;;  %v1268_v19 = vadd.f32 %v2215_v13, %v2103_v8  ;;  %v2218_v20 = vadd.f32 %v2217_v17, %v2216_v14 }
 0x162   : > { %2008 = vst [vmem:[%s2633_s20 + $0x58] sm:$0xff] %v1976_v18   ;;  %v1428_v21 = vadd.f32 %v2625_v41, %v1268_v19  ;;  %v1271_v22 = vadd.f32 %v2218_v20, %v2106_v16 }
 0x163   : > { %v2107_v23 = vpop.f32.mrb[52].mxu0 }
 0x164   : > { %v1429_v24 = vadd.f32 %v2625_v41, %v1271_v22  ;;  %v2219_v25 = vpop.f32.mrb[52].mxu1  ;;  %v2108_v26 = vpop.f32.mrb[53].mxu0  ;;  %v1460_v30 = vmax.f32 %v1428_v21, 0.0 }
 0x165   : > { %v2109_v27 = vadd.f32 %v2108_v26, %v2107_v23  ;;  %v2220_v28 = vpop.f32.mrb[53].mxu1  ;;  %v2110_v29 = vpop.f32.mrb[54].mxu0 }
 0x166   : > { %v1461_v31 = vmax.f32 %v1429_v24, 0.0  ;;  %v2221_v32 = vadd.f32 %v2220_v28, %v2219_v25  ;;  %v2222_v33 = vpop.f32.mrb[54].mxu1  ;;  %v2111_v34 = vpop.f32.mrb[55].mxu0 }
 0x167   : > { %v2112_v35 = vadd.f32 %v2111_v34, %v2110_v29  ;;  %v2223_v36 = vpop.f32.mrb[55].mxu1 }
 0x168   : > { %v1981_v37 = vpack.c.bf16 %v1461_v31, %v1460_v30  ;;  %v1276_v38 = vadd.f32 %v2221_v32, %v2109_v27  ;;  %v2224_v39 = vadd.f32 %v2223_v36, %v2222_v33 }
 0x16a   : > { %2009 = vst [vmem:[%s2633_s20 + $0x60] sm:$0xff] %v1981_v37   ;;  %v1430_v40 = vadd.f32 %v2625_v41, %v1276_v38  ;;  %v1279_v42 = vadd.f32 %v2224_v39, %v2112_v35 }
 0x16b   : > { %v2113_v43 = vpop.f32.mrb[56].mxu0 }
 0x16c   : > { %v1431_v44 = vadd.f32 %v2625_v41, %v1279_v42  ;;  %v2225_v45 = vpop.f32.mrb[56].mxu1  ;;  %v2114_v46 = vpop.f32.mrb[57].mxu0  ;;  %v1462_v50 = vmax.f32 %v1430_v40, 0.0 }
 0x16d   : > { %v2115_v47 = vadd.f32 %v2114_v46, %v2113_v43  ;;  %v2226_v48 = vpop.f32.mrb[57].mxu1  ;;  %v2116_v49 = vpop.f32.mrb[58].mxu0 }
 0x16e   : > { %v1463_v51 = vmax.f32 %v1431_v44, 0.0  ;;  %v2227_v52 = vadd.f32 %v2226_v48, %v2225_v45  ;;  %v2228_v53 = vpop.f32.mrb[58].mxu1  ;;  %v2117_v54 = vpop.f32.mrb[59].mxu0 }
 0x16f   : > { %v2118_v55 = vadd.f32 %v2117_v54, %v2116_v49  ;;  %v2229_v56 = vpop.f32.mrb[59].mxu1 }
 0x170   : > { %v1986_v57 = vpack.c.bf16 %v1463_v51, %v1462_v50  ;;  %v1284_v58 = vadd.f32 %v2227_v52, %v2115_v47  ;;  %v2230_v59 = vadd.f32 %v2229_v56, %v2228_v53 }
 0x172   : > { %2010 = vst [vmem:[%s2633_s20 + $0x68] sm:$0xff] %v1986_v57   ;;  %v1432_v60 = vadd.f32 %v2625_v41, %v1284_v58  ;;  %v1287_v61 = vadd.f32 %v2230_v59, %v2118_v55 }
 0x173   : > { %v2119_v62 = vpop.f32.mrb[60].mxu0 }
 0x174   : > { %v1433_v63 = vadd.f32 %v2625_v41, %v1287_v61  ;;  %v2231_v0 = vpop.f32.mrb[60].mxu1  ;;  %v2120_v1 = vpop.f32.mrb[61].mxu0  ;;  %v1464_v5 = vmax.f32 %v1432_v60, 0.0 }
 0x175   : > { %v2121_v2 = vadd.f32 %v2120_v1, %v2119_v62  ;;  %v2232_v3 = vpop.f32.mrb[61].mxu1  ;;  %v2122_v4 = vpop.f32.mrb[62].mxu0 }
 0x176   : > { %v1465_v6 = vmax.f32 %v1433_v63, 0.0  ;;  %v2233_v7 = vadd.f32 %v2232_v3, %v2231_v0  ;;  %v2234_v8 = vpop.f32.mrb[62].mxu1  ;;  %v2123_v9 = vpop.f32.mrb[63].mxu0 }
 0x177   : > { %v2124_v10 = vadd.f32 %v2123_v9, %v2122_v4  ;;  %v2235_v11 = vpop.f32.mrb[63].mxu1 }
 0x178   : > { %v1991_v12 = vpack.c.bf16 %v1465_v6, %v1464_v5  ;;  %v1292_v13 = vadd.f32 %v2233_v7, %v2121_v2  ;;  %v2236_v14 = vadd.f32 %v2235_v11, %v2234_v8 }
 0x17a   : > { %2011 = vst [vmem:[%s2633_s20 + $0x70] sm:$0xff] %v1991_v12   ;;  %v1434_v15 = vadd.f32 %v2625_v41, %v1292_v13  ;;  %v1295_v16 = vadd.f32 %v2236_v14, %v2124_v10 }
 0x17c   : > { %v1435_v17 = vadd.f32 %v2625_v41, %v1295_v16  ;;  %v1466_v18 = vmax.f32 %v1434_v15, 0.0 }
 0x17e   : > { %v1467_v19 = vmax.f32 %v1435_v17, 0.0 }
 0x180   : > { %v1996_v20 = vpack.c.bf16 %v1467_v19, %v1466_v18 }
 0x182   : > { %2012 = vst [vmem:[%s2633_s20 + $0x78] sm:$0xff] %v1996_v20  }
 0x183 PF: > { %s13_s14 = sadd.s32 1, %s2411_s14   ;;  %s2694_s12 = smov %s2407_s13 }
 0x184   : > { %p10_p5 = scmp.ge.s32.totalorder %s13_s14, 4   ;;  %s2695_s13 = smov %s2697_s15 }
 0x186   :  { %12 = sbr.rel (!%p10_p5) target bundleno = 2 (0x2), region = 76 }

// kernel: alexnet_forward.14
= control target key start
LH: loop header
LB: loop body
LE: loop exit
PB: predicated region body
PF: predicated region fallthrough
CT: control target
= control target key end

     0   :  { %s1552_s12 = smov 0   ;;  %s1554_s13 = smov 0   ;;  %s1776_s0 = inlined_call_operand.vmem [shape: bf16[128,1792], index: 0, kind: input, shape index: {}]   ;;  %s1777_s1 = inlined_call_operand.vmem [shape: bf16[1792,256], index: 1, kind: input, shape index: {}]   ;;  %s1778_s2 = inlined_call_operand.vmem [shape: f32[1,256], index: 2, kind: input, shape index: {}]   ;;  %s1779_s3 = inlined_call_operand.vmem [shape: bf16[128,256], index: 3, kind: output, shape index: {}]  }
   0x1   :  { %s1556_s14 = smov 0   ;;  %s1558_s15 = smov 0  }
   0x2   :  { %s1560_s16 = smov 0  }
   0x3 LB: > { %s25_s17 = sadd.s32 1, %s1525_s15  ;;  %p48_p1 = scmp.ne.s32.totalorder %s1517_s13, %s1513_s12  ;;  %s1529_s16 = sphi %s1560_s16, %s13_s16   ;;  %s1525_s15 = sphi %s1558_s15, %s1783_s15   ;;  %s1521_s14 = sphi %s1556_s14, %s1782_s14   ;;  %s1517_s13 = sphi %s1554_s13, %s1781_s13   ;;  %s1513_s12 = sphi %s1552_s12, %s1780_s12  }
   0x4   : > { %p26_p0 = scmp.ge.s32.totalorder %s25_s17, 7  ;;  %p49_p2 = scmp.eq.s32.totalorder %s1529_s16, 0 }
   0x5   : > { %s41_s19 = sadd.s32 1, %s1517_s13  ;;  %p1249_p5 = scmp.ge.s32.totalorder %s1529_s16, 7 }
   0x6   : > { %s1785_s17 = smov (%p26_p0, %s25_s17), 0  ;;  %p50_p3 = por %p49_p2, %p48_p1 }
   0x7   : > { %s37_s18 = ssub.s32 %s1525_s15, %s1785_s17  ;;  %164 = sbr.rel (%p1249_p5) target bundleno = 26 (0x1a), region = 20 }
   0x8   : > { %p39_p4 = scmp.eq.s32.totalorder %s37_s18, 0 }
   0xa   : > { %s1587_s20 = scalar_select %p39_p4, %s1517_s13, %s41_s19  }
   0xe   : > { %167 = sbr.rel (!%p50_p3) target bundleno = 26 (0x1a), region = 24  ;;  %s169_s21 = sand.u32 (%p50_p3), 1, %s1517_s13  }
   0xf   : > { %s1328_s22 = sshll.u32 (%p50_p3), %s1525_s15, 3  ;;  %s1250_s23 = sshll.u32 (%p50_p3), %s169_s21, 7 }
  0x10   : > { %s1595_s26 = scalar_lea.vmem (%p50_p3), %s1776_s0, %s1328_s22  ;;  %s171_s27 = scalar_lea.vmem (%p50_p3), [#allocation3], %s1250_s23 }
  0x11   : > { %v235_v0 = vld [vmem:[%s1595_s26] sm:$0xff] (%p50_p3)  ;;  %v237_v1 = vld [vmem:[%s1595_s26 + $0x38] sm:$0xff] (%p50_p3)  ;;  %v239_v2 = vld [vmem:[%s1595_s26 + $0x70] sm:$0xff] (%p50_p3) }
  0x12   : > { %236 = vst [vmem:[%s171_s27] sm:$0xff] (%p50_p3), %v235_v0  ;;  %238 = vst [vmem:[%s171_s27 + $0x8] sm:$0xff] (%p50_p3), %v237_v1  ;;  %v241_v3 = vld [vmem:[%s1595_s26 + $0xa8] sm:$0xff] (%p50_p3)  ;;  %v243_v4 = vld [vmem:[%s1595_s26 + $0xe0] sm:$0xff] (%p50_p3) }
  0x13   : > { %240 = vst [vmem:[%s171_s27 + $0x10] sm:$0xff] (%p50_p3), %v239_v2  ;;  %v245_v5 = vld [vmem:[%s1595_s26 + $0x118] sm:$0xff] (%p50_p3)  ;;  %242 = vst [vmem:[%s171_s27 + $0x18] sm:$0xff] (%p50_p3), %v241_v3  ;;  %v247_v6 = vld [vmem:[%s1595_s26 + $0x150] sm:$0xff] (%p50_p3) }
  0x14   : > { %244 = vst [vmem:[%s171_s27 + $0x20] sm:$0xff] (%p50_p3), %v243_v4  ;;  %246 = vst [vmem:[%s171_s27 + $0x28] sm:$0xff] (%p50_p3), %v245_v5  ;;  %v249_v7 = vld [vmem:[%s1595_s26 + $0x188] sm:$0xff] (%p50_p3)  ;;  %v251_v8 = vld [vmem:[%s1595_s26 + $0x1c0] sm:$0xff] (%p50_p3) }
  0x15   : > { %248 = vst [vmem:[%s171_s27 + $0x30] sm:$0xff] %v247_v6  ;;  %250 = vst [vmem:[%s171_s27 + $0x38] sm:$0xff] %v249_v7  ;;  %v253_v9 = vld [vmem:[%s1595_s26 + $0x1f8] sm:$0xff]  ;;  %v255_v10 = vld [vmem:[%s1595_s26 + $0x230] sm:$0xff] }
  0x16   : > { %252 = vst [vmem:[%s171_s27 + $0x40] sm:$0xff] %v251_v8  ;;  %v257_v11 = vld [vmem:[%s1595_s26 + $0x268] sm:$0xff]  ;;  %254 = vst [vmem:[%s171_s27 + $0x48] sm:$0xff] %v253_v9  ;;  %v259_v12 = vld [vmem:[%s1595_s26 + $0x2a0] sm:$0xff] }
  0x17   : > { %256 = vst [vmem:[%s171_s27 + $0x50] sm:$0xff] %v255_v10  ;;  %258 = vst [vmem:[%s171_s27 + $0x58] sm:$0xff] %v257_v11  ;;  %v261_v13 = vld [vmem:[%s1595_s26 + $0x2d8] sm:$0xff]  ;;  %v263_v14 = vld [vmem:[%s1595_s26 + $0x310] sm:$0xff] }
  0x18   : > { %260 = vst [vmem:[%s171_s27 + $0x60] sm:$0xff] %v259_v12  ;;  %262 = vst [vmem:[%s171_s27 + $0x68] sm:$0xff] %v261_v13  ;;  %v265_v15 = vld [vmem:[%s1595_s26 + $0x348] sm:$0xff] }
  0x19   : > { %264 = vst [vmem:[%s171_s27 + $0x70] sm:$0xff] %v263_v14  ;;  %266 = vst [vmem:[%s171_s27 + $0x78] sm:$0xff] %v265_v15 }
  0x1a PF: > { %p1253_p6 = scmp.ge.s32.totalorder %s1529_s16, 1  ;;  %p286_p7 = scmp.lt.s32.totalorder %s1529_s16, 8 }
  0x1c   : > { %p287_p8 = pnand %p1253_p6, %p286_p7 }
  0x1d   : > { %s293_s28 = sand.u32 (!%p287_p8), 1, %s1513_s12   ;;  %s1255_s29 = sshll.u32 (!%p287_p8), %s1521_s14, 5 }
  0x1e   : > { %290 = sbr.rel (%p287_p8) target bundleno = 378 (0x17a), region = 66  ;;  %s1254_s30 = sshll.u32 (!%p287_p8), %s293_s28, 7 }
  0x1f   : > { %p339_p9 = scmp.lt.s32.totalorder (!%p287_p8), %s1255_s29, 223  ;;  %s1622_s8 = scalar_lea.vmem (!%p287_p8), [#allocation3], %s1254_s30 }
  0x20   : > { %p1258_p10 = scmp.ne.s32.totalorder (!%p287_p8), %s1521_s14, 0 }
  0x25   : > { %s1787_s29 = smov (!%p339_p9, %s1255_s29), 223  ;;  %369 = sbr.rel (%p1258_p10) target bundleno = 55 (0x37), region = 74 }
  0x26   : > { %s1329_s4 = sshll.u32 %s1787_s29, 3  ;;  %v1531_v16 = vmov (!%p1258_p10), 0.0  }
  0x27   : > { %s1620_s7 = scalar_lea.vmem %s1777_s1, %s1329_s4  ;;  %370 = vst [vmem:[#allocation2] sm:$0xff] (!%p1258_p10), %v1531_v16  ;;  %371 = vst [vmem:[#allocation2 + $0x8] sm:$0xff] (!%p1258_p10), %v1531_v16 }
  0x28   : > { %372 = vst [vmem:[#allocation2 + $0x10] sm:$0xff] (!%p1258_p10), %v1531_v16  ;;  %373 = vst [vmem:[#allocation2 + $0x18] sm:$0xff] (!%p1258_p10), %v1531_v16 }
  0x29   : > { %374 = vst [vmem:[#allocation2 + $0x20] sm:$0xff] (!%p1258_p10), %v1531_v16  ;;  %375 = vst [vmem:[#allocation2 + $0x28] sm:$0xff] (!%p1258_p10), %v1531_v16 }
  0x2a   : > { %376 = vst [vmem:[#allocation2 + $0x30] sm:$0xff] (!%p1258_p10), %v1531_v16  ;;  %377 = vst [vmem:[#allocation2 + $0x38] sm:$0xff] (!%p1258_p10), %v1531_v16 }
  0x2b   : > { %378 = vst [vmem:[#allocation2 + $0x40] sm:$0xff] (!%p1258_p10), %v1531_v16  ;;  %379 = vst [vmem:[#allocation2 + $0x48] sm:$0xff] (!%p1258_p10), %v1531_v16 }
  0x2c   : > { %380 = vst [vmem:[#allocation2 + $0x50] sm:$0xff] %v1531_v16  ;;  %381 = vst [vmem:[#allocation2 + $0x58] sm:$0xff] %v1531_v16 }
  0x2d   : > { %382 = vst [vmem:[#allocation2 + $0x60] sm:$0xff] %v1531_v16  ;;  %383 = vst [vmem:[#allocation2 + $0x68] sm:$0xff] %v1531_v16 }
  0x2e   : > { %384 = vst [vmem:[#allocation2 + $0x70] sm:$0xff] %v1531_v16  ;;  %385 = vst [vmem:[#allocation2 + $0x78] sm:$0xff] %v1531_v16 }
  0x2f   : > { %386 = vst [vmem:[#allocation2 + $0x80] sm:$0xff] %v1531_v16  ;;  %387 = vst [vmem:[#allocation2 + $0x88] sm:$0xff] %v1531_v16 }
  0x30   : > { %388 = vst [vmem:[#allocation2 + $0x90] sm:$0xff] %v1531_v16  ;;  %389 = vst [vmem:[#allocation2 + $0x98] sm:$0xff] %v1531_v16 }
  0x31   : > { %390 = vst [vmem:[#allocation2 + $0xa0] sm:$0xff] %v1531_v16  ;;  %391 = vst [vmem:[#allocation2 + $0xa8] sm:$0xff] %v1531_v16 }
  0x32   : > { %392 = vst [vmem:[#allocation2 + $0xb0] sm:$0xff] %v1531_v16  ;;  %393 = vst [vmem:[#allocation2 + $0xb8] sm:$0xff] %v1531_v16 }
  0x33   : > { %394 = vst [vmem:[#allocation2 + $0xc0] sm:$0xff] %v1531_v16  ;;  %395 = vst [vmem:[#allocation2 + $0xc8] sm:$0xff] %v1531_v16 }
  0x34   : > { %396 = vst [vmem:[#allocation2 + $0xd0] sm:$0xff] %v1531_v16  ;;  %397 = vst [vmem:[#allocation2 + $0xd8] sm:$0xff] %v1531_v16 }
  0x35   : > { %398 = vst [vmem:[#allocation2 + $0xe0] sm:$0xff] %v1531_v16  ;;  %399 = vst [vmem:[#allocation2 + $0xe8] sm:$0xff] %v1531_v16 }
  0x36   : > { %400 = vst [vmem:[#allocation2 + $0xf0] sm:$0xff] %v1531_v16  ;;  %401 = vst [vmem:[#allocation2 + $0xf8] sm:$0xff] %v1531_v16 }
  0x37 PF: > { %v1419_v17 = vld [vmem:[%s1620_s7 + $0x4] ss:$8 sps:$4 sm:$0xff]   ;;  %v1421_v18 = vld [vmem:[%s1620_s7] ss:$8 sps:$4 sm:$0xff]   ;;  %v1422_v19 = vld [vmem:[%s1620_s7 + $0x14] ss:$8 sps:$4 sm:$0xff]  }
  0x38   : > { %722 = vmatprep.subr.bf16.mxu0 %v1419_v17  ;;  %1346 = vmatprep.subr.bf16.mxu1 %v1419_v17  ;;  %v1424_v20 = vld [vmem:[%s1620_s7 + $0x10] ss:$8 sps:$4 sm:$0xff]   ;;  %v1425_v21 = vld [vmem:[%s1620_s7 + $0x24] ss:$8 sps:$4 sm:$0xff]   ;;  %v1427_v22 = vld [vmem:[%s1620_s7 + $0x20] ss:$8 sps:$4 sm:$0xff]  }
  0x39   : > { %723 = vmatpush1.bf16.msra.mxu0 %v1421_v18  ;;  %1362 = vmatpush1.bf16.msra.mxu1 %v1421_v18  ;;  %v1428_v23 = vld [vmem:[%s1620_s7 + $0x34] ss:$8 sps:$4 sm:$0xff]   ;;  %v1430_v24 = vld [vmem:[%s1620_s7 + $0x30] ss:$8 sps:$4 sm:$0xff]   ;;  %v1431_v25 = vld [vmem:[%s1620_s7 + $0x44] ss:$8 sps:$4 sm:$0xff]  }
  0x3a   : > { %724 = vmatprep.subr.bf16.mxu0 %v1422_v19  ;;  %1347 = vmatprep.subr.bf16.mxu1 %v1422_v19  ;;  %v1433_v26 = vld [vmem:[%s1620_s7 + $0x40] ss:$8 sps:$4 sm:$0xff]   ;;  %v1434_v27 = vld [vmem:[%s1620_s7 + $0x54] ss:$8 sps:$4 sm:$0xff]   ;;  %v1436_v28 = vld [vmem:[%s1620_s7 + $0x50] ss:$8 sps:$4 sm:$0xff]  }
  0x3b   : > { %v1437_v29 = vld [vmem:[%s1620_s7 + $0x64] ss:$8 sps:$4 sm:$0xff]   ;;  %v1439_v31 = vld [vmem:[%s1620_s7 + $0x60] ss:$8 sps:$4 sm:$0xff]   ;;  %v1440_v33 = vld [vmem:[%s1620_s7 + $0x74] ss:$8 sps:$4 sm:$0xff]  }
  0x3c   : > { %v1469_v30 = vld [vmem:[%s1622_s8 + $0x4] ss:$8 sps:$4 sm:$0xff]   ;;  %v1442_v34 = vld [vmem:[%s1620_s7 + $0x70] ss:$8 sps:$4 sm:$0xff]   ;;  %v1445_v36 = vld [vmem:[%s1620_s7 + $0x80] ss:$8 sps:$4 sm:$0xff]  }
  0x3d   : > { %725 = vmatpush1.bf16.msra.mxu0 %v1424_v20  ;;  %1363 = vmatpush1.bf16.msra.mxu1 %v1424_v20  ;;  %v1472_v32 = vld [vmem:[%s1622_s8 + $0x44] ss:$8 sps:$4 sm:$0xff]   ;;  %v1446_v37 = vld [vmem:[%s1620_s7 + $0x94] ss:$8 sps:$4 sm:$0xff]   ;;  %v1448_v38 = vld [vmem:[%s1620_s7 + $0x90] ss:$8 sps:$4 sm:$0xff]  }
  0x3e   : > { %726 = vmatprep.subr.bf16.mxu0 %v1425_v21  ;;  %1348 = vmatprep.subr.bf16.mxu1 %v1425_v21  ;;  %v1443_v35 = vld [vmem:[%s1620_s7 + $0x84] ss:$8 sps:$4 sm:$0xff]   ;;  %v1451_v40 = vld [vmem:[%s1620_s7 + $0xa0] ss:$8 sps:$4 sm:$0xff]   ;;  %v1452_v41 = vld [vmem:[%s1620_s7 + $0xb4] ss:$8 sps:$4 sm:$0xff]  }
  0x3f   : > { %754 = vmatprep.mubr.bf16.mxu0 %v1469_v30  ;;  %794 = vmatprep.mubr.bf16.mxu1 %v1472_v32  ;;  %v1449_v39 = vld [vmem:[%s1620_s7 + $0xa4] ss:$8 sps:$4 sm:$0xff]   ;;  %v1454_v42 = vld [vmem:[%s1620_s7 + $0xb0] ss:$8 sps:$4 sm:$0xff]   ;;  %v1457_v44 = vld [vmem:[%s1620_s7 + $0xc0] ss:$8 sps:$4 sm:$0xff]  }
  0x40   : > { %v1455_v43 = vld [vmem:[%s1620_s7 + $0xc4] ss:$8 sps:$4 sm:$0xff]   ;;  %v1458_v45 = vld [vmem:[%s1620_s7 + $0xd4] ss:$8 sps:$4 sm:$0xff]   ;;  %v1460_v46 = vld [vmem:[%s1620_s7 + $0xd0] ss:$8 sps:$4 sm:$0xff]  }
  0x41   : > { %727 = vmatpush1.bf16.msra.mxu0 %v1427_v22  ;;  %1364 = vmatpush1.bf16.msra.mxu1 %v1427_v22  ;;  %v1461_v47 = vld [vmem:[%s1620_s7 + $0xe4] ss:$8 sps:$4 sm:$0xff]   ;;  %v1463_v48 = vld [vmem:[%s1620_s7 + $0xe0] ss:$8 sps:$4 sm:$0xff]   ;;  %v1464_v49 = vld [vmem:[%s1620_s7 + $0xf4] ss:$8 sps:$4 sm:$0xff]  }
  0x42   : > { %728 = vmatprep.subr.bf16.mxu0 %v1428_v23  ;;  %1349 = vmatprep.subr.bf16.mxu1 %v1428_v23  ;;  %v1466_v50 = vld [vmem:[%s1620_s7 + $0xf0] ss:$8 sps:$4 sm:$0xff]   ;;  %v1467_v51 = vld [vmem:[%s1622_s8] ss:$8 sps:$4 sm:$0xff]   ;;  %v1473_v53 = vld [vmem:[%s1622_s8 + $0x14] ss:$8 sps:$4 sm:$0xff]  }
  0x43   : > { %v1470_v52 = vld [vmem:[%s1622_s8 + $0x40] ss:$8 sps:$4 sm:$0xff]   ;;  %v1475_v54 = vld [vmem:[%s1622_s8 + $0x54] ss:$8 sps:$4 sm:$0xff]   ;;  %v1477_v55 = vld [vmem:[%s1622_s8 + $0x10] ss:$8 sps:$4 sm:$0xff]  }
  0x44   : > { %v1478_v56 = vld [vmem:[%s1622_s8 + $0x50] ss:$8 sps:$4 sm:$0xff]   ;;  %v1479_v57 = vld [vmem:[%s1622_s8 + $0x24] ss:$8 sps:$4 sm:$0xff]   ;;  %v1483_v59 = vld [vmem:[%s1622_s8 + $0x20] ss:$8 sps:$4 sm:$0xff]  }
  0x45   : > { %729 = vmatpush1.bf16.msra.mxu0 %v1430_v24  ;;  %1365 = vmatpush1.bf16.msra.mxu1 %v1430_v24  ;;  %v1481_v58 = vld [vmem:[%s1622_s8 + $0x64] ss:$8 sps:$4 sm:$0xff]   ;;  %v1484_v60 = vld [vmem:[%s1622_s8 + $0x60] ss:$8 sps:$4 sm:$0xff]   ;;  %v1485_v61 = vld [vmem:[%s1622_s8 + $0x34] ss:$8 sps:$4 sm:$0xff]  }
  0x46   : > { %730 = vmatprep.subr.bf16.mxu0 %v1431_v25  ;;  %1350 = vmatprep.subr.bf16.mxu1 %v1431_v25  ;;  %v1487_v62 = vld [vmem:[%s1622_s8 + $0x74] ss:$8 sps:$4 sm:$0xff]   ;;  %v1489_v63 = vld [vmem:[%s1622_s8 + $0x30] ss:$8 sps:$4 sm:$0xff]   ;;  %v402_v1 = vld [vmem:[#allocation2] sm:$0xff]  ;;  %p1307_p11 = scmp.ne.s32.totalorder %s1521_s14, 6 }
  0x47   : > { %v1490_v0 = vld [vmem:[%s1622_s8 + $0x70] ss:$8 sps:$4 sm:$0xff]   ;;  %v418_v2 = vld [vmem:[#allocation2 + $0x80] sm:$0xff]  ;;  %v403_v3 = vld [vmem:[#allocation2 + $0x8] sm:$0xff] }
  0x48   : > { %v419_v4 = vld [vmem:[#allocation2 + $0x88] sm:$0xff]  ;;  %v404_v7 = vld [vmem:[#allocation2 + $0x10] sm:$0xff]  ;;  %v405_v13 = vld [vmem:[#allocation2 + $0x18] sm:$0xff] }
  0x49   : > { %731 = vmatpush1.bf16.msra.mxu0 %v1433_v26  ;;  %1366 = vmatpush1.bf16.msra.mxu1 %v1433_v26  ;;  %v420_v8 = vld [vmem:[#allocation2 + $0x90] sm:$0xff]  ;;  %v421_v14 = vld [vmem:[#allocation2 + $0x98] sm:$0xff]  ;;  %v406_v25 = vld [vmem:[#allocation2 + $0x20] sm:$0xff] }
  0x4a   : > { %732 = vmatprep.subr.bf16.mxu0 %v1434_v27  ;;  %1351 = vmatprep.subr.bf16.mxu1 %v1434_v27  ;;  %v422_v26 = vld [vmem:[#allocation2 + $0xa0] sm:$0xff]  ;;  %v407_v27 = vld [vmem:[#allocation2 + $0x28] sm:$0xff]  ;;  %v424_v32 = vld [vmem:[#allocation2 + $0xb0] sm:$0xff] }
  0x4d   : > { %733 = vmatpush1.bf16.msra.mxu0 %v1436_v28  ;;  %1367 = vmatpush1.bf16.msra.mxu1 %v1436_v28  ;;  %v423_v28 = vld [vmem:[#allocation2 + $0xa8] sm:$0xff] }
  0x4e   : > { %734 = vmatprep.subr.bf16.mxu0 %v1437_v29  ;;  %1352 = vmatprep.subr.bf16.mxu1 %v1437_v29 }
  0x51   : > { %735 = vmatpush1.bf16.msra.mxu0 %v1439_v31  ;;  %1368 = vmatpush1.bf16.msra.mxu1 %v1439_v31  ;;  %v408_v31 = vld [vmem:[#allocation2 + $0x30] sm:$0xff] }
  0x52   : > { %736 = vmatprep.subr.bf16.mxu0 %v1440_v33  ;;  %1353 = vmatprep.subr.bf16.mxu1 %v1440_v33 }
  0x55   : > { %737 = vmatpush1.bf16.msra.mxu0 %v1442_v34  ;;  %1369 = vmatpush1.bf16.msra.mxu1 %v1442_v34 }
  0x56   : > { %738 = vmatprep.subr.bf16.mxu0 %v1443_v35  ;;  %1354 = vmatprep.subr.bf16.mxu1 %v1443_v35 }
  0x59   : > { %739 = vmatpush1.bf16.msra.mxu0 %v1445_v36  ;;  %1370 = vmatpush1.bf16.msra.mxu1 %v1445_v36 }
  0x5a   : > { %740 = vmatprep.subr.bf16.mxu0 %v1446_v37  ;;  %1355 = vmatprep.subr.bf16.mxu1 %v1446_v37  ;;  %v409_v37 = vld [vmem:[#allocation2 + $0x38] sm:$0xff] }
  0x5d   : > { %741 = vmatpush1.bf16.msra.mxu0 %v1448_v38  ;;  %1371 = vmatpush1.bf16.msra.mxu1 %v1448_v38  ;;  %v425_v38 = vld [vmem:[#allocation2 + $0xb8] sm:$0xff] }
  0x5e   : > { %742 = vmatprep.subr.bf16.mxu0 %v1449_v39  ;;  %1356 = vmatprep.subr.bf16.mxu1 %v1449_v39 }
  0x61   : > { %743 = vmatpush1.bf16.msra.mxu0 %v1451_v40  ;;  %1372 = vmatpush1.bf16.msra.mxu1 %v1451_v40 }
  0x62   : > { %744 = vmatprep.subr.bf16.mxu0 %v1452_v41  ;;  %1357 = vmatprep.subr.bf16.mxu1 %v1452_v41 }
  0x65   : > { %745 = vmatpush1.bf16.msra.mxu0 %v1454_v42  ;;  %1373 = vmatpush1.bf16.msra.mxu1 %v1454_v42 }
  0x66   : > { %746 = vmatprep.subr.bf16.mxu0 %v1455_v43  ;;  %1358 = vmatprep.subr.bf16.mxu1 %v1455_v43 }
  0x69   : > { %747 = vmatpush1.bf16.msra.mxu0 %v1457_v44  ;;  %1374 = vmatpush1.bf16.msra.mxu1 %v1457_v44 }
  0x6a   : > { %748 = vmatprep.subr.bf16.mxu0 %v1458_v45  ;;  %1359 = vmatprep.subr.bf16.mxu1 %v1458_v45 }
  0x6d   : > { %749 = vmatpush1.bf16.msra.mxu0 %v1460_v46  ;;  %1375 = vmatpush1.bf16.msra.mxu1 %v1460_v46 }
  0x6e   : > { %750 = vmatprep.subr.bf16.mxu0 %v1461_v47  ;;  %1360 = vmatprep.subr.bf16.mxu1 %v1461_v47 }
  0x71   : > { %751 = vmatpush1.bf16.msra.mxu0 %v1463_v48  ;;  %1376 = vmatpush1.bf16.msra.mxu1 %v1463_v48 }
  0x72   : > { %752 = vmatprep.subr.bf16.mxu0 %v1464_v49  ;;  %1361 = vmatprep.subr.bf16.mxu1 %v1464_v49  ;;  %v410_v49 = vld [vmem:[#allocation2 + $0x40] sm:$0xff] }
  0x75   : > { %753 = vmatpush1.bf16.msra.mxu0 %v1466_v50  ;;  %1377 = vmatpush1.bf16.msra.mxu1 %v1466_v50  ;;  %v426_v50 = vld [vmem:[#allocation2 + $0xc0] sm:$0xff] }
  0x78   : > { %755 = vmatmul.mubr.bf16.vlgmr.msra.gmra.mrb[0].mxu0 %v1467_v51  ;;  %795 = vmatmul.mubr.bf16.vlgmr.msra.gmra.mrb[0].mxu1 %v1470_v52  ;;  %v411_v51 = vld [vmem:[#allocation2 + $0x48] sm:$0xff] }
  0x79   : > { %764 = vmatprep.mubr.bf16.mxu0 %v1473_v53  ;;  %804 = vmatprep.mubr.bf16.mxu1 %v1475_v54  ;;  %v427_v52 = vld [vmem:[#allocation2 + $0xc8] sm:$0xff] }
  0x80   : > { %765 = vmatmul.mubr.bf16.gmra.mrb[4].mxu0 %v1477_v55  ;;  %805 = vmatmul.mubr.bf16.gmra.mrb[4].mxu1 %v1478_v56  ;;  %v412_v55 = vld [vmem:[#allocation2 + $0x50] sm:$0xff] }
  0x81   : > { %774 = vmatprep.mubr.bf16.mxu0 %v1479_v57  ;;  %814 = vmatprep.mubr.bf16.mxu1 %v1481_v58  ;;  %v428_v56 = vld [vmem:[#allocation2 + $0xd0] sm:$0xff] }
  0x88   : > { %775 = vmatmul.mubr.bf16.gmra.mrb[8].mxu0 %v1483_v59  ;;  %815 = vmatmul.mubr.bf16.gmra.mrb[8].mxu1 %v1484_v60 }
  0x89   : > { %784 = vmatprep.mubr.bf16.mxu0 %v1485_v61  ;;  %824 = vmatprep.mubr.bf16.mxu1 %v1487_v62  ;;  %v413_v61 = vld [vmem:[#allocation2 + $0x58] sm:$0xff] }
  0x8a   : > { %v429_v62 = vld [vmem:[#allocation2 + $0xd8] sm:$0xff] }
  0x90   : > { %785 = vmatmul.mubr.bf16.gmra.mrb[12].mxu0 %v1489_v63  ;;  %825 = vmatmul.mubr.bf16.gmra.mrb[12].mxu1 %v1490_v0 }
 0x14b   : > { %v756_v5 = vpop.f32.mrb[0].mxu0  ;;  %v796_v6 = vpop.f32.mrb[0].mxu1 }
 0x14c   : > { %v835_v9 = vadd.f32 %v756_v5, %v402_v1  ;;  %v851_v10 = vadd.f32 %v796_v6, %v418_v2  ;;  %v758_v11 = vpop.f32.mrb[1].mxu0  ;;  %v798_v12 = vpop.f32.mrb[1].mxu1 }
 0x14d   : > { %v836_v15 = vadd.f32 %v758_v11, %v403_v3  ;;  %v852_v16 = vadd.f32 %v798_v12, %v419_v4  ;;  %v760_v17 = vpop.f32.mrb[2].mxu0  ;;  %v800_v18 = vpop.f32.mrb[2].mxu1  ;;  %v415_v11 = vld [vmem:[#allocation2 + $0x68] sm:$0xff] }
 0x14e   : > { %867 = vst [vmem:[#allocation2] sm:$0xff] %v835_v9  ;;  %883 = vst [vmem:[#allocation2 + $0x80] sm:$0xff] %v851_v10  ;;  %v837_v19 = vadd.f32 %v760_v17, %v404_v7  ;;  %v853_v20 = vadd.f32 %v800_v18, %v420_v8  ;;  %v762_v21 = vpop.f32.mrb[3].mxu0  ;;  %v802_v22 = vpop.f32.mrb[3].mxu1  ;;  %v414_v9 = vld [vmem:[#allocation2 + $0x60] sm:$0xff]  ;;  %v431_v12 = vld [vmem:[#allocation2 + $0xe8] sm:$0xff] }
 0x14f   : > { %868 = vst [vmem:[#allocation2 + $0x8] sm:$0xff] %v836_v15  ;;  %884 = vst [vmem:[#allocation2 + $0x88] sm:$0xff] %v852_v16  ;;  %v838_v23 = vadd.f32 %v762_v21, %v405_v13  ;;  %v854_v24 = vadd.f32 %v802_v22, %v421_v14  ;;  %v430_v10 = vld [vmem:[#allocation2 + $0xe0] sm:$0xff]  ;;  %v416_v15 = vld [vmem:[#allocation2 + $0x70] sm:$0xff] }
 0x150   : > { %869 = vst [vmem:[#allocation2 + $0x10] sm:$0xff] %v837_v19  ;;  %885 = vst [vmem:[#allocation2 + $0x90] sm:$0xff] %v853_v20  ;;  %v432_v16 = vld [vmem:[#allocation2 + $0xf0] sm:$0xff]  ;;  %v417_v21 = vld [vmem:[#allocation2 + $0x78] sm:$0xff] }
 0x151   : > { %870 = vst [vmem:[#allocation2 + $0x18] sm:$0xff] %v838_v23  ;;  %886 = vst [vmem:[#allocation2 + $0x98] sm:$0xff] %v854_v24  ;;  %v433_v22 = vld [vmem:[#allocation2 + $0xf8] sm:$0xff] }
 0x153   : > { %v766_v29 = vpop.f32.mrb[4].mxu0  ;;  %v806_v30 = vpop.f32.mrb[4].mxu1 }
 0x154   : > { %v839_v33 = vadd.f32 %v766_v29, %v406_v25  ;;  %v855_v34 = vadd.f32 %v806_v30, %v422_v26  ;;  %v768_v35 = vpop.f32.mrb[5].mxu0  ;;  %v808_v36 = vpop.f32.mrb[5].mxu1 }
 0x155   : > { %v840_v39 = vadd.f32 %v768_v35, %v407_v27  ;;  %v856_v40 = vadd.f32 %v808_v36, %v423_v28  ;;  %v770_v41 = vpop.f32.mrb[6].mxu0  ;;  %v810_v42 = vpop.f32.mrb[6].mxu1  ;;  %v935_v35 = vld [vmem:[%s1778_s2] sm:$0x3] (!%p1307_p11) }
 0x156   : > { %871 = vst [vmem:[#allocation2 + $0x20] sm:$0xff] %v839_v33  ;;  %887 = vst [vmem:[#allocation2 + $0xa0] sm:$0xff] %v855_v34  ;;  %v841_v43 = vadd.f32 %v770_v41, %v408_v31  ;;  %v857_v44 = vadd.f32 %v810_v42, %v424_v32  ;;  %v772_v45 = vpop.f32.mrb[7].mxu0  ;;  %v812_v46 = vpop.f32.mrb[7].mxu1  ;;  %v937_v33 = vlaneseq (!%p1307_p11)  ;;  %v903_v36 = vld [vmem:[#allocation2] sm:$0xff] (!%p1307_p11) }
 0x157   : > { %872 = vst [vmem:[#allocation2 + $0x28] sm:$0xff] %v840_v39  ;;  %888 = vst [vmem:[#allocation2 + $0xa8] sm:$0xff] %v856_v40  ;;  %v842_v47 = vadd.f32 %v772_v45, %v409_v37  ;;  %v858_v48 = vadd.f32 %v812_v46, %v425_v38  ;;  %v904_v37 = vld [vmem:[#allocation2 + $0x8] sm:$0xff] (!%p1307_p11)  ;;  %v905_v40 = vld [vmem:[#allocation2 + $0x10] sm:$0xff] (!%p1307_p11) }
 0x158   : > { %873 = vst [vmem:[#allocation2 + $0x30] sm:$0xff] %v841_v43  ;;  %889 = vst [vmem:[#allocation2 + $0xb0] sm:$0xff] %v857_v44  ;;  %v938_v34 = vshrl.u32 (!%p1307_p11), %v937_v33, 7  ;;  %v906_v41 = vld [vmem:[#allocation2 + $0x18] sm:$0xff] (!%p1307_p11) }
 0x159   : > { %874 = vst [vmem:[#allocation2 + $0x38] sm:$0xff] %v842_v47  ;;  %890 = vst [vmem:[#allocation2 + $0xb8] sm:$0xff] %v858_v48 }
 0x15a   : > { %v939_v38 = vsub.s32 (!%p1307_p11), 0, %v938_v34  ;;  %v943_v39 = vsub.s32 (!%p1307_p11), 1, %v938_v34 }
 0x15b   : > { %v776_v53 = vpop.f32.mrb[8].mxu0  ;;  %v816_v54 = vpop.f32.mrb[8].mxu1 }
 0x15c   : > { %v843_v57 = vadd.f32 %v776_v53, %v410_v49  ;;  %v859_v58 = vadd.f32 %v816_v54, %v426_v50  ;;  %v778_v59 = vpop.f32.mrb[9].mxu0  ;;  %v818_v60 = vpop.f32.mrb[9].mxu1  ;;  %v1677_v43 = vrot.slane (!%p1307_p11), %v935_v35, %v939_v38  ;;  %v1679_v44 = vrot.slane (!%p1307_p11), %v935_v35, %v943_v39 }
 0x15d   : > { %v844_v63 = vadd.f32 %v778_v59, %v411_v51  ;;  %v860_v0 = vadd.f32 %v818_v60, %v427_v52  ;;  %v780_v1 = vpop.f32.mrb[10].mxu0  ;;  %v820_v2 = vpop.f32.mrb[10].mxu1  ;;  %v907_v42 = vld [vmem:[#allocation2 + $0x20] sm:$0xff] (!%p1307_p11) }
 0x15e   : > { %875 = vst [vmem:[#allocation2 + $0x40] sm:$0xff] %v843_v57  ;;  %891 = vst [vmem:[#allocation2 + $0xc0] sm:$0xff] %v859_v58  ;;  %v845_v3 = vadd.f32 %v780_v1, %v412_v55  ;;  %v861_v4 = vadd.f32 %v820_v2, %v428_v56  ;;  %v782_v5 = vpop.f32.mrb[11].mxu0  ;;  %v822_v6 = vpop.f32.mrb[11].mxu1  ;;  %v908_v45 = vld [vmem:[#allocation2 + $0x28] sm:$0xff] (!%p1307_p11)  ;;  %v947_v48 = vadd.f32 (!%p1307_p11), %v1677_v43, %v903_v36 }
 0x15f   : > { %876 = vst [vmem:[#allocation2 + $0x48] sm:$0xff] %v844_v63  ;;  %892 = vst [vmem:[#allocation2 + $0xc8] sm:$0xff] %v860_v0  ;;  %v846_v7 = vadd.f32 %v782_v5, %v413_v61  ;;  %v862_v8 = vadd.f32 %v822_v6, %v429_v62  ;;  %v909_v46 = vld [vmem:[#allocation2 + $0x30] sm:$0xff] (!%p1307_p11)  ;;  %v948_v49 = vadd.f32 (!%p1307_p11), %v1679_v44, %v904_v37  ;;  %v924_v33 = vld [vmem:[#allocation2 + $0xa8] sm:$0xff] (!%p1307_p11) }
 0x160   : > { %877 = vst [vmem:[#allocation2 + $0x50] sm:$0xff] %v845_v3  ;;  %893 = vst [vmem:[#allocation2 + $0xd0] sm:$0xff] %v861_v4  ;;  %v910_v47 = vld [vmem:[#allocation2 + $0x38] sm:$0xff] (!%p1307_p11)  ;;  %v949_v50 = vadd.f32 (!%p1307_p11), %v1677_v43, %v905_v40  ;;  %v950_v51 = vadd.f32 (!%p1307_p11), %v1679_v44, %v906_v41  ;;  %v951_v52 = vadd.f32 (!%p1307_p11), %v1677_v43, %v907_v42  ;;  %v979_v58 = vmax.f32 (!%p1307_p11), %v947_v48, 0.0  ;;  %v925_v38 = vld [vmem:[#allocation2 + $0xb0] sm:$0xff] (!%p1307_p11) }
 0x161   : > { %878 = vst [vmem:[#allocation2 + $0x58] sm:$0xff] %v846_v7  ;;  %894 = vst [vmem:[#allocation2 + $0xd8] sm:$0xff] %v862_v8  ;;  %v952_v53 = vadd.f32 (!%p1307_p11), %v1679_v44, %v908_v45  ;;  %v953_v54 = vadd.f32 (!%p1307_p11), %v1677_v43, %v909_v46  ;;  %v954_v55 = vadd.f32 (!%p1307_p11), %v1679_v44, %v910_v47  ;;  %v980_v59 = vmax.f32 (!%p1307_p11), %v948_v49, 0.0  ;;  %v926_v39 = vld [vmem:[#allocation2 + $0xb8] sm:$0xff] (!%p1307_p11) }
 0x162   : > { %v981_v60 = vmax.f32 (!%p1307_p11), %v949_v50, 0.0  ;;  %v982_v61 = vmax.f32 (!%p1307_p11), %v950_v51, 0.0  ;;  %v983_v0 = vmax.f32 (!%p1307_p11), %v951_v52, 0.0  ;;  %v968_v50 = vadd.f32 (!%p1307_p11), %v1679_v44, %v924_v33 }
 0x163   : > { %v786_v13 = vpop.f32.mrb[12].mxu0  ;;  %v826_v14 = vpop.f32.mrb[12].mxu1  ;;  %902 = sbr.rel (%p1307_p11) target bundleno = 378 (0x17a), region = 78  ;;  %v984_v1 = vmax.f32 (!%p1307_p11), %v952_v53, 0.0  ;;  %v985_v2 = vmax.f32 (!%p1307_p11), %v953_v54, 0.0  ;;  %v986_v3 = vmax.f32 (!%p1307_p11), %v954_v55, 0.0  ;;  %v1330_v6 = vpack.c.bf16 (!%p1307_p11), %v980_v59, %v979_v58 }
 0x164   : > { %v847_v17 = vadd.f32 %v786_v13, %v414_v9  ;;  %v863_v18 = vadd.f32 %v826_v14, %v430_v10  ;;  %v788_v19 = vpop.f32.mrb[13].mxu0  ;;  %v828_v20 = vpop.f32.mrb[13].mxu1  ;;  %v1331_v7 = vpack.c.bf16 (!%p1307_p11), %v982_v61, %v981_v60  ;;  %v969_v54 = vadd.f32 (!%p1307_p11), %v1677_v43, %v925_v38 }
 0x165   : > { %v848_v23 = vadd.f32 %v788_v19, %v415_v11  ;;  %v864_v24 = vadd.f32 %v828_v20, %v431_v12  ;;  %v790_v25 = vpop.f32.mrb[14].mxu0  ;;  %v830_v26 = vpop.f32.mrb[14].mxu1  ;;  %v911_v56 = vld [vmem:[#allocation2 + $0x40] sm:$0xff] (!%p1307_p11)  ;;  %v1332_v12 = vpack.c.bf16 (!%p1307_p11), %v984_v1, %v983_v0  ;;  %v1333_v13 = vpack.c.bf16 (!%p1307_p11), %v986_v3, %v985_v2  ;;  %1107 = vst [vmem:[%s1779_s3] sm:$0xff] (!%p1307_p11), %v1330_v6 }
 0x166   : > { %879 = vst [vmem:[#allocation2 + $0x60] sm:$0xff] %v847_v17  ;;  %895 = vst [vmem:[#allocation2 + $0xe0] sm:$0xff] %v863_v18  ;;  %v849_v27 = vadd.f32 %v790_v25, %v416_v15  ;;  %v865_v28 = vadd.f32 %v830_v26, %v432_v16  ;;  %v792_v29 = vpop.f32.mrb[15].mxu0  ;;  %v832_v30 = vpop.f32.mrb[15].mxu1  ;;  %v912_v57 = vld [vmem:[#allocation2 + $0x48] sm:$0xff] (!%p1307_p11)  ;;  %v955_v8 = vadd.f32 (!%p1307_p11), %v1677_v43, %v911_v56  ;;  %v919_v16 = vld [vmem:[#allocation2 + $0x80] sm:$0xff] (!%p1307_p11) }
 0x167   : > { %880 = vst [vmem:[#allocation2 + $0x68] sm:$0xff] %v848_v23  ;;  %896 = vst [vmem:[#allocation2 + $0xe8] sm:$0xff] %v864_v24  ;;  %v850_v31 = vadd.f32 %v792_v29, %v417_v21  ;;  %v866_v32 = vadd.f32 %v832_v30, %v433_v22  ;;  %v913_v62 = vld [vmem:[#allocation2 + $0x50] sm:$0xff] (!%p1307_p11)  ;;  %v956_v9 = vadd.f32 (!%p1307_p11), %v1679_v44, %v912_v57  ;;  %v920_v21 = vld [vmem:[#allocation2 + $0x88] sm:$0xff] (!%p1307_p11)  ;;  %v1000_v60 = vmax.f32 (!%p1307_p11), %v968_v50, 0.0 }
 0x168   : > { %881 = vst [vmem:[#allocation2 + $0x70] sm:$0xff] %v849_v27  ;;  %897 = vst [vmem:[#allocation2 + $0xf0] sm:$0xff] %v865_v28  ;;  %v914_v63 = vld [vmem:[#allocation2 + $0x58] sm:$0xff] (!%p1307_p11)  ;;  %v957_v14 = vadd.f32 (!%p1307_p11), %v1677_v43, %v913_v62  ;;  %v987_v17 = vmax.f32 (!%p1307_p11), %v955_v8, 0.0  ;;  %v921_v26 = vld [vmem:[#allocation2 + $0x90] sm:$0xff] (!%p1307_p11)  ;;  %v964_v37 = vadd.f32 (!%p1307_p11), %v1679_v44, %v920_v21  ;;  %v970_v55 = vadd.f32 (!%p1307_p11), %v1679_v44, %v926_v39 }
 0x169   : > { %882 = vst [vmem:[#allocation2 + $0x78] sm:$0xff] %v850_v31  ;;  %898 = vst [vmem:[#allocation2 + $0xf8] sm:$0xff] %v866_v32  ;;  %v958_v15 = vadd.f32 (!%p1307_p11), %v1679_v44, %v914_v63  ;;  %v988_v18 = vmax.f32 (!%p1307_p11), %v956_v9, 0.0  ;;  %v922_v27 = vld [vmem:[#allocation2 + $0x98] sm:$0xff] (!%p1307_p11)  ;;  %v963_v31 = vadd.f32 (!%p1307_p11), %v1677_v43, %v919_v16  ;;  %v923_v32 = vld [vmem:[#allocation2 + $0xa0] sm:$0xff] (!%p1307_p11)  ;;  %v965_v42 = vadd.f32 (!%p1307_p11), %v1677_v43, %v921_v26 }
 0x16a   : > { %1108 = vst [vmem:[%s1779_s3 + $0x8] sm:$0xff] %v1331_v7  ;;  %1109 = vst [vmem:[%s1779_s3 + $0x10] sm:$0xff] %v1332_v12  ;;  %v989_v22 = vmax.f32 %v957_v14, 0.0  ;;  %v966_v45 = vadd.f32 %v1679_v44, %v922_v27  ;;  %v927_v46 = vld [vmem:[#allocation2 + $0xc0] sm:$0xff]  ;;  %v996_v48 = vmax.f32 %v964_v37, 0.0  ;;  %v967_v49 = vadd.f32 %v1677_v43, %v923_v32  ;;  %v928_v51 = vld [vmem:[#allocation2 + $0xc8] sm:$0xff] }
 0x16b   : > { %1110 = vst [vmem:[%s1779_s3 + $0x18] sm:$0xff] %v1333_v13  ;;  %v990_v23 = vmax.f32 %v958_v15, 0.0  ;;  %v1334_v28 = vpack.c.bf16 %v988_v18, %v987_v17  ;;  %v995_v41 = vmax.f32 %v963_v31, 0.0  ;;  %v997_v52 = vmax.f32 %v965_v42, 0.0  ;;  %v929_v56 = vld [vmem:[#allocation2 + $0xd0] sm:$0xff]  ;;  %v930_v57 = vld [vmem:[#allocation2 + $0xd8] sm:$0xff] }
 0x16c   : > { %v998_v53 = vmax.f32 %v966_v45, 0.0  ;;  %v999_v59 = vmax.f32 %v967_v49, 0.0  ;;  %v971_v61 = vadd.f32 %v1677_v43, %v927_v46  ;;  %v1001_v1 = vmax.f32 %v969_v54, 0.0 }
 0x16d   : > { %v915_v4 = vld [vmem:[#allocation2 + $0x60] sm:$0xff]  ;;  %v1335_v34 = vpack.c.bf16 %v990_v23, %v989_v22  ;;  %1111 = vst [vmem:[%s1779_s3 + $0x20] sm:$0xff] %v1334_v28  ;;  %v1338_v58 = vpack.c.bf16 %v996_v48, %v995_v41  ;;  %v1002_v2 = vmax.f32 %v970_v55, 0.0  ;;  %v972_v3 = vadd.f32 %v1679_v44, %v928_v51 }
 0x16e   : > { %v916_v5 = vld [vmem:[#allocation2 + $0x68] sm:$0xff]  ;;  %v959_v19 = vadd.f32 %v1677_v43, %v915_v4  ;;  %v931_v62 = vld [vmem:[#allocation2 + $0xe0] sm:$0xff]  ;;  %v1339_v0 = vpack.c.bf16 %v998_v53, %v997_v52  ;;  %v1340_v6 = vpack.c.bf16 %v1000_v60, %v999_v59  ;;  %v1003_v7 = vmax.f32 %v971_v61, 0.0 }
 0x16f   : > { %v917_v10 = vld [vmem:[#allocation2 + $0x70] sm:$0xff]  ;;  %v960_v20 = vadd.f32 %v1679_v44, %v916_v5  ;;  %1112 = vst [vmem:[%s1779_s3 + $0x28] sm:$0xff] %v1335_v34  ;;  %v932_v63 = vld [vmem:[#allocation2 + $0xe8] sm:$0xff]  ;;  %1115 = vst [vmem:[%s1779_s3 + $0x40] sm:$0xff] %v1338_v58  ;;  %v973_v8 = vadd.f32 %v1677_v43, %v929_v56  ;;  %v974_v9 = vadd.f32 %v1679_v44, %v930_v57 }
 0x170   : > { %v918_v11 = vld [vmem:[#allocation2 + $0x78] sm:$0xff]  ;;  %v961_v24 = vadd.f32 %v1677_v43, %v917_v10  ;;  %v991_v29 = vmax.f32 %v959_v19, 0.0  ;;  %v933_v4 = vld [vmem:[#allocation2 + $0xf0] sm:$0xff]  ;;  %1116 = vst [vmem:[%s1779_s3 + $0x48] sm:$0xff] %v1339_v0  ;;  %v1341_v10 = vpack.c.bf16 %v1002_v2, %v1001_v1  ;;  %v975_v12 = vadd.f32 %v1677_v43, %v931_v62  ;;  %1117 = vst [vmem:[%s1779_s3 + $0x50] sm:$0xff] %v1340_v6 }
 0x171   : > { %v962_v25 = vadd.f32 %v1679_v44, %v918_v11  ;;  %v992_v30 = vmax.f32 %v960_v20, 0.0  ;;  %v934_v5 = vld [vmem:[#allocation2 + $0xf8] sm:$0xff]  ;;  %v1004_v11 = vmax.f32 %v972_v3, 0.0  ;;  %v976_v13 = vadd.f32 %v1679_v44, %v932_v63 }
 0x172   : > { %v993_v35 = vmax.f32 %v961_v24, 0.0  ;;  %v1005_v14 = vmax.f32 %v973_v8, 0.0  ;;  %v1006_v15 = vmax.f32 %v974_v9, 0.0  ;;  %v977_v16 = vadd.f32 %v1677_v43, %v933_v4  ;;  %1118 = vst [vmem:[%s1779_s3 + $0x58] sm:$0xff] %v1341_v10 }
 0x173   : > { %v994_v36 = vmax.f32 %v962_v25, 0.0  ;;  %v1336_v40 = vpack.c.bf16 %v992_v30, %v991_v29  ;;  %v978_v17 = vadd.f32 %v1679_v44, %v934_v5  ;;  %v1342_v18 = vpack.c.bf16 %v1004_v11, %v1003_v7 }
 0x174   : > { %v1007_v19 = vmax.f32 %v975_v12, 0.0  ;;  %v1008_v20 = vmax.f32 %v976_v13, 0.0  ;;  %v1343_v21 = vpack.c.bf16 %v1006_v15, %v1005_v14  ;;  %v1009_v22 = vmax.f32 %v977_v16, 0.0 }
 0x175   : > { %v1337_v47 = vpack.c.bf16 %v994_v36, %v993_v35  ;;  %1113 = vst [vmem:[%s1779_s3 + $0x30] sm:$0xff] %v1336_v40  ;;  %v1010_v23 = vmax.f32 %v978_v17, 0.0  ;;  %1119 = vst [vmem:[%s1779_s3 + $0x60] sm:$0xff] %v1342_v18 }
 0x176   : > { %v1344_v24 = vpack.c.bf16 %v1008_v20, %v1007_v19  ;;  %1120 = vst [vmem:[%s1779_s3 + $0x68] sm:$0xff] %v1343_v21 }
 0x177   : > { %1114 = vst [vmem:[%s1779_s3 + $0x38] sm:$0xff] %v1337_v47  ;;  %v1345_v43 = vpack.c.bf16 %v1010_v23, %v1009_v22 }
 0x178   : > { %1121 = vst [vmem:[%s1779_s3 + $0x70] sm:$0xff] %v1344_v24 }
 0x179   : > { %1122 = vst [vmem:[%s1779_s3 + $0x78] sm:$0xff] %v1345_v43 }
 0x17a PF: > { %s13_s16 = sadd.s32 1, %s1529_s16   ;;  %s1780_s12 = smov %s1517_s13 }
 0x17b   : > { %p10_p12 = scmp.ge.s32.totalorder %s13_s16, 9   ;;  %s1781_s13 = smov %s1587_s20 }
 0x17c   : > { %s1782_s14 = smov %s1525_s15  ;;  %s1783_s15 = smov %s1785_s17 }
 0x17d   :  { %12 = sbr.rel (!%p10_p12) target bundleno = 3 (0x3), region = 119 }

// kernel: alexnet_forward.15
= control target key start
LH: loop header
LB: loop body
LE: loop exit
PB: predicated region body
PF: predicated region fallthrough
CT: control target
= control target key end

     0   :  { %s531_s15 = smov 0   ;;  %s623_s0 = inlined_call_operand.vmem [shape: bf16[2,4,4,192], index: 0, kind: input, shape index: {}]   ;;  %s624_s1 = inlined_call_operand.vmem [shape: bf16[2,4,3,192], index: 1, kind: input, shape index: {}]   ;;  %s625_s2 = inlined_call_operand.vmem [shape: bf16[2,3,4,192], index: 2, kind: input, shape index: {}]   ;;  %s626_s3 = inlined_call_operand.vmem [shape: bf16[2,3,3,192], index: 3, kind: input, shape index: {}]   ;;  %s627_s4 = inlined_call_operand.vmem [shape: bf16[2,3,3,192], index: 4, kind: output, shape index: {}]  }
   0x1 LB: > { %s473_s16 = sadd.s32 4294967295, %s504_s15   ;;  %p477_p0 = scmp.ge.s32.totalorder %s504_s15, 1  ;;  %s504_s15 = sphi %s531_s15, %s14_s15  }
   0x2   : > { %p192_p1 = scmp.lt.s32.totalorder %s504_s15, 3 }
   0x4   : > { %p193_p2 = pnand %p477_p0, %p192_p1 }
   0x5   : > { %p233_p3 = scmp.lt.s32.totalorder (!%p193_p2), %s473_s16, 1  ;;  %vm366_vm0 = vcmask (!%p193_p2), 1041408   ;;  %vm367_vm1 = vsmask.f32 (!%p193_p2), 1280  ;;  %vm369_vm2 = vcmask (!%p193_p2), 519170  }
   0x6   : > { %196 = sbr.rel (%p193_p2) target bundleno = 46 (0x2e), region = 36  ;;  %vm370_vm3 = vsmask.f32 (!%p193_p2), 3328  ;;  %vm368_vm4 = vmand (!%p193_p2), %vm366_vm0, %vm367_vm1 }
   0x7   : > { %vm371_vm5 = vmand (!%p193_p2), %vm369_vm2, %vm370_vm3 }
   0x8   : > { %vm601_vm6 = vmor (!%p193_p2), %vm371_vm5, %vm368_vm4 }
   0xd   : > { %s631_s16 = smov (!%p233_p3, %s473_s16), 1 }
   0xe   : > { %s487_s17 = sshll.u32 %s631_s16, 4  ;;  %s539_s18 = smul.u32 12, %s631_s16 }
   0xf   : > { %s544_s21 = scalar_lea.vmem %s623_s0, %s487_s17  ;;  %s549_s24 = scalar_lea.vmem %s624_s1, %s487_s17 }
  0x10   : > { %s555_s27 = scalar_lea.vmem %s625_s2, %s539_s18  ;;  %s561_s30 = scalar_lea.vmem %s626_s3, %s539_s18  ;;  %v564_v0 = vld [vmem:[%s544_s21] sm:$0xf]  ;;  %v567_v1 = vld [vmem:[%s544_s21 + $0x4] sm:$0xf]  ;;  %v579_v17 = vld [vmem:[%s544_s21 + $0x8] sm:$0xf] }
  0x11   : > { %v262_v2 = vld [vmem:[%s549_s24] sm:$0xf]  ;;  %v263_v3 = vld [vmem:[%s549_s24 + $0x4] sm:$0xf]  ;;  %v318_v10 = vshrl.u32 %v564_v0, 16  ;;  %v321_v11 = vshll.u32 %v564_v0, 16  ;;  %s596_s7 = scalar_lea.vmem %s627_s4, %s539_s18 }
  0x12   : > { %v266_v4 = vld [vmem:[%s555_s27] sm:$0xf]  ;;  %v270_v6 = vld [vmem:[%s561_s30 + $0x4] sm:$0xf]  ;;  %v327_v12 = vshrl.u32 %v567_v1, 16  ;;  %v330_v13 = vshll.u32 %v567_v1, 16 }
  0x13   : > { %v269_v5 = vld [vmem:[%s561_s30] sm:$0xf]  ;;  %v282_v8 = vshrl.u32 %v266_v4, 16  ;;  %v285_v9 = vshll.u32 %v266_v4, 16  ;;  %v264_v18 = vld [vmem:[%s549_s24 + $0x8] sm:$0xf]  ;;  %v273_v19 = vmax.bf16 %v270_v6, %v263_v3 }
  0x14   : > { %v272_v7 = vmax.bf16 %v269_v5, %v262_v2  ;;  %v320_v20 = vrot.slane %v318_v10, 6  ;;  %v323_v21 = vrot.slane %v321_v11, 7  ;;  %v329_v22 = vrot.slane %v327_v12, 6  ;;  %v267_v24 = vld [vmem:[%s555_s27 + $0x4] sm:$0xf] }
  0x15   : > { %v284_v15 = vrot.slane %v282_v8, 6  ;;  %v287_v16 = vrot.slane %v285_v9, 7  ;;  %v332_v23 = vrot.slane %v330_v13, 7  ;;  %v276_v27 = vmax.bf16 %v273_v19, %v264_v18  ;;  %v271_v29 = vld [vmem:[%s561_s30 + $0x8] sm:$0xf] }
  0x16   : > { %v275_v14 = vmax.bf16 %v272_v7, %v263_v3  ;;  %v291_v28 = vshrl.u32 %v267_v24, 16  ;;  %v324_v30 = vor.u32 %v323_v21, %v320_v20  ;;  %v294_v31 = vshll.u32 %v267_v24, 16  ;;  %v268_v33 = vld [vmem:[%s555_s27 + $0x8] sm:$0xf]  ;;  %v261_v38 = vld [vmem:[%s544_s21 + $0xc] sm:$0xf] }
  0x17   : > { %v288_v26 = vor.u32 %v287_v16, %v284_v15  ;;  %v336_v32 = vshrl.u32 %v579_v17, 16  ;;  %v333_v35 = vor.u32 %v332_v23, %v329_v22  ;;  %v339_v37 = vshll.u32 %v579_v17, 16  ;;  %v265_v43 = vld [vmem:[%s549_s24 + $0xc] sm:$0xf]  ;;  %v376_v15 = vld [vmem:[%s596_s7 + $0x4] sm:$0xf] }
  0x18   : > { %v278_v25 = vmax.bf16 %v275_v14, %v266_v4  ;;  %v293_v36 = vrot.slane %v291_v28, 6  ;;  %v325_v39 = vrot.slane %v324_v30, 2  ;;  %v279_v40 = vmax.bf16 %v276_v27, %v267_v24  ;;  %v373_v4 = vld [vmem:[%s596_s7] sm:$0xf]  ;;  %v379_v21 = vld [vmem:[%s596_s7 + $0x8] sm:$0xf] }
  0x19   : > { %v289_v34 = vrot.slane %v288_v26, 2  ;;  %v296_v41 = vrot.slane %v294_v31, 7  ;;  %v338_v42 = vrot.slane %v336_v32, 6  ;;  %v341_v45 = vrot.slane %v339_v37, 7 }
  0x1a   : > { %v274_v46 = vmax.bf16 %v271_v29, %v264_v18  ;;  %v300_v47 = vshrl.u32 %v268_v33, 16  ;;  %v303_v49 = vshll.u32 %v268_v33, 16  ;;  %v354_v50 = vshrl.u32 %v261_v38, 16 }
  0x1b   : > { %v311_v44 = vmax.bf16 %v289_v34, %v278_v25  ;;  %v297_v48 = vor.u32 %v296_v41, %v293_v36  ;;  %v357_v51 = vshll.u32 %v261_v38, 16  ;;  %v334_v57 = vrot.slane %v333_v35, 2 }
  0x1c   : > { %v277_v53 = vmax.bf16 %v274_v46, %v265_v43  ;;  %v302_v54 = vrot.slane %v300_v47, 6  ;;  %v305_v56 = vrot.slane %v303_v49, 7  ;;  %v342_v59 = vor.u32 %v341_v45, %v338_v42 }
  0x1d   : > { %v314_v52 = vmax.bf16 %v311_v44, %v564_v0  ;;  %v298_v55 = vrot.slane %v297_v48, 2  ;;  %v356_v60 = vrot.slane %v354_v50, 6  ;;  %v359_v0 = vrot.slane %v357_v51, 7 }
  0x1e   : > { %v280_v62 = vmax.bf16 %v277_v53, %v268_v33  ;;  %v306_v63 = vor.u32 %v305_v56, %v302_v54  ;;  %v343_v8 = vrot.slane %v342_v59, 2 }
  0x1f   : > { %v347_v58 = vmax.bf16 %v325_v39, %v314_v52  ;;  %v312_v61 = vmax.bf16 %v298_v55, %v279_v40  ;;  %v360_v11 = vor.u32 %v359_v0, %v356_v60 }
  0x20   : > { %v307_v6 = vrot.slane %v306_v63, 2 }
  0x21   : > { %v350_v2 = vmax.bf16 %v347_v58, %v567_v1  ;;  %v315_v5 = vmax.bf16 %v312_v61, %v567_v1  ;;  %v361_v18 = vrot.slane %v360_v11, 2 }
  0x22   : > { %v313_v10 = vmax.bf16 %v307_v6, %v280_v62 }
  0x23   : > { %v363_v7 = vmax.bf16 %v350_v2, %v334_v57  ;;  %v348_v9 = vmax.bf16 %v334_v57, %v315_v5 }
  0x24   : > { %v316_v14 = vmax.bf16 %v313_v10, %v579_v17 }
  0x25   : > { %v374_v12 = vsel %vm601_vm6, %v363_v7, %v373_v4  ;;  %v351_v13 = vmax.bf16 %v348_v9, %v579_v17 }
  0x26   : > { %375 = vst [vmem:[%s596_s7] sm:$0xf] %v374_v12  ;;  %v349_v1 = vmax.bf16 %v343_v8, %v316_v14 }
  0x27   : > { %v364_v16 = vmax.bf16 %v351_v13, %v343_v8 }
  0x28   : > { %v352_v20 = vmax.bf16 %v349_v1, %v261_v38 }
  0x29   : > { %v377_v19 = vsel %vm601_vm6, %v364_v16, %v376_v15 }
  0x2a   : > { %378 = vst [vmem:[%s596_s7 + $0x4] sm:$0xf] %v377_v19  ;;  %v365_v22 = vmax.bf16 %v361_v18, %v352_v20 }
  0x2c   : > { %v380_v23 = vsel %vm601_vm6, %v365_v22, %v379_v21 }
  0x2d   : > { %381 = vst [vmem:[%s596_s7 + $0x8] sm:$0xf] %v380_v23 }
  0x2e PF: > { %s14_s15 = sadd.s32 1, %s504_s15  }
  0x2f   : > { %p11_p4 = scmp.ge.s32.totalorder %s14_s15, 4  }
  0x31   :  { %13 = sbr.rel (!%p11_p4) target bundleno = 1 (0x1), region = 75 }

// kernel: alexnet_forward.16
= control target key start
LH: loop header
LB: loop body
LE: loop exit
PB: predicated region body
PF: predicated region fallthrough
CT: control target
= control target key end

     0   :  { %s2063_s0 = inlined_call_operand.vmem [shape: bf16[48,1920], index: 0, kind: input, shape index: {}]   ;;  %s2064_s1 = inlined_call_operand.vmem [shape: bf16[1920,512], index: 1, kind: input, shape index: {}]   ;;  %s2065_s2 = inlined_call_operand.vmem [shape: f32[1,512], index: 2, kind: input, shape index: {}]   ;;  %s2066_s3 = inlined_call_operand.vmem [shape: bf16[48,512], index: 3, kind: output, shape index: {}]  }
   0x1   :  { %2068 = sst [smem:[#allocation7_spill]] %s2063_s0 }
   0x2   :  { %2069 = sst [smem:[#allocation8_spill]] %s2064_s1 }
   0x3   :  { %s1713_s12 = smov 0   ;;  %s1715_s13 = smov 0  }
   0x4   :  { %s1717_s14 = smov 0   ;;  %s1719_s15 = smov 0  }
   0x5   :  { %s1721_s16 = smov 0   ;;  %s1723_s17 = smov 0  }
   0x6   :  { %s1725_s18 = smov 0   ;;  %s1727_s19 = smov 0  }
   0x7   :  { %s1729_s20 = smov 0   ;;  %s1731_s21 = smov 0  }
   0x8   :  { %s1733_s22 = smov 0  }
   0x9 LB: > { %s1312_s23 = sadd.s32 4294967295, %s1689_s22   ;;  %s25_s24 = sadd.s32 1, %s1681_s20  ;;  %s1689_s22 = sphi %s1733_s22, %s13_s22   ;;  %s1685_s21 = sphi %s1731_s21, %s2086_s21   ;;  %s1681_s20 = sphi %s1729_s20, %s2085_s20   ;;  %s1677_s19 = sphi %s1727_s19, %s2084_s19   ;;  %s1673_s18 = sphi %s1725_s18, %s2083_s18   ;;  %s1669_s17 = sphi %s1723_s17, %s2082_s17   ;;  %s1665_s16 = sphi %s1721_s16, %s2081_s16   ;;  %s1661_s15 = sphi %s1719_s15, %s2080_s15   ;;  %s1657_s14 = sphi %s1717_s14, %s2079_s14   ;;  %s1653_s13 = sphi %s1715_s13, %s2078_s13   ;;  %s1649_s12 = sphi %s1713_s12, %s2077_s12  }
   0xa   : > { %p26_p0 = scmp.ge.s32.totalorder %s25_s24, 5  ;;  %s28_s25 = sadd.s32 1, %s1685_s21 }
   0xb   : > { %s41_s26 = sadd.s32 1, %s1669_s17  ;;  %p48_p1 = scmp.ne.s32.totalorder %s1669_s17, %s1665_s16 }
   0xc   : > { %s2088_s24 = smov (%p26_p0, %s25_s24), 0  ;;  %s2090_s25 = smov (!%p26_p0, %s28_s25), %s1685_s21 }
   0xd   : > { %s37_s27 = ssub.s32 %s1681_s20, %s2088_s24  ;;  %p49_p2 = scmp.eq.s32.totalorder %s1689_s22, 0 }
   0xe   : > { %p30_p3 = scmp.ge.s32.totalorder %s2090_s25, 2  ;;  %p39_p4 = scmp.eq.s32.totalorder %s37_s27, 0 }
   0xf   : > { %p1780_p5 = por %p49_p2, %p48_p1  ;;  %s69_s29 = sadd.s32 1, %s1661_s15 }
  0x10   : > { %s2092_s25 = smov (%p30_p3, %s2090_s25), 0  ;;  %p76_p6 = scmp.ne.s32.totalorder %s1661_s15, %s1657_s14 }
  0x11   : > { %2071 = sst [smem:[#allocation6_spill]] %s2092_s25  ;;  %s65_s4 = ssub.s32 %s1685_s21, %s2092_s25 }
  0x12   : > { %s1788_s30 = scalar_select %p39_p4, %s1669_s17, %s41_s26  }
  0x13   : > { %s66_s5 = sor.u32 %s65_s4, %s37_s27  ;;  %p121_p7 = scmp.eq.s32.totalorder %s65_s4, 0 }
  0x14   : > { %p67_p8 = scmp.eq.s32.totalorder %s66_s5, 0  ;;  %p1794_p9 = por %p76_p6, %p49_p2 }
  0x15   : > { %s123_s7 = sadd.s32 1, %s1653_s13  ;;  %p133_p10 = scmp.ne.s32.totalorder %s1653_s13, %s1649_s12 }
  0x16   : > { %s1802_s8 = scalar_select %p67_p8, %s1661_s15, %s69_s29  }
  0x17   : > { %s1805_s9 = scalar_select %p121_p7, %s1653_s13, %s123_s7  }
  0x18   : > { %p134_p11 = scmp.eq.s32.totalorder %s1312_s23, 9  ;;  %p1315_p13 = scmp.ge.s32.totalorder %s1689_s22, 10 }
  0x1a   : > { %p1807_p12 = por %p134_p11, %p133_p10  ;;  %156 = sbr.rel (%p1315_p13) target bundleno = 83 (0x53), region = 16 }
  0x21   : > { %159 = sbr.rel (!%p1780_p5) target bundleno = 49 (0x31), region = 20  ;;  %s161_s11 = sand.u32 (%p1780_p5), 1, %s1669_s17  }
  0x22   : > { %s1403_s26 = smul.u32 (%p1780_p5), 12, %s1681_s20  ;;  %s2074_s0 = sld [smem:[#allocation7_spill]] (%p1780_p5) }
  0x23   : > { %s1424_s27 = smul.u32 (%p1780_p5), 72, %s161_s11 }
  0x25   : > { %s163_s23 = scalar_lea.vmem (%p1780_p5), [#allocation3], %s1424_s27 }
  0x28   : > { %s169_s5 = scalar_lea.vmem %s2074_s0, %s1403_s26 }
  0x29   : > { %v184_v0 = vld [vmem:[%s169_s5] sm:$0xff]  ;;  %v188_v2 = vld [vmem:[%s169_s5 + $0x78] sm:$0xff]  ;;  %v192_v4 = vld [vmem:[%s169_s5 + $0xf0] sm:$0xff] }
  0x2a   : > { %v186_v1 = vld [vmem:[%s169_s5 + $0x3c] sm:$0xff]  ;;  %185 = vst [vmem:[%s163_s23] sm:$0xff] %v184_v0  ;;  %189 = vst [vmem:[%s163_s23 + $0x18] sm:$0xff] %v188_v2  ;;  %v190_v3 = vld [vmem:[%s169_s5 + $0xb4] sm:$0xff] }
  0x2b   : > { %187 = vst [vmem:[%s163_s23 + $0xc] sm:$0xff] %v186_v1  ;;  %v194_v5 = vld [vmem:[%s169_s5 + $0x12c] sm:$0xff]  ;;  %191 = vst [vmem:[%s163_s23 + $0x24] sm:$0xff] %v190_v3  ;;  %v1317_v6 = vld [vmem:[%s169_s5 + $0x8] sm:$0xf] }
  0x2c   : > { %193 = vst [vmem:[%s163_s23 + $0x30] sm:$0xff] %v192_v4  ;;  %195 = vst [vmem:[%s163_s23 + $0x3c] sm:$0xff] %v194_v5  ;;  %v1319_v7 = vld [vmem:[%s169_s5 + $0x44] sm:$0xf]  ;;  %v1321_v8 = vld [vmem:[%s169_s5 + $0x80] sm:$0xf] }
  0x2d   : > { %1318 = vst [vmem:[%s163_s23 + $0x8] sm:$0xf] %v1317_v6  ;;  %1320 = vst [vmem:[%s163_s23 + $0x14] sm:$0xf] %v1319_v7  ;;  %v1323_v9 = vld [vmem:[%s169_s5 + $0xbc] sm:$0xf] }
  0x2e   : > { %1322 = vst [vmem:[%s163_s23 + $0x20] sm:$0xf] %v1321_v8  ;;  %v1325_v10 = vld [vmem:[%s169_s5 + $0xf8] sm:$0xf]  ;;  %v1327_v11 = vld [vmem:[%s169_s5 + $0x134] sm:$0xf] }
  0x2f   : > { %1324 = vst [vmem:[%s163_s23 + $0x2c] sm:$0xf] %v1323_v9  ;;  %1326 = vst [vmem:[%s163_s23 + $0x38] sm:$0xf] %v1325_v10 }
  0x30   : > { %1328 = vst [vmem:[%s163_s23 + $0x44] sm:$0xf] %v1327_v11 }
  0x31 PF: > { %220 = sbr.rel (!%p1794_p9) target bundleno = 83 (0x53), region = 46  ;;  %s222_s28 = sand.u32 (%p1794_p9), 1, %s1661_s15  }
  0x32   : > { %s1425_s7 = smul.u32 (%p1794_p9), 384, %s222_s28  ;;  %s1329_s11 = sshll.u32 (%p1794_p9), %s1685_s21, 1 }
  0x33   : > { %s1404_s26 = smul.u32 (%p1794_p9), 192, %s1681_s20  ;;  %s2075_s1 = sld [smem:[#allocation8_spill]] (%p1794_p9) }
  0x34   : > { %s1832_s6 = scalar_lea.vmem (%p1794_p9), [#allocation4], %s1425_s7 }
  0x35   : > { %s228_s27 = sadd.s32 (%p1794_p9), %s1404_s26, %s1329_s11 }
  0x36   : > { %s1331_s29 = sshll.u32 (%p1794_p9), %s228_s27, 2 }
  0x39   : > { %s1827_s5 = scalar_lea.vmem %s2075_s1, %s1331_s29 }
  0x3a   : > { %v352_v12 = vld [vmem:[%s1827_s5] sm:$0xff]  ;;  %v354_v13 = vld [vmem:[%s1827_s5 + $0x10] sm:$0xff] }
  0x3b   : > { %v356_v14 = vld [vmem:[%s1827_s5 + $0x20] sm:$0xff]  ;;  %353 = vst [vmem:[%s1832_s6] sm:$0xff] %v352_v12  ;;  %355 = vst [vmem:[%s1832_s6 + $0x8] sm:$0xff] %v354_v13  ;;  %v358_v15 = vld [vmem:[%s1827_s5 + $0x30] sm:$0xff] }
  0x3c   : > { %357 = vst [vmem:[%s1832_s6 + $0x10] sm:$0xff] %v356_v14  ;;  %v360_v16 = vld [vmem:[%s1827_s5 + $0x40] sm:$0xff]  ;;  %v362_v17 = vld [vmem:[%s1827_s5 + $0x50] sm:$0xff]  ;;  %359 = vst [vmem:[%s1832_s6 + $0x18] sm:$0xff] %v358_v15 }
  0x3d   : > { %361 = vst [vmem:[%s1832_s6 + $0x20] sm:$0xff] %v360_v16  ;;  %363 = vst [vmem:[%s1832_s6 + $0x28] sm:$0xff] %v362_v17  ;;  %v364_v18 = vld [vmem:[%s1827_s5 + $0x60] sm:$0xff]  ;;  %v366_v19 = vld [vmem:[%s1827_s5 + $0x70] sm:$0xff] }
  0x3e   : > { %v368_v20 = vld [vmem:[%s1827_s5 + $0x80] sm:$0xff]  ;;  %365 = vst [vmem:[%s1832_s6 + $0x30] sm:$0xff] %v364_v18  ;;  %367 = vst [vmem:[%s1832_s6 + $0x38] sm:$0xff] %v366_v19  ;;  %v370_v21 = vld [vmem:[%s1827_s5 + $0x90] sm:$0xff] }
  0x3f   : > { %369 = vst [vmem:[%s1832_s6 + $0x40] sm:$0xff] %v368_v20  ;;  %v372_v22 = vld [vmem:[%s1827_s5 + $0xa0] sm:$0xff]  ;;  %v374_v23 = vld [vmem:[%s1827_s5 + $0xb0] sm:$0xff]  ;;  %371 = vst [vmem:[%s1832_s6 + $0x48] sm:$0xff] %v370_v21 }
  0x40   : > { %373 = vst [vmem:[%s1832_s6 + $0x50] sm:$0xff] %v372_v22  ;;  %375 = vst [vmem:[%s1832_s6 + $0x58] sm:$0xff] %v374_v23  ;;  %v376_v24 = vld [vmem:[%s1827_s5 + $0xc0] sm:$0xff]  ;;  %v378_v25 = vld [vmem:[%s1827_s5 + $0xd0] sm:$0xff] }
  0x41   : > { %v380_v26 = vld [vmem:[%s1827_s5 + $0xe0] sm:$0xff]  ;;  %377 = vst [vmem:[%s1832_s6 + $0x60] sm:$0xff] %v376_v24  ;;  %379 = vst [vmem:[%s1832_s6 + $0x68] sm:$0xff] %v378_v25  ;;  %v382_v27 = vld [vmem:[%s1827_s5 + $0xf0] sm:$0xff] }
  0x42   : > { %381 = vst [vmem:[%s1832_s6 + $0x70] sm:$0xff] %v380_v26  ;;  %v384_v28 = vld [vmem:[%s1827_s5 + $0x100] sm:$0xff]  ;;  %v386_v29 = vld [vmem:[%s1827_s5 + $0x110] sm:$0xff]  ;;  %383 = vst [vmem:[%s1832_s6 + $0x78] sm:$0xff] %v382_v27 }
  0x43   : > { %385 = vst [vmem:[%s1832_s6 + $0x80] sm:$0xff] %v384_v28  ;;  %387 = vst [vmem:[%s1832_s6 + $0x88] sm:$0xff] %v386_v29  ;;  %v388_v30 = vld [vmem:[%s1827_s5 + $0x120] sm:$0xff]  ;;  %v390_v31 = vld [vmem:[%s1827_s5 + $0x130] sm:$0xff] }
  0x44   : > { %v392_v32 = vld [vmem:[%s1827_s5 + $0x140] sm:$0xff]  ;;  %389 = vst [vmem:[%s1832_s6 + $0x90] sm:$0xff] %v388_v30  ;;  %391 = vst [vmem:[%s1832_s6 + $0x98] sm:$0xff] %v390_v31  ;;  %v394_v33 = vld [vmem:[%s1827_s5 + $0x150] sm:$0xff] }
  0x45   : > { %393 = vst [vmem:[%s1832_s6 + $0xa0] sm:$0xff] %v392_v32  ;;  %v396_v34 = vld [vmem:[%s1827_s5 + $0x160] sm:$0xff]  ;;  %v398_v35 = vld [vmem:[%s1827_s5 + $0x170] sm:$0xff]  ;;  %395 = vst [vmem:[%s1832_s6 + $0xa8] sm:$0xff] %v394_v33 }
  0x46   : > { %397 = vst [vmem:[%s1832_s6 + $0xb0] sm:$0xff] %v396_v34  ;;  %399 = vst [vmem:[%s1832_s6 + $0xb8] sm:$0xff] %v398_v35  ;;  %v400_v36 = vld [vmem:[%s1827_s5 + $0x180] sm:$0xff]  ;;  %v402_v37 = vld [vmem:[%s1827_s5 + $0x190] sm:$0xff] }
  0x47   : > { %v404_v38 = vld [vmem:[%s1827_s5 + $0x1a0] sm:$0xff]  ;;  %401 = vst [vmem:[%s1832_s6 + $0xc0] sm:$0xff] %v400_v36  ;;  %403 = vst [vmem:[%s1832_s6 + $0xc8] sm:$0xff] %v402_v37  ;;  %v406_v39 = vld [vmem:[%s1827_s5 + $0x1b0] sm:$0xff] }
  0x48   : > { %405 = vst [vmem:[%s1832_s6 + $0xd0] sm:$0xff] %v404_v38  ;;  %v408_v40 = vld [vmem:[%s1827_s5 + $0x1c0] sm:$0xff]  ;;  %v410_v41 = vld [vmem:[%s1827_s5 + $0x1d0] sm:$0xff]  ;;  %407 = vst [vmem:[%s1832_s6 + $0xd8] sm:$0xff] %v406_v39 }
  0x49   : > { %409 = vst [vmem:[%s1832_s6 + $0xe0] sm:$0xff] %v408_v40  ;;  %411 = vst [vmem:[%s1832_s6 + $0xe8] sm:$0xff] %v410_v41  ;;  %v412_v42 = vld [vmem:[%s1827_s5 + $0x1e0] sm:$0xff]  ;;  %v414_v43 = vld [vmem:[%s1827_s5 + $0x1f0] sm:$0xff] }
  0x4a   : > { %v416_v44 = vld [vmem:[%s1827_s5 + $0x200] sm:$0xff]  ;;  %413 = vst [vmem:[%s1832_s6 + $0xf0] sm:$0xff] %v412_v42  ;;  %415 = vst [vmem:[%s1832_s6 + $0xf8] sm:$0xff] %v414_v43  ;;  %v418_v45 = vld [vmem:[%s1827_s5 + $0x210] sm:$0xff] }
  0x4b   : > { %417 = vst [vmem:[%s1832_s6 + $0x100] sm:$0xff] %v416_v44  ;;  %v420_v46 = vld [vmem:[%s1827_s5 + $0x220] sm:$0xff]  ;;  %v422_v47 = vld [vmem:[%s1827_s5 + $0x230] sm:$0xff]  ;;  %419 = vst [vmem:[%s1832_s6 + $0x108] sm:$0xff] %v418_v45 }
  0x4c   : > { %421 = vst [vmem:[%s1832_s6 + $0x110] sm:$0xff] %v420_v46  ;;  %423 = vst [vmem:[%s1832_s6 + $0x118] sm:$0xff] %v422_v47  ;;  %v424_v48 = vld [vmem:[%s1827_s5 + $0x240] sm:$0xff]  ;;  %v426_v49 = vld [vmem:[%s1827_s5 + $0x250] sm:$0xff] }
  0x4d   : > { %v428_v50 = vld [vmem:[%s1827_s5 + $0x260] sm:$0xff]  ;;  %425 = vst [vmem:[%s1832_s6 + $0x120] sm:$0xff] %v424_v48  ;;  %427 = vst [vmem:[%s1832_s6 + $0x128] sm:$0xff] %v426_v49  ;;  %v430_v51 = vld [vmem:[%s1827_s5 + $0x270] sm:$0xff] }
  0x4e   : > { %429 = vst [vmem:[%s1832_s6 + $0x130] sm:$0xff] %v428_v50  ;;  %v432_v52 = vld [vmem:[%s1827_s5 + $0x280] sm:$0xff]  ;;  %v434_v53 = vld [vmem:[%s1827_s5 + $0x290] sm:$0xff]  ;;  %431 = vst [vmem:[%s1832_s6 + $0x138] sm:$0xff] %v430_v51 }
  0x4f   : > { %433 = vst [vmem:[%s1832_s6 + $0x140] sm:$0xff] %v432_v52  ;;  %435 = vst [vmem:[%s1832_s6 + $0x148] sm:$0xff] %v434_v53  ;;  %v436_v54 = vld [vmem:[%s1827_s5 + $0x2a0] sm:$0xff]  ;;  %v438_v55 = vld [vmem:[%s1827_s5 + $0x2b0] sm:$0xff] }
  0x50   : > { %v440_v56 = vld [vmem:[%s1827_s5 + $0x2c0] sm:$0xff]  ;;  %437 = vst [vmem:[%s1832_s6 + $0x150] sm:$0xff] %v436_v54  ;;  %439 = vst [vmem:[%s1832_s6 + $0x158] sm:$0xff] %v438_v55  ;;  %v442_v57 = vld [vmem:[%s1827_s5 + $0x2d0] sm:$0xff] }
  0x51   : > { %441 = vst [vmem:[%s1832_s6 + $0x160] sm:$0xff] %v440_v56  ;;  %v444_v58 = vld [vmem:[%s1827_s5 + $0x2e0] sm:$0xff]  ;;  %v446_v59 = vld [vmem:[%s1827_s5 + $0x2f0] sm:$0xff]  ;;  %443 = vst [vmem:[%s1832_s6 + $0x168] sm:$0xff] %v442_v57 }
  0x52   : > { %445 = vst [vmem:[%s1832_s6 + $0x170] sm:$0xff] %v444_v58  ;;  %447 = vst [vmem:[%s1832_s6 + $0x178] sm:$0xff] %v446_v59 }
  0x53 PF: > { %p1332_p0 = scmp.ge.s32.totalorder %s1689_s22, 1  ;;  %p460_p1 = scmp.lt.s32.totalorder %s1689_s22, 11 }
  0x55   : > { %p461_p2 = pnand %p1332_p0, %p460_p1 }
  0x56   : > { %s467_s0 = sand.u32 (!%p461_p2), 1, %s1665_s16   ;;  %s474_s23 = sand.u32 (!%p461_p2), 1, %s1657_s14  }
  0x57   : > { %464 = sbr.rel (%p461_p2) target bundleno = 425 (0x1a9), region = 88  ;;  %s501_s7 = sand.u32 (!%p461_p2), 1, %s1649_s12  }
  0x58   : > { %s1426_s28 = smul.u32 (!%p461_p2), 72, %s467_s0  ;;  %s1333_s26 = sshll.u32 (!%p461_p2), %s1677_s19, 1 }
  0x59   : > { %s1427_s11 = smul.u32 (!%p461_p2), 384, %s474_s23  ;;  %p509_p3 = scmp.lt.s32.totalorder (!%p461_p2), %s1333_s26, 3 }
  0x5a   : > { %s1428_s27 = smul.u32 (!%p461_p2), 48, %s501_s7  ;;  %s1939_s6 = scalar_lea.vmem (!%p461_p2), [#allocation3], %s1426_s28 }
  0x5b   : > { %s1941_s1 = scalar_lea.vmem (!%p461_p2), [#allocation4], %s1427_s11  ;;  %p1334_p4 = scmp.ne.s32.totalorder (!%p461_p2), %s1673_s18, 0 }
  0x5c   : > { %s1943_s25 = scalar_lea.vmem (!%p461_p2), [#allocation5], %s1428_s27 }
  0x5e   : > { %s2094_s26 = smov (!%p509_p3, %s1333_s26), 3  ;;  %519 = sbr.rel (%p1334_p4) target bundleno = 102 (0x66), region = 100 }
  0x5f   : > { %s511_s5 = scalar_lea.vmem %s2065_s2, %s2094_s26  ;;  %v1691_v60 = vmov (!%p1334_p4), 0.0  }
  0x60   : > { %520 = vst [vmem:[#allocation2] sm:$0xff] (!%p1334_p4), %v1691_v60  ;;  %521 = vst [vmem:[#allocation2 + $0x8] sm:$0xff] (!%p1334_p4), %v1691_v60 }
  0x61   : > { %522 = vst [vmem:[#allocation2 + $0x10] sm:$0xff] (!%p1334_p4), %v1691_v60  ;;  %523 = vst [vmem:[#allocation2 + $0x18] sm:$0xff] (!%p1334_p4), %v1691_v60 }
  0x62   : > { %524 = vst [vmem:[#allocation2 + $0x20] sm:$0xff] (!%p1334_p4), %v1691_v60  ;;  %525 = vst [vmem:[#allocation2 + $0x28] sm:$0xff] (!%p1334_p4), %v1691_v60 }
  0x63   : > { %526 = vst [vmem:[#allocation2 + $0x30] sm:$0xff] (!%p1334_p4), %v1691_v60  ;;  %527 = vst [vmem:[#allocation2 + $0x38] sm:$0xff] (!%p1334_p4), %v1691_v60 }
  0x64   : > { %528 = vst [vmem:[#allocation2 + $0x40] sm:$0xff] (!%p1334_p4), %v1691_v60  ;;  %529 = vst [vmem:[#allocation2 + $0x48] sm:$0xff] (!%p1334_p4), %v1691_v60 }
  0x65   : > { %530 = vst [vmem:[#allocation2 + $0x50] sm:$0xff] %v1691_v60  ;;  %531 = vst [vmem:[#allocation2 + $0x58] sm:$0xff] %v1691_v60 }
  0x66 PF: > { %v1519_v61 = vld [vmem:[%s1941_s1 + $0x4] ss:$8 sps:$4 sm:$0xff]   ;;  %v1521_v62 = vld [vmem:[%s1941_s1] ss:$8 sps:$4 sm:$0xff]   ;;  %v1692_v63 = vmov 0   ;;  %p1392_p5 = scmp.ne.s32.totalorder %s1673_s18, 4 }
  0x67   : > { %987 = vmatprep.mubr.bf16.mxu0 %v1692_v63  ;;  %892 = vmatprep.subr.bf16.mxu1 %v1519_v61  ;;  %v1522_v0 = vld [vmem:[%s1941_s1 + $0x14] ss:$8 sps:$4 sm:$0xff]   ;;  %v1524_v1 = vld [vmem:[%s1941_s1 + $0x10] ss:$8 sps:$4 sm:$0xff]   ;;  %v1525_v2 = vld [vmem:[%s1941_s1 + $0x24] ss:$8 sps:$4 sm:$0xff]  }
  0x68   : > { %893 = vmatpush1.bf16.msra.mxu1 %v1521_v62  ;;  %v1527_v3 = vld [vmem:[%s1941_s1 + $0x20] ss:$8 sps:$4 sm:$0xff]   ;;  %v1528_v4 = vld [vmem:[%s1941_s1 + $0x34] ss:$8 sps:$4 sm:$0xff]   ;;  %v1530_v5 = vld [vmem:[%s1941_s1 + $0x30] ss:$8 sps:$4 sm:$0xff]  }
  0x69   : > { %894 = vmatprep.subr.bf16.mxu1 %v1522_v0  ;;  %v1543_v6 = vld [vmem:[%s1941_s1 + $0x104] ss:$8 sps:$4 sm:$0xff]   ;;  %v1545_v7 = vld [vmem:[%s1941_s1 + $0x100] ss:$8 sps:$4 sm:$0xff]   ;;  %v1549_v9 = vld [vmem:[%s1941_s1 + $0x114] ss:$8 sps:$4 sm:$0xff]  }
  0x6a   : > { %v1531_v8 = vld [vmem:[%s1941_s1 + $0x44] ss:$8 sps:$4 sm:$0xff]   ;;  %955 = vmatprep.subr.bf16.mxu0 %v1543_v6  ;;  %v1551_v10 = vld [vmem:[%s1941_s1 + $0x110] ss:$8 sps:$4 sm:$0xff]   ;;  %v1533_v11 = vld [vmem:[%s1941_s1 + $0x40] ss:$8 sps:$4 sm:$0xff]  }
  0x6b   : > { %956 = vmatpush1.bf16.msra.mxu0 %v1545_v7  ;;  %v1534_v12 = vld [vmem:[%s1941_s1 + $0x54] ss:$8 sps:$4 sm:$0xff]   ;;  %v1555_v13 = vld [vmem:[%s1941_s1 + $0x124] ss:$8 sps:$4 sm:$0xff]   ;;  %v1557_v14 = vld [vmem:[%s1941_s1 + $0x120] ss:$8 sps:$4 sm:$0xff]  }
  0x6c   : > { %895 = vmatpush1.bf16.msra.mxu1 %v1524_v1  ;;  %957 = vmatprep.subr.bf16.mxu0 %v1549_v9  ;;  %v1536_v15 = vld [vmem:[%s1941_s1 + $0x50] ss:$8 sps:$4 sm:$0xff]   ;;  %v1561_v16 = vld [vmem:[%s1941_s1 + $0x134] ss:$8 sps:$4 sm:$0xff]   ;;  %v1537_v17 = vld [vmem:[%s1941_s1 + $0x64] ss:$8 sps:$4 sm:$0xff]  }
  0x6d   : > { %896 = vmatprep.subr.bf16.mxu1 %v1525_v2  ;;  %v1563_v18 = vld [vmem:[%s1941_s1 + $0x130] ss:$8 sps:$4 sm:$0xff]   ;;  %v1539_v19 = vld [vmem:[%s1941_s1 + $0x60] ss:$8 sps:$4 sm:$0xff]   ;;  %v1567_v20 = vld [vmem:[%s1941_s1 + $0x144] ss:$8 sps:$4 sm:$0xff]  }
  0x6e   : > { %v1540_v21 = vld [vmem:[%s1941_s1 + $0x74] ss:$8 sps:$4 sm:$0xff]   ;;  %v1569_v22 = vld [vmem:[%s1941_s1 + $0x140] ss:$8 sps:$4 sm:$0xff]   ;;  %v1542_v23 = vld [vmem:[%s1941_s1 + $0x70] ss:$8 sps:$4 sm:$0xff]  }
  0x6f   : > { %958 = vmatpush1.bf16.msra.mxu0 %v1551_v10  ;;  %v1573_v24 = vld [vmem:[%s1941_s1 + $0x154] ss:$8 sps:$4 sm:$0xff]   ;;  %v1546_v25 = vld [vmem:[%s1941_s1 + $0x84] ss:$8 sps:$4 sm:$0xff]   ;;  %v1575_v26 = vld [vmem:[%s1941_s1 + $0x150] ss:$8 sps:$4 sm:$0xff]  }
  0x70   : > { %897 = vmatpush1.bf16.msra.mxu1 %v1527_v3  ;;  %959 = vmatprep.subr.bf16.mxu0 %v1555_v13  ;;  %v1548_v27 = vld [vmem:[%s1941_s1 + $0x80] ss:$8 sps:$4 sm:$0xff]   ;;  %v1579_v28 = vld [vmem:[%s1941_s1 + $0x164] ss:$8 sps:$4 sm:$0xff]   ;;  %v1552_v29 = vld [vmem:[%s1941_s1 + $0x94] ss:$8 sps:$4 sm:$0xff]  }
  0x71   : > { %898 = vmatprep.subr.bf16.mxu1 %v1528_v4  ;;  %v1554_v30 = vld [vmem:[%s1941_s1 + $0x90] ss:$8 sps:$4 sm:$0xff]   ;;  %v1581_v31 = vld [vmem:[%s1941_s1 + $0x160] ss:$8 sps:$4 sm:$0xff]   ;;  %v1585_v33 = vld [vmem:[%s1941_s1 + $0x174] ss:$8 sps:$4 sm:$0xff]  }
  0x72   : > { %v1594_v32 = vld [vmem:[%s1939_s6 + $0x4] ss:$12 sps:$4 sm:$0xff]   ;;  %v1558_v34 = vld [vmem:[%s1941_s1 + $0xa4] ss:$8 sps:$4 sm:$0xff]   ;;  %v1587_v35 = vld [vmem:[%s1941_s1 + $0x170] ss:$8 sps:$4 sm:$0xff]  }
  0x73   : > { %960 = vmatpush1.bf16.msra.mxu0 %v1557_v14  ;;  %924 = vmatprep.mubr.bf16.mxu1 %v1594_v32  ;;  %v1560_v36 = vld [vmem:[%s1941_s1 + $0xa0] ss:$8 sps:$4 sm:$0xff]   ;;  %v1564_v37 = vld [vmem:[%s1941_s1 + $0xb4] ss:$8 sps:$4 sm:$0xff]   ;;  %v1566_v39 = vld [vmem:[%s1941_s1 + $0xb0] ss:$8 sps:$4 sm:$0xff]  }
  0x74   : > { %899 = vmatpush1.bf16.msra.mxu1 %v1530_v5  ;;  %961 = vmatprep.subr.bf16.mxu0 %v1561_v16  ;;  %v1591_v38 = vld [vmem:[%s1939_s6 + $0x8] ss:$12 sps:$4 sm:$0xff]   ;;  %v1576_v42 = vld [vmem:[%s1941_s1 + $0xd4] ss:$8 sps:$4 sm:$0xff]  }
  0x75   : > { %900 = vmatprep.subr.bf16.mxu1 %v1531_v8  ;;  %v1570_v40 = vld [vmem:[%s1941_s1 + $0xc4] ss:$8 sps:$4 sm:$0xff]   ;;  %v1572_v41 = vld [vmem:[%s1941_s1 + $0xc0] ss:$8 sps:$4 sm:$0xff]   ;;  %v1578_v44 = vld [vmem:[%s1941_s1 + $0xd0] ss:$8 sps:$4 sm:$0xff]  }
  0x76   : > { %v1595_v43 = vld [vmem:[%s1939_s6 + $0x20] ss:$12 sps:$4 sm:$0xff]   ;;  %v1584_v46 = vld [vmem:[%s1941_s1 + $0xe0] ss:$8 sps:$4 sm:$0xff]  }
  0x77   : > { %962 = vmatpush1.bf16.msra.mxu0 %v1563_v18  ;;  %v1582_v45 = vld [vmem:[%s1941_s1 + $0xe4] ss:$8 sps:$4 sm:$0xff]   ;;  %v1588_v47 = vld [vmem:[%s1941_s1 + $0xf4] ss:$8 sps:$4 sm:$0xff]   ;;  %v1590_v49 = vld [vmem:[%s1941_s1 + $0xf0] ss:$8 sps:$4 sm:$0xff]  }
  0x78   : > { %901 = vmatpush1.bf16.msra.mxu1 %v1533_v11  ;;  %963 = vmatprep.subr.bf16.mxu0 %v1567_v20  ;;  %v1599_v48 = vld [vmem:[%s1939_s6 + $0x38] ss:$12 sps:$4 sm:$0xff]   ;;  %v1592_v50 = vld [vmem:[%s1939_s6] ss:$12 sps:$4 sm:$0xff]   ;;  %v1596_v51 = vld [vmem:[%s1939_s6 + $0x1c] ss:$12 sps:$4 sm:$0xff]  }
  0x79   : > { %902 = vmatprep.subr.bf16.mxu1 %v1534_v12  ;;  %v1598_v52 = vld [vmem:[%s1939_s6 + $0x18] ss:$12 sps:$4 sm:$0xff]   ;;  %v1600_v53 = vld [vmem:[%s1939_s6 + $0x34] ss:$12 sps:$4 sm:$0xff]   ;;  %v1602_v54 = vld [vmem:[%s1939_s6 + $0x30] ss:$12 sps:$4 sm:$0xff]  }
  0x7a   : > { %v532_v3 = vld [vmem:[#allocation2] sm:$0xff]  ;;  %v533_v6 = vld [vmem:[#allocation2 + $0x8] sm:$0xff]  ;;  %v534_v9 = vld [vmem:[#allocation2 + $0x10] sm:$0xff] }
  0x7b   : > { %964 = vmatpush1.bf16.msra.mxu0 %v1569_v22  ;;  %v535_v13 = vld [vmem:[#allocation2 + $0x18] sm:$0xff]  ;;  %v537_v22 = vld [vmem:[#allocation2 + $0x28] sm:$0xff] }
  0x7c   : > { %903 = vmatpush1.bf16.msra.mxu1 %v1536_v15  ;;  %965 = vmatprep.subr.bf16.mxu0 %v1573_v24 }
  0x7d   : > { %904 = vmatprep.subr.bf16.mxu1 %v1537_v17 }
  0x7f   : > { %966 = vmatpush1.bf16.msra.mxu0 %v1575_v26 }
  0x80   : > { %905 = vmatpush1.bf16.msra.mxu1 %v1539_v19  ;;  %967 = vmatprep.subr.bf16.mxu0 %v1579_v28  ;;  %v536_v19 = vld [vmem:[#allocation2 + $0x20] sm:$0xff] }
  0x81   : > { %906 = vmatprep.subr.bf16.mxu1 %v1540_v21 }
  0x83   : > { %968 = vmatpush1.bf16.msra.mxu0 %v1581_v31 }
  0x84   : > { %907 = vmatpush1.bf16.msra.mxu1 %v1542_v23  ;;  %969 = vmatprep.subr.bf16.mxu0 %v1585_v33 }
  0x85   : > { %908 = vmatprep.subr.bf16.mxu1 %v1546_v25  ;;  %v538_v25 = vld [vmem:[#allocation2 + $0x30] sm:$0xff] }
  0x87   : > { %970 = vmatpush1.bf16.msra.mxu0 %v1587_v35  ;;  %v540_v35 = vld [vmem:[#allocation2 + $0x40] sm:$0xff] }
  0x88   : > { %909 = vmatpush1.bf16.msra.mxu1 %v1548_v27 }
  0x89   : > { %910 = vmatprep.subr.bf16.mxu1 %v1552_v29  ;;  %v539_v29 = vld [vmem:[#allocation2 + $0x38] sm:$0xff] }
  0x8a   : > { %988 = vmatmul.mubr.bf16.vlgmr.msra.gmra.mrb[0].mxu0 %v1591_v38  ;;  %v541_v38 = vld [vmem:[#allocation2 + $0x48] sm:$0xff] }
  0x8b   : > { %997 = vmatprep.mubr.bf16.mxu0 %v1692_v63 }
  0x8c   : > { %911 = vmatpush1.bf16.msra.mxu1 %v1554_v30 }
  0x8d   : > { %912 = vmatprep.subr.bf16.mxu1 %v1558_v34 }
  0x90   : > { %913 = vmatpush1.bf16.msra.mxu1 %v1560_v36 }
  0x91   : > { %914 = vmatprep.subr.bf16.mxu1 %v1564_v37 }
  0x92   : > { %998 = vmatmul.mubr.bf16.gmra.mrb[4].mxu0 %v1595_v43 }
  0x93   : > { %1007 = vmatprep.mubr.bf16.mxu0 %v1692_v63 }
  0x94   : > { %915 = vmatpush1.bf16.msra.mxu1 %v1566_v39 }
  0x95   : > { %916 = vmatprep.subr.bf16.mxu1 %v1570_v40 }
  0x98   : > { %917 = vmatpush1.bf16.msra.mxu1 %v1572_v41  ;;  %v542_v41 = vld [vmem:[#allocation2 + $0x50] sm:$0xff] }
  0x99   : > { %918 = vmatprep.subr.bf16.mxu1 %v1576_v42 }
  0x9a   : > { %1008 = vmatmul.mubr.bf16.gmra.mrb[8].mxu0 %v1599_v48 }
  0x9c   : > { %919 = vmatpush1.bf16.msra.mxu1 %v1578_v44 }
  0x9d   : > { %920 = vmatprep.subr.bf16.mxu1 %v1582_v45  ;;  %v543_v45 = vld [vmem:[#allocation2 + $0x58] sm:$0xff] }
  0xa0   : > { %921 = vmatpush1.bf16.msra.mxu1 %v1584_v46 }
  0xa1   : > { %922 = vmatprep.subr.bf16.mxu1 %v1588_v47 }
  0xa4   : > { %923 = vmatpush1.bf16.msra.mxu1 %v1590_v49 }
  0xa7   : > { %925 = vmatmul.mubr.bf16.vlgmr.msra.gmra.mrb[0].mxu1 %v1592_v50 }
  0xa8   : > { %934 = vmatprep.mubr.bf16.mxu1 %v1596_v51  ;;  %v1060_v51 = vlaneseq (!%p1392_p5) }
  0xaf   : > { %935 = vmatmul.mubr.bf16.gmra.mrb[4].mxu1 %v1598_v52  ;;  %v1061_v52 = vshrl.u32 (!%p1392_p5), %v1060_v51, 7 }
  0xb0   : > { %944 = vmatprep.mubr.bf16.mxu1 %v1600_v53  ;;  %v1058_v53 = vld [vmem:[%s511_s5] sm:$0x3] (!%p1392_p5) }
  0xb7   : > { %945 = vmatmul.mubr.bf16.gmra.mrb[8].mxu1 %v1602_v54 }
 0x15d   : > { %v989_v55 = vpop.f32.mrb[0].mxu0 }
 0x15e   : > { %v991_v56 = vpop.f32.mrb[1].mxu0 }
 0x15f   : > { %v993_v57 = vpop.f32.mrb[2].mxu0 }
 0x160   : > { %v995_v58 = vpop.f32.mrb[3].mxu0 }
 0x165   : > { %v999_v59 = vpop.f32.mrb[4].mxu0 }
 0x166   : > { %v1001_v60 = vpop.f32.mrb[5].mxu0 }
 0x167   : > { %v1003_v61 = vpop.f32.mrb[6].mxu0 }
 0x168   : > { %v1005_v62 = vpop.f32.mrb[7].mxu0 }
 0x16d   : > { %v1009_v63 = vpop.f32.mrb[8].mxu0 }
 0x16e   : > { %v1011_v0 = vpop.f32.mrb[9].mxu0 }
 0x16f   : > { %v1013_v1 = vpop.f32.mrb[10].mxu0 }
 0x170   : > { %v1015_v2 = vpop.f32.mrb[11].mxu0 }
 0x17a   : > { %v926_v4 = vpop.f32.mrb[0].mxu1 }
 0x17b   : > { %v990_v5 = vadd.f32 %v989_v55, %v926_v4  ;;  %v928_v7 = vpop.f32.mrb[1].mxu1 }
 0x17c   : > { %v992_v8 = vadd.f32 %v991_v56, %v928_v7  ;;  %v930_v10 = vpop.f32.mrb[2].mxu1  ;;  %v1062_v56 = vsub.s32 (!%p1392_p5), 0, %v1061_v52 }
 0x17d   : > { %v1018_v11 = vadd.f32 %v990_v5, %v532_v3  ;;  %v994_v12 = vadd.f32 %v993_v57, %v930_v10  ;;  %v932_v14 = vpop.f32.mrb[3].mxu1  ;;  %v1066_v57 = vsub.s32 (!%p1392_p5), 1, %v1061_v52 }
 0x17e   : > { %v1019_v15 = vadd.f32 %v992_v8, %v533_v6  ;;  %v996_v16 = vadd.f32 %v995_v58, %v932_v14 }
 0x17f   : > { %1030 = vst [vmem:[#allocation2] sm:$0xff] %v1018_v11  ;;  %v1020_v17 = vadd.f32 %v994_v12, %v534_v9 }
 0x180   : > { %1031 = vst [vmem:[#allocation2 + $0x8] sm:$0xff] %v1019_v15  ;;  %v1021_v18 = vadd.f32 %v996_v16, %v535_v13 }
 0x181   : > { %1032 = vst [vmem:[#allocation2 + $0x10] sm:$0xff] %v1020_v17 }
 0x182   : > { %1033 = vst [vmem:[#allocation2 + $0x18] sm:$0xff] %v1021_v18  ;;  %v936_v20 = vpop.f32.mrb[4].mxu1 }
 0x183   : > { %v1000_v21 = vadd.f32 %v999_v59, %v936_v20  ;;  %v938_v23 = vpop.f32.mrb[5].mxu1 }
 0x184   : > { %v1002_v24 = vadd.f32 %v1001_v60, %v938_v23  ;;  %v940_v26 = vpop.f32.mrb[6].mxu1 }
 0x185   : > { %v1022_v27 = vadd.f32 %v1000_v21, %v536_v19  ;;  %v1004_v28 = vadd.f32 %v1003_v61, %v940_v26  ;;  %v942_v30 = vpop.f32.mrb[7].mxu1  ;;  %v1063_v61 = vrot.slane (!%p1392_p5), %v1058_v53, %v1062_v56 }
 0x186   : > { %v1023_v31 = vadd.f32 %v1002_v24, %v537_v22  ;;  %v1006_v32 = vadd.f32 %v1005_v62, %v942_v30  ;;  %v1046_v54 = vld [vmem:[#allocation2] sm:$0xff] (!%p1392_p5)  ;;  %v1067_v62 = vrot.slane (!%p1392_p5), %v1058_v53, %v1066_v57 }
 0x187   : > { %1034 = vst [vmem:[#allocation2 + $0x20] sm:$0xff] %v1022_v27  ;;  %v1024_v33 = vadd.f32 %v1004_v28, %v538_v25  ;;  %v1047_v55 = vld [vmem:[#allocation2 + $0x8] sm:$0xff] (!%p1392_p5) }
 0x188   : > { %1035 = vst [vmem:[#allocation2 + $0x28] sm:$0xff] %v1023_v31  ;;  %v1025_v34 = vadd.f32 %v1006_v32, %v539_v29  ;;  %v1048_v58 = vld [vmem:[#allocation2 + $0x10] sm:$0xff] (!%p1392_p5)  ;;  %v1071_v3 = vadd.f32 (!%p1392_p5), %v1067_v62, %v1047_v55 }
 0x189   : > { %1036 = vst [vmem:[#allocation2 + $0x30] sm:$0xff] %v1024_v33  ;;  %v1049_v59 = vld [vmem:[#allocation2 + $0x18] sm:$0xff] (!%p1392_p5)  ;;  %v1072_v4 = vadd.f32 (!%p1392_p5), %v1063_v61, %v1048_v58 }
 0x18a   : > { %1037 = vst [vmem:[#allocation2 + $0x38] sm:$0xff] %v1025_v34  ;;  %v946_v36 = vpop.f32.mrb[8].mxu1  ;;  %v1073_v5 = vadd.f32 (!%p1392_p5), %v1067_v62, %v1049_v59  ;;  %v1083_v13 = vmax.f32 (!%p1392_p5), %v1071_v3, 0.0 }
 0x18b   : > { %v1010_v37 = vadd.f32 %v1009_v63, %v946_v36  ;;  %v948_v39 = vpop.f32.mrb[9].mxu1  ;;  %v1084_v14 = vmax.f32 (!%p1392_p5), %v1072_v4, 0.0 }
 0x18c   : > { %v1012_v40 = vadd.f32 %v1011_v0, %v948_v39  ;;  %v950_v42 = vpop.f32.mrb[10].mxu1  ;;  %1045 = sbr.rel (%p1392_p5) target bundleno = 417 (0x1a1), region = 104  ;;  %v1085_v15 = vmax.f32 (!%p1392_p5), %v1073_v5, 0.0 }
 0x18d   : > { %v1026_v43 = vadd.f32 %v1010_v37, %v540_v35  ;;  %v1014_v44 = vadd.f32 %v1013_v1, %v950_v42  ;;  %v952_v46 = vpop.f32.mrb[11].mxu1 }
 0x18e   : > { %v1027_v47 = vadd.f32 %v1012_v40, %v541_v38  ;;  %v1016_v48 = vadd.f32 %v1015_v2, %v952_v46  ;;  %v1050_v60 = vld [vmem:[#allocation2 + $0x20] sm:$0xff] (!%p1392_p5)  ;;  %v1070_v2 = vadd.f32 (!%p1392_p5), %v1063_v61, %v1046_v54  ;;  %v1406_v23 = vpack.c.bf16 (!%p1392_p5), %v1085_v15, %v1084_v14 }
 0x18f   : > { %1038 = vst [vmem:[#allocation2 + $0x40] sm:$0xff] %v1026_v43  ;;  %v1028_v49 = vadd.f32 %v1014_v44, %v542_v41  ;;  %v1051_v63 = vld [vmem:[#allocation2 + $0x28] sm:$0xff] (!%p1392_p5)  ;;  %v1074_v6 = vadd.f32 (!%p1392_p5), %v1063_v61, %v1050_v60 }
 0x190   : > { %1039 = vst [vmem:[#allocation2 + $0x48] sm:$0xff] %v1027_v47  ;;  %v1029_v50 = vadd.f32 %v1016_v48, %v543_v45  ;;  %v1052_v0 = vld [vmem:[#allocation2 + $0x30] sm:$0xff] (!%p1392_p5)  ;;  %v1075_v7 = vadd.f32 (!%p1392_p5), %v1067_v62, %v1051_v63  ;;  %v1082_v12 = vmax.f32 (!%p1392_p5), %v1070_v2, 0.0  ;;  %1131 = vst [vmem:[%s1943_s25 + $0x8] sm:$0xff] (!%p1392_p5), %v1406_v23 }
 0x191   : > { %1040 = vst [vmem:[#allocation2 + $0x50] sm:$0xff] %v1028_v49  ;;  %v1053_v1 = vld [vmem:[#allocation2 + $0x38] sm:$0xff] (!%p1392_p5)  ;;  %v1076_v8 = vadd.f32 (!%p1392_p5), %v1063_v61, %v1052_v0  ;;  %v1086_v18 = vmax.f32 (!%p1392_p5), %v1074_v6, 0.0 }
 0x192   : > { %1041 = vst [vmem:[#allocation2 + $0x58] sm:$0xff] %v1029_v50  ;;  %v1077_v9 = vadd.f32 (!%p1392_p5), %v1067_v62, %v1053_v1  ;;  %v1087_v19 = vmax.f32 (!%p1392_p5), %v1075_v7, 0.0  ;;  %v1405_v22 = vpack.c.bf16 (!%p1392_p5), %v1083_v13, %v1082_v12 }
 0x193   : > { %v1088_v20 = vmax.f32 %v1076_v8, 0.0 }
 0x194   : > { %v1089_v21 = vmax.f32 %v1077_v9, 0.0  ;;  %v1407_v26 = vpack.c.bf16 %v1087_v19, %v1086_v18  ;;  %1130 = vst [vmem:[%s1943_s25] sm:$0xff] %v1405_v22 }
 0x196   : > { %v1054_v10 = vld [vmem:[#allocation2 + $0x40] sm:$0xff]  ;;  %v1408_v27 = vpack.c.bf16 %v1089_v21, %v1088_v20  ;;  %1132 = vst [vmem:[%s1943_s25 + $0x10] sm:$0xff] %v1407_v26 }
 0x197   : > { %v1055_v11 = vld [vmem:[#allocation2 + $0x48] sm:$0xff]  ;;  %v1078_v24 = vadd.f32 %v1063_v61, %v1054_v10 }
 0x198   : > { %v1056_v16 = vld [vmem:[#allocation2 + $0x50] sm:$0xff]  ;;  %v1079_v25 = vadd.f32 %v1067_v62, %v1055_v11  ;;  %1133 = vst [vmem:[%s1943_s25 + $0x18] sm:$0xff] %v1408_v27 }
 0x199   : > { %v1057_v17 = vld [vmem:[#allocation2 + $0x58] sm:$0xff]  ;;  %v1080_v28 = vadd.f32 %v1063_v61, %v1056_v16  ;;  %v1090_v30 = vmax.f32 %v1078_v24, 0.0 }
 0x19a   : > { %v1081_v29 = vadd.f32 %v1067_v62, %v1057_v17  ;;  %v1091_v31 = vmax.f32 %v1079_v25, 0.0 }
 0x19b   : > { %v1092_v32 = vmax.f32 %v1080_v28, 0.0 }
 0x19c   : > { %v1093_v33 = vmax.f32 %v1081_v29, 0.0  ;;  %v1409_v34 = vpack.c.bf16 %v1091_v31, %v1090_v30 }
 0x19e   : > { %v1410_v35 = vpack.c.bf16 %v1093_v33, %v1092_v32  ;;  %1134 = vst [vmem:[%s1943_s25 + $0x20] sm:$0xff] %v1409_v34 }
 0x1a0   : > { %1135 = vst [vmem:[%s1943_s25 + $0x28] sm:$0xff] %v1410_v35 }
 0x1a1 PF: > { %1142 = sbr.rel (!%p1807_p12) target bundleno = 425 (0x1a9), region = 108  ;;  %s1411_s14 = sshll.u32 (%p1807_p12), %s1677_s19, 3  ;;  %v1186_v36 = vld [vmem:[%s1943_s25] sm:$0xff] (%p1807_p12)  ;;  %v1190_v38 = vld [vmem:[%s1943_s25 + $0x10] sm:$0xff] (%p1807_p12)  ;;  %v1192_v39 = vld [vmem:[%s1943_s25 + $0x18] sm:$0xff] (%p1807_p12) }
 0x1a2   : > { %s1148_s0 = scalar_lea.vmem (%p1807_p12), %s2066_s3, %s1411_s14 }
 0x1a3   : > { %1187 = vst [vmem:[%s1148_s0] sm:$0xff] (%p1807_p12), %v1186_v36  ;;  %1191 = vst [vmem:[%s1148_s0 + $0x20] sm:$0xff] (%p1807_p12), %v1190_v38 }
 0x1a4   : > { %1193 = vst [vmem:[%s1148_s0 + $0x30] sm:$0xff] (%p1807_p12), %v1192_v39 }
 0x1a5   : > { %v1188_v37 = vld [vmem:[%s1943_s25 + $0x8] sm:$0xff] (%p1807_p12)  ;;  %v1194_v40 = vld [vmem:[%s1943_s25 + $0x20] sm:$0xff] (%p1807_p12) }
 0x1a6   : > { %1189 = vst [vmem:[%s1148_s0 + $0x10] sm:$0xff] (%p1807_p12), %v1188_v37  ;;  %1195 = vst [vmem:[%s1148_s0 + $0x40] sm:$0xff] (%p1807_p12), %v1194_v40 }
 0x1a7   : > { %v1196_v41 = vld [vmem:[%s1943_s25 + $0x28] sm:$0xff] (%p1807_p12) }
 0x1a8   : > { %1197 = vst [vmem:[%s1148_s0 + $0x50] sm:$0xff] %v1196_v41 }
 0x1a9 PF: > { %s13_s22 = sadd.s32 1, %s1689_s22   ;;  %s2076_s25 = sld [smem:[#allocation6_spill]] }
 0x1aa   : > { %p10_p6 = scmp.ge.s32.totalorder %s13_s22, 12   ;;  %s2077_s12 = smov %s1653_s13 }
 0x1ab   : > { %s2078_s13 = smov %s1805_s9  ;;  %s2079_s14 = smov %s1661_s15 }
 0x1ac   : > { %s2080_s15 = smov %s1802_s8  ;;  %s2081_s16 = smov %s1669_s17 }
 0x1ad   : > { %s2082_s17 = smov %s1788_s30  ;;  %s2083_s18 = smov %s1681_s20 }
 0x1ae   : > { %s2084_s19 = smov %s1685_s21  ;;  %s2085_s20 = smov %s2088_s24 }
 0x1af   : > { %s2086_s21 = smov %s2076_s25  ;;  %12 = sbr.rel (!%p10_p6) target bundleno = 9 (0x9), region = 194 }

// kernel: alexnet_forward.17
= control target key start
LH: loop header
LB: loop body
LE: loop exit
PB: predicated region body
PF: predicated region fallthrough
CT: control target
= control target key end

     0   :  { %s1500_s12 = smov 0   ;;  %s1502_s13 = smov 0   ;;  %s1668_s0 = inlined_call_operand.vmem [shape: bf16[48,3584], index: 0, kind: input, shape index: {}]   ;;  %s1669_s1 = inlined_call_operand.vmem [shape: bf16[3584,256], index: 1, kind: input, shape index: {}]   ;;  %s1670_s2 = inlined_call_operand.vmem [shape: f32[1,256], index: 2, kind: input, shape index: {}]   ;;  %s1671_s3 = inlined_call_operand.vmem [shape: bf16[48,256], index: 3, kind: output, shape index: {}]  }
   0x1   :  { %s1504_s14 = smov 0   ;;  %s1506_s15 = smov 0  }
   0x2   :  { %s1508_s16 = smov 0  }
   0x3 LB: > { %s25_s17 = sadd.s32 1, %s1473_s15  ;;  %p48_p1 = scmp.ne.s32.totalorder %s1465_s13, %s1461_s12  ;;  %s1477_s16 = sphi %s1508_s16, %s13_s16   ;;  %s1473_s15 = sphi %s1506_s15, %s1675_s15   ;;  %s1469_s14 = sphi %s1504_s14, %s1674_s14   ;;  %s1465_s13 = sphi %s1502_s13, %s1673_s13   ;;  %s1461_s12 = sphi %s1500_s12, %s1672_s12  }
   0x4   : > { %p26_p0 = scmp.ge.s32.totalorder %s25_s17, 7  ;;  %p49_p2 = scmp.eq.s32.totalorder %s1477_s16, 0 }
   0x5   : > { %s41_s19 = sadd.s32 1, %s1465_s13  ;;  %p1167_p5 = scmp.ge.s32.totalorder %s1477_s16, 7 }
   0x6   : > { %s1677_s17 = smov (%p26_p0, %s25_s17), 0  ;;  %p50_p3 = por %p49_p2, %p48_p1 }
   0x7   : > { %s37_s18 = ssub.s32 %s1473_s15, %s1677_s17  ;;  %164 = sbr.rel (%p1167_p5) target bundleno = 25 (0x19), region = 20 }
   0x8   : > { %p39_p4 = scmp.eq.s32.totalorder %s37_s18, 0 }
   0xa   : > { %s1535_s20 = scalar_select %p39_p4, %s1465_s13, %s41_s19  }
   0xe   : > { %167 = sbr.rel (!%p50_p3) target bundleno = 25 (0x19), region = 24  ;;  %s169_s21 = sand.u32 (%p50_p3), 1, %s1465_s13  }
   0xf   : > { %s1262_s22 = sshll.u32 (%p50_p3), %s1473_s15, 4  ;;  %s1282_s23 = smul.u32 (%p50_p3), 96, %s169_s21 }
  0x10   : > { %s177_s26 = scalar_lea.vmem (%p50_p3), %s1668_s0, %s1262_s22 }
  0x11   : > { %v190_v0 = vld [vmem:[%s177_s26] sm:$0xff] (%p50_p3)  ;;  %v192_v1 = vld [vmem:[%s177_s26 + $0x8] sm:$0xff] (%p50_p3)  ;;  %v194_v2 = vld [vmem:[%s177_s26 + $0x70] sm:$0xff] (%p50_p3)  ;;  %s171_s27 = scalar_lea.vmem (%p50_p3), [#allocation3], %s1282_s23 }
  0x12   : > { %v196_v3 = vld [vmem:[%s177_s26 + $0x78] sm:$0xff] (%p50_p3)  ;;  %v198_v4 = vld [vmem:[%s177_s26 + $0xe0] sm:$0xff] (%p50_p3)  ;;  %v200_v5 = vld [vmem:[%s177_s26 + $0xe8] sm:$0xff] (%p50_p3)  ;;  %191 = vst [vmem:[%s171_s27] sm:$0xff] (%p50_p3), %v190_v0 }
  0x13   : > { %193 = vst [vmem:[%s171_s27 + $0x8] sm:$0xff] (%p50_p3), %v192_v1  ;;  %195 = vst [vmem:[%s171_s27 + $0x10] sm:$0xff] (%p50_p3), %v194_v2  ;;  %v202_v6 = vld [vmem:[%s177_s26 + $0x150] sm:$0xff] (%p50_p3)  ;;  %v204_v7 = vld [vmem:[%s177_s26 + $0x158] sm:$0xff] (%p50_p3) }
  0x14   : > { %197 = vst [vmem:[%s171_s27 + $0x18] sm:$0xff] (%p50_p3), %v196_v3  ;;  %199 = vst [vmem:[%s171_s27 + $0x20] sm:$0xff] (%p50_p3), %v198_v4  ;;  %v206_v8 = vld [vmem:[%s177_s26 + $0x1c0] sm:$0xff] (%p50_p3)  ;;  %v208_v9 = vld [vmem:[%s177_s26 + $0x1c8] sm:$0xff] (%p50_p3) }
  0x15   : > { %201 = vst [vmem:[%s171_s27 + $0x28] sm:$0xff] %v200_v5  ;;  %203 = vst [vmem:[%s171_s27 + $0x30] sm:$0xff] %v202_v6  ;;  %v210_v10 = vld [vmem:[%s177_s26 + $0x230] sm:$0xff]  ;;  %v212_v11 = vld [vmem:[%s177_s26 + $0x238] sm:$0xff] }
  0x16   : > { %205 = vst [vmem:[%s171_s27 + $0x38] sm:$0xff] %v204_v7  ;;  %207 = vst [vmem:[%s171_s27 + $0x40] sm:$0xff] %v206_v8 }
  0x17   : > { %209 = vst [vmem:[%s171_s27 + $0x48] sm:$0xff] %v208_v9  ;;  %211 = vst [vmem:[%s171_s27 + $0x50] sm:$0xff] %v210_v10 }
  0x18   : > { %213 = vst [vmem:[%s171_s27 + $0x58] sm:$0xff] %v212_v11 }
  0x19 PF: > { %p1170_p6 = scmp.ge.s32.totalorder %s1477_s16, 1  ;;  %p233_p7 = scmp.lt.s32.totalorder %s1477_s16, 8 }
  0x1b   : > { %p234_p8 = pnand %p1170_p6, %p233_p7 }
  0x1c   : > { %s240_s28 = sand.u32 (!%p234_p8), 1, %s1461_s12   ;;  %s1171_s29 = sshll.u32 (!%p234_p8), %s1469_s14, 6 }
  0x1d   : > { %237 = sbr.rel (%p234_p8) target bundleno = 360 (0x168), region = 51  ;;  %p286_p9 = scmp.lt.s32.totalorder (!%p234_p8), %s1171_s29, 447 }
  0x1e   : > { %s1283_s30 = smul.u32 (!%p234_p8), 96, %s240_s28  ;;  %p1174_p10 = scmp.ne.s32.totalorder (!%p234_p8), %s1469_s14, 0 }
  0x20   : > { %s1552_s8 = scalar_lea.vmem (!%p234_p8), [#allocation3], %s1283_s30 }
  0x24   : > { %s1679_s29 = smov (!%p286_p9, %s1171_s29), 447  ;;  %316 = sbr.rel (%p1174_p10) target bundleno = 44 (0x2c), region = 59 }
  0x25   : > { %s1263_s4 = sshll.u32 %s1679_s29, 3  ;;  %v1479_v12 = vmov (!%p1174_p10), 0.0  }
  0x26   : > { %s1550_s7 = scalar_lea.vmem %s1669_s1, %s1263_s4  ;;  %317 = vst [vmem:[#allocation2] sm:$0xff] (!%p1174_p10), %v1479_v12  ;;  %318 = vst [vmem:[#allocation2 + $0x8] sm:$0xff] (!%p1174_p10), %v1479_v12 }
  0x27   : > { %319 = vst [vmem:[#allocation2 + $0x10] sm:$0xff] (!%p1174_p10), %v1479_v12  ;;  %320 = vst [vmem:[#allocation2 + $0x18] sm:$0xff] (!%p1174_p10), %v1479_v12 }
  0x28   : > { %321 = vst [vmem:[#allocation2 + $0x20] sm:$0xff] (!%p1174_p10), %v1479_v12  ;;  %322 = vst [vmem:[#allocation2 + $0x28] sm:$0xff] (!%p1174_p10), %v1479_v12 }
  0x29   : > { %323 = vst [vmem:[#allocation2 + $0x30] sm:$0xff] (!%p1174_p10), %v1479_v12  ;;  %324 = vst [vmem:[#allocation2 + $0x38] sm:$0xff] (!%p1174_p10), %v1479_v12 }
  0x2a   : > { %325 = vst [vmem:[#allocation2 + $0x40] sm:$0xff] (!%p1174_p10), %v1479_v12  ;;  %326 = vst [vmem:[#allocation2 + $0x48] sm:$0xff] (!%p1174_p10), %v1479_v12 }
  0x2b   : > { %327 = vst [vmem:[#allocation2 + $0x50] sm:$0xff] %v1479_v12  ;;  %328 = vst [vmem:[#allocation2 + $0x58] sm:$0xff] %v1479_v12 }
  0x2c PF: > { %v1325_v13 = vld [vmem:[%s1550_s7 + $0x4] ss:$8 sps:$4 sm:$0xff]   ;;  %v1329_v15 = vld [vmem:[%s1550_s7] ss:$8 sps:$4 sm:$0xff]   ;;  %v1331_v17 = vld [vmem:[%s1550_s7 + $0x14] ss:$8 sps:$4 sm:$0xff]  }
  0x2d   : > { %v1327_v14 = vld [vmem:[%s1550_s7 + $0x104] ss:$8 sps:$4 sm:$0xff]   ;;  %797 = vmatprep.subr.bf16.mxu1 %v1325_v13  ;;  %v1330_v16 = vld [vmem:[%s1550_s7 + $0x100] ss:$8 sps:$4 sm:$0xff]   ;;  %v1333_v18 = vld [vmem:[%s1550_s7 + $0x114] ss:$8 sps:$4 sm:$0xff]  }
  0x2e   : > { %860 = vmatprep.subr.bf16.mxu0 %v1327_v14  ;;  %798 = vmatpush1.bf16.msra.mxu1 %v1329_v15  ;;  %v1335_v19 = vld [vmem:[%s1550_s7 + $0x10] ss:$8 sps:$4 sm:$0xff]   ;;  %v1337_v21 = vld [vmem:[%s1550_s7 + $0x24] ss:$8 sps:$4 sm:$0xff]   ;;  %v1341_v23 = vld [vmem:[%s1550_s7 + $0x20] ss:$8 sps:$4 sm:$0xff]  }
  0x2f   : > { %861 = vmatpush1.bf16.msra.mxu0 %v1330_v16  ;;  %799 = vmatprep.subr.bf16.mxu1 %v1331_v17  ;;  %v1336_v20 = vld [vmem:[%s1550_s7 + $0x110] ss:$8 sps:$4 sm:$0xff]   ;;  %v1339_v22 = vld [vmem:[%s1550_s7 + $0x124] ss:$8 sps:$4 sm:$0xff]   ;;  %v1342_v24 = vld [vmem:[%s1550_s7 + $0x120] ss:$8 sps:$4 sm:$0xff]  }
  0x30   : > { %862 = vmatprep.subr.bf16.mxu0 %v1333_v18  ;;  %v1343_v25 = vld [vmem:[%s1550_s7 + $0x34] ss:$8 sps:$4 sm:$0xff]   ;;  %v1347_v27 = vld [vmem:[%s1550_s7 + $0x30] ss:$8 sps:$4 sm:$0xff]   ;;  %v1349_v29 = vld [vmem:[%s1550_s7 + $0x44] ss:$8 sps:$4 sm:$0xff]  }
  0x31   : > { %v1345_v26 = vld [vmem:[%s1550_s7 + $0x134] ss:$8 sps:$4 sm:$0xff]   ;;  %v1348_v28 = vld [vmem:[%s1550_s7 + $0x130] ss:$8 sps:$4 sm:$0xff]   ;;  %v1351_v30 = vld [vmem:[%s1550_s7 + $0x144] ss:$8 sps:$4 sm:$0xff]  }
  0x32   : > { %800 = vmatpush1.bf16.msra.mxu1 %v1335_v19  ;;  %v1353_v31 = vld [vmem:[%s1550_s7 + $0x40] ss:$8 sps:$4 sm:$0xff]   ;;  %v1355_v33 = vld [vmem:[%s1550_s7 + $0x54] ss:$8 sps:$4 sm:$0xff]   ;;  %v1359_v35 = vld [vmem:[%s1550_s7 + $0x50] ss:$8 sps:$4 sm:$0xff]  }
  0x33   : > { %863 = vmatpush1.bf16.msra.mxu0 %v1336_v20  ;;  %801 = vmatprep.subr.bf16.mxu1 %v1337_v21  ;;  %v1354_v32 = vld [vmem:[%s1550_s7 + $0x140] ss:$8 sps:$4 sm:$0xff]   ;;  %v1357_v34 = vld [vmem:[%s1550_s7 + $0x154] ss:$8 sps:$4 sm:$0xff]   ;;  %v1360_v36 = vld [vmem:[%s1550_s7 + $0x150] ss:$8 sps:$4 sm:$0xff]  }
  0x34   : > { %864 = vmatprep.subr.bf16.mxu0 %v1339_v22  ;;  %v1361_v37 = vld [vmem:[%s1550_s7 + $0x64] ss:$8 sps:$4 sm:$0xff]   ;;  %v1365_v39 = vld [vmem:[%s1550_s7 + $0x60] ss:$8 sps:$4 sm:$0xff]   ;;  %v1367_v41 = vld [vmem:[%s1550_s7 + $0x74] ss:$8 sps:$4 sm:$0xff]  }
  0x35   : > { %v1363_v38 = vld [vmem:[%s1550_s7 + $0x164] ss:$8 sps:$4 sm:$0xff]   ;;  %v1366_v40 = vld [vmem:[%s1550_s7 + $0x160] ss:$8 sps:$4 sm:$0xff]   ;;  %v1369_v42 = vld [vmem:[%s1550_s7 + $0x174] ss:$8 sps:$4 sm:$0xff]  }
  0x36   : > { %802 = vmatpush1.bf16.msra.mxu1 %v1341_v23  ;;  %v1371_v43 = vld [vmem:[%s1550_s7 + $0x70] ss:$8 sps:$4 sm:$0xff]   ;;  %v1373_v45 = vld [vmem:[%s1550_s7 + $0x84] ss:$8 sps:$4 sm:$0xff]   ;;  %v1377_v47 = vld [vmem:[%s1550_s7 + $0x80] ss:$8 sps:$4 sm:$0xff]  }
  0x37   : > { %865 = vmatpush1.bf16.msra.mxu0 %v1342_v24  ;;  %803 = vmatprep.subr.bf16.mxu1 %v1343_v25  ;;  %v1372_v44 = vld [vmem:[%s1550_s7 + $0x170] ss:$8 sps:$4 sm:$0xff]   ;;  %v1375_v46 = vld [vmem:[%s1550_s7 + $0x184] ss:$8 sps:$4 sm:$0xff]   ;;  %v1378_v48 = vld [vmem:[%s1550_s7 + $0x180] ss:$8 sps:$4 sm:$0xff]  }
  0x38   : > { %866 = vmatprep.subr.bf16.mxu0 %v1345_v26  ;;  %v1379_v49 = vld [vmem:[%s1550_s7 + $0x94] ss:$8 sps:$4 sm:$0xff]   ;;  %v1383_v51 = vld [vmem:[%s1550_s7 + $0x90] ss:$8 sps:$4 sm:$0xff]   ;;  %v1385_v53 = vld [vmem:[%s1550_s7 + $0xa4] ss:$8 sps:$4 sm:$0xff]  }
  0x39   : > { %v1381_v50 = vld [vmem:[%s1550_s7 + $0x194] ss:$8 sps:$4 sm:$0xff]   ;;  %v1384_v52 = vld [vmem:[%s1550_s7 + $0x190] ss:$8 sps:$4 sm:$0xff]   ;;  %v1387_v54 = vld [vmem:[%s1550_s7 + $0x1a4] ss:$8 sps:$4 sm:$0xff]  }
  0x3a   : > { %804 = vmatpush1.bf16.msra.mxu1 %v1347_v27  ;;  %v1389_v55 = vld [vmem:[%s1550_s7 + $0xa0] ss:$8 sps:$4 sm:$0xff]   ;;  %v1391_v57 = vld [vmem:[%s1550_s7 + $0xb4] ss:$8 sps:$4 sm:$0xff]   ;;  %v1395_v59 = vld [vmem:[%s1550_s7 + $0xb0] ss:$8 sps:$4 sm:$0xff]  }
  0x3b   : > { %867 = vmatpush1.bf16.msra.mxu0 %v1348_v28  ;;  %805 = vmatprep.subr.bf16.mxu1 %v1349_v29  ;;  %v1390_v56 = vld [vmem:[%s1550_s7 + $0x1a0] ss:$8 sps:$4 sm:$0xff]   ;;  %v1393_v58 = vld [vmem:[%s1550_s7 + $0x1b4] ss:$8 sps:$4 sm:$0xff]   ;;  %v1396_v60 = vld [vmem:[%s1550_s7 + $0x1b0] ss:$8 sps:$4 sm:$0xff]  }
  0x3c   : > { %868 = vmatprep.subr.bf16.mxu0 %v1351_v30  ;;  %v1397_v61 = vld [vmem:[%s1550_s7 + $0xc4] ss:$8 sps:$4 sm:$0xff]   ;;  %v1401_v1 = vld [vmem:[%s1550_s7 + $0xc0] ss:$8 sps:$4 sm:$0xff]   ;;  %v1403_v3 = vld [vmem:[%s1550_s7 + $0xd4] ss:$8 sps:$4 sm:$0xff]  }
  0x3d   : > { %v1423_v62 = vld [vmem:[%s1552_s8 + $0x4] ss:$16 sps:$4 sm:$0xff]   ;;  %v1426_v0 = vld [vmem:[%s1552_s8 + $0xc] ss:$16 sps:$4 sm:$0xff]   ;;  %v1402_v2 = vld [vmem:[%s1550_s7 + $0x1c0] ss:$8 sps:$4 sm:$0xff]  }
  0x3e   : > { %806 = vmatpush1.bf16.msra.mxu1 %v1353_v31  ;;  %v1399_v63 = vld [vmem:[%s1550_s7 + $0x1c4] ss:$8 sps:$4 sm:$0xff]   ;;  %829 = vmatprep.mubr.bf16.mxu1 %v1423_v62  ;;  %v1405_v4 = vld [vmem:[%s1550_s7 + $0x1d4] ss:$8 sps:$4 sm:$0xff]   ;;  %v1407_v5 = vld [vmem:[%s1550_s7 + $0xd0] ss:$8 sps:$4 sm:$0xff]  }
  0x3f   : > { %869 = vmatpush1.bf16.msra.mxu0 %v1354_v32  ;;  %807 = vmatprep.subr.bf16.mxu1 %v1355_v33  ;;  %v1408_v6 = vld [vmem:[%s1550_s7 + $0x1d0] ss:$8 sps:$4 sm:$0xff]   ;;  %v1409_v7 = vld [vmem:[%s1550_s7 + $0xe4] ss:$8 sps:$4 sm:$0xff]   ;;  %v1413_v9 = vld [vmem:[%s1550_s7 + $0xe0] ss:$8 sps:$4 sm:$0xff]  }
  0x40   : > { %870 = vmatprep.subr.bf16.mxu0 %v1357_v34  ;;  %892 = vmatprep.mubr.bf16.mxu0 %v1426_v0  ;;  %v1411_v8 = vld [vmem:[%s1550_s7 + $0x1e4] ss:$8 sps:$4 sm:$0xff]   ;;  %v1414_v10 = vld [vmem:[%s1550_s7 + $0x1e0] ss:$8 sps:$4 sm:$0xff]   ;;  %v1415_v11 = vld [vmem:[%s1550_s7 + $0xf4] ss:$8 sps:$4 sm:$0xff]  }
  0x41   : > { %v1417_v12 = vld [vmem:[%s1550_s7 + $0x1f4] ss:$8 sps:$4 sm:$0xff]   ;;  %v1419_v13 = vld [vmem:[%s1550_s7 + $0xf0] ss:$8 sps:$4 sm:$0xff]   ;;  %v329_v26 = vld [vmem:[#allocation2] sm:$0xff]  ;;  %p1251_p11 = scmp.ne.s32.totalorder %s1469_s14, 6 }
  0x42   : > { %808 = vmatpush1.bf16.msra.mxu1 %v1359_v35  ;;  %v1420_v14 = vld [vmem:[%s1550_s7 + $0x1f0] ss:$8 sps:$4 sm:$0xff]   ;;  %v1427_v17 = vld [vmem:[%s1552_s8 + $0x24] ss:$16 sps:$4 sm:$0xff]   ;;  %v1429_v18 = vld [vmem:[%s1552_s8 + $0x2c] ss:$16 sps:$4 sm:$0xff]  }
  0x43   : > { %871 = vmatpush1.bf16.msra.mxu0 %v1360_v36  ;;  %809 = vmatprep.subr.bf16.mxu1 %v1361_v37  ;;  %v1421_v15 = vld [vmem:[%s1552_s8] ss:$16 sps:$4 sm:$0xff]   ;;  %v1424_v16 = vld [vmem:[%s1552_s8 + $0x8] ss:$16 sps:$4 sm:$0xff]   ;;  %v1433_v21 = vld [vmem:[%s1552_s8 + $0x44] ss:$16 sps:$4 sm:$0xff]  }
  0x44   : > { %872 = vmatprep.subr.bf16.mxu0 %v1363_v38  ;;  %v1431_v19 = vld [vmem:[%s1552_s8 + $0x20] ss:$16 sps:$4 sm:$0xff]   ;;  %v1432_v20 = vld [vmem:[%s1552_s8 + $0x28] ss:$16 sps:$4 sm:$0xff]   ;;  %v1435_v22 = vld [vmem:[%s1552_s8 + $0x4c] ss:$16 sps:$4 sm:$0xff]  }
  0x45   : > { %v1437_v23 = vld [vmem:[%s1552_s8 + $0x40] ss:$16 sps:$4 sm:$0xff]   ;;  %v1438_v24 = vld [vmem:[%s1552_s8 + $0x48] ss:$16 sps:$4 sm:$0xff]  }
  0x46   : > { %810 = vmatpush1.bf16.msra.mxu1 %v1365_v39  ;;  %v330_v30 = vld [vmem:[#allocation2 + $0x8] sm:$0xff]  ;;  %v331_v34 = vld [vmem:[#allocation2 + $0x10] sm:$0xff]  ;;  %v332_v39 = vld [vmem:[#allocation2 + $0x18] sm:$0xff] }
  0x47   : > { %873 = vmatpush1.bf16.msra.mxu0 %v1366_v40  ;;  %811 = vmatprep.subr.bf16.mxu1 %v1367_v41 }
  0x48   : > { %874 = vmatprep.subr.bf16.mxu0 %v1369_v42 }
  0x4a   : > { %812 = vmatpush1.bf16.msra.mxu1 %v1371_v43 }
  0x4b   : > { %875 = vmatpush1.bf16.msra.mxu0 %v1372_v44  ;;  %813 = vmatprep.subr.bf16.mxu1 %v1373_v45 }
  0x4c   : > { %876 = vmatprep.subr.bf16.mxu0 %v1375_v46  ;;  %v333_v46 = vld [vmem:[#allocation2 + $0x20] sm:$0xff] }
  0x4e   : > { %814 = vmatpush1.bf16.msra.mxu1 %v1377_v47 }
  0x4f   : > { %877 = vmatpush1.bf16.msra.mxu0 %v1378_v48  ;;  %815 = vmatprep.subr.bf16.mxu1 %v1379_v49 }
  0x50   : > { %878 = vmatprep.subr.bf16.mxu0 %v1381_v50  ;;  %v334_v50 = vld [vmem:[#allocation2 + $0x28] sm:$0xff] }
  0x52   : > { %816 = vmatpush1.bf16.msra.mxu1 %v1383_v51 }
  0x53   : > { %879 = vmatpush1.bf16.msra.mxu0 %v1384_v52  ;;  %817 = vmatprep.subr.bf16.mxu1 %v1385_v53 }
  0x54   : > { %880 = vmatprep.subr.bf16.mxu0 %v1387_v54  ;;  %v335_v54 = vld [vmem:[#allocation2 + $0x30] sm:$0xff] }
  0x56   : > { %818 = vmatpush1.bf16.msra.mxu1 %v1389_v55 }
  0x57   : > { %881 = vmatpush1.bf16.msra.mxu0 %v1390_v56  ;;  %819 = vmatprep.subr.bf16.mxu1 %v1391_v57 }
  0x58   : > { %882 = vmatprep.subr.bf16.mxu0 %v1393_v58 }
  0x5a   : > { %820 = vmatpush1.bf16.msra.mxu1 %v1395_v59  ;;  %v336_v59 = vld [vmem:[#allocation2 + $0x38] sm:$0xff] }
  0x5b   : > { %883 = vmatpush1.bf16.msra.mxu0 %v1396_v60  ;;  %821 = vmatprep.subr.bf16.mxu1 %v1397_v61 }
  0x5c   : > { %884 = vmatprep.subr.bf16.mxu0 %v1399_v63 }
  0x5e   : > { %822 = vmatpush1.bf16.msra.mxu1 %v1401_v1 }
  0x5f   : > { %885 = vmatpush1.bf16.msra.mxu0 %v1402_v2  ;;  %823 = vmatprep.subr.bf16.mxu1 %v1403_v3  ;;  %v337_v2 = vld [vmem:[#allocation2 + $0x40] sm:$0xff] }
  0x60   : > { %886 = vmatprep.subr.bf16.mxu0 %v1405_v4 }
  0x62   : > { %824 = vmatpush1.bf16.msra.mxu1 %v1407_v5 }
  0x63   : > { %887 = vmatpush1.bf16.msra.mxu0 %v1408_v6  ;;  %825 = vmatprep.subr.bf16.mxu1 %v1409_v7  ;;  %v338_v6 = vld [vmem:[#allocation2 + $0x48] sm:$0xff] }
  0x64   : > { %888 = vmatprep.subr.bf16.mxu0 %v1411_v8 }
  0x66   : > { %826 = vmatpush1.bf16.msra.mxu1 %v1413_v9 }
  0x67   : > { %889 = vmatpush1.bf16.msra.mxu0 %v1414_v10  ;;  %827 = vmatprep.subr.bf16.mxu1 %v1415_v11  ;;  %v339_v10 = vld [vmem:[#allocation2 + $0x50] sm:$0xff] }
  0x68   : > { %890 = vmatprep.subr.bf16.mxu0 %v1417_v12 }
  0x6a   : > { %828 = vmatpush1.bf16.msra.mxu1 %v1419_v13 }
  0x6b   : > { %891 = vmatpush1.bf16.msra.mxu0 %v1420_v14 }
  0x6d   : > { %830 = vmatmul.mubr.bf16.vlgmr.msra.gmra.mrb[0].mxu1 %v1421_v15  ;;  %v340_v15 = vld [vmem:[#allocation2 + $0x58] sm:$0xff] }
  0x6e   : > { %893 = vmatmul.mubr.bf16.vlgmr.msra.gmra.mrb[0].mxu0 %v1424_v16  ;;  %839 = vmatprep.mubr.bf16.mxu1 %v1427_v17 }
  0x6f   : > { %902 = vmatprep.mubr.bf16.mxu0 %v1429_v18 }
  0x75   : > { %840 = vmatmul.mubr.bf16.gmra.mrb[4].mxu1 %v1431_v19 }
  0x76   : > { %903 = vmatmul.mubr.bf16.gmra.mrb[4].mxu0 %v1432_v20  ;;  %849 = vmatprep.mubr.bf16.mxu1 %v1433_v21  ;;  %v965_v21 = vlaneseq (!%p1251_p11) }
  0x77   : > { %912 = vmatprep.mubr.bf16.mxu0 %v1435_v22 }
  0x78   : > { %v966_v22 = vshrl.u32 (!%p1251_p11), %v965_v21, 7 }
  0x7d   : > { %850 = vmatmul.mubr.bf16.gmra.mrb[8].mxu1 %v1437_v23  ;;  %v963_v23 = vld [vmem:[%s1670_s2] sm:$0x3] (!%p1251_p11) }
  0x7e   : > { %913 = vmatmul.mubr.bf16.gmra.mrb[8].mxu0 %v1438_v24 }
 0x140   : > { %v831_v25 = vpop.f32.mrb[0].mxu1 }
 0x141   : > { %v894_v27 = vpop.f32.mrb[0].mxu0  ;;  %v833_v29 = vpop.f32.mrb[1].mxu1 }
 0x142   : > { %v895_v28 = vadd.f32 %v894_v27, %v831_v25  ;;  %v896_v31 = vpop.f32.mrb[1].mxu0  ;;  %v835_v33 = vpop.f32.mrb[2].mxu1  ;;  %v971_v27 = vsub.s32 (!%p1251_p11), 1, %v966_v22 }
 0x143   : > { %v897_v32 = vadd.f32 %v896_v31, %v833_v29  ;;  %v898_v35 = vpop.f32.mrb[2].mxu0  ;;  %v837_v38 = vpop.f32.mrb[3].mxu1 }
 0x144   : > { %v923_v36 = vadd.f32 %v895_v28, %v329_v26  ;;  %v899_v37 = vadd.f32 %v898_v35, %v835_v33  ;;  %v900_v40 = vpop.f32.mrb[3].mxu0  ;;  %v967_v26 = vsub.s32 (!%p1251_p11), 0, %v966_v22 }
 0x145   : > { %v924_v41 = vadd.f32 %v897_v32, %v330_v30  ;;  %v901_v42 = vadd.f32 %v900_v40, %v837_v38  ;;  %v972_v32 = vrot.slane (!%p1251_p11), %v963_v23, %v971_v27 }
 0x146   : > { %935 = vst [vmem:[#allocation2] sm:$0xff] %v923_v36  ;;  %v925_v43 = vadd.f32 %v899_v37, %v331_v34  ;;  %v968_v31 = vrot.slane (!%p1251_p11), %v963_v23, %v967_v26 }
 0x147   : > { %936 = vst [vmem:[#allocation2 + $0x8] sm:$0xff] %v924_v41  ;;  %v926_v44 = vadd.f32 %v901_v42, %v332_v39 }
 0x148   : > { %937 = vst [vmem:[#allocation2 + $0x10] sm:$0xff] %v925_v43  ;;  %v841_v45 = vpop.f32.mrb[4].mxu1 }
 0x149   : > { %938 = vst [vmem:[#allocation2 + $0x18] sm:$0xff] %v926_v44  ;;  %v904_v47 = vpop.f32.mrb[4].mxu0  ;;  %v843_v49 = vpop.f32.mrb[5].mxu1 }
 0x14a   : > { %v905_v48 = vadd.f32 %v904_v47, %v841_v45  ;;  %v906_v51 = vpop.f32.mrb[5].mxu0  ;;  %v845_v53 = vpop.f32.mrb[6].mxu1 }
 0x14b   : > { %v907_v52 = vadd.f32 %v906_v51, %v843_v49  ;;  %v908_v55 = vpop.f32.mrb[6].mxu0  ;;  %v847_v58 = vpop.f32.mrb[7].mxu1 }
 0x14c   : > { %v927_v56 = vadd.f32 %v905_v48, %v333_v46  ;;  %v909_v57 = vadd.f32 %v908_v55, %v845_v53  ;;  %v910_v60 = vpop.f32.mrb[7].mxu0 }
 0x14d   : > { %v928_v61 = vadd.f32 %v907_v52, %v334_v50  ;;  %v911_v62 = vadd.f32 %v910_v60, %v847_v58  ;;  %v951_v24 = vld [vmem:[#allocation2] sm:$0xff] (!%p1251_p11) }
 0x14e   : > { %939 = vst [vmem:[#allocation2 + $0x20] sm:$0xff] %v927_v56  ;;  %v929_v63 = vadd.f32 %v909_v57, %v335_v54  ;;  %v952_v25 = vld [vmem:[#allocation2 + $0x8] sm:$0xff] (!%p1251_p11)  ;;  %v975_v36 = vadd.f32 (!%p1251_p11), %v968_v31, %v951_v24 }
 0x14f   : > { %940 = vst [vmem:[#allocation2 + $0x28] sm:$0xff] %v928_v61  ;;  %v930_v0 = vadd.f32 %v911_v62, %v336_v59  ;;  %v953_v28 = vld [vmem:[#allocation2 + $0x10] sm:$0xff] (!%p1251_p11)  ;;  %v976_v37 = vadd.f32 (!%p1251_p11), %v972_v32, %v952_v25 }
 0x150   : > { %941 = vst [vmem:[#allocation2 + $0x30] sm:$0xff] %v929_v63  ;;  %v851_v1 = vpop.f32.mrb[8].mxu1  ;;  %v954_v29 = vld [vmem:[#allocation2 + $0x18] sm:$0xff] (!%p1251_p11)  ;;  %v977_v38 = vadd.f32 (!%p1251_p11), %v968_v31, %v953_v28  ;;  %v987_v46 = vmax.f32 (!%p1251_p11), %v975_v36, 0.0 }
 0x151   : > { %942 = vst [vmem:[#allocation2 + $0x38] sm:$0xff] %v930_v0  ;;  %v914_v3 = vpop.f32.mrb[8].mxu0  ;;  %v853_v5 = vpop.f32.mrb[9].mxu1  ;;  %v978_v39 = vadd.f32 (!%p1251_p11), %v972_v32, %v954_v29  ;;  %v988_v47 = vmax.f32 (!%p1251_p11), %v976_v37, 0.0 }
 0x152   : > { %v915_v4 = vadd.f32 %v914_v3, %v851_v1  ;;  %v916_v7 = vpop.f32.mrb[9].mxu0  ;;  %v855_v9 = vpop.f32.mrb[10].mxu1  ;;  %v989_v48 = vmax.f32 (!%p1251_p11), %v977_v38, 0.0 }
 0x153   : > { %v917_v8 = vadd.f32 %v916_v7, %v853_v5  ;;  %v918_v11 = vpop.f32.mrb[10].mxu0  ;;  %v857_v14 = vpop.f32.mrb[11].mxu1  ;;  %950 = sbr.rel (%p1251_p11) target bundleno = 360 (0x168), region = 63  ;;  %v990_v49 = vmax.f32 (!%p1251_p11), %v978_v39, 0.0  ;;  %v1264_v56 = vpack.c.bf16 (!%p1251_p11), %v988_v47, %v987_v46 }
 0x154   : > { %v931_v12 = vadd.f32 %v915_v4, %v337_v2  ;;  %v919_v13 = vadd.f32 %v918_v11, %v855_v9  ;;  %v920_v16 = vpop.f32.mrb[11].mxu0 }
 0x155   : > { %v932_v17 = vadd.f32 %v917_v8, %v338_v6  ;;  %v921_v18 = vadd.f32 %v920_v16, %v857_v14  ;;  %v955_v30 = vld [vmem:[#allocation2 + $0x20] sm:$0xff] (!%p1251_p11)  ;;  %v1265_v57 = vpack.c.bf16 (!%p1251_p11), %v990_v49, %v989_v48  ;;  %1035 = vst [vmem:[%s1671_s3] sm:$0xff] (!%p1251_p11), %v1264_v56 }
 0x156   : > { %943 = vst [vmem:[#allocation2 + $0x40] sm:$0xff] %v931_v12  ;;  %v933_v19 = vadd.f32 %v919_v13, %v339_v10  ;;  %v956_v33 = vld [vmem:[#allocation2 + $0x28] sm:$0xff] (!%p1251_p11)  ;;  %v979_v40 = vadd.f32 (!%p1251_p11), %v968_v31, %v955_v30 }
 0x157   : > { %944 = vst [vmem:[#allocation2 + $0x48] sm:$0xff] %v932_v17  ;;  %v934_v20 = vadd.f32 %v921_v18, %v340_v15  ;;  %v957_v34 = vld [vmem:[#allocation2 + $0x30] sm:$0xff] (!%p1251_p11)  ;;  %v980_v41 = vadd.f32 (!%p1251_p11), %v972_v32, %v956_v33  ;;  %1036 = vst [vmem:[%s1671_s3 + $0x8] sm:$0xff] (!%p1251_p11), %v1265_v57 }
 0x158   : > { %945 = vst [vmem:[#allocation2 + $0x50] sm:$0xff] %v933_v19  ;;  %v958_v35 = vld [vmem:[#allocation2 + $0x38] sm:$0xff] (!%p1251_p11)  ;;  %v981_v42 = vadd.f32 (!%p1251_p11), %v968_v31, %v957_v34  ;;  %v991_v52 = vmax.f32 (!%p1251_p11), %v979_v40, 0.0 }
 0x159   : > { %946 = vst [vmem:[#allocation2 + $0x58] sm:$0xff] %v934_v20  ;;  %v982_v43 = vadd.f32 (!%p1251_p11), %v972_v32, %v958_v35  ;;  %v992_v53 = vmax.f32 (!%p1251_p11), %v980_v41, 0.0 }
 0x15a   : > { %v993_v54 = vmax.f32 %v981_v42, 0.0 }
 0x15b   : > { %v994_v55 = vmax.f32 %v982_v43, 0.0  ;;  %v1266_v60 = vpack.c.bf16 %v992_v53, %v991_v52 }
 0x15d   : > { %v959_v44 = vld [vmem:[#allocation2 + $0x40] sm:$0xff]  ;;  %v1267_v61 = vpack.c.bf16 %v994_v55, %v993_v54  ;;  %1037 = vst [vmem:[%s1671_s3 + $0x10] sm:$0xff] %v1266_v60 }
 0x15e   : > { %v960_v45 = vld [vmem:[#allocation2 + $0x48] sm:$0xff]  ;;  %v983_v58 = vadd.f32 %v968_v31, %v959_v44 }
 0x15f   : > { %v961_v50 = vld [vmem:[#allocation2 + $0x50] sm:$0xff]  ;;  %v984_v59 = vadd.f32 %v972_v32, %v960_v45  ;;  %1038 = vst [vmem:[%s1671_s3 + $0x18] sm:$0xff] %v1267_v61 }
 0x160   : > { %v962_v51 = vld [vmem:[#allocation2 + $0x58] sm:$0xff]  ;;  %v985_v62 = vadd.f32 %v968_v31, %v961_v50  ;;  %v995_v0 = vmax.f32 %v983_v58, 0.0 }
 0x161   : > { %v986_v63 = vadd.f32 %v972_v32, %v962_v51  ;;  %v996_v1 = vmax.f32 %v984_v59, 0.0 }
 0x162   : > { %v997_v2 = vmax.f32 %v985_v62, 0.0 }
 0x163   : > { %v998_v3 = vmax.f32 %v986_v63, 0.0  ;;  %v1268_v4 = vpack.c.bf16 %v996_v1, %v995_v0 }
 0x165   : > { %v1269_v5 = vpack.c.bf16 %v998_v3, %v997_v2  ;;  %1039 = vst [vmem:[%s1671_s3 + $0x20] sm:$0xff] %v1268_v4 }
 0x167   : > { %1040 = vst [vmem:[%s1671_s3 + $0x28] sm:$0xff] %v1269_v5 }
 0x168 PF: > { %s13_s16 = sadd.s32 1, %s1477_s16   ;;  %s1672_s12 = smov %s1465_s13 }
 0x169   : > { %p10_p12 = scmp.ge.s32.totalorder %s13_s16, 9   ;;  %s1673_s13 = smov %s1535_s20 }
 0x16a   : > { %s1674_s14 = smov %s1473_s15  ;;  %s1675_s15 = smov %s1677_s17 }
 0x16b   :  { %12 = sbr.rel (!%p10_p12) target bundleno = 3 (0x3), region = 104 }

// kernel: alexnet_forward.18
= control target key start
LH: loop header
LB: loop body
LE: loop exit
PB: predicated region body
PF: predicated region fallthrough
CT: control target
= control target key end

     0   :  { %s1500_s12 = smov 0   ;;  %s1502_s13 = smov 0   ;;  %s1668_s0 = inlined_call_operand.vmem [shape: bf16[48,2560], index: 0, kind: input, shape index: {}]   ;;  %s1669_s1 = inlined_call_operand.vmem [shape: bf16[2560,256], index: 1, kind: input, shape index: {}]   ;;  %s1670_s2 = inlined_call_operand.vmem [shape: f32[1,256], index: 2, kind: input, shape index: {}]   ;;  %s1671_s3 = inlined_call_operand.vmem [shape: bf16[48,256], index: 3, kind: output, shape index: {}]  }
   0x1   :  { %s1504_s14 = smov 0   ;;  %s1506_s15 = smov 0  }
   0x2   :  { %s1508_s16 = smov 0  }
   0x3 LB: > { %s25_s17 = sadd.s32 1, %s1473_s15  ;;  %p48_p1 = scmp.ne.s32.totalorder %s1465_s13, %s1461_s12  ;;  %s1477_s16 = sphi %s1508_s16, %s13_s16   ;;  %s1473_s15 = sphi %s1506_s15, %s1675_s15   ;;  %s1469_s14 = sphi %s1504_s14, %s1674_s14   ;;  %s1465_s13 = sphi %s1502_s13, %s1673_s13   ;;  %s1461_s12 = sphi %s1500_s12, %s1672_s12  }
   0x4   : > { %p26_p0 = scmp.ge.s32.totalorder %s25_s17, 5  ;;  %p49_p2 = scmp.eq.s32.totalorder %s1477_s16, 0 }
   0x5   : > { %s41_s19 = sadd.s32 1, %s1465_s13  ;;  %p1167_p5 = scmp.ge.s32.totalorder %s1477_s16, 5 }
   0x6   : > { %s1677_s17 = smov (%p26_p0, %s25_s17), 0  ;;  %p50_p3 = por %p49_p2, %p48_p1 }
   0x7   : > { %s37_s18 = ssub.s32 %s1473_s15, %s1677_s17  ;;  %164 = sbr.rel (%p1167_p5) target bundleno = 25 (0x19), region = 20 }
   0x8   : > { %p39_p4 = scmp.eq.s32.totalorder %s37_s18, 0 }
   0xa   : > { %s1535_s20 = scalar_select %p39_p4, %s1465_s13, %s41_s19  }
   0xe   : > { %167 = sbr.rel (!%p50_p3) target bundleno = 25 (0x19), region = 24  ;;  %s169_s21 = sand.u32 (%p50_p3), 1, %s1465_s13  }
   0xf   : > { %s1262_s22 = sshll.u32 (%p50_p3), %s1473_s15, 4  ;;  %s1282_s23 = smul.u32 (%p50_p3), 96, %s169_s21 }
  0x10   : > { %s177_s26 = scalar_lea.vmem (%p50_p3), %s1668_s0, %s1262_s22 }
  0x11   : > { %v190_v0 = vld [vmem:[%s177_s26] sm:$0xff] (%p50_p3)  ;;  %v192_v1 = vld [vmem:[%s177_s26 + $0x8] sm:$0xff] (%p50_p3)  ;;  %v194_v2 = vld [vmem:[%s177_s26 + $0x50] sm:$0xff] (%p50_p3)  ;;  %s171_s27 = scalar_lea.vmem (%p50_p3), [#allocation3], %s1282_s23 }
  0x12   : > { %v196_v3 = vld [vmem:[%s177_s26 + $0x58] sm:$0xff] (%p50_p3)  ;;  %v198_v4 = vld [vmem:[%s177_s26 + $0xa0] sm:$0xff] (%p50_p3)  ;;  %v200_v5 = vld [vmem:[%s177_s26 + $0xa8] sm:$0xff] (%p50_p3)  ;;  %191 = vst [vmem:[%s171_s27] sm:$0xff] (%p50_p3), %v190_v0 }
  0x13   : > { %193 = vst [vmem:[%s171_s27 + $0x8] sm:$0xff] (%p50_p3), %v192_v1  ;;  %195 = vst [vmem:[%s171_s27 + $0x10] sm:$0xff] (%p50_p3), %v194_v2  ;;  %v202_v6 = vld [vmem:[%s177_s26 + $0xf0] sm:$0xff] (%p50_p3)  ;;  %v204_v7 = vld [vmem:[%s177_s26 + $0xf8] sm:$0xff] (%p50_p3) }
  0x14   : > { %197 = vst [vmem:[%s171_s27 + $0x18] sm:$0xff] (%p50_p3), %v196_v3  ;;  %199 = vst [vmem:[%s171_s27 + $0x20] sm:$0xff] (%p50_p3), %v198_v4  ;;  %v206_v8 = vld [vmem:[%s177_s26 + $0x140] sm:$0xff] (%p50_p3)  ;;  %v208_v9 = vld [vmem:[%s177_s26 + $0x148] sm:$0xff] (%p50_p3) }
  0x15   : > { %201 = vst [vmem:[%s171_s27 + $0x28] sm:$0xff] %v200_v5  ;;  %203 = vst [vmem:[%s171_s27 + $0x30] sm:$0xff] %v202_v6  ;;  %v210_v10 = vld [vmem:[%s177_s26 + $0x190] sm:$0xff]  ;;  %v212_v11 = vld [vmem:[%s177_s26 + $0x198] sm:$0xff] }
  0x16   : > { %205 = vst [vmem:[%s171_s27 + $0x38] sm:$0xff] %v204_v7  ;;  %207 = vst [vmem:[%s171_s27 + $0x40] sm:$0xff] %v206_v8 }
  0x17   : > { %209 = vst [vmem:[%s171_s27 + $0x48] sm:$0xff] %v208_v9  ;;  %211 = vst [vmem:[%s171_s27 + $0x50] sm:$0xff] %v210_v10 }
  0x18   : > { %213 = vst [vmem:[%s171_s27 + $0x58] sm:$0xff] %v212_v11 }
  0x19 PF: > { %p1170_p6 = scmp.ge.s32.totalorder %s1477_s16, 1  ;;  %p233_p7 = scmp.lt.s32.totalorder %s1477_s16, 6 }
  0x1b   : > { %p234_p8 = pnand %p1170_p6, %p233_p7 }
  0x1c   : > { %s240_s28 = sand.u32 (!%p234_p8), 1, %s1461_s12   ;;  %s1171_s29 = sshll.u32 (!%p234_p8), %s1469_s14, 6 }
  0x1d   : > { %237 = sbr.rel (%p234_p8) target bundleno = 360 (0x168), region = 51  ;;  %p286_p9 = scmp.lt.s32.totalorder (!%p234_p8), %s1171_s29, 319 }
  0x1e   : > { %s1283_s30 = smul.u32 (!%p234_p8), 96, %s240_s28  ;;  %p1174_p10 = scmp.ne.s32.totalorder (!%p234_p8), %s1469_s14, 0 }
  0x20   : > { %s1552_s8 = scalar_lea.vmem (!%p234_p8), [#allocation3], %s1283_s30 }
  0x24   : > { %s1679_s29 = smov (!%p286_p9, %s1171_s29), 319  ;;  %316 = sbr.rel (%p1174_p10) target bundleno = 44 (0x2c), region = 59 }
  0x25   : > { %s1263_s4 = sshll.u32 %s1679_s29, 3  ;;  %v1479_v12 = vmov (!%p1174_p10), 0.0  }
  0x26   : > { %s1550_s7 = scalar_lea.vmem %s1669_s1, %s1263_s4  ;;  %317 = vst [vmem:[#allocation2] sm:$0xff] (!%p1174_p10), %v1479_v12  ;;  %318 = vst [vmem:[#allocation2 + $0x8] sm:$0xff] (!%p1174_p10), %v1479_v12 }
  0x27   : > { %319 = vst [vmem:[#allocation2 + $0x10] sm:$0xff] (!%p1174_p10), %v1479_v12  ;;  %320 = vst [vmem:[#allocation2 + $0x18] sm:$0xff] (!%p1174_p10), %v1479_v12 }
  0x28   : > { %321 = vst [vmem:[#allocation2 + $0x20] sm:$0xff] (!%p1174_p10), %v1479_v12  ;;  %322 = vst [vmem:[#allocation2 + $0x28] sm:$0xff] (!%p1174_p10), %v1479_v12 }
  0x29   : > { %323 = vst [vmem:[#allocation2 + $0x30] sm:$0xff] (!%p1174_p10), %v1479_v12  ;;  %324 = vst [vmem:[#allocation2 + $0x38] sm:$0xff] (!%p1174_p10), %v1479_v12 }
  0x2a   : > { %325 = vst [vmem:[#allocation2 + $0x40] sm:$0xff] (!%p1174_p10), %v1479_v12  ;;  %326 = vst [vmem:[#allocation2 + $0x48] sm:$0xff] (!%p1174_p10), %v1479_v12 }
  0x2b   : > { %327 = vst [vmem:[#allocation2 + $0x50] sm:$0xff] %v1479_v12  ;;  %328 = vst [vmem:[#allocation2 + $0x58] sm:$0xff] %v1479_v12 }
  0x2c PF: > { %v1325_v13 = vld [vmem:[%s1550_s7 + $0x4] ss:$8 sps:$4 sm:$0xff]   ;;  %v1329_v15 = vld [vmem:[%s1550_s7] ss:$8 sps:$4 sm:$0xff]   ;;  %v1331_v17 = vld [vmem:[%s1550_s7 + $0x14] ss:$8 sps:$4 sm:$0xff]  }
  0x2d   : > { %v1327_v14 = vld [vmem:[%s1550_s7 + $0x104] ss:$8 sps:$4 sm:$0xff]   ;;  %797 = vmatprep.subr.bf16.mxu1 %v1325_v13  ;;  %v1330_v16 = vld [vmem:[%s1550_s7 + $0x100] ss:$8 sps:$4 sm:$0xff]   ;;  %v1333_v18 = vld [vmem:[%s1550_s7 + $0x114] ss:$8 sps:$4 sm:$0xff]  }
  0x2e   : > { %860 = vmatprep.subr.bf16.mxu0 %v1327_v14  ;;  %798 = vmatpush1.bf16.msra.mxu1 %v1329_v15  ;;  %v1335_v19 = vld [vmem:[%s1550_s7 + $0x10] ss:$8 sps:$4 sm:$0xff]   ;;  %v1337_v21 = vld [vmem:[%s1550_s7 + $0x24] ss:$8 sps:$4 sm:$0xff]   ;;  %v1341_v23 = vld [vmem:[%s1550_s7 + $0x20] ss:$8 sps:$4 sm:$0xff]  }
  0x2f   : > { %861 = vmatpush1.bf16.msra.mxu0 %v1330_v16  ;;  %799 = vmatprep.subr.bf16.mxu1 %v1331_v17  ;;  %v1336_v20 = vld [vmem:[%s1550_s7 + $0x110] ss:$8 sps:$4 sm:$0xff]   ;;  %v1339_v22 = vld [vmem:[%s1550_s7 + $0x124] ss:$8 sps:$4 sm:$0xff]   ;;  %v1342_v24 = vld [vmem:[%s1550_s7 + $0x120] ss:$8 sps:$4 sm:$0xff]  }
  0x30   : > { %862 = vmatprep.subr.bf16.mxu0 %v1333_v18  ;;  %v1343_v25 = vld [vmem:[%s1550_s7 + $0x34] ss:$8 sps:$4 sm:$0xff]   ;;  %v1347_v27 = vld [vmem:[%s1550_s7 + $0x30] ss:$8 sps:$4 sm:$0xff]   ;;  %v1349_v29 = vld [vmem:[%s1550_s7 + $0x44] ss:$8 sps:$4 sm:$0xff]  }
  0x31   : > { %v1345_v26 = vld [vmem:[%s1550_s7 + $0x134] ss:$8 sps:$4 sm:$0xff]   ;;  %v1348_v28 = vld [vmem:[%s1550_s7 + $0x130] ss:$8 sps:$4 sm:$0xff]   ;;  %v1351_v30 = vld [vmem:[%s1550_s7 + $0x144] ss:$8 sps:$4 sm:$0xff]  }
  0x32   : > { %800 = vmatpush1.bf16.msra.mxu1 %v1335_v19  ;;  %v1353_v31 = vld [vmem:[%s1550_s7 + $0x40] ss:$8 sps:$4 sm:$0xff]   ;;  %v1355_v33 = vld [vmem:[%s1550_s7 + $0x54] ss:$8 sps:$4 sm:$0xff]   ;;  %v1359_v35 = vld [vmem:[%s1550_s7 + $0x50] ss:$8 sps:$4 sm:$0xff]  }
  0x33   : > { %863 = vmatpush1.bf16.msra.mxu0 %v1336_v20  ;;  %801 = vmatprep.subr.bf16.mxu1 %v1337_v21  ;;  %v1354_v32 = vld [vmem:[%s1550_s7 + $0x140] ss:$8 sps:$4 sm:$0xff]   ;;  %v1357_v34 = vld [vmem:[%s1550_s7 + $0x154] ss:$8 sps:$4 sm:$0xff]   ;;  %v1360_v36 = vld [vmem:[%s1550_s7 + $0x150] ss:$8 sps:$4 sm:$0xff]  }
  0x34   : > { %864 = vmatprep.subr.bf16.mxu0 %v1339_v22  ;;  %v1361_v37 = vld [vmem:[%s1550_s7 + $0x64] ss:$8 sps:$4 sm:$0xff]   ;;  %v1365_v39 = vld [vmem:[%s1550_s7 + $0x60] ss:$8 sps:$4 sm:$0xff]   ;;  %v1367_v41 = vld [vmem:[%s1550_s7 + $0x74] ss:$8 sps:$4 sm:$0xff]  }
  0x35   : > { %v1363_v38 = vld [vmem:[%s1550_s7 + $0x164] ss:$8 sps:$4 sm:$0xff]   ;;  %v1366_v40 = vld [vmem:[%s1550_s7 + $0x160] ss:$8 sps:$4 sm:$0xff]   ;;  %v1369_v42 = vld [vmem:[%s1550_s7 + $0x174] ss:$8 sps:$4 sm:$0xff]  }
  0x36   : > { %802 = vmatpush1.bf16.msra.mxu1 %v1341_v23  ;;  %v1371_v43 = vld [vmem:[%s1550_s7 + $0x70] ss:$8 sps:$4 sm:$0xff]   ;;  %v1373_v45 = vld [vmem:[%s1550_s7 + $0x84] ss:$8 sps:$4 sm:$0xff]   ;;  %v1377_v47 = vld [vmem:[%s1550_s7 + $0x80] ss:$8 sps:$4 sm:$0xff]  }
  0x37   : > { %865 = vmatpush1.bf16.msra.mxu0 %v1342_v24  ;;  %803 = vmatprep.subr.bf16.mxu1 %v1343_v25  ;;  %v1372_v44 = vld [vmem:[%s1550_s7 + $0x170] ss:$8 sps:$4 sm:$0xff]   ;;  %v1375_v46 = vld [vmem:[%s1550_s7 + $0x184] ss:$8 sps:$4 sm:$0xff]   ;;  %v1378_v48 = vld [vmem:[%s1550_s7 + $0x180] ss:$8 sps:$4 sm:$0xff]  }
  0x38   : > { %866 = vmatprep.subr.bf16.mxu0 %v1345_v26  ;;  %v1379_v49 = vld [vmem:[%s1550_s7 + $0x94] ss:$8 sps:$4 sm:$0xff]   ;;  %v1383_v51 = vld [vmem:[%s1550_s7 + $0x90] ss:$8 sps:$4 sm:$0xff]   ;;  %v1385_v53 = vld [vmem:[%s1550_s7 + $0xa4] ss:$8 sps:$4 sm:$0xff]  }
  0x39   : > { %v1381_v50 = vld [vmem:[%s1550_s7 + $0x194] ss:$8 sps:$4 sm:$0xff]   ;;  %v1384_v52 = vld [vmem:[%s1550_s7 + $0x190] ss:$8 sps:$4 sm:$0xff]   ;;  %v1387_v54 = vld [vmem:[%s1550_s7 + $0x1a4] ss:$8 sps:$4 sm:$0xff]  }
  0x3a   : > { %804 = vmatpush1.bf16.msra.mxu1 %v1347_v27  ;;  %v1389_v55 = vld [vmem:[%s1550_s7 + $0xa0] ss:$8 sps:$4 sm:$0xff]   ;;  %v1391_v57 = vld [vmem:[%s1550_s7 + $0xb4] ss:$8 sps:$4 sm:$0xff]   ;;  %v1395_v59 = vld [vmem:[%s1550_s7 + $0xb0] ss:$8 sps:$4 sm:$0xff]  }
  0x3b   : > { %867 = vmatpush1.bf16.msra.mxu0 %v1348_v28  ;;  %805 = vmatprep.subr.bf16.mxu1 %v1349_v29  ;;  %v1390_v56 = vld [vmem:[%s1550_s7 + $0x1a0] ss:$8 sps:$4 sm:$0xff]   ;;  %v1393_v58 = vld [vmem:[%s1550_s7 + $0x1b4] ss:$8 sps:$4 sm:$0xff]   ;;  %v1396_v60 = vld [vmem:[%s1550_s7 + $0x1b0] ss:$8 sps:$4 sm:$0xff]  }
  0x3c   : > { %868 = vmatprep.subr.bf16.mxu0 %v1351_v30  ;;  %v1397_v61 = vld [vmem:[%s1550_s7 + $0xc4] ss:$8 sps:$4 sm:$0xff]   ;;  %v1401_v1 = vld [vmem:[%s1550_s7 + $0xc0] ss:$8 sps:$4 sm:$0xff]   ;;  %v1403_v3 = vld [vmem:[%s1550_s7 + $0xd4] ss:$8 sps:$4 sm:$0xff]  }
  0x3d   : > { %v1423_v62 = vld [vmem:[%s1552_s8 + $0x4] ss:$16 sps:$4 sm:$0xff]   ;;  %v1426_v0 = vld [vmem:[%s1552_s8 + $0xc] ss:$16 sps:$4 sm:$0xff]   ;;  %v1402_v2 = vld [vmem:[%s1550_s7 + $0x1c0] ss:$8 sps:$4 sm:$0xff]  }
  0x3e   : > { %806 = vmatpush1.bf16.msra.mxu1 %v1353_v31  ;;  %v1399_v63 = vld [vmem:[%s1550_s7 + $0x1c4] ss:$8 sps:$4 sm:$0xff]   ;;  %829 = vmatprep.mubr.bf16.mxu1 %v1423_v62  ;;  %v1405_v4 = vld [vmem:[%s1550_s7 + $0x1d4] ss:$8 sps:$4 sm:$0xff]   ;;  %v1407_v5 = vld [vmem:[%s1550_s7 + $0xd0] ss:$8 sps:$4 sm:$0xff]  }
  0x3f   : > { %869 = vmatpush1.bf16.msra.mxu0 %v1354_v32  ;;  %807 = vmatprep.subr.bf16.mxu1 %v1355_v33  ;;  %v1408_v6 = vld [vmem:[%s1550_s7 + $0x1d0] ss:$8 sps:$4 sm:$0xff]   ;;  %v1409_v7 = vld [vmem:[%s1550_s7 + $0xe4] ss:$8 sps:$4 sm:$0xff]   ;;  %v1413_v9 = vld [vmem:[%s1550_s7 + $0xe0] ss:$8 sps:$4 sm:$0xff]  }
  0x40   : > { %870 = vmatprep.subr.bf16.mxu0 %v1357_v34  ;;  %892 = vmatprep.mubr.bf16.mxu0 %v1426_v0  ;;  %v1411_v8 = vld [vmem:[%s1550_s7 + $0x1e4] ss:$8 sps:$4 sm:$0xff]   ;;  %v1414_v10 = vld [vmem:[%s1550_s7 + $0x1e0] ss:$8 sps:$4 sm:$0xff]   ;;  %v1415_v11 = vld [vmem:[%s1550_s7 + $0xf4] ss:$8 sps:$4 sm:$0xff]  }
  0x41   : > { %v1417_v12 = vld [vmem:[%s1550_s7 + $0x1f4] ss:$8 sps:$4 sm:$0xff]   ;;  %v1419_v13 = vld [vmem:[%s1550_s7 + $0xf0] ss:$8 sps:$4 sm:$0xff]   ;;  %v329_v26 = vld [vmem:[#allocation2] sm:$0xff]  ;;  %p1251_p11 = scmp.ne.s32.totalorder %s1469_s14, 4 }
  0x42   : > { %808 = vmatpush1.bf16.msra.mxu1 %v1359_v35  ;;  %v1420_v14 = vld [vmem:[%s1550_s7 + $0x1f0] ss:$8 sps:$4 sm:$0xff]   ;;  %v1427_v17 = vld [vmem:[%s1552_s8 + $0x24] ss:$16 sps:$4 sm:$0xff]   ;;  %v1429_v18 = vld [vmem:[%s1552_s8 + $0x2c] ss:$16 sps:$4 sm:$0xff]  }
  0x43   : > { %871 = vmatpush1.bf16.msra.mxu0 %v1360_v36  ;;  %809 = vmatprep.subr.bf16.mxu1 %v1361_v37  ;;  %v1421_v15 = vld [vmem:[%s1552_s8] ss:$16 sps:$4 sm:$0xff]   ;;  %v1424_v16 = vld [vmem:[%s1552_s8 + $0x8] ss:$16 sps:$4 sm:$0xff]   ;;  %v1433_v21 = vld [vmem:[%s1552_s8 + $0x44] ss:$16 sps:$4 sm:$0xff]  }
  0x44   : > { %872 = vmatprep.subr.bf16.mxu0 %v1363_v38  ;;  %v1431_v19 = vld [vmem:[%s1552_s8 + $0x20] ss:$16 sps:$4 sm:$0xff]   ;;  %v1432_v20 = vld [vmem:[%s1552_s8 + $0x28] ss:$16 sps:$4 sm:$0xff]   ;;  %v1435_v22 = vld [vmem:[%s1552_s8 + $0x4c] ss:$16 sps:$4 sm:$0xff]  }
  0x45   : > { %v1437_v23 = vld [vmem:[%s1552_s8 + $0x40] ss:$16 sps:$4 sm:$0xff]   ;;  %v1438_v24 = vld [vmem:[%s1552_s8 + $0x48] ss:$16 sps:$4 sm:$0xff]  }
  0x46   : > { %810 = vmatpush1.bf16.msra.mxu1 %v1365_v39  ;;  %v330_v30 = vld [vmem:[#allocation2 + $0x8] sm:$0xff]  ;;  %v331_v34 = vld [vmem:[#allocation2 + $0x10] sm:$0xff]  ;;  %v332_v39 = vld [vmem:[#allocation2 + $0x18] sm:$0xff] }
  0x47   : > { %873 = vmatpush1.bf16.msra.mxu0 %v1366_v40  ;;  %811 = vmatprep.subr.bf16.mxu1 %v1367_v41 }
  0x48   : > { %874 = vmatprep.subr.bf16.mxu0 %v1369_v42 }
  0x4a   : > { %812 = vmatpush1.bf16.msra.mxu1 %v1371_v43 }
  0x4b   : > { %875 = vmatpush1.bf16.msra.mxu0 %v1372_v44  ;;  %813 = vmatprep.subr.bf16.mxu1 %v1373_v45 }
  0x4c   : > { %876 = vmatprep.subr.bf16.mxu0 %v1375_v46  ;;  %v333_v46 = vld [vmem:[#allocation2 + $0x20] sm:$0xff] }
  0x4e   : > { %814 = vmatpush1.bf16.msra.mxu1 %v1377_v47 }
  0x4f   : > { %877 = vmatpush1.bf16.msra.mxu0 %v1378_v48  ;;  %815 = vmatprep.subr.bf16.mxu1 %v1379_v49 }
  0x50   : > { %878 = vmatprep.subr.bf16.mxu0 %v1381_v50  ;;  %v334_v50 = vld [vmem:[#allocation2 + $0x28] sm:$0xff] }
  0x52   : > { %816 = vmatpush1.bf16.msra.mxu1 %v1383_v51 }
  0x53   : > { %879 = vmatpush1.bf16.msra.mxu0 %v1384_v52  ;;  %817 = vmatprep.subr.bf16.mxu1 %v1385_v53 }
  0x54   : > { %880 = vmatprep.subr.bf16.mxu0 %v1387_v54  ;;  %v335_v54 = vld [vmem:[#allocation2 + $0x30] sm:$0xff] }
  0x56   : > { %818 = vmatpush1.bf16.msra.mxu1 %v1389_v55 }
  0x57   : > { %881 = vmatpush1.bf16.msra.mxu0 %v1390_v56  ;;  %819 = vmatprep.subr.bf16.mxu1 %v1391_v57 }
  0x58   : > { %882 = vmatprep.subr.bf16.mxu0 %v1393_v58 }
  0x5a   : > { %820 = vmatpush1.bf16.msra.mxu1 %v1395_v59  ;;  %v336_v59 = vld [vmem:[#allocation2 + $0x38] sm:$0xff] }
  0x5b   : > { %883 = vmatpush1.bf16.msra.mxu0 %v1396_v60  ;;  %821 = vmatprep.subr.bf16.mxu1 %v1397_v61 }
  0x5c   : > { %884 = vmatprep.subr.bf16.mxu0 %v1399_v63 }
  0x5e   : > { %822 = vmatpush1.bf16.msra.mxu1 %v1401_v1 }
  0x5f   : > { %885 = vmatpush1.bf16.msra.mxu0 %v1402_v2  ;;  %823 = vmatprep.subr.bf16.mxu1 %v1403_v3  ;;  %v337_v2 = vld [vmem:[#allocation2 + $0x40] sm:$0xff] }
  0x60   : > { %886 = vmatprep.subr.bf16.mxu0 %v1405_v4 }
  0x62   : > { %824 = vmatpush1.bf16.msra.mxu1 %v1407_v5 }
  0x63   : > { %887 = vmatpush1.bf16.msra.mxu0 %v1408_v6  ;;  %825 = vmatprep.subr.bf16.mxu1 %v1409_v7  ;;  %v338_v6 = vld [vmem:[#allocation2 + $0x48] sm:$0xff] }
  0x64   : > { %888 = vmatprep.subr.bf16.mxu0 %v1411_v8 }
  0x66   : > { %826 = vmatpush1.bf16.msra.mxu1 %v1413_v9 }
  0x67   : > { %889 = vmatpush1.bf16.msra.mxu0 %v1414_v10  ;;  %827 = vmatprep.subr.bf16.mxu1 %v1415_v11  ;;  %v339_v10 = vld [vmem:[#allocation2 + $0x50] sm:$0xff] }
  0x68   : > { %890 = vmatprep.subr.bf16.mxu0 %v1417_v12 }
  0x6a   : > { %828 = vmatpush1.bf16.msra.mxu1 %v1419_v13 }
  0x6b   : > { %891 = vmatpush1.bf16.msra.mxu0 %v1420_v14 }
  0x6d   : > { %830 = vmatmul.mubr.bf16.vlgmr.msra.gmra.mrb[0].mxu1 %v1421_v15  ;;  %v340_v15 = vld [vmem:[#allocation2 + $0x58] sm:$0xff] }
  0x6e   : > { %893 = vmatmul.mubr.bf16.vlgmr.msra.gmra.mrb[0].mxu0 %v1424_v16  ;;  %839 = vmatprep.mubr.bf16.mxu1 %v1427_v17 }
  0x6f   : > { %902 = vmatprep.mubr.bf16.mxu0 %v1429_v18 }
  0x75   : > { %840 = vmatmul.mubr.bf16.gmra.mrb[4].mxu1 %v1431_v19 }
  0x76   : > { %903 = vmatmul.mubr.bf16.gmra.mrb[4].mxu0 %v1432_v20  ;;  %849 = vmatprep.mubr.bf16.mxu1 %v1433_v21  ;;  %v965_v21 = vlaneseq (!%p1251_p11) }
  0x77   : > { %912 = vmatprep.mubr.bf16.mxu0 %v1435_v22 }
  0x78   : > { %v966_v22 = vshrl.u32 (!%p1251_p11), %v965_v21, 7 }
  0x7d   : > { %850 = vmatmul.mubr.bf16.gmra.mrb[8].mxu1 %v1437_v23  ;;  %v963_v23 = vld [vmem:[%s1670_s2] sm:$0x3] (!%p1251_p11) }
  0x7e   : > { %913 = vmatmul.mubr.bf16.gmra.mrb[8].mxu0 %v1438_v24 }
 0x140   : > { %v831_v25 = vpop.f32.mrb[0].mxu1 }
 0x141   : > { %v894_v27 = vpop.f32.mrb[0].mxu0  ;;  %v833_v29 = vpop.f32.mrb[1].mxu1 }
 0x142   : > { %v895_v28 = vadd.f32 %v894_v27, %v831_v25  ;;  %v896_v31 = vpop.f32.mrb[1].mxu0  ;;  %v835_v33 = vpop.f32.mrb[2].mxu1  ;;  %v971_v27 = vsub.s32 (!%p1251_p11), 1, %v966_v22 }
 0x143   : > { %v897_v32 = vadd.f32 %v896_v31, %v833_v29  ;;  %v898_v35 = vpop.f32.mrb[2].mxu0  ;;  %v837_v38 = vpop.f32.mrb[3].mxu1 }
 0x144   : > { %v923_v36 = vadd.f32 %v895_v28, %v329_v26  ;;  %v899_v37 = vadd.f32 %v898_v35, %v835_v33  ;;  %v900_v40 = vpop.f32.mrb[3].mxu0  ;;  %v967_v26 = vsub.s32 (!%p1251_p11), 0, %v966_v22 }
 0x145   : > { %v924_v41 = vadd.f32 %v897_v32, %v330_v30  ;;  %v901_v42 = vadd.f32 %v900_v40, %v837_v38  ;;  %v972_v32 = vrot.slane (!%p1251_p11), %v963_v23, %v971_v27 }
 0x146   : > { %935 = vst [vmem:[#allocation2] sm:$0xff] %v923_v36  ;;  %v925_v43 = vadd.f32 %v899_v37, %v331_v34  ;;  %v968_v31 = vrot.slane (!%p1251_p11), %v963_v23, %v967_v26 }
 0x147   : > { %936 = vst [vmem:[#allocation2 + $0x8] sm:$0xff] %v924_v41  ;;  %v926_v44 = vadd.f32 %v901_v42, %v332_v39 }
 0x148   : > { %937 = vst [vmem:[#allocation2 + $0x10] sm:$0xff] %v925_v43  ;;  %v841_v45 = vpop.f32.mrb[4].mxu1 }
 0x149   : > { %938 = vst [vmem:[#allocation2 + $0x18] sm:$0xff] %v926_v44  ;;  %v904_v47 = vpop.f32.mrb[4].mxu0  ;;  %v843_v49 = vpop.f32.mrb[5].mxu1 }
 0x14a   : > { %v905_v48 = vadd.f32 %v904_v47, %v841_v45  ;;  %v906_v51 = vpop.f32.mrb[5].mxu0  ;;  %v845_v53 = vpop.f32.mrb[6].mxu1 }
 0x14b   : > { %v907_v52 = vadd.f32 %v906_v51, %v843_v49  ;;  %v908_v55 = vpop.f32.mrb[6].mxu0  ;;  %v847_v58 = vpop.f32.mrb[7].mxu1 }
 0x14c   : > { %v927_v56 = vadd.f32 %v905_v48, %v333_v46  ;;  %v909_v57 = vadd.f32 %v908_v55, %v845_v53  ;;  %v910_v60 = vpop.f32.mrb[7].mxu0 }
 0x14d   : > { %v928_v61 = vadd.f32 %v907_v52, %v334_v50  ;;  %v911_v62 = vadd.f32 %v910_v60, %v847_v58  ;;  %v951_v24 = vld [vmem:[#allocation2] sm:$0xff] (!%p1251_p11) }
 0x14e   : > { %939 = vst [vmem:[#allocation2 + $0x20] sm:$0xff] %v927_v56  ;;  %v929_v63 = vadd.f32 %v909_v57, %v335_v54  ;;  %v952_v25 = vld [vmem:[#allocation2 + $0x8] sm:$0xff] (!%p1251_p11)  ;;  %v975_v36 = vadd.f32 (!%p1251_p11), %v968_v31, %v951_v24 }
 0x14f   : > { %940 = vst [vmem:[#allocation2 + $0x28] sm:$0xff] %v928_v61  ;;  %v930_v0 = vadd.f32 %v911_v62, %v336_v59  ;;  %v953_v28 = vld [vmem:[#allocation2 + $0x10] sm:$0xff] (!%p1251_p11)  ;;  %v976_v37 = vadd.f32 (!%p1251_p11), %v972_v32, %v952_v25 }
 0x150   : > { %941 = vst [vmem:[#allocation2 + $0x30] sm:$0xff] %v929_v63  ;;  %v851_v1 = vpop.f32.mrb[8].mxu1  ;;  %v954_v29 = vld [vmem:[#allocation2 + $0x18] sm:$0xff] (!%p1251_p11)  ;;  %v977_v38 = vadd.f32 (!%p1251_p11), %v968_v31, %v953_v28  ;;  %v987_v46 = vmax.f32 (!%p1251_p11), %v975_v36, 0.0 }
 0x151   : > { %942 = vst [vmem:[#allocation2 + $0x38] sm:$0xff] %v930_v0  ;;  %v914_v3 = vpop.f32.mrb[8].mxu0  ;;  %v853_v5 = vpop.f32.mrb[9].mxu1  ;;  %v978_v39 = vadd.f32 (!%p1251_p11), %v972_v32, %v954_v29  ;;  %v988_v47 = vmax.f32 (!%p1251_p11), %v976_v37, 0.0 }
 0x152   : > { %v915_v4 = vadd.f32 %v914_v3, %v851_v1  ;;  %v916_v7 = vpop.f32.mrb[9].mxu0  ;;  %v855_v9 = vpop.f32.mrb[10].mxu1  ;;  %v989_v48 = vmax.f32 (!%p1251_p11), %v977_v38, 0.0 }
 0x153   : > { %v917_v8 = vadd.f32 %v916_v7, %v853_v5  ;;  %v918_v11 = vpop.f32.mrb[10].mxu0  ;;  %v857_v14 = vpop.f32.mrb[11].mxu1  ;;  %950 = sbr.rel (%p1251_p11) target bundleno = 360 (0x168), region = 63  ;;  %v990_v49 = vmax.f32 (!%p1251_p11), %v978_v39, 0.0  ;;  %v1264_v56 = vpack.c.bf16 (!%p1251_p11), %v988_v47, %v987_v46 }
 0x154   : > { %v931_v12 = vadd.f32 %v915_v4, %v337_v2  ;;  %v919_v13 = vadd.f32 %v918_v11, %v855_v9  ;;  %v920_v16 = vpop.f32.mrb[11].mxu0 }
 0x155   : > { %v932_v17 = vadd.f32 %v917_v8, %v338_v6  ;;  %v921_v18 = vadd.f32 %v920_v16, %v857_v14  ;;  %v955_v30 = vld [vmem:[#allocation2 + $0x20] sm:$0xff] (!%p1251_p11)  ;;  %v1265_v57 = vpack.c.bf16 (!%p1251_p11), %v990_v49, %v989_v48  ;;  %1035 = vst [vmem:[%s1671_s3] sm:$0xff] (!%p1251_p11), %v1264_v56 }
 0x156   : > { %943 = vst [vmem:[#allocation2 + $0x40] sm:$0xff] %v931_v12  ;;  %v933_v19 = vadd.f32 %v919_v13, %v339_v10  ;;  %v956_v33 = vld [vmem:[#allocation2 + $0x28] sm:$0xff] (!%p1251_p11)  ;;  %v979_v40 = vadd.f32 (!%p1251_p11), %v968_v31, %v955_v30 }
 0x157   : > { %944 = vst [vmem:[#allocation2 + $0x48] sm:$0xff] %v932_v17  ;;  %v934_v20 = vadd.f32 %v921_v18, %v340_v15  ;;  %v957_v34 = vld [vmem:[#allocation2 + $0x30] sm:$0xff] (!%p1251_p11)  ;;  %v980_v41 = vadd.f32 (!%p1251_p11), %v972_v32, %v956_v33  ;;  %1036 = vst [vmem:[%s1671_s3 + $0x8] sm:$0xff] (!%p1251_p11), %v1265_v57 }
 0x158   : > { %945 = vst [vmem:[#allocation2 + $0x50] sm:$0xff] %v933_v19  ;;  %v958_v35 = vld [vmem:[#allocation2 + $0x38] sm:$0xff] (!%p1251_p11)  ;;  %v981_v42 = vadd.f32 (!%p1251_p11), %v968_v31, %v957_v34  ;;  %v991_v52 = vmax.f32 (!%p1251_p11), %v979_v40, 0.0 }
 0x159   : > { %946 = vst [vmem:[#allocation2 + $0x58] sm:$0xff] %v934_v20  ;;  %v982_v43 = vadd.f32 (!%p1251_p11), %v972_v32, %v958_v35  ;;  %v992_v53 = vmax.f32 (!%p1251_p11), %v980_v41, 0.0 }
 0x15a   : > { %v993_v54 = vmax.f32 %v981_v42, 0.0 }
 0x15b   : > { %v994_v55 = vmax.f32 %v982_v43, 0.0  ;;  %v1266_v60 = vpack.c.bf16 %v992_v53, %v991_v52 }
 0x15d   : > { %v959_v44 = vld [vmem:[#allocation2 + $0x40] sm:$0xff]  ;;  %v1267_v61 = vpack.c.bf16 %v994_v55, %v993_v54  ;;  %1037 = vst [vmem:[%s1671_s3 + $0x10] sm:$0xff] %v1266_v60 }
 0x15e   : > { %v960_v45 = vld [vmem:[#allocation2 + $0x48] sm:$0xff]  ;;  %v983_v58 = vadd.f32 %v968_v31, %v959_v44 }
 0x15f   : > { %v961_v50 = vld [vmem:[#allocation2 + $0x50] sm:$0xff]  ;;  %v984_v59 = vadd.f32 %v972_v32, %v960_v45  ;;  %1038 = vst [vmem:[%s1671_s3 + $0x18] sm:$0xff] %v1267_v61 }
 0x160   : > { %v962_v51 = vld [vmem:[#allocation2 + $0x58] sm:$0xff]  ;;  %v985_v62 = vadd.f32 %v968_v31, %v961_v50  ;;  %v995_v0 = vmax.f32 %v983_v58, 0.0 }
 0x161   : > { %v986_v63 = vadd.f32 %v972_v32, %v962_v51  ;;  %v996_v1 = vmax.f32 %v984_v59, 0.0 }
 0x162   : > { %v997_v2 = vmax.f32 %v985_v62, 0.0 }
 0x163   : > { %v998_v3 = vmax.f32 %v986_v63, 0.0  ;;  %v1268_v4 = vpack.c.bf16 %v996_v1, %v995_v0 }
 0x165   : > { %v1269_v5 = vpack.c.bf16 %v998_v3, %v997_v2  ;;  %1039 = vst [vmem:[%s1671_s3 + $0x20] sm:$0xff] %v1268_v4 }
 0x167   : > { %1040 = vst [vmem:[%s1671_s3 + $0x28] sm:$0xff] %v1269_v5 }
 0x168 PF: > { %s13_s16 = sadd.s32 1, %s1477_s16   ;;  %s1672_s12 = smov %s1465_s13 }
 0x169   : > { %p10_p12 = scmp.ge.s32.totalorder %s13_s16, 7   ;;  %s1673_s13 = smov %s1535_s20 }
 0x16a   : > { %s1674_s14 = smov %s1473_s15  ;;  %s1675_s15 = smov %s1677_s17 }
 0x16b   :  { %12 = sbr.rel (!%p10_p12) target bundleno = 3 (0x3), region = 104 }

// kernel: alexnet_forward.19
= control target key start
LH: loop header
LB: loop body
LE: loop exit
PB: predicated region body
PF: predicated region fallthrough
CT: control target
= control target key end

     0   :  { %s431_s15 = smov 0   ;;  %s457_s0 = inlined_call_operand.vmem [shape: bf16[2,2,2,256], index: 0, kind: input, shape index: {}]   ;;  %s458_s1 = inlined_call_operand.vmem [shape: bf16[2,2,1,256], index: 1, kind: input, shape index: {}]   ;;  %s459_s2 = inlined_call_operand.vmem [shape: bf16[2,1,2,256], index: 2, kind: input, shape index: {}]   ;;  %s460_s3 = inlined_call_operand.vmem [shape: bf16[2,1,1,256], index: 3, kind: input, shape index: {}]   ;;  %s461_s4 = inlined_call_operand.vmem [shape: bf16[2,1,1,256], index: 4, kind: output, shape index: {}]  }
   0x1 LB: > { %s375_s16 = sadd.s32 4294967295, %s404_s15   ;;  %p379_p0 = scmp.ge.s32.totalorder %s404_s15, 1  ;;  %s404_s15 = sphi %s431_s15, %s14_s15  }
   0x2   : > { %p188_p1 = scmp.lt.s32.totalorder %s404_s15, 3 }
   0x4   : > { %p189_p2 = pnand %p379_p0, %p188_p1 }
   0x5   : > { %p224_p3 = scmp.lt.s32.totalorder (!%p189_p2), %s375_s16, 1  ;;  %vm276_vm0 = vcmask (!%p189_p2), 1040384   ;;  %vm277_vm1 = vsmask.f32 (!%p189_p2), 256  ;;  %vm279_vm2 = vcmask (!%p189_p2), 1041409  }
   0x6   : > { %192 = sbr.rel (%p189_p2) target bundleno = 37 (0x25), region = 36  ;;  %vm280_vm3 = vsmask.f32 (!%p189_p2), 1280  ;;  %vm278_vm4 = vmand (!%p189_p2), %vm276_vm0, %vm277_vm1 }
   0x7   : > { %vm281_vm5 = vmand (!%p189_p2), %vm279_vm2, %vm280_vm3 }
   0x8   : > { %vm282_vm6 = vmor (!%p189_p2), %vm281_vm5, %vm278_vm4 }
   0xd   : > { %s463_s16 = smov (!%p224_p3, %s375_s16), 1 }
   0xe   : > { %s380_s17 = sshll.u32 %s463_s16, 2  ;;  %s382_s18 = sshll.u32 %s463_s16, 1 }
   0xf   : > { %s231_s21 = scalar_lea.vmem %s458_s1, %s380_s17  ;;  %s235_s24 = scalar_lea.vmem %s459_s2, %s382_s18 }
  0x10   : > { %s239_s27 = scalar_lea.vmem %s460_s3, %s382_s18  ;;  %v246_v0 = vld [vmem:[%s231_s21] sm:$0x3]  ;;  %v247_v1 = vld [vmem:[%s231_s21 + $0x2] sm:$0x3]  ;;  %s227_s30 = scalar_lea.vmem %s457_s0, %s380_s17 }
  0x11   : > { %v248_v2 = vld [vmem:[%s235_s24] sm:$0x3]  ;;  %v245_v11 = vld [vmem:[%s227_s30 + $0x2] sm:$0x3]  ;;  %s243_s7 = scalar_lea.vmem %s461_s4, %s382_s18 }
  0x12   : > { %v249_v3 = vld [vmem:[%s239_s27] sm:$0x3]  ;;  %v254_v6 = vshrl.u32 %v248_v2, 16  ;;  %v270_v14 = vshrl.u32 %v245_v11, 16 }
  0x13   : > { %v250_v4 = vmax.bf16 %v249_v3, %v246_v0  ;;  %v244_v7 = vld [vmem:[%s227_s30] sm:$0x3] }
  0x14   : > { %v262_v10 = vshrl.u32 %v244_v7, 16  ;;  %v283_v16 = vld [vmem:[%s243_s7] sm:$0x3] }
  0x15   : > { %v251_v5 = vmax.bf16 %v250_v4, %v247_v1 }
  0x17   : > { %v252_v8 = vmax.bf16 %v251_v5, %v248_v2 }
  0x19   : > { %v259_v9 = vmax.bf16 %v254_v6, %v252_v8 }
  0x1b   : > { %v260_v12 = vmax.bf16 %v259_v9, %v244_v7 }
  0x1d   : > { %v267_v13 = vmax.bf16 %v262_v10, %v260_v12 }
  0x1f   : > { %v268_v15 = vmax.bf16 %v267_v13, %v245_v11 }
  0x21   : > { %v275_v17 = vmax.bf16 %v270_v14, %v268_v15 }
  0x23   : > { %v284_v18 = vsel %vm282_vm6, %v275_v17, %v283_v16 }
  0x24   : > { %285 = vst [vmem:[%s243_s7] sm:$0x3] %v284_v18 }
  0x25 PF: > { %s14_s15 = sadd.s32 1, %s404_s15  }
  0x26   : > { %p11_p4 = scmp.ge.s32.totalorder %s14_s15, 4  }
  0x28   :  { %13 = sbr.rel (!%p11_p4) target bundleno = 1 (0x1), region = 75 }

// kernel: alexnet_forward.20
= control target key start
LH: loop header
LB: loop body
LE: loop exit
PB: predicated region body
PF: predicated region fallthrough
CT: control target
= control target key end

     0   :  { %s901_s9 = smov 0   ;;  %s1028_s0 = inlined_call_operand.vmem [shape: bf16[512,8], index: 0, kind: input, shape index: {}]   ;;  %s1029_s1 = inlined_call_operand.vmem [shape: bf16[8,36], index: 1, kind: input, shape index: {}]   ;;  %s1030_s2 = inlined_call_operand.vmem [shape: bf16[512,36], index: 2, kind: output, shape index: {}]  }
   0x1 LB: > { %s692_s10 = sadd.s32 4294967295, %s884_s9   ;;  %p696_p0 = scmp.ge.s32.totalorder %s884_s9, 1  ;;  %s884_s9 = sphi %s901_s9, %s12_s9  }
   0x2   : > { %p113_p1 = scmp.lt.s32.totalorder %s884_s9, 3 }
   0x4   : > { %p114_p2 = pnand %p696_p0, %p113_p1 }
   0x5   : > { %v180_v0 = vld [vmem:[%s1029_s1] sm:$0xf] (!%p114_p2)  ;;  %vm310_vm0 = vcmask (!%p114_p2), 1043456   ;;  %s697_s13 = sshll.u32 (!%p114_p2), %s692_s10, 5  ;;  %vm261_vm1 = vcmask (!%p114_p2), 64512   ;;  %vm603_vm2 = vcmask (!%p114_p2), 289792  }
   0x6   : > { %117 = sbr.rel (%p114_p2) target bundleno = 261 (0x105), region = 28  ;;  %852 = vmatprep.subr.msk.bf16.mxu0 (!%p114_p2), %vm310_vm0, %v180_v0  ;;  %853 = vmatprep.subr.msk.bf16.mxu1 (!%p114_p2), %vm310_vm0, %v180_v0  ;;  %v312_v1 = vsel (!%p114_p2), %vm310_vm0, %v180_v0, 0  ;;  %p136_p3 = scmp.lt.s32.totalorder (!%p114_p2), %s697_s13, 63 }
   0x7   : > { %817 = vmatpush3.bf16.msra.mxu0 (!%p114_p2), %v312_v1  ;;  %851 = vmatpush3.bf16.msra.mxu1 (!%p114_p2), %v312_v1 }
   0xd   : > { %s1032_s13 = smov (!%p136_p3, %s697_s13), 63 }
   0xe   : > { %s698_s14 = sshll.u32 %s1032_s13, 2 }
   0xf   : > { %s920_s17 = scalar_lea.vmem %s1028_s0, %s698_s14  ;;  %s959_s20 = scalar_lea.vmem %s1030_s2, %s698_s14 }
  0x10   : > { %v862_v2 = vld [vmem:[%s920_s17] sm:$0xff]   ;;  %v864_v4 = vld [vmem:[%s920_s17 + $0x8] sm:$0xff]   ;;  %v866_v6 = vld [vmem:[%s920_s17 + $0x10] sm:$0xff]  }
  0x11   : > { %v863_v3 = vld [vmem:[%s920_s17 + $0x40] sm:$0xff]   ;;  %818 = vmatprep.mubr.msk.bf16.mxu0 %vm261_vm1, %v862_v2  ;;  %v865_v5 = vld [vmem:[%s920_s17 + $0x48] sm:$0xff]   ;;  %v867_v7 = vld [vmem:[%s920_s17 + $0x50] sm:$0xff]  }
  0x12   : > { %834 = vmatprep.mubr.msk.bf16.mxu1 %vm261_vm1, %v863_v3  ;;  %819 = vmatmul.mubr.msk.bf16.vlgmr.msra.gmra.mrb[0].mxu0 %vm261_vm1, %v864_v4  ;;  %v868_v8 = vld [vmem:[%s920_s17 + $0x18] sm:$0xff]   ;;  %v870_v10 = vld [vmem:[%s920_s17 + $0x20] sm:$0xff]   ;;  %v872_v12 = vld [vmem:[%s920_s17 + $0x28] sm:$0xff]  }
  0x13   : > { %835 = vmatmul.mubr.msk.bf16.vlgmr.msra.gmra.mrb[0].mxu1 %vm261_vm1, %v865_v5  ;;  %822 = vmatprep.mubr.msk.bf16.mxu0 %vm261_vm1, %v866_v6  ;;  %v869_v9 = vld [vmem:[%s920_s17 + $0x58] sm:$0xff]   ;;  %v871_v11 = vld [vmem:[%s920_s17 + $0x60] sm:$0xff]   ;;  %v873_v13 = vld [vmem:[%s920_s17 + $0x68] sm:$0xff]  }
  0x14   : > { %838 = vmatprep.mubr.msk.bf16.mxu1 %vm261_vm1, %v867_v7  ;;  %v874_v14 = vld [vmem:[%s920_s17 + $0x30] sm:$0xff]   ;;  %v876_v16 = vld [vmem:[%s920_s17 + $0x38] sm:$0xff]  }
  0x15   : > { %v875_v15 = vld [vmem:[%s920_s17 + $0x70] sm:$0xff]   ;;  %v877_v17 = vld [vmem:[%s920_s17 + $0x78] sm:$0xff]  }
  0x1a   : > { %823 = vmatmul.mubr.msk.bf16.gmra.mrb[4].mxu0 %vm261_vm1, %v868_v8 }
  0x1b   : > { %839 = vmatmul.mubr.msk.bf16.gmra.mrb[4].mxu1 %vm261_vm1, %v869_v9  ;;  %826 = vmatprep.mubr.msk.bf16.mxu0 %vm261_vm1, %v870_v10 }
  0x1c   : > { %842 = vmatprep.mubr.msk.bf16.mxu1 %vm261_vm1, %v871_v11 }
  0x22   : > { %827 = vmatmul.mubr.msk.bf16.gmra.mrb[8].mxu0 %vm261_vm1, %v872_v12 }
  0x23   : > { %843 = vmatmul.mubr.msk.bf16.gmra.mrb[8].mxu1 %vm261_vm1, %v873_v13  ;;  %830 = vmatprep.mubr.msk.bf16.mxu0 %vm261_vm1, %v874_v14 }
  0x24   : > { %846 = vmatprep.mubr.msk.bf16.mxu1 %vm261_vm1, %v875_v15 }
  0x2a   : > { %831 = vmatmul.mubr.msk.bf16.gmra.mrb[12].mxu0 %vm261_vm1, %v876_v16 }
  0x2b   : > { %847 = vmatmul.mubr.msk.bf16.gmra.mrb[12].mxu1 %vm261_vm1, %v877_v17 }
  0xe5   : > { %v820_v18 = vpop.f32.mrb[0].mxu0 }
  0xe6   : > { %v769_v19 = vpack.c.bf16 %v820_v18, %v820_v18  ;;  %v836_v20 = vpop.f32.mrb[0].mxu1  ;;  %v348_v21 = vpop.f32.mrb[1].mxu0 }
  0xe7   : > { %v785_v22 = vpack.c.bf16 %v836_v20, %v836_v20  ;;  %v767_v23 = vpack.c.bf16 %v348_v21, %v348_v21  ;;  %v412_v24 = vpop.f32.mrb[1].mxu1  ;;  %v821_v25 = vpop.f32.mrb[2].mxu0 }
  0xe8   : > { %606 = vst.msk [vmem:[%s959_s20 + $0x8] sm:$0xf] %vm603_vm2, %v769_v19  ;;  %v783_v26 = vpack.c.bf16 %v412_v24, %v412_v24  ;;  %v770_v27 = vpack.c.bf16 %v821_v25, %v821_v25  ;;  %v837_v28 = vpop.f32.mrb[2].mxu1  ;;  %v351_v29 = vpop.f32.mrb[3].mxu0 }
  0xe9   : > { %622 = vst.msk [vmem:[%s959_s20 + $0x48] sm:$0xf] %vm603_vm2, %v785_v22  ;;  %604 = vst.msk [vmem:[%s959_s20] sm:$0xf] %vm603_vm2, %v767_v23  ;;  %v786_v30 = vpack.c.bf16 %v837_v28, %v837_v28  ;;  %v768_v31 = vpack.c.bf16 %v351_v29, %v351_v29  ;;  %v415_v32 = vpop.f32.mrb[3].mxu1 }
  0xea   : > { %620 = vst.msk [vmem:[%s959_s20 + $0x40] sm:$0xf] %vm603_vm2, %v783_v26  ;;  %607 = vst.msk [vmem:[%s959_s20 + $0xc] sm:$0xf] %vm603_vm2, %v770_v27  ;;  %v784_v33 = vpack.c.bf16 %v415_v32, %v415_v32 }
  0xeb   : > { %623 = vst.msk [vmem:[%s959_s20 + $0x4c] sm:$0xf] %vm603_vm2, %v786_v30  ;;  %605 = vst.msk [vmem:[%s959_s20 + $0x4] sm:$0xf] %vm603_vm2, %v768_v31 }
  0xec   : > { %621 = vst.msk [vmem:[%s959_s20 + $0x44] sm:$0xf] %vm603_vm2, %v784_v33 }
  0xed   : > { %v824_v34 = vpop.f32.mrb[4].mxu0 }
  0xee   : > { %v773_v35 = vpack.c.bf16 %v824_v34, %v824_v34  ;;  %v840_v36 = vpop.f32.mrb[4].mxu1  ;;  %v364_v37 = vpop.f32.mrb[5].mxu0 }
  0xef   : > { %v789_v38 = vpack.c.bf16 %v840_v36, %v840_v36  ;;  %v771_v39 = vpack.c.bf16 %v364_v37, %v364_v37  ;;  %v428_v40 = vpop.f32.mrb[5].mxu1  ;;  %v825_v41 = vpop.f32.mrb[6].mxu0 }
  0xf0   : > { %610 = vst.msk [vmem:[%s959_s20 + $0x18] sm:$0xf] %vm603_vm2, %v773_v35  ;;  %v787_v42 = vpack.c.bf16 %v428_v40, %v428_v40  ;;  %v774_v43 = vpack.c.bf16 %v825_v41, %v825_v41  ;;  %v841_v44 = vpop.f32.mrb[6].mxu1  ;;  %v367_v45 = vpop.f32.mrb[7].mxu0 }
  0xf1   : > { %626 = vst.msk [vmem:[%s959_s20 + $0x58] sm:$0xf] %vm603_vm2, %v789_v38  ;;  %608 = vst.msk [vmem:[%s959_s20 + $0x10] sm:$0xf] %vm603_vm2, %v771_v39  ;;  %v790_v46 = vpack.c.bf16 %v841_v44, %v841_v44  ;;  %v772_v47 = vpack.c.bf16 %v367_v45, %v367_v45  ;;  %v431_v48 = vpop.f32.mrb[7].mxu1 }
  0xf2   : > { %624 = vst.msk [vmem:[%s959_s20 + $0x50] sm:$0xf] %vm603_vm2, %v787_v42  ;;  %611 = vst.msk [vmem:[%s959_s20 + $0x1c] sm:$0xf] %vm603_vm2, %v774_v43  ;;  %v788_v49 = vpack.c.bf16 %v431_v48, %v431_v48 }
  0xf3   : > { %627 = vst.msk [vmem:[%s959_s20 + $0x5c] sm:$0xf] %vm603_vm2, %v790_v46  ;;  %609 = vst.msk [vmem:[%s959_s20 + $0x14] sm:$0xf] %vm603_vm2, %v772_v47 }
  0xf4   : > { %625 = vst.msk [vmem:[%s959_s20 + $0x54] sm:$0xf] %vm603_vm2, %v788_v49 }
  0xf5   : > { %v828_v50 = vpop.f32.mrb[8].mxu0 }
  0xf6   : > { %v777_v51 = vpack.c.bf16 %v828_v50, %v828_v50  ;;  %v844_v52 = vpop.f32.mrb[8].mxu1  ;;  %v380_v53 = vpop.f32.mrb[9].mxu0 }
  0xf7   : > { %v793_v54 = vpack.c.bf16 %v844_v52, %v844_v52  ;;  %v775_v55 = vpack.c.bf16 %v380_v53, %v380_v53  ;;  %v444_v56 = vpop.f32.mrb[9].mxu1  ;;  %v829_v57 = vpop.f32.mrb[10].mxu0 }
  0xf8   : > { %614 = vst.msk [vmem:[%s959_s20 + $0x28] sm:$0xf] %vm603_vm2, %v777_v51  ;;  %v791_v58 = vpack.c.bf16 %v444_v56, %v444_v56  ;;  %v778_v59 = vpack.c.bf16 %v829_v57, %v829_v57  ;;  %v845_v60 = vpop.f32.mrb[10].mxu1  ;;  %v383_v61 = vpop.f32.mrb[11].mxu0 }
  0xf9   : > { %630 = vst.msk [vmem:[%s959_s20 + $0x68] sm:$0xf] %vm603_vm2, %v793_v54  ;;  %612 = vst.msk [vmem:[%s959_s20 + $0x20] sm:$0xf] %vm603_vm2, %v775_v55  ;;  %v794_v62 = vpack.c.bf16 %v845_v60, %v845_v60  ;;  %v776_v63 = vpack.c.bf16 %v383_v61, %v383_v61  ;;  %v447_v0 = vpop.f32.mrb[11].mxu1 }
  0xfa   : > { %628 = vst.msk [vmem:[%s959_s20 + $0x60] sm:$0xf] %vm603_vm2, %v791_v58  ;;  %615 = vst.msk [vmem:[%s959_s20 + $0x2c] sm:$0xf] %vm603_vm2, %v778_v59  ;;  %v792_v1 = vpack.c.bf16 %v447_v0, %v447_v0 }
  0xfb   : > { %631 = vst.msk [vmem:[%s959_s20 + $0x6c] sm:$0xf] %vm603_vm2, %v794_v62  ;;  %613 = vst.msk [vmem:[%s959_s20 + $0x24] sm:$0xf] %vm603_vm2, %v776_v63 }
  0xfc   : > { %629 = vst.msk [vmem:[%s959_s20 + $0x64] sm:$0xf] %vm603_vm2, %v792_v1 }
  0xfd   : > { %v832_v2 = vpop.f32.mrb[12].mxu0 }
  0xfe   : > { %v781_v3 = vpack.c.bf16 %v832_v2, %v832_v2  ;;  %v848_v4 = vpop.f32.mrb[12].mxu1  ;;  %v396_v5 = vpop.f32.mrb[13].mxu0 }
  0xff   : > { %v797_v6 = vpack.c.bf16 %v848_v4, %v848_v4  ;;  %v779_v7 = vpack.c.bf16 %v396_v5, %v396_v5  ;;  %v460_v8 = vpop.f32.mrb[13].mxu1  ;;  %v833_v9 = vpop.f32.mrb[14].mxu0 }
 0x100   : > { %618 = vst.msk [vmem:[%s959_s20 + $0x38] sm:$0xf] %vm603_vm2, %v781_v3  ;;  %v795_v10 = vpack.c.bf16 %v460_v8, %v460_v8  ;;  %v782_v11 = vpack.c.bf16 %v833_v9, %v833_v9  ;;  %v849_v12 = vpop.f32.mrb[14].mxu1  ;;  %v399_v13 = vpop.f32.mrb[15].mxu0 }
 0x101   : > { %634 = vst.msk [vmem:[%s959_s20 + $0x78] sm:$0xf] %vm603_vm2, %v797_v6  ;;  %616 = vst.msk [vmem:[%s959_s20 + $0x30] sm:$0xf] %vm603_vm2, %v779_v7  ;;  %v798_v14 = vpack.c.bf16 %v849_v12, %v849_v12  ;;  %v780_v15 = vpack.c.bf16 %v399_v13, %v399_v13  ;;  %v463_v16 = vpop.f32.mrb[15].mxu1 }
 0x102   : > { %632 = vst.msk [vmem:[%s959_s20 + $0x70] sm:$0xf] %vm603_vm2, %v795_v10  ;;  %619 = vst.msk [vmem:[%s959_s20 + $0x3c] sm:$0xf] %vm603_vm2, %v782_v11  ;;  %v796_v17 = vpack.c.bf16 %v463_v16, %v463_v16 }
 0x103   : > { %635 = vst.msk [vmem:[%s959_s20 + $0x7c] sm:$0xf] %vm603_vm2, %v798_v14  ;;  %617 = vst.msk [vmem:[%s959_s20 + $0x34] sm:$0xf] %vm603_vm2, %v780_v15 }
 0x104   : > { %633 = vst.msk [vmem:[%s959_s20 + $0x74] sm:$0xf] %vm603_vm2, %v796_v17 }
 0x105 PF: > { %s12_s9 = sadd.s32 1, %s884_s9  }
 0x106   : > { %p9_p4 = scmp.ge.s32.totalorder %s12_s9, 4  }
 0x108   :  { %11 = sbr.rel (!%p9_p4) target bundleno = 1 (0x1), region = 58 }

// kernel: alexnet_forward.21
= control target key start
LH: loop header
LB: loop body
LE: loop exit
PB: predicated region body
PF: predicated region fallthrough
CT: control target
= control target key end

     0   :  { %s1762_s0 = inlined_call_operand.vmem [shape: bf16[16,9216], index: 0, kind: input, shape index: {}]   ;;  %s1763_s1 = inlined_call_operand.hbm [shape: bf16[9216,4096], index: 1, kind: input, shape index: {}]   ;;  %s1764_s2 = inlined_call_operand.vmem [shape: f32[1,4096], index: 2, kind: input, shape index: {}]   ;;  %s1765_s3 = inlined_call_operand.vmem [shape: bf16[16,4096], index: 3, kind: output, shape index: {}]  }
   0x1   :  { %1769 = sst [smem:[#allocation12_spill]] %s1762_s0 }
   0x2   :  { %8 = vsyncpa [#allocation5], 0 }
   0x3   :  { %10 = vsyncpa [#allocation5 + $0x1], 0  ;;  %s1464_s12 = smov 0   ;;  %s1466_s13 = smov 0  }
   0x4   :  { %s1468_s14 = smov 0   ;;  %s1470_s15 = smov 0  }
   0x5   :  { %s1472_s16 = smov 0   ;;  %s1474_s17 = smov 0  }
   0x6   :  { %s1476_s18 = smov 0   ;;  %s1478_s19 = smov 0  }
   0x7   :  { %s1480_s20 = smov 0   ;;  %s1482_s21 = smov 0  }
   0x8   :  { %s1484_s22 = smov 0   ;;  %s1486_s23 = smov 0  }
   0x9 LB: > { %1770 = sst [smem:[#allocation8_spill]] %s1433_s22  ;;  %s1004_s24 = sadd.s32 4294967295, %s1437_s23   ;;  %s1437_s23 = sphi %s1486_s23, %s16_s23   ;;  %s1433_s22 = sphi %s1484_s22, %s1783_s22   ;;  %s1429_s21 = sphi %s1482_s21, %s1793_s21   ;;  %s1425_s20 = sphi %s1480_s20, %s1792_s20   ;;  %s1421_s19 = sphi %s1478_s19, %s1791_s19   ;;  %s1417_s18 = sphi %s1476_s18, %s1790_s18   ;;  %s1413_s17 = sphi %s1474_s17, %s1789_s17   ;;  %s1409_s16 = sphi %s1472_s16, %s1788_s16   ;;  %s1405_s15 = sphi %s1470_s15, %s1787_s15   ;;  %s1401_s14 = sphi %s1468_s14, %s1786_s14   ;;  %s1397_s13 = sphi %s1466_s13, %s1785_s13   ;;  %s1393_s12 = sphi %s1464_s12, %s1784_s12  }
   0xa   : > { %s28_s25 = sadd.s32 1, %s1429_s21  ;;  %s31_s26 = sadd.s32 1, %s1433_s22 }
   0xb   : > { %p29_p0 = scmp.ge.s32.totalorder %s28_s25, 18  ;;  %s44_s27 = sadd.s32 1, %s1417_s18 }
   0xc   : > { %p51_p1 = scmp.ne.s32.totalorder %s1417_s18, %s1413_s17  ;;  %p52_p2 = scmp.eq.s32.totalorder %s1437_s23, 0 }
   0xd   : > { %s1795_s25 = smov (%p29_p0, %s28_s25), 0  ;;  %s1797_s26 = smov (!%p29_p0, %s31_s26), %s1433_s22 }
   0xe   : > { %1771 = sst [smem:[#allocation9_spill]] %s1795_s25  ;;  %s40_s28 = ssub.s32 %s1429_s21, %s1795_s25 }
   0xf   : > { %p33_p3 = scmp.ge.s32.totalorder %s1797_s26, 16  ;;  %p42_p4 = scmp.eq.s32.totalorder %s40_s28, 0 }
  0x10   : > { %p1536_p5 = por %p52_p2, %p51_p1  ;;  %s72_s30 = sadd.s32 1, %s1409_s16 }
  0x11   : > { %s1799_s26 = smov (%p33_p3, %s1797_s26), 0  ;;  %p79_p6 = scmp.ne.s32.totalorder %s1409_s16, %s1405_s15 }
  0x12   : > { %1773 = sst [smem:[#allocation10_spill]] %s1799_s26  ;;  %s68_s5 = ssub.s32 %s1433_s22, %s1799_s26 }
  0x13   : > { %s1544_s4 = scalar_select %p42_p4, %s1417_s18, %s44_s27  }
  0x14   : > { %s69_s6 = sor.u32 %s68_s5, %s40_s28  ;;  %p85_p7 = scmp.ne.s32.totalorder %s1405_s15, %s1401_s14 }
  0x15   : > { %1774 = sst [smem:[#allocation11_spill]] %s1544_s4  ;;  %p70_p8 = scmp.eq.s32.totalorder %s69_s6, 0 }
  0x16   : > { %p1552_p9 = por %p79_p6, %p52_p2  ;;  %p86_p10 = scmp.eq.s32.totalorder %s1004_s24, 0 }
  0x17   : > { %p124_p11 = scmp.eq.s32.totalorder %s68_s5, 0  ;;  %s126_s10 = sadd.s32 1, %s1397_s13 }
  0x18   : > { %s1559_s8 = scalar_select %p70_p8, %s1409_s16, %s72_s30  }
  0x19   : > { %p1561_p12 = por %p86_p10, %p85_p7  ;;  %p136_p13 = scmp.ne.s32.totalorder %s1397_s13, %s1393_s12 }
  0x1a   : > { %s1567_s11 = scalar_select %p124_p11, %s1397_s13, %s126_s10  }
  0x1b   : > { %p137_p0 = scmp.eq.s32.totalorder %s1004_s24, 287  ;;  %p1007_p2 = scmp.ge.s32.totalorder %s1437_s23, 288 }
  0x1d   : > { %p1573_p1 = por %p137_p0, %p136_p13  ;;  %159 = sbr.rel (%p1007_p2) target bundleno = 77 (0x4d), region = 16 }
  0x1f   : > { %s1777_s14 = scalar_select %p1573_p1, 1, 0 }
  0x24   : > { %162 = sbr.rel (!%p1536_p5) target bundleno = 48 (0x30), region = 20  ;;  %s164_s27 = sand.u32 (%p1536_p5), 1, %s1417_s18  }
  0x25   : > { %s1098_s28 = sshll.u32 (%p1536_p5), %s1429_s21, 4  ;;  %s1008_s30 = sshll.u32 (%p1536_p5), %s164_s27, 5 }
  0x26   : > { %s1778_s0 = sld [smem:[#allocation12_spill]] (%p1536_p5)  ;;  %s166_s24 = scalar_lea.vmem (%p1536_p5), [#allocation3], %s1008_s30 }
  0x2c   : > { %s172_s10 = scalar_lea.vmem %s1778_s0, %s1098_s28 }
  0x2d   : > { %v185_v0 = vld [vmem:[%s172_s10] sm:$0xff]  ;;  %v187_v1 = vld [vmem:[%s172_s10 + $0x8] sm:$0xff] }
  0x2e   : > { %v189_v2 = vld [vmem:[%s172_s10 + $0x120] sm:$0xff]  ;;  %186 = vst [vmem:[%s166_s24] sm:$0xff] %v185_v0  ;;  %188 = vst [vmem:[%s166_s24 + $0x8] sm:$0xff] %v187_v1  ;;  %v191_v3 = vld [vmem:[%s172_s10 + $0x128] sm:$0xff] }
  0x2f   : > { %190 = vst [vmem:[%s166_s24 + $0x10] sm:$0xff] %v189_v2  ;;  %192 = vst [vmem:[%s166_s24 + $0x18] sm:$0xff] %v191_v3 }
  0x30 PF: > { %s199_s29 = sand.u32 1, %s1409_s16   ;;  %s1013_s27 = sshll.u32 %s1433_s22, 1 }
  0x31   : > { %s1011_s26 = sshll.u32 %s199_s29, 9  ;;  %s1099_s25 = sshll.u32 %s1429_s21, 11 }
  0x32   : > { %s210_s5 = sadd.s32 %s1099_s25, %s1013_s27  ;;  %s203_s28 = scalar_lea.vmem [#allocation4], %s1011_s26 }
  0x33   : > { %s213_s6 = sshll.u32 %s203_s28, 4  ;;  %s1015_s0 = sshll.u32 %s210_s5, 6  ;;  %s1588_s6 = int_to_ptr.vmem [resolvable:$true] %s213_s6 }
  0x34   : > { %s1593_s10 = scalar_lea.hbm %s1763_s1, %s1015_s0  ;;  %s1595_s24 = scalar_lea.sflag [#allocation5], %s199_s29 }
  0x35   : > { %s1311_s22 = scalar_lea.hbm %s1593_s10, 8192  ;;  %s1315_s27 = scalar_lea.hbm %s1763_s1, 2359296 }
  0x36   : > { %p1312_p3 = scmp.ne.s32.totalorder %s1593_s10, %s1311_s22  ;;  %p1316_p6 = scmp.lt.u32.totalorder %s1593_s10, %s1763_s1 }
  0x37   : > { %p1317_p7 = scmp.lt.u32.totalorder %s1315_s27, %s1311_s22  ;;  %p1319_p10 = scmp.lt.u32.totalorder %s1311_s22, %s1593_s10 }
  0x38   : > { %p1313_p4 = pnand %p1312_p3, %p1552_p9 }
  0x39   : > { %p1318_p8 = por %p1317_p7, %p1316_p6 }
  0x3a   : > { %p1314_p5 = pneg %p1313_p4 }
  0x3b   : > { %p1320_p11 = por %p1319_p10, %p1318_p8 }
  0x3d   : > { %p1321_p13 = pnand %p1320_p11, %p1314_p5 }
  0x3f   : > { %1324 = shalt.err (!%p1321_p13)
}
  0x40   : > { %s1325_s0 = scalar_lea.vmem %s1588_s6, 8192  ;;  %s1439_s4 = smov [#allocation4]  }
  0x41   : > { %p1326_p0 = scmp.ne.s32.totalorder %s1588_s6, %s1325_s0  ;;  %s1329_s29 = sshll.u32 %s1439_s4, 4  ;;  %s1330_s29 = int_to_ptr.vmem [resolvable:$false] %s1329_s29 }
  0x42   : > { %s1331_s30 = scalar_lea.vmem %s1330_s29, 16384  ;;  %p1332_p4 = scmp.lt.s32.totalorder %s1588_s6, %s1330_s29 }
  0x43   : > { %p1327_p2 = pnand %p1326_p0, %p1552_p9  ;;  %p1333_p1 = scmp.lt.s32.totalorder %s1331_s30, %s1325_s0 }
  0x45   : > { %p1328_p3 = pneg %p1327_p2  ;;  %p1334_p6 = por %p1333_p1, %p1332_p4 }
  0x47   : > { %p1335_p7 = pnand %p1334_p6, %p1328_p3 }
  0x49   : > { %1338 = shalt.err (!%p1335_p7)
}
  0x4a   : > { %s1440_s22 = smov 2048   ;;  %s1441_s25 = smov 128  }
  0x4b   : > { %s1442_s26 = smov 8  }
  0x4c   : > { %1107 = dma.hbm_to_vmem [thread:$0]  (%p1552_p9), %s1593_s10, 8192, %s1588_s6, %s1595_s24, %s1440_s22, %s1441_s25, %s1442_s26  }
  0x4d PF: > { %p1016_p5 = scmp.ge.s32.totalorder %s1437_s23, 1  ;;  %p229_p8 = scmp.lt.s32.totalorder %s1437_s23, 289 }
  0x4f   : > { %p230_p10 = pnand %p1016_p5, %p229_p8 }
  0x50   : > { %s236_s27 = sand.u32 (!%p230_p10), 1, %s1413_s17   ;;  %s242_s5 = sand.u32 (!%p230_p10), 1, %s1405_s15  }
  0x51   : > { %233 = sbr.rel (%p230_p10) target bundleno = 409 (0x199), region = 51  ;;  %s1017_s28 = sshll.u32 (!%p230_p10), %s236_s27, 5 }
  0x52   : > { %s1018_s0 = sshll.u32 (!%p230_p10), %s242_s5, 9  ;;  %s1623_s4 = scalar_lea.vmem (!%p230_p10), [#allocation3], %s1017_s28 }
  0x53   : > { %s243_s29 = scalar_lea.sflag (!%p230_p10), [#allocation5], %s242_s5  ;;  %s1625_s30 = scalar_lea.vmem (!%p230_p10), [#allocation4], %s1018_s0 }
  0x58   : > { %1388 = dma.done.wait (%p1561_p12), %s243_s29, 8192  }
  0x59   : > { %1390 = vsyncadd (%p1561_p12), %s243_s29, 4294959104  ;;  %s273_s7 = sand.u32 1, %s1393_s12   ;;  %s1020_s6 = sshll.u32 %s1425_s20, 1 }
  0x5a   : > { %s1019_s10 = sshll.u32 %s273_s7, 4  ;;  %p281_p9 = scmp.lt.s32.totalorder %s1020_s6, 31 }
  0x5b   : > { %s1639_s25 = scalar_lea.vmem [#allocation6], %s1019_s10  ;;  %p1021_p1 = scmp.ne.s32.totalorder %s1421_s19, 0 }
  0x5c   : > { %s1801_s6 = smov (!%p281_p9, %s1020_s6), 31  ;;  %v1443_v4 = vmov (!%p1021_p1), 0.0  }
  0x5d   : > { %s283_s22 = scalar_lea.vmem %s1764_s2, %s1801_s6  ;;  %290 = sbr.rel (%p1021_p1) target bundleno = 100 (0x64), region = 63  ;;  %291 = vst [vmem:[#allocation2] sm:$0xff] (!%p1021_p1), %v1443_v4  ;;  %292 = vst [vmem:[#allocation2 + $0x8] sm:$0xff] (!%p1021_p1), %v1443_v4 }
  0x5e   : > { %293 = vst [vmem:[#allocation2 + $0x10] sm:$0xff] (!%p1021_p1), %v1443_v4  ;;  %294 = vst [vmem:[#allocation2 + $0x18] sm:$0xff] (!%p1021_p1), %v1443_v4 }
  0x64 PF: > { %v1209_v5 = vld [vmem:[%s1625_s30 + $0x4] ss:$8 sps:$4 sm:$0xff]   ;;  %v1213_v7 = vld [vmem:[%s1625_s30] ss:$8 sps:$4 sm:$0xff]   ;;  %v1215_v9 = vld [vmem:[%s1625_s30 + $0x14] ss:$8 sps:$4 sm:$0xff]  }
  0x65   : > { %v1211_v6 = vld [vmem:[%s1625_s30 + $0x104] ss:$8 sps:$4 sm:$0xff]   ;;  %707 = vmatprep.subr.bf16.mxu1 %v1209_v5  ;;  %v1214_v8 = vld [vmem:[%s1625_s30 + $0x100] ss:$8 sps:$4 sm:$0xff]   ;;  %v1217_v10 = vld [vmem:[%s1625_s30 + $0x114] ss:$8 sps:$4 sm:$0xff]  }
  0x66   : > { %750 = vmatprep.subr.bf16.mxu0 %v1211_v6  ;;  %708 = vmatpush1.bf16.msra.mxu1 %v1213_v7  ;;  %v1219_v11 = vld [vmem:[%s1625_s30 + $0x10] ss:$8 sps:$4 sm:$0xff]   ;;  %v1221_v13 = vld [vmem:[%s1625_s30 + $0x24] ss:$8 sps:$4 sm:$0xff]   ;;  %v1225_v15 = vld [vmem:[%s1625_s30 + $0x20] ss:$8 sps:$4 sm:$0xff]  }
  0x67   : > { %751 = vmatpush1.bf16.msra.mxu0 %v1214_v8  ;;  %709 = vmatprep.subr.bf16.mxu1 %v1215_v9  ;;  %v1220_v12 = vld [vmem:[%s1625_s30 + $0x110] ss:$8 sps:$4 sm:$0xff]   ;;  %v1223_v14 = vld [vmem:[%s1625_s30 + $0x124] ss:$8 sps:$4 sm:$0xff]   ;;  %v1226_v16 = vld [vmem:[%s1625_s30 + $0x120] ss:$8 sps:$4 sm:$0xff]  }
  0x68   : > { %752 = vmatprep.subr.bf16.mxu0 %v1217_v10  ;;  %v1227_v17 = vld [vmem:[%s1625_s30 + $0x34] ss:$8 sps:$4 sm:$0xff]   ;;  %v1231_v19 = vld [vmem:[%s1625_s30 + $0x30] ss:$8 sps:$4 sm:$0xff]   ;;  %v1233_v21 = vld [vmem:[%s1625_s30 + $0x44] ss:$8 sps:$4 sm:$0xff]  }
  0x69   : > { %v1229_v18 = vld [vmem:[%s1625_s30 + $0x134] ss:$8 sps:$4 sm:$0xff]   ;;  %v1232_v20 = vld [vmem:[%s1625_s30 + $0x130] ss:$8 sps:$4 sm:$0xff]   ;;  %v1235_v22 = vld [vmem:[%s1625_s30 + $0x144] ss:$8 sps:$4 sm:$0xff]  }
  0x6a   : > { %710 = vmatpush1.bf16.msra.mxu1 %v1219_v11  ;;  %v1237_v23 = vld [vmem:[%s1625_s30 + $0x40] ss:$8 sps:$4 sm:$0xff]   ;;  %v1239_v25 = vld [vmem:[%s1625_s30 + $0x54] ss:$8 sps:$4 sm:$0xff]   ;;  %v1243_v27 = vld [vmem:[%s1625_s30 + $0x50] ss:$8 sps:$4 sm:$0xff]  }
  0x6b   : > { %753 = vmatpush1.bf16.msra.mxu0 %v1220_v12  ;;  %711 = vmatprep.subr.bf16.mxu1 %v1221_v13  ;;  %v1238_v24 = vld [vmem:[%s1625_s30 + $0x140] ss:$8 sps:$4 sm:$0xff]   ;;  %v1241_v26 = vld [vmem:[%s1625_s30 + $0x154] ss:$8 sps:$4 sm:$0xff]   ;;  %v1244_v28 = vld [vmem:[%s1625_s30 + $0x150] ss:$8 sps:$4 sm:$0xff]  }
  0x6c   : > { %754 = vmatprep.subr.bf16.mxu0 %v1223_v14  ;;  %v1245_v29 = vld [vmem:[%s1625_s30 + $0x64] ss:$8 sps:$4 sm:$0xff]   ;;  %v1249_v31 = vld [vmem:[%s1625_s30 + $0x60] ss:$8 sps:$4 sm:$0xff]   ;;  %v1251_v33 = vld [vmem:[%s1625_s30 + $0x74] ss:$8 sps:$4 sm:$0xff]  }
  0x6d   : > { %v1247_v30 = vld [vmem:[%s1625_s30 + $0x164] ss:$8 sps:$4 sm:$0xff]   ;;  %v1250_v32 = vld [vmem:[%s1625_s30 + $0x160] ss:$8 sps:$4 sm:$0xff]   ;;  %v1253_v34 = vld [vmem:[%s1625_s30 + $0x174] ss:$8 sps:$4 sm:$0xff]  }
  0x6e   : > { %712 = vmatpush1.bf16.msra.mxu1 %v1225_v15  ;;  %v1255_v35 = vld [vmem:[%s1625_s30 + $0x70] ss:$8 sps:$4 sm:$0xff]   ;;  %v1257_v37 = vld [vmem:[%s1625_s30 + $0x84] ss:$8 sps:$4 sm:$0xff]   ;;  %v1261_v39 = vld [vmem:[%s1625_s30 + $0x80] ss:$8 sps:$4 sm:$0xff]  }
  0x6f   : > { %755 = vmatpush1.bf16.msra.mxu0 %v1226_v16  ;;  %713 = vmatprep.subr.bf16.mxu1 %v1227_v17  ;;  %v1256_v36 = vld [vmem:[%s1625_s30 + $0x170] ss:$8 sps:$4 sm:$0xff]   ;;  %v1259_v38 = vld [vmem:[%s1625_s30 + $0x184] ss:$8 sps:$4 sm:$0xff]   ;;  %v1262_v40 = vld [vmem:[%s1625_s30 + $0x180] ss:$8 sps:$4 sm:$0xff]  }
  0x70   : > { %756 = vmatprep.subr.bf16.mxu0 %v1229_v18  ;;  %v1263_v41 = vld [vmem:[%s1625_s30 + $0x94] ss:$8 sps:$4 sm:$0xff]   ;;  %v1267_v43 = vld [vmem:[%s1625_s30 + $0x90] ss:$8 sps:$4 sm:$0xff]   ;;  %v1269_v45 = vld [vmem:[%s1625_s30 + $0xa4] ss:$8 sps:$4 sm:$0xff]  }
  0x71   : > { %v1265_v42 = vld [vmem:[%s1625_s30 + $0x194] ss:$8 sps:$4 sm:$0xff]   ;;  %v1268_v44 = vld [vmem:[%s1625_s30 + $0x190] ss:$8 sps:$4 sm:$0xff]   ;;  %v1271_v46 = vld [vmem:[%s1625_s30 + $0x1a4] ss:$8 sps:$4 sm:$0xff]  }
  0x72   : > { %714 = vmatpush1.bf16.msra.mxu1 %v1231_v19  ;;  %v1273_v47 = vld [vmem:[%s1625_s30 + $0xa0] ss:$8 sps:$4 sm:$0xff]   ;;  %v1275_v49 = vld [vmem:[%s1625_s30 + $0xb4] ss:$8 sps:$4 sm:$0xff]   ;;  %v1279_v51 = vld [vmem:[%s1625_s30 + $0xb0] ss:$8 sps:$4 sm:$0xff]  }
  0x73   : > { %757 = vmatpush1.bf16.msra.mxu0 %v1232_v20  ;;  %715 = vmatprep.subr.bf16.mxu1 %v1233_v21  ;;  %v1274_v48 = vld [vmem:[%s1625_s30 + $0x1a0] ss:$8 sps:$4 sm:$0xff]   ;;  %v1277_v50 = vld [vmem:[%s1625_s30 + $0x1b4] ss:$8 sps:$4 sm:$0xff]   ;;  %v1280_v53 = vld [vmem:[%s1625_s30 + $0x1b0] ss:$8 sps:$4 sm:$0xff]  }
  0x74   : > { %758 = vmatprep.subr.bf16.mxu0 %v1235_v22  ;;  %v1307_v52 = vld [vmem:[%s1623_s4 + $0x4] ss:$16 sps:$4 sm:$0xff]   ;;  %v1310_v56 = vld [vmem:[%s1623_s4 + $0xc] ss:$16 sps:$4 sm:$0xff]   ;;  %v1285_v57 = vld [vmem:[%s1625_s30 + $0xc0] ss:$8 sps:$4 sm:$0xff]  }
  0x75   : > { %v1281_v54 = vld [vmem:[%s1625_s30 + $0xc4] ss:$8 sps:$4 sm:$0xff]   ;;  %739 = vmatprep.mubr.bf16.mxu1 %v1307_v52  ;;  %782 = vmatprep.mubr.bf16.mxu0 %v1310_v56  ;;  %v1286_v58 = vld [vmem:[%s1625_s30 + $0x1c0] ss:$8 sps:$4 sm:$0xff]   ;;  %v1287_v59 = vld [vmem:[%s1625_s30 + $0xd4] ss:$8 sps:$4 sm:$0xff]  }
  0x76   : > { %716 = vmatpush1.bf16.msra.mxu1 %v1237_v23  ;;  %v1283_v55 = vld [vmem:[%s1625_s30 + $0x1c4] ss:$8 sps:$4 sm:$0xff]   ;;  %v1289_v60 = vld [vmem:[%s1625_s30 + $0x1d4] ss:$8 sps:$4 sm:$0xff]   ;;  %v1291_v61 = vld [vmem:[%s1625_s30 + $0xd0] ss:$8 sps:$4 sm:$0xff]  }
  0x77   : > { %759 = vmatpush1.bf16.msra.mxu0 %v1238_v24  ;;  %717 = vmatprep.subr.bf16.mxu1 %v1239_v25  ;;  %v1292_v62 = vld [vmem:[%s1625_s30 + $0x1d0] ss:$8 sps:$4 sm:$0xff]   ;;  %v1293_v63 = vld [vmem:[%s1625_s30 + $0xe4] ss:$8 sps:$4 sm:$0xff]   ;;  %v1297_v1 = vld [vmem:[%s1625_s30 + $0xe0] ss:$8 sps:$4 sm:$0xff]  }
  0x78   : > { %760 = vmatprep.subr.bf16.mxu0 %v1241_v26  ;;  %v1295_v0 = vld [vmem:[%s1625_s30 + $0x1e4] ss:$8 sps:$4 sm:$0xff]   ;;  %v1298_v2 = vld [vmem:[%s1625_s30 + $0x1e0] ss:$8 sps:$4 sm:$0xff]   ;;  %v1299_v3 = vld [vmem:[%s1625_s30 + $0xf4] ss:$8 sps:$4 sm:$0xff]  }
  0x79   : > { %v1301_v4 = vld [vmem:[%s1625_s30 + $0x1f4] ss:$8 sps:$4 sm:$0xff]   ;;  %v1303_v5 = vld [vmem:[%s1625_s30 + $0xf0] ss:$8 sps:$4 sm:$0xff]   ;;  %v295_v10 = vld [vmem:[#allocation2] sm:$0xff]  ;;  %p1090_p12 = scmp.ne.s32.totalorder %s1421_s19, 17 }
  0x7a   : > { %718 = vmatpush1.bf16.msra.mxu1 %v1243_v27  ;;  %v1304_v6 = vld [vmem:[%s1625_s30 + $0x1f0] ss:$8 sps:$4 sm:$0xff]   ;;  %v296_v14 = vld [vmem:[#allocation2 + $0x8] sm:$0xff] }
  0x7b   : > { %761 = vmatpush1.bf16.msra.mxu0 %v1244_v28  ;;  %719 = vmatprep.subr.bf16.mxu1 %v1245_v29  ;;  %v1305_v7 = vld [vmem:[%s1623_s4] ss:$16 sps:$4 sm:$0xff]   ;;  %v1308_v8 = vld [vmem:[%s1623_s4 + $0x8] ss:$16 sps:$4 sm:$0xff]   ;;  %v811_v29 = vlaneseq (!%p1090_p12) }
  0x7c   : > { %762 = vmatprep.subr.bf16.mxu0 %v1247_v30  ;;  %v297_v18 = vld [vmem:[#allocation2 + $0x10] sm:$0xff]  ;;  %v298_v23 = vld [vmem:[#allocation2 + $0x18] sm:$0xff] }
  0x7d   : > { %v812_v30 = vshrl.u32 (!%p1090_p12), %v811_v29, 7 }
  0x7e   : > { %720 = vmatpush1.bf16.msra.mxu1 %v1249_v31  ;;  %v809_v31 = vld [vmem:[%s283_s22] sm:$0x3] (!%p1090_p12) }
  0x7f   : > { %763 = vmatpush1.bf16.msra.mxu0 %v1250_v32  ;;  %721 = vmatprep.subr.bf16.mxu1 %v1251_v33  ;;  %v813_v33 = vsub.s32 (!%p1090_p12), 0, %v812_v30 }
  0x80   : > { %764 = vmatprep.subr.bf16.mxu0 %v1253_v34  ;;  %v817_v34 = vsub.s32 (!%p1090_p12), 1, %v812_v30 }
  0x82   : > { %722 = vmatpush1.bf16.msra.mxu1 %v1255_v35 }
  0x83   : > { %765 = vmatpush1.bf16.msra.mxu0 %v1256_v36  ;;  %723 = vmatprep.subr.bf16.mxu1 %v1257_v37 }
  0x84   : > { %766 = vmatprep.subr.bf16.mxu0 %v1259_v38  ;;  %v814_v38 = vrot.slane (!%p1090_p12), %v809_v31, %v813_v33 }
  0x86   : > { %724 = vmatpush1.bf16.msra.mxu1 %v1261_v39  ;;  %v818_v39 = vrot.slane (!%p1090_p12), %v809_v31, %v817_v34 }
  0x87   : > { %767 = vmatpush1.bf16.msra.mxu0 %v1262_v40  ;;  %725 = vmatprep.subr.bf16.mxu1 %v1263_v41 }
  0x88   : > { %768 = vmatprep.subr.bf16.mxu0 %v1265_v42 }
  0x8a   : > { %726 = vmatpush1.bf16.msra.mxu1 %v1267_v43 }
  0x8b   : > { %769 = vmatpush1.bf16.msra.mxu0 %v1268_v44  ;;  %727 = vmatprep.subr.bf16.mxu1 %v1269_v45 }
  0x8c   : > { %770 = vmatprep.subr.bf16.mxu0 %v1271_v46 }
  0x8e   : > { %728 = vmatpush1.bf16.msra.mxu1 %v1273_v47 }
  0x8f   : > { %771 = vmatpush1.bf16.msra.mxu0 %v1274_v48  ;;  %729 = vmatprep.subr.bf16.mxu1 %v1275_v49 }
  0x90   : > { %772 = vmatprep.subr.bf16.mxu0 %v1277_v50 }
  0x92   : > { %730 = vmatpush1.bf16.msra.mxu1 %v1279_v51 }
  0x93   : > { %773 = vmatpush1.bf16.msra.mxu0 %v1280_v53  ;;  %731 = vmatprep.subr.bf16.mxu1 %v1281_v54 }
  0x94   : > { %774 = vmatprep.subr.bf16.mxu0 %v1283_v55 }
  0x96   : > { %732 = vmatpush1.bf16.msra.mxu1 %v1285_v57 }
  0x97   : > { %775 = vmatpush1.bf16.msra.mxu0 %v1286_v58  ;;  %733 = vmatprep.subr.bf16.mxu1 %v1287_v59 }
  0x98   : > { %776 = vmatprep.subr.bf16.mxu0 %v1289_v60 }
  0x9a   : > { %734 = vmatpush1.bf16.msra.mxu1 %v1291_v61 }
  0x9b   : > { %777 = vmatpush1.bf16.msra.mxu0 %v1292_v62  ;;  %735 = vmatprep.subr.bf16.mxu1 %v1293_v63 }
  0x9c   : > { %778 = vmatprep.subr.bf16.mxu0 %v1295_v0 }
  0x9e   : > { %736 = vmatpush1.bf16.msra.mxu1 %v1297_v1 }
  0x9f   : > { %779 = vmatpush1.bf16.msra.mxu0 %v1298_v2  ;;  %737 = vmatprep.subr.bf16.mxu1 %v1299_v3 }
  0xa0   : > { %780 = vmatprep.subr.bf16.mxu0 %v1301_v4 }
  0xa2   : > { %738 = vmatpush1.bf16.msra.mxu1 %v1303_v5 }
  0xa3   : > { %781 = vmatpush1.bf16.msra.mxu0 %v1304_v6 }
  0xa5   : > { %740 = vmatmul.mubr.bf16.vlgmr.msra.gmra.mrb[0].mxu1 %v1305_v7 }
  0xa6   : > { %783 = vmatmul.mubr.bf16.vlgmr.msra.gmra.mrb[0].mxu0 %v1308_v8 }
 0x178   : > { %v741_v9 = vpop.f32.mrb[0].mxu1 }
 0x179   : > { %v784_v11 = vpop.f32.mrb[0].mxu0  ;;  %v743_v13 = vpop.f32.mrb[1].mxu1 }
 0x17a   : > { %v785_v12 = vadd.f32 %v784_v11, %v741_v9  ;;  %v786_v15 = vpop.f32.mrb[1].mxu0  ;;  %v745_v17 = vpop.f32.mrb[2].mxu1 }
 0x17b   : > { %v787_v16 = vadd.f32 %v786_v15, %v743_v13  ;;  %v788_v19 = vpop.f32.mrb[2].mxu0  ;;  %v747_v22 = vpop.f32.mrb[3].mxu1  ;;  %804 = sbr.rel (%p1090_p12) target bundleno = 400 (0x190), region = 67 }
 0x17c   : > { %v793_v20 = vadd.f32 %v785_v12, %v295_v10  ;;  %v789_v21 = vadd.f32 %v788_v19, %v745_v17  ;;  %v790_v24 = vpop.f32.mrb[3].mxu0 }
 0x17d   : > { %v794_v25 = vadd.f32 %v787_v16, %v296_v14  ;;  %v791_v26 = vadd.f32 %v790_v24, %v747_v22 }
 0x17e   : > { %797 = vst [vmem:[#allocation2] sm:$0xff] %v793_v20  ;;  %v795_v27 = vadd.f32 %v789_v21, %v297_v18 }
 0x17f   : > { %798 = vst [vmem:[#allocation2 + $0x8] sm:$0xff] %v794_v25  ;;  %v796_v28 = vadd.f32 %v791_v26, %v298_v23 }
 0x180   : > { %799 = vst [vmem:[#allocation2 + $0x10] sm:$0xff] %v795_v27 }
 0x181   : > { %800 = vst [vmem:[#allocation2 + $0x18] sm:$0xff] %v796_v28 }
 0x185   : > { %v805_v32 = vld [vmem:[#allocation2] sm:$0xff] }
 0x186   : > { %v806_v35 = vld [vmem:[#allocation2 + $0x8] sm:$0xff]  ;;  %v821_v40 = vadd.f32 %v814_v38, %v805_v32 }
 0x187   : > { %v807_v36 = vld [vmem:[#allocation2 + $0x10] sm:$0xff]  ;;  %v822_v41 = vadd.f32 %v818_v39, %v806_v35 }
 0x188   : > { %v808_v37 = vld [vmem:[#allocation2 + $0x18] sm:$0xff]  ;;  %v823_v42 = vadd.f32 %v814_v38, %v807_v36  ;;  %v825_v44 = vmax.f32 %v821_v40, 0.0 }
 0x189   : > { %v824_v43 = vadd.f32 %v818_v39, %v808_v37  ;;  %v826_v45 = vmax.f32 %v822_v41, 0.0 }
 0x18a   : > { %v827_v46 = vmax.f32 %v823_v42, 0.0 }
 0x18b   : > { %v828_v47 = vmax.f32 %v824_v43, 0.0  ;;  %v1100_v48 = vpack.c.bf16 %v826_v45, %v825_v44 }
 0x18d   : > { %v1101_v49 = vpack.c.bf16 %v828_v47, %v827_v46  ;;  %841 = vst [vmem:[%s1639_s25] sm:$0xff] %v1100_v48 }
 0x18f   : > { %842 = vst [vmem:[%s1639_s25 + $0x8] sm:$0xff] %v1101_v49 }
 0x190 PF: > { %p1779_p11 = scmp.ne.s32.totalorder %s1777_s14, 0 }
 0x191   : > { %s1102_s19 = sshll.u32 (%p1779_p11), %s1425_s20, 3 }
 0x192   : > { %849 = sbr.rel (!%p1779_p11) target bundleno = 409 (0x199), region = 71  ;;  %s855_s5 = scalar_lea.vmem (%p1779_p11), %s1765_s3, %s1102_s19 }
 0x194   : > { %v885_v50 = vld [vmem:[%s1639_s25] sm:$0xff] (%p1779_p11) }
 0x195   : > { %886 = vst [vmem:[%s855_s5] sm:$0xff] (%p1779_p11), %v885_v50 }
 0x196   : > { %v887_v51 = vld [vmem:[%s1639_s25 + $0x8] sm:$0xff] (%p1779_p11) }
 0x197   : > { %888 = vst [vmem:[%s855_s5 + $0x80] sm:$0xff] (%p1779_p11), %v887_v51 }
 0x199 PF: > { %s16_s23 = sadd.s32 1, %s1437_s23   ;;  %s1780_s20 = sld [smem:[#allocation11_spill]] }
 0x19a   : > { %p13_p13 = scmp.ge.s32.totalorder %s16_s23, 290   ;;  %s1781_s28 = sld [smem:[#allocation8_spill]] }
 0x19b   : > { %s1782_s0 = sld [smem:[#allocation9_spill]]  ;;  %s1783_s22 = sld [smem:[#allocation10_spill]] }
 0x19c   : > { %s1784_s12 = smov %s1397_s13  ;;  %s1785_s13 = smov %s1567_s11 }
 0x19d   : > { %s1786_s14 = smov %s1405_s15  ;;  %s1787_s15 = smov %s1409_s16 }
 0x19e   : > { %s1788_s16 = smov %s1559_s8  ;;  %s1789_s17 = smov %s1417_s18 }
 0x19f   : > { %s1790_s18 = smov %s1780_s20  ;;  %s1791_s19 = smov %s1429_s21 }
 0x1a0   : > { %s1792_s20 = smov %s1781_s28  ;;  %15 = sbr.rel (!%p13_p13) target bundleno = 9 (0x9), region = 152 }
 0x1a1   : > { %s1793_s21 = smov %s1782_s0 }
 0x1a7   :  { %904 = vsyncpa [#allocation5], 1 }
 0x1a8   :  { %906 = vsyncpa [#allocation5 + $0x1], 1 }

// kernel: alexnet_forward.22
= control target key start
LH: loop header
LB: loop body
LE: loop exit
PB: predicated region body
PF: predicated region fallthrough
CT: control target
= control target key end

     0   :  { %s2368_s0 = inlined_call_operand.hbm [shape: bf16[16,4096], index: 0, kind: input, shape index: {}]   ;;  %s2369_s1 = inlined_call_operand.vmem [shape: bf16[4096,4096], index: 1, kind: input, shape index: {}]   ;;  %s2370_s2 = inlined_call_operand.hbm [shape: f32[1,4096], index: 2, kind: input, shape index: {}]   ;;  %s2371_s3 = inlined_call_operand.hbm [shape: bf16[16,4096], index: 3, kind: output, shape index: {}]  }
   0x1   :  { %2385 = sst [smem:[#allocation23_spill]] %s2368_s0 }
   0x2   :  { %2386 = sst [smem:[#allocation24_spill]] %s2371_s3 }
   0x3   :  { %8 = vsyncpa [#allocation4], 0 }
   0x4   :  { %10 = vsyncpa [#allocation4 + $0x1], 0 }
   0x5   :  { %11 = vsyncpa [#allocation8], 0 }
   0x6   :  { %13 = vsyncpa [#allocation8 + $0x1], 0 }
   0x7   :  { %14 = vsyncpa [#allocation5], 0 }
   0x8   :  { %16 = vsyncpa [#allocation5 + $0x1], 0  ;;  %s1843_s12 = smov 0   ;;  %s1845_s13 = smov 0  }
   0x9   :  { %s1847_s14 = smov 0   ;;  %s1849_s15 = smov 0  }
   0xa   :  { %s1851_s16 = smov 0   ;;  %s1853_s17 = smov 0  }
   0xb   :  { %s1855_s18 = smov 0   ;;  %s1857_s19 = smov 0  }
   0xc   :  { %s1859_s20 = smov 0   ;;  %s1861_s21 = smov 0  }
   0xd   :  { %s1863_s22 = smov 0   ;;  %s1865_s23 = smov 0  }
   0xe   :  { %s1867_s24 = smov 0  }
   0xf LB: > { %2387 = sst [smem:[#allocation13_spill]] %s1763_s12  ;;  %s2372_s25 = sadd.s32 4294967295, %s1811_s24   ;;  %s1811_s24 = sphi %s1867_s24, %s22_s24   ;;  %s1807_s23 = sphi %s1865_s23, %s2435_s23   ;;  %s1803_s22 = sphi %s1863_s22, %s2434_s22   ;;  %s1799_s21 = sphi %s1861_s21, %s2433_s21   ;;  %s1795_s20 = sphi %s1859_s20, %s2432_s20   ;;  %s1791_s19 = sphi %s1857_s19, %s2422_s19   ;;  %s1787_s18 = sphi %s1855_s18, %s2431_s18   ;;  %s1783_s17 = sphi %s1853_s17, %s2430_s17   ;;  %s1779_s16 = sphi %s1851_s16, %s2429_s16   ;;  %s1775_s15 = sphi %s1849_s15, %s2428_s15   ;;  %s1771_s14 = sphi %s1847_s14, %s2427_s14   ;;  %s1767_s13 = sphi %s1845_s13, %s2426_s13   ;;  %s1763_s12 = sphi %s1843_s12, %s2425_s12  }
  0x10   : > { %2388 = sst [smem:[#allocation14_spill]] %s1791_s19  ;;  %s34_s27 = sadd.s32 1, %s1803_s22 }
  0x11   : > { %2389 = sst [smem:[#allocation15_spill]] %s1799_s21  ;;  %s37_s28 = sadd.s32 1, %s1807_s23 }
  0x12   : > { %p35_p0 = scmp.ge.s32.totalorder %s34_s27, 8  ;;  %s50_s29 = sadd.s32 1, %s1791_s19 }
  0x13   : > { %p57_p1 = scmp.ne.s32.totalorder %s1791_s19, %s1787_s18  ;;  %p58_p2 = scmp.eq.s32.totalorder %s1811_s24, 0 }
  0x14   : > { %s2437_s27 = smov (%p35_p0, %s34_s27), 0  ;;  %s2439_s28 = smov (!%p35_p0, %s37_s28), %s1807_s23 }
  0x15   : > { %2390 = sst [smem:[#allocation16_spill]] %s2437_s27  ;;  %s46_s30 = ssub.s32 %s1803_s22, %s2437_s27 }
  0x16   : > { %p1921_p3 = por %p58_p2, %p57_p1  ;;  %p39_p4 = scmp.ge.s32.totalorder %s2439_s28, 16 }
  0x17   : > { %p48_p5 = scmp.eq.s32.totalorder %s46_s30, 0  ;;  %p63_p6 = scmp.ne.s32.totalorder %s1787_s18, %s1783_s17 }
  0x18   : > { %p1928_p7 = scmp.eq.s32.totalorder %s2372_s25, 0  ;;  %s2441_s28 = smov (%p39_p4, %s2439_s28), 0 }
  0x19   : > { %2393 = sst [smem:[#allocation17_spill]] %s2441_s28  ;;  %s74_s8 = ssub.s32 %s1807_s23, %s2441_s28 }
  0x1a   : > { %s1935_s6 = scalar_select %p48_p5, %s1791_s19, %s50_s29  }
  0x1b   : > { %p1939_p8 = por %p1928_p7, %p63_p6  ;;  %s75_s9 = sor.u32 %s74_s8, %s46_s30 }
  0x1c   : > { %2394 = sst [smem:[#allocation18_spill]] %s1935_s6  ;;  %s78_s10 = sadd.s32 1, %s1779_s16 }
  0x1d   : > { %s2395_s7 = scalar_select %p1939_p8, 1, 0 }
  0x1e   : > { %p76_p9 = scmp.eq.s32.totalorder %s75_s9, 0  ;;  %p85_p10 = scmp.ne.s32.totalorder %s1779_s16, %s1775_s15 }
  0x1f   : > { %p102_p11 = scmp.eq.s32.totalorder %s74_s8, 0  ;;  %s104_s11 = sadd.s32 1, %s1771_s14 }
  0x20   : > { %s1950_s17 = scalar_select %p76_p9, %s1779_s16, %s78_s10  }
  0x21   : > { %p1954_p12 = por %p85_p10, %p58_p2  ;;  %p111_p13 = scmp.ne.s32.totalorder %s1771_s14, %s1767_s13 }
  0x22   : > { %2396 = sst [smem:[#allocation19_spill]] %s1950_s17  ;;  %p117_p1 = scmp.ne.s32.totalorder %s1767_s13, %s1763_s12 }
  0x23   : > { %s1961_s26 = scalar_select %p102_p11, %s1771_s14, %s104_s11  }
  0x24   : > { %p1965_p0 = por %p111_p13, %p58_p2  ;;  %s2400_s30 = sadd.s32 4294967295, %s1811_s24  }
  0x25   : > { %2398 = sst [smem:[#allocation20_spill]] %s1961_s26  ;;  %p143_p4 = scmp.eq.s32.totalorder %s2400_s30, 127 }
  0x26   : > { %s2399_s25 = scalar_select %p1965_p0, 1, 0 }
  0x27   : > { %s2401_s8 = sadd.s32 4294967294, %s1811_s24   ;;  %p1977_p6 = por %p117_p1, %p1928_p7 }
  0x28   : > { %p149_p5 = scmp.eq.s32.totalorder %s2401_s8, 127  ;;  %p1981_p9 = por %p143_p4, %p111_p13 }
  0x29   : > { %s2402_s9 = scalar_select %p1977_p6, 1, 0 }
  0x2a   : > { %s2403_s10 = scalar_select %p1981_p9, 1, 0 }
  0x2b   : > { %p1985_p10 = por %p149_p5, %p117_p1  ;;  %p1285_p2 = scmp.ge.s32.totalorder %s1811_s24, 128 }
  0x2c   : > { %2404 = sst [smem:[#allocation21_spill]] %s2403_s10  ;;  %s169_s30 = sand.u32 (!%p1285_p2), 1, %s1791_s19  }
  0x2d   : > { %s2405_s11 = scalar_select %p1985_p10, 1, 0 }
  0x2e   : > { %165 = sbr.rel (%p1285_p2) target bundleno = 174 (0xae), region = 16  ;;  %s1379_s5 = sshll.u32 (!%p1285_p2), %s1803_s22, 8 }
  0x2f   : > { %2406 = sst [smem:[#allocation22_spill]] %s2405_s11  ;;  %s1286_s8 = sshll.u32 (!%p1285_p2), %s169_s30, 5 }
  0x30   : > { %s2407_s0 = sld [smem:[#allocation23_spill]] (!%p1285_p2)  ;;  %s173_s17 = scalar_lea.vmem (!%p1285_p2), [#allocation3], %s1286_s8 }
  0x31   : > { %s183_s26 = sshll.u32 (!%p1285_p2), %s173_s17, 4  ;;  %s1999_s11 = scalar_lea.sflag (!%p1285_p2), [#allocation4], %s169_s30  ;;  %s1997_s26 = int_to_ptr.vmem [resolvable:$true] %s183_s26 }
  0x36   : > { %s1995_s6 = scalar_lea.hbm %s2407_s0, %s1379_s5  ;;  %s1617_s27 = scalar_lea.hbm %s2407_s0, 4096 }
  0x37   : > { %s1613_s12 = scalar_lea.hbm %s1995_s6, 512  ;;  %p1618_p1 = scmp.lt.u32.totalorder %s1995_s6, %s2407_s0 }
  0x38   : > { %p1614_p7 = scmp.ne.s32.totalorder %s1995_s6, %s1613_s12  ;;  %p1619_p4 = scmp.lt.u32.totalorder %s1617_s27, %s1613_s12 }
  0x39   : > { %p1621_p2 = scmp.lt.u32.totalorder %s1613_s12, %s1995_s6 }
  0x3a   : > { %p1615_p11 = pnand %p1614_p7, %p1921_p3  ;;  %p1620_p5 = por %p1619_p4, %p1618_p1 }
  0x3c   : > { %p1616_p13 = pneg %p1615_p11  ;;  %p1622_p10 = por %p1621_p2, %p1620_p5 }
  0x3e   : > { %p1623_p9 = pnand %p1622_p10, %p1616_p13 }
  0x40   : > { %1626 = shalt.err (!%p1623_p9)
}
  0x41   : > { %s1627_s17 = scalar_lea.vmem %s1997_s26, 512  ;;  %s1813_s3 = smov [#allocation3]  }
  0x42   : > { %p1628_p7 = scmp.ne.s32.totalorder %s1997_s26, %s1627_s17  ;;  %s1631_s19 = sshll.u32 %s1813_s3, 4  ;;  %s1632_s19 = int_to_ptr.vmem [resolvable:$false] %s1631_s19 }
  0x43   : > { %s1633_s30 = scalar_lea.vmem %s1632_s19, 1024  ;;  %p1634_p8 = scmp.lt.s32.totalorder %s1997_s26, %s1632_s19 }
  0x44   : > { %p1629_p11 = pnand %p1628_p7, %p1921_p3  ;;  %p1635_p0 = scmp.lt.s32.totalorder %s1633_s30, %s1627_s17 }
  0x46   : > { %p1630_p6 = pneg %p1629_p11  ;;  %p1636_p1 = por %p1635_p0, %p1634_p8 }
  0x48   : > { %p1637_p4 = pnand %p1636_p1, %p1630_p6 }
  0x4a   : > { %1640 = shalt.err (!%p1637_p4)
}
  0x4b   : > { %s1814_s12 = smov 2048   ;;  %s1815_s8 = smov 256  }
  0x4c   : > { %s1816_s27 = smov 16   ;;  %192 = sbr.rel (!%p1954_p12) target bundleno = 148 (0x94), region = 24 }
  0x4d   : > { %1389 = dma.hbm_to_vmem [thread:$0]  (%p1921_p3), %s1995_s6, 512, %s1997_s26, %s1999_s11, %s1814_s12, %s1815_s8, %s1816_s27  }
  0x4e   : > { %s194_s28 = sand.u32 (%p1954_p12), 1, %s1779_s16   ;;  %s1291_s5 = sshll.u32 (%p1954_p12), %s1807_s23, 1 }
  0x4f   : > { %s1289_s17 = sshll.u32 (%p1954_p12), %s194_s28, 9  ;;  %s1380_s3 = sshll.u32 (%p1954_p12), %s1803_s22, 11 }
  0x50   : > { %s200_s19 = sadd.s32 (%p1954_p12), %s1380_s3, %s1291_s5  ;;  %s2036_s26 = scalar_lea.vmem (%p1954_p12), [#allocation6], %s1289_s17 }
  0x51   : > { %s1293_s30 = sshll.u32 (%p1954_p12), %s200_s19, 2 }
  0x52   : > { %s2031_s21 = scalar_lea.vmem (%p1954_p12), %s2369_s1, %s1293_s30 }
  0x53   : > { %v356_v0 = vld [vmem:[%s2031_s21] sm:$0xff] }
  0x54   : > { %v358_v1 = vld [vmem:[%s2031_s21 + $0x80] sm:$0xff]  ;;  %357 = vst [vmem:[%s2036_s26] sm:$0xff] %v356_v0 }
  0x55   : > { %v360_v2 = vld [vmem:[%s2031_s21 + $0x100] sm:$0xff]  ;;  %359 = vst [vmem:[%s2036_s26 + $0x8] sm:$0xff] %v358_v1 }
  0x56   : > { %361 = vst [vmem:[%s2036_s26 + $0x10] sm:$0xff] %v360_v2  ;;  %v362_v3 = vld [vmem:[%s2031_s21 + $0x180] sm:$0xff] }
  0x57   : > { %v364_v4 = vld [vmem:[%s2031_s21 + $0x200] sm:$0xff]  ;;  %363 = vst [vmem:[%s2036_s26 + $0x18] sm:$0xff] %v362_v3 }
  0x58   : > { %v366_v5 = vld [vmem:[%s2031_s21 + $0x280] sm:$0xff]  ;;  %365 = vst [vmem:[%s2036_s26 + $0x20] sm:$0xff] %v364_v4 }
  0x59   : > { %367 = vst [vmem:[%s2036_s26 + $0x28] sm:$0xff] %v366_v5  ;;  %v368_v6 = vld [vmem:[%s2031_s21 + $0x300] sm:$0xff] }
  0x5a   : > { %v370_v7 = vld [vmem:[%s2031_s21 + $0x380] sm:$0xff]  ;;  %369 = vst [vmem:[%s2036_s26 + $0x30] sm:$0xff] %v368_v6 }
  0x5b   : > { %v372_v8 = vld [vmem:[%s2031_s21 + $0x400] sm:$0xff]  ;;  %371 = vst [vmem:[%s2036_s26 + $0x38] sm:$0xff] %v370_v7 }
  0x5c   : > { %373 = vst [vmem:[%s2036_s26 + $0x40] sm:$0xff] %v372_v8  ;;  %v374_v9 = vld [vmem:[%s2031_s21 + $0x480] sm:$0xff] }
  0x5d   : > { %v376_v10 = vld [vmem:[%s2031_s21 + $0x500] sm:$0xff]  ;;  %375 = vst [vmem:[%s2036_s26 + $0x48] sm:$0xff] %v374_v9 }
  0x5e   : > { %v378_v11 = vld [vmem:[%s2031_s21 + $0x580] sm:$0xff]  ;;  %377 = vst [vmem:[%s2036_s26 + $0x50] sm:$0xff] %v376_v10 }
  0x5f   : > { %379 = vst [vmem:[%s2036_s26 + $0x58] sm:$0xff] %v378_v11  ;;  %v380_v12 = vld [vmem:[%s2031_s21 + $0x600] sm:$0xff] }
  0x60   : > { %v382_v13 = vld [vmem:[%s2031_s21 + $0x680] sm:$0xff]  ;;  %381 = vst [vmem:[%s2036_s26 + $0x60] sm:$0xff] %v380_v12 }
  0x61   : > { %v384_v14 = vld [vmem:[%s2031_s21 + $0x700] sm:$0xff]  ;;  %383 = vst [vmem:[%s2036_s26 + $0x68] sm:$0xff] %v382_v13 }
  0x62   : > { %385 = vst [vmem:[%s2036_s26 + $0x70] sm:$0xff] %v384_v14  ;;  %v386_v15 = vld [vmem:[%s2031_s21 + $0x780] sm:$0xff] }
  0x63   : > { %v388_v16 = vld [vmem:[%s2031_s21 + $0x800] sm:$0xff]  ;;  %387 = vst [vmem:[%s2036_s26 + $0x78] sm:$0xff] %v386_v15 }
  0x64   : > { %v390_v17 = vld [vmem:[%s2031_s21 + $0x880] sm:$0xff]  ;;  %389 = vst [vmem:[%s2036_s26 + $0x80] sm:$0xff] %v388_v16 }
  0x65   : > { %391 = vst [vmem:[%s2036_s26 + $0x88] sm:$0xff] %v390_v17  ;;  %v392_v18 = vld [vmem:[%s2031_s21 + $0x900] sm:$0xff] }
  0x66   : > { %v394_v19 = vld [vmem:[%s2031_s21 + $0x980] sm:$0xff]  ;;  %393 = vst [vmem:[%s2036_s26 + $0x90] sm:$0xff] %v392_v18 }
  0x67   : > { %v396_v20 = vld [vmem:[%s2031_s21 + $0xa00] sm:$0xff]  ;;  %395 = vst [vmem:[%s2036_s26 + $0x98] sm:$0xff] %v394_v19 }
  0x68   : > { %397 = vst [vmem:[%s2036_s26 + $0xa0] sm:$0xff] %v396_v20  ;;  %v398_v21 = vld [vmem:[%s2031_s21 + $0xa80] sm:$0xff] }
  0x69   : > { %v400_v22 = vld [vmem:[%s2031_s21 + $0xb00] sm:$0xff]  ;;  %399 = vst [vmem:[%s2036_s26 + $0xa8] sm:$0xff] %v398_v21 }
  0x6a   : > { %v402_v23 = vld [vmem:[%s2031_s21 + $0xb80] sm:$0xff]  ;;  %401 = vst [vmem:[%s2036_s26 + $0xb0] sm:$0xff] %v400_v22 }
  0x6b   : > { %403 = vst [vmem:[%s2036_s26 + $0xb8] sm:$0xff] %v402_v23  ;;  %v404_v24 = vld [vmem:[%s2031_s21 + $0xc00] sm:$0xff] }
  0x6c   : > { %v406_v25 = vld [vmem:[%s2031_s21 + $0xc80] sm:$0xff]  ;;  %405 = vst [vmem:[%s2036_s26 + $0xc0] sm:$0xff] %v404_v24 }
  0x6d   : > { %v408_v26 = vld [vmem:[%s2031_s21 + $0xd00] sm:$0xff]  ;;  %407 = vst [vmem:[%s2036_s26 + $0xc8] sm:$0xff] %v406_v25 }
  0x6e   : > { %409 = vst [vmem:[%s2036_s26 + $0xd0] sm:$0xff] %v408_v26  ;;  %v410_v27 = vld [vmem:[%s2031_s21 + $0xd80] sm:$0xff] }
  0x6f   : > { %v412_v28 = vld [vmem:[%s2031_s21 + $0xe00] sm:$0xff]  ;;  %411 = vst [vmem:[%s2036_s26 + $0xd8] sm:$0xff] %v410_v27 }
  0x70   : > { %v414_v29 = vld [vmem:[%s2031_s21 + $0xe80] sm:$0xff]  ;;  %413 = vst [vmem:[%s2036_s26 + $0xe0] sm:$0xff] %v412_v28 }
  0x71   : > { %415 = vst [vmem:[%s2036_s26 + $0xe8] sm:$0xff] %v414_v29  ;;  %v416_v30 = vld [vmem:[%s2031_s21 + $0xf00] sm:$0xff] }
  0x72   : > { %v418_v31 = vld [vmem:[%s2031_s21 + $0xf80] sm:$0xff]  ;;  %417 = vst [vmem:[%s2036_s26 + $0xf0] sm:$0xff] %v416_v30 }
  0x73   : > { %v420_v32 = vld [vmem:[%s2031_s21 + $0x1000] sm:$0xff]  ;;  %419 = vst [vmem:[%s2036_s26 + $0xf8] sm:$0xff] %v418_v31 }
  0x74   : > { %421 = vst [vmem:[%s2036_s26 + $0x100] sm:$0xff] %v420_v32  ;;  %v422_v33 = vld [vmem:[%s2031_s21 + $0x1080] sm:$0xff] }
  0x75   : > { %v424_v34 = vld [vmem:[%s2031_s21 + $0x1100] sm:$0xff]  ;;  %423 = vst [vmem:[%s2036_s26 + $0x108] sm:$0xff] %v422_v33 }
  0x76   : > { %v426_v35 = vld [vmem:[%s2031_s21 + $0x1180] sm:$0xff]  ;;  %425 = vst [vmem:[%s2036_s26 + $0x110] sm:$0xff] %v424_v34 }
  0x77   : > { %427 = vst [vmem:[%s2036_s26 + $0x118] sm:$0xff] %v426_v35  ;;  %v428_v36 = vld [vmem:[%s2031_s21 + $0x1200] sm:$0xff] }
  0x78   : > { %v430_v37 = vld [vmem:[%s2031_s21 + $0x1280] sm:$0xff]  ;;  %429 = vst [vmem:[%s2036_s26 + $0x120] sm:$0xff] %v428_v36 }
  0x79   : > { %v432_v38 = vld [vmem:[%s2031_s21 + $0x1300] sm:$0xff]  ;;  %431 = vst [vmem:[%s2036_s26 + $0x128] sm:$0xff] %v430_v37 }
  0x7a   : > { %433 = vst [vmem:[%s2036_s26 + $0x130] sm:$0xff] %v432_v38  ;;  %v434_v39 = vld [vmem:[%s2031_s21 + $0x1380] sm:$0xff] }
  0x7b   : > { %v436_v40 = vld [vmem:[%s2031_s21 + $0x1400] sm:$0xff]  ;;  %435 = vst [vmem:[%s2036_s26 + $0x138] sm:$0xff] %v434_v39 }
  0x7c   : > { %v438_v41 = vld [vmem:[%s2031_s21 + $0x1480] sm:$0xff]  ;;  %437 = vst [vmem:[%s2036_s26 + $0x140] sm:$0xff] %v436_v40 }
  0x7d   : > { %439 = vst [vmem:[%s2036_s26 + $0x148] sm:$0xff] %v438_v41  ;;  %v440_v42 = vld [vmem:[%s2031_s21 + $0x1500] sm:$0xff] }
  0x7e   : > { %v442_v43 = vld [vmem:[%s2031_s21 + $0x1580] sm:$0xff]  ;;  %441 = vst [vmem:[%s2036_s26 + $0x150] sm:$0xff] %v440_v42 }
  0x7f   : > { %v444_v44 = vld [vmem:[%s2031_s21 + $0x1600] sm:$0xff]  ;;  %443 = vst [vmem:[%s2036_s26 + $0x158] sm:$0xff] %v442_v43 }
  0x80   : > { %445 = vst [vmem:[%s2036_s26 + $0x160] sm:$0xff] %v444_v44  ;;  %v446_v45 = vld [vmem:[%s2031_s21 + $0x1680] sm:$0xff] }
  0x81   : > { %v448_v46 = vld [vmem:[%s2031_s21 + $0x1700] sm:$0xff]  ;;  %447 = vst [vmem:[%s2036_s26 + $0x168] sm:$0xff] %v446_v45 }
  0x82   : > { %v450_v47 = vld [vmem:[%s2031_s21 + $0x1780] sm:$0xff]  ;;  %449 = vst [vmem:[%s2036_s26 + $0x170] sm:$0xff] %v448_v46 }
  0x83   : > { %451 = vst [vmem:[%s2036_s26 + $0x178] sm:$0xff] %v450_v47  ;;  %v452_v48 = vld [vmem:[%s2031_s21 + $0x1800] sm:$0xff] }
  0x84   : > { %v454_v49 = vld [vmem:[%s2031_s21 + $0x1880] sm:$0xff]  ;;  %453 = vst [vmem:[%s2036_s26 + $0x180] sm:$0xff] %v452_v48 }
  0x85   : > { %v456_v50 = vld [vmem:[%s2031_s21 + $0x1900] sm:$0xff]  ;;  %455 = vst [vmem:[%s2036_s26 + $0x188] sm:$0xff] %v454_v49 }
  0x86   : > { %457 = vst [vmem:[%s2036_s26 + $0x190] sm:$0xff] %v456_v50  ;;  %v458_v51 = vld [vmem:[%s2031_s21 + $0x1980] sm:$0xff] }
  0x87   : > { %v460_v52 = vld [vmem:[%s2031_s21 + $0x1a00] sm:$0xff]  ;;  %459 = vst [vmem:[%s2036_s26 + $0x198] sm:$0xff] %v458_v51 }
  0x88   : > { %v462_v53 = vld [vmem:[%s2031_s21 + $0x1a80] sm:$0xff]  ;;  %461 = vst [vmem:[%s2036_s26 + $0x1a0] sm:$0xff] %v460_v52 }
  0x89   : > { %463 = vst [vmem:[%s2036_s26 + $0x1a8] sm:$0xff] %v462_v53  ;;  %v464_v54 = vld [vmem:[%s2031_s21 + $0x1b00] sm:$0xff] }
  0x8a   : > { %v466_v55 = vld [vmem:[%s2031_s21 + $0x1b80] sm:$0xff]  ;;  %465 = vst [vmem:[%s2036_s26 + $0x1b0] sm:$0xff] %v464_v54 }
  0x8b   : > { %v468_v56 = vld [vmem:[%s2031_s21 + $0x1c00] sm:$0xff]  ;;  %467 = vst [vmem:[%s2036_s26 + $0x1b8] sm:$0xff] %v466_v55 }
  0x8c   : > { %469 = vst [vmem:[%s2036_s26 + $0x1c0] sm:$0xff] %v468_v56  ;;  %v470_v57 = vld [vmem:[%s2031_s21 + $0x1c80] sm:$0xff] }
  0x8d   : > { %v472_v58 = vld [vmem:[%s2031_s21 + $0x1d00] sm:$0xff]  ;;  %471 = vst [vmem:[%s2036_s26 + $0x1c8] sm:$0xff] %v470_v57 }
  0x8e   : > { %v474_v59 = vld [vmem:[%s2031_s21 + $0x1d80] sm:$0xff]  ;;  %473 = vst [vmem:[%s2036_s26 + $0x1d0] sm:$0xff] %v472_v58 }
  0x8f   : > { %475 = vst [vmem:[%s2036_s26 + $0x1d8] sm:$0xff] %v474_v59  ;;  %v476_v60 = vld [vmem:[%s2031_s21 + $0x1e00] sm:$0xff] }
  0x90   : > { %v478_v61 = vld [vmem:[%s2031_s21 + $0x1e80] sm:$0xff]  ;;  %477 = vst [vmem:[%s2036_s26 + $0x1e0] sm:$0xff] %v476_v60 }
  0x91   : > { %v480_v62 = vld [vmem:[%s2031_s21 + $0x1f00] sm:$0xff]  ;;  %479 = vst [vmem:[%s2036_s26 + $0x1e8] sm:$0xff] %v478_v61 }
  0x92   : > { %481 = vst [vmem:[%s2036_s26 + $0x1f0] sm:$0xff] %v480_v62  ;;  %v482_v63 = vld [vmem:[%s2031_s21 + $0x1f80] sm:$0xff] }
  0x93   : > { %483 = vst [vmem:[%s2036_s26 + $0x1f8] sm:$0xff] %v482_v63 }
  0x94 PF: > { %s490_s0 = sand.u32 1, %s1771_s14   ;;  %s1381_s4 = sshll.u32 %s1807_s23, 5 }
  0x95   : > { %s1294_s6 = sshll.u32 %s490_s0, 1  ;;  %s2168_s11 = scalar_lea.hbm %s2370_s2, %s1381_s4 }
  0x96   : > { %s494_s12 = scalar_lea.vmem [#allocation7], %s1294_s6  ;;  %s491_s21 = scalar_lea.sflag [#allocation8], %s490_s0 }
  0x97   : > { %s502_s8 = sshll.u32 %s494_s12, 4  ;;  %s1641_s27 = scalar_lea.hbm %s2168_s11, 32  ;;  %s503_s8 = int_to_ptr.vmem [resolvable:$true] %s502_s8 }
  0x98   : > { %p1642_p3 = scmp.ne.s32.totalorder %s2168_s11, %s1641_s27  ;;  %p2408_p8 = scmp.ne.s32.totalorder %s2399_s25, 0 }
  0x99   : > { %s1645_s17 = scalar_lea.hbm %s2370_s2, 512  ;;  %p1646_p6 = scmp.lt.u32.totalorder %s2168_s11, %s2370_s2 }
  0x9a   : > { %p1643_p12 = pnand %p1642_p3, %p2408_p8  ;;  %p1647_p9 = scmp.lt.u32.totalorder %s1645_s17, %s1641_s27 }
  0x9b   : > { %p1649_p13 = scmp.lt.u32.totalorder %s1641_s27, %s2168_s11 }
  0x9c   : > { %p1644_p0 = pneg %p1643_p12  ;;  %p1648_p10 = por %p1647_p9, %p1646_p6 }
  0x9e   : > { %p1650_p5 = por %p1649_p13, %p1648_p10 }
  0xa0   : > { %p1651_p2 = pnand %p1650_p5, %p1644_p0 }
  0xa2   : > { %1654 = shalt.err (!%p1651_p2)
}
  0xa3   : > { %s1655_s30 = scalar_lea.vmem %s503_s8, 32  ;;  %s1817_s26 = smov [#allocation7]  }
  0xa4   : > { %p1656_p7 = scmp.ne.s32.totalorder %s503_s8, %s1655_s30  ;;  %s1659_s0 = sshll.u32 %s1817_s26, 4  ;;  %s1660_s0 = int_to_ptr.vmem [resolvable:$false] %s1659_s0 }
  0xa5   : > { %s1661_s4 = scalar_lea.vmem %s1660_s0, 64  ;;  %p1662_p4 = scmp.lt.s32.totalorder %s503_s8, %s1660_s0 }
  0xa6   : > { %p1657_p11 = pnand %p1656_p7, %p2408_p8  ;;  %p1663_p3 = scmp.lt.s32.totalorder %s1661_s4, %s1655_s30 }
  0xa8   : > { %p1658_p1 = pneg %p1657_p11  ;;  %p1664_p12 = por %p1663_p3, %p1662_p4 }
  0xaa   : > { %p1665_p6 = pnand %p1664_p12, %p1658_p1 }
  0xac   : > { %1668 = shalt.err (!%p1665_p6)
}
  0xad   : > { %1390 = dma.hbm_to_vmem [thread:$0]  (%p2408_p8), %s2168_s11, 32, %s503_s8, %s491_s21  }
  0xae PF: > { %p1297_p0 = scmp.ge.s32.totalorder %s1811_s24, 1  ;;  %p507_p9 = scmp.lt.s32.totalorder %s1811_s24, 129 }
  0xb0   : > { %p508_p10 = pnand %p1297_p0, %p507_p9 }
  0xb1   : > { %s513_s6 = sand.u32 (!%p508_p10), 1, %s1787_s18   ;;  %p2409_p13 = scmp.ne.s32.totalorder (!%p508_p10), %s2395_s7, 0 }
  0xb2   : > { %511 = sbr.rel (%p508_p10) target bundleno = 530 (0x212), region = 66  ;;  %s1298_s29 = sshll.u32 (!%p508_p10), %s513_s6, 5 }
  0xb3   : > { %s514_s10 = scalar_lea.sflag (!%p508_p10), [#allocation4], %s513_s6  ;;  %s2190_s12 = scalar_lea.vmem (!%p508_p10), [#allocation3], %s1298_s29 }
  0xb9   : > { %1750 = dma.done.wait (%p2409_p13), %s514_s10, 512  }
  0xba   : > { %1752 = vsyncadd (%p2409_p13), %s514_s10, 4294966784  ;;  %s523_s25 = sand.u32 1, %s1775_s15   ;;  %s2198_s11 = sand.u32 1, %s1767_s13  }
  0xbb   : > { %s1299_s8 = sshll.u32 %s523_s25, 9  ;;  %s1300_s21 = sshll.u32 %s2198_s11, 1 }
  0xbc   : > { %s2201_s27 = scalar_lea.vmem [#allocation6], %s1299_s8  ;;  %s530_s28 = scalar_lea.sflag [#allocation8], %s2198_s11 }
  0xbd   : > { %s2204_s5 = scalar_lea.vmem [#allocation7], %s1300_s21  ;;  %p2410_p8 = scmp.ne.s32.totalorder %s2402_s9, 0 }
  0xbf   : > { %1754 = dma.done.wait (%p2410_p8), %s530_s28, 32  }
  0xc0   : > { %1756 = vsyncadd (%p2410_p8), %s530_s28, 4294967264  ;;  %s1301_s7 = sshll.u32 %s2198_s11, 4  ;;  %p1302_p5 = scmp.ne.s32.totalorder %s1795_s20, 0 }
  0xc1   : > { %s2211_s17 = scalar_lea.vmem [#allocation9], %s1301_s7  ;;  %v1818_v0 = vmov (!%p1302_p5), 0.0  }
  0xc2   : > { %575 = sbr.rel (%p1302_p5) target bundleno = 201 (0xc9), region = 82  ;;  %576 = vst [vmem:[#allocation2] sm:$0xff] (!%p1302_p5), %v1818_v0  ;;  %577 = vst [vmem:[#allocation2 + $0x8] sm:$0xff] (!%p1302_p5), %v1818_v0 }
  0xc3   : > { %578 = vst [vmem:[#allocation2 + $0x10] sm:$0xff] (!%p1302_p5), %v1818_v0  ;;  %579 = vst [vmem:[#allocation2 + $0x18] sm:$0xff] (!%p1302_p5), %v1818_v0 }
  0xc9 PF: > { %v1511_v1 = vld [vmem:[%s2201_s27 + $0x4] ss:$8 sps:$4 sm:$0xff]   ;;  %v1515_v3 = vld [vmem:[%s2201_s27] ss:$8 sps:$4 sm:$0xff]   ;;  %v1517_v5 = vld [vmem:[%s2201_s27 + $0x14] ss:$8 sps:$4 sm:$0xff]  }
  0xca   : > { %v1513_v2 = vld [vmem:[%s2201_s27 + $0x104] ss:$8 sps:$4 sm:$0xff]   ;;  %992 = vmatprep.subr.bf16.mxu1 %v1511_v1  ;;  %v1516_v4 = vld [vmem:[%s2201_s27 + $0x100] ss:$8 sps:$4 sm:$0xff]   ;;  %v1519_v6 = vld [vmem:[%s2201_s27 + $0x114] ss:$8 sps:$4 sm:$0xff]  }
  0xcb   : > { %1035 = vmatprep.subr.bf16.mxu0 %v1513_v2  ;;  %993 = vmatpush1.bf16.msra.mxu1 %v1515_v3  ;;  %v1521_v7 = vld [vmem:[%s2201_s27 + $0x10] ss:$8 sps:$4 sm:$0xff]   ;;  %v1523_v9 = vld [vmem:[%s2201_s27 + $0x24] ss:$8 sps:$4 sm:$0xff]   ;;  %v1527_v11 = vld [vmem:[%s2201_s27 + $0x20] ss:$8 sps:$4 sm:$0xff]  }
  0xcc   : > { %1036 = vmatpush1.bf16.msra.mxu0 %v1516_v4  ;;  %994 = vmatprep.subr.bf16.mxu1 %v1517_v5  ;;  %v1522_v8 = vld [vmem:[%s2201_s27 + $0x110] ss:$8 sps:$4 sm:$0xff]   ;;  %v1525_v10 = vld [vmem:[%s2201_s27 + $0x124] ss:$8 sps:$4 sm:$0xff]   ;;  %v1528_v12 = vld [vmem:[%s2201_s27 + $0x120] ss:$8 sps:$4 sm:$0xff]  }
  0xcd   : > { %1037 = vmatprep.subr.bf16.mxu0 %v1519_v6  ;;  %v1529_v13 = vld [vmem:[%s2201_s27 + $0x34] ss:$8 sps:$4 sm:$0xff]   ;;  %v1533_v15 = vld [vmem:[%s2201_s27 + $0x30] ss:$8 sps:$4 sm:$0xff]   ;;  %v1535_v17 = vld [vmem:[%s2201_s27 + $0x44] ss:$8 sps:$4 sm:$0xff]  }
  0xce   : > { %v1531_v14 = vld [vmem:[%s2201_s27 + $0x134] ss:$8 sps:$4 sm:$0xff]   ;;  %v1534_v16 = vld [vmem:[%s2201_s27 + $0x130] ss:$8 sps:$4 sm:$0xff]   ;;  %v1537_v18 = vld [vmem:[%s2201_s27 + $0x144] ss:$8 sps:$4 sm:$0xff]  }
  0xcf   : > { %995 = vmatpush1.bf16.msra.mxu1 %v1521_v7  ;;  %v1539_v19 = vld [vmem:[%s2201_s27 + $0x40] ss:$8 sps:$4 sm:$0xff]   ;;  %v1541_v21 = vld [vmem:[%s2201_s27 + $0x54] ss:$8 sps:$4 sm:$0xff]   ;;  %v1545_v23 = vld [vmem:[%s2201_s27 + $0x50] ss:$8 sps:$4 sm:$0xff]  }
  0xd0   : > { %1038 = vmatpush1.bf16.msra.mxu0 %v1522_v8  ;;  %996 = vmatprep.subr.bf16.mxu1 %v1523_v9  ;;  %v1540_v20 = vld [vmem:[%s2201_s27 + $0x140] ss:$8 sps:$4 sm:$0xff]   ;;  %v1543_v22 = vld [vmem:[%s2201_s27 + $0x154] ss:$8 sps:$4 sm:$0xff]   ;;  %v1546_v24 = vld [vmem:[%s2201_s27 + $0x150] ss:$8 sps:$4 sm:$0xff]  }
  0xd1   : > { %1039 = vmatprep.subr.bf16.mxu0 %v1525_v10  ;;  %v1547_v25 = vld [vmem:[%s2201_s27 + $0x64] ss:$8 sps:$4 sm:$0xff]   ;;  %v1551_v27 = vld [vmem:[%s2201_s27 + $0x60] ss:$8 sps:$4 sm:$0xff]   ;;  %v1553_v29 = vld [vmem:[%s2201_s27 + $0x74] ss:$8 sps:$4 sm:$0xff]  }
  0xd2   : > { %v1549_v26 = vld [vmem:[%s2201_s27 + $0x164] ss:$8 sps:$4 sm:$0xff]   ;;  %v1552_v28 = vld [vmem:[%s2201_s27 + $0x160] ss:$8 sps:$4 sm:$0xff]   ;;  %v1555_v30 = vld [vmem:[%s2201_s27 + $0x174] ss:$8 sps:$4 sm:$0xff]  }
  0xd3   : > { %997 = vmatpush1.bf16.msra.mxu1 %v1527_v11  ;;  %v1557_v31 = vld [vmem:[%s2201_s27 + $0x70] ss:$8 sps:$4 sm:$0xff]   ;;  %v1559_v33 = vld [vmem:[%s2201_s27 + $0x84] ss:$8 sps:$4 sm:$0xff]   ;;  %v1563_v35 = vld [vmem:[%s2201_s27 + $0x80] ss:$8 sps:$4 sm:$0xff]  }
  0xd4   : > { %1040 = vmatpush1.bf16.msra.mxu0 %v1528_v12  ;;  %998 = vmatprep.subr.bf16.mxu1 %v1529_v13  ;;  %v1558_v32 = vld [vmem:[%s2201_s27 + $0x170] ss:$8 sps:$4 sm:$0xff]   ;;  %v1561_v34 = vld [vmem:[%s2201_s27 + $0x184] ss:$8 sps:$4 sm:$0xff]   ;;  %v1564_v36 = vld [vmem:[%s2201_s27 + $0x180] ss:$8 sps:$4 sm:$0xff]  }
  0xd5   : > { %1041 = vmatprep.subr.bf16.mxu0 %v1531_v14  ;;  %v1565_v37 = vld [vmem:[%s2201_s27 + $0x94] ss:$8 sps:$4 sm:$0xff]   ;;  %v1569_v39 = vld [vmem:[%s2201_s27 + $0x90] ss:$8 sps:$4 sm:$0xff]   ;;  %v1571_v41 = vld [vmem:[%s2201_s27 + $0xa4] ss:$8 sps:$4 sm:$0xff]  }
  0xd6   : > { %v1567_v38 = vld [vmem:[%s2201_s27 + $0x194] ss:$8 sps:$4 sm:$0xff]   ;;  %v1570_v40 = vld [vmem:[%s2201_s27 + $0x190] ss:$8 sps:$4 sm:$0xff]   ;;  %v1573_v42 = vld [vmem:[%s2201_s27 + $0x1a4] ss:$8 sps:$4 sm:$0xff]  }
  0xd7   : > { %999 = vmatpush1.bf16.msra.mxu1 %v1533_v15  ;;  %v1575_v43 = vld [vmem:[%s2201_s27 + $0xa0] ss:$8 sps:$4 sm:$0xff]   ;;  %v1577_v45 = vld [vmem:[%s2201_s27 + $0xb4] ss:$8 sps:$4 sm:$0xff]   ;;  %v1581_v47 = vld [vmem:[%s2201_s27 + $0xb0] ss:$8 sps:$4 sm:$0xff]  }
  0xd8   : > { %1042 = vmatpush1.bf16.msra.mxu0 %v1534_v16  ;;  %1000 = vmatprep.subr.bf16.mxu1 %v1535_v17  ;;  %v1576_v44 = vld [vmem:[%s2201_s27 + $0x1a0] ss:$8 sps:$4 sm:$0xff]   ;;  %v1579_v46 = vld [vmem:[%s2201_s27 + $0x1b4] ss:$8 sps:$4 sm:$0xff]   ;;  %v1582_v49 = vld [vmem:[%s2201_s27 + $0x1b0] ss:$8 sps:$4 sm:$0xff]  }
  0xd9   : > { %1043 = vmatprep.subr.bf16.mxu0 %v1537_v18  ;;  %v1609_v48 = vld [vmem:[%s2190_s12 + $0x4] ss:$16 sps:$4 sm:$0xff]   ;;  %v1612_v52 = vld [vmem:[%s2190_s12 + $0xc] ss:$16 sps:$4 sm:$0xff]   ;;  %v1587_v53 = vld [vmem:[%s2201_s27 + $0xc0] ss:$8 sps:$4 sm:$0xff]  }
  0xda   : > { %v1583_v50 = vld [vmem:[%s2201_s27 + $0xc4] ss:$8 sps:$4 sm:$0xff]   ;;  %1024 = vmatprep.mubr.bf16.mxu1 %v1609_v48  ;;  %1067 = vmatprep.mubr.bf16.mxu0 %v1612_v52  ;;  %v1588_v54 = vld [vmem:[%s2201_s27 + $0x1c0] ss:$8 sps:$4 sm:$0xff]   ;;  %v1589_v55 = vld [vmem:[%s2201_s27 + $0xd4] ss:$8 sps:$4 sm:$0xff]  }
  0xdb   : > { %1001 = vmatpush1.bf16.msra.mxu1 %v1539_v19  ;;  %v1585_v51 = vld [vmem:[%s2201_s27 + $0x1c4] ss:$8 sps:$4 sm:$0xff]   ;;  %v1591_v56 = vld [vmem:[%s2201_s27 + $0x1d4] ss:$8 sps:$4 sm:$0xff]   ;;  %v1593_v57 = vld [vmem:[%s2201_s27 + $0xd0] ss:$8 sps:$4 sm:$0xff]  }
  0xdc   : > { %1044 = vmatpush1.bf16.msra.mxu0 %v1540_v20  ;;  %1002 = vmatprep.subr.bf16.mxu1 %v1541_v21  ;;  %v1594_v58 = vld [vmem:[%s2201_s27 + $0x1d0] ss:$8 sps:$4 sm:$0xff]   ;;  %v1595_v59 = vld [vmem:[%s2201_s27 + $0xe4] ss:$8 sps:$4 sm:$0xff]   ;;  %v1599_v61 = vld [vmem:[%s2201_s27 + $0xe0] ss:$8 sps:$4 sm:$0xff]  }
  0xdd   : > { %1045 = vmatprep.subr.bf16.mxu0 %v1543_v22  ;;  %v1597_v60 = vld [vmem:[%s2201_s27 + $0x1e4] ss:$8 sps:$4 sm:$0xff]   ;;  %v1600_v62 = vld [vmem:[%s2201_s27 + $0x1e0] ss:$8 sps:$4 sm:$0xff]   ;;  %v1601_v63 = vld [vmem:[%s2201_s27 + $0xf4] ss:$8 sps:$4 sm:$0xff]  }
  0xde   : > { %v1603_v0 = vld [vmem:[%s2201_s27 + $0x1f4] ss:$8 sps:$4 sm:$0xff]   ;;  %v1605_v1 = vld [vmem:[%s2201_s27 + $0xf0] ss:$8 sps:$4 sm:$0xff]   ;;  %v580_v6 = vld [vmem:[#allocation2] sm:$0xff]  ;;  %p1371_p2 = scmp.ne.s32.totalorder %s1795_s20, 7 }
  0xdf   : > { %1003 = vmatpush1.bf16.msra.mxu1 %v1545_v23  ;;  %v1606_v2 = vld [vmem:[%s2201_s27 + $0x1f0] ss:$8 sps:$4 sm:$0xff]   ;;  %v581_v10 = vld [vmem:[#allocation2 + $0x8] sm:$0xff] }
  0xe0   : > { %1046 = vmatpush1.bf16.msra.mxu0 %v1546_v24  ;;  %1004 = vmatprep.subr.bf16.mxu1 %v1547_v25  ;;  %v1607_v3 = vld [vmem:[%s2190_s12] ss:$16 sps:$4 sm:$0xff]   ;;  %v1610_v4 = vld [vmem:[%s2190_s12 + $0x8] ss:$16 sps:$4 sm:$0xff]   ;;  %v1096_v25 = vlaneseq (!%p1371_p2) }
  0xe1   : > { %1047 = vmatprep.subr.bf16.mxu0 %v1549_v26  ;;  %v582_v14 = vld [vmem:[#allocation2 + $0x10] sm:$0xff]  ;;  %v583_v19 = vld [vmem:[#allocation2 + $0x18] sm:$0xff] }
  0xe2   : > { %v1097_v26 = vshrl.u32 (!%p1371_p2), %v1096_v25, 7 }
  0xe3   : > { %1005 = vmatpush1.bf16.msra.mxu1 %v1551_v27  ;;  %v1094_v27 = vld [vmem:[%s2204_s5] sm:$0x3] (!%p1371_p2) }
  0xe4   : > { %1048 = vmatpush1.bf16.msra.mxu0 %v1552_v28  ;;  %1006 = vmatprep.subr.bf16.mxu1 %v1553_v29  ;;  %v1098_v29 = vsub.s32 (!%p1371_p2), 0, %v1097_v26 }
  0xe5   : > { %1049 = vmatprep.subr.bf16.mxu0 %v1555_v30  ;;  %v1102_v30 = vsub.s32 (!%p1371_p2), 1, %v1097_v26 }
  0xe7   : > { %1007 = vmatpush1.bf16.msra.mxu1 %v1557_v31 }
  0xe8   : > { %1050 = vmatpush1.bf16.msra.mxu0 %v1558_v32  ;;  %1008 = vmatprep.subr.bf16.mxu1 %v1559_v33 }
  0xe9   : > { %1051 = vmatprep.subr.bf16.mxu0 %v1561_v34  ;;  %v1099_v34 = vrot.slane (!%p1371_p2), %v1094_v27, %v1098_v29 }
  0xeb   : > { %1009 = vmatpush1.bf16.msra.mxu1 %v1563_v35  ;;  %v1103_v35 = vrot.slane (!%p1371_p2), %v1094_v27, %v1102_v30 }
  0xec   : > { %1052 = vmatpush1.bf16.msra.mxu0 %v1564_v36  ;;  %1010 = vmatprep.subr.bf16.mxu1 %v1565_v37 }
  0xed   : > { %1053 = vmatprep.subr.bf16.mxu0 %v1567_v38 }
  0xef   : > { %1011 = vmatpush1.bf16.msra.mxu1 %v1569_v39 }
  0xf0   : > { %1054 = vmatpush1.bf16.msra.mxu0 %v1570_v40  ;;  %1012 = vmatprep.subr.bf16.mxu1 %v1571_v41 }
  0xf1   : > { %1055 = vmatprep.subr.bf16.mxu0 %v1573_v42 }
  0xf3   : > { %1013 = vmatpush1.bf16.msra.mxu1 %v1575_v43 }
  0xf4   : > { %1056 = vmatpush1.bf16.msra.mxu0 %v1576_v44  ;;  %1014 = vmatprep.subr.bf16.mxu1 %v1577_v45 }
  0xf5   : > { %1057 = vmatprep.subr.bf16.mxu0 %v1579_v46 }
  0xf7   : > { %1015 = vmatpush1.bf16.msra.mxu1 %v1581_v47 }
  0xf8   : > { %1058 = vmatpush1.bf16.msra.mxu0 %v1582_v49  ;;  %1016 = vmatprep.subr.bf16.mxu1 %v1583_v50 }
  0xf9   : > { %1059 = vmatprep.subr.bf16.mxu0 %v1585_v51 }
  0xfb   : > { %1017 = vmatpush1.bf16.msra.mxu1 %v1587_v53 }
  0xfc   : > { %1060 = vmatpush1.bf16.msra.mxu0 %v1588_v54  ;;  %1018 = vmatprep.subr.bf16.mxu1 %v1589_v55 }
  0xfd   : > { %1061 = vmatprep.subr.bf16.mxu0 %v1591_v56 }
  0xff   : > { %1019 = vmatpush1.bf16.msra.mxu1 %v1593_v57 }
 0x100   : > { %1062 = vmatpush1.bf16.msra.mxu0 %v1594_v58  ;;  %1020 = vmatprep.subr.bf16.mxu1 %v1595_v59 }
 0x101   : > { %1063 = vmatprep.subr.bf16.mxu0 %v1597_v60 }
 0x103   : > { %1021 = vmatpush1.bf16.msra.mxu1 %v1599_v61 }
 0x104   : > { %1064 = vmatpush1.bf16.msra.mxu0 %v1600_v62  ;;  %1022 = vmatprep.subr.bf16.mxu1 %v1601_v63 }
 0x105   : > { %1065 = vmatprep.subr.bf16.mxu0 %v1603_v0 }
 0x107   : > { %1023 = vmatpush1.bf16.msra.mxu1 %v1605_v1 }
 0x108   : > { %1066 = vmatpush1.bf16.msra.mxu0 %v1606_v2 }
 0x10a   : > { %1025 = vmatmul.mubr.bf16.vlgmr.msra.gmra.mrb[0].mxu1 %v1607_v3 }
 0x10b   : > { %1068 = vmatmul.mubr.bf16.vlgmr.msra.gmra.mrb[0].mxu0 %v1610_v4 }
 0x1dd   : > { %v1026_v5 = vpop.f32.mrb[0].mxu1 }
 0x1de   : > { %v1069_v7 = vpop.f32.mrb[0].mxu0  ;;  %v1028_v9 = vpop.f32.mrb[1].mxu1 }
 0x1df   : > { %v1070_v8 = vadd.f32 %v1069_v7, %v1026_v5  ;;  %v1071_v11 = vpop.f32.mrb[1].mxu0  ;;  %v1030_v13 = vpop.f32.mrb[2].mxu1 }
 0x1e0   : > { %v1072_v12 = vadd.f32 %v1071_v11, %v1028_v9  ;;  %v1073_v15 = vpop.f32.mrb[2].mxu0  ;;  %v1032_v18 = vpop.f32.mrb[3].mxu1  ;;  %1089 = sbr.rel (%p1371_p2) target bundleno = 501 (0x1f5), region = 86 }
 0x1e1   : > { %v1078_v16 = vadd.f32 %v1070_v8, %v580_v6  ;;  %v1074_v17 = vadd.f32 %v1073_v15, %v1030_v13  ;;  %v1075_v20 = vpop.f32.mrb[3].mxu0 }
 0x1e2   : > { %v1079_v21 = vadd.f32 %v1072_v12, %v581_v10  ;;  %v1076_v22 = vadd.f32 %v1075_v20, %v1032_v18 }
 0x1e3   : > { %1082 = vst [vmem:[#allocation2] sm:$0xff] %v1078_v16  ;;  %v1080_v23 = vadd.f32 %v1074_v17, %v582_v14 }
 0x1e4   : > { %1083 = vst [vmem:[#allocation2 + $0x8] sm:$0xff] %v1079_v21  ;;  %v1081_v24 = vadd.f32 %v1076_v22, %v583_v19 }
 0x1e5   : > { %1084 = vst [vmem:[#allocation2 + $0x10] sm:$0xff] %v1080_v23 }
 0x1e6   : > { %1085 = vst [vmem:[#allocation2 + $0x18] sm:$0xff] %v1081_v24 }
 0x1ea   : > { %v1090_v28 = vld [vmem:[#allocation2] sm:$0xff] }
 0x1eb   : > { %v1091_v31 = vld [vmem:[#allocation2 + $0x8] sm:$0xff]  ;;  %v1106_v36 = vadd.f32 %v1099_v34, %v1090_v28 }
 0x1ec   : > { %v1092_v32 = vld [vmem:[#allocation2 + $0x10] sm:$0xff]  ;;  %v1107_v37 = vadd.f32 %v1103_v35, %v1091_v31 }
 0x1ed   : > { %v1093_v33 = vld [vmem:[#allocation2 + $0x18] sm:$0xff]  ;;  %v1108_v38 = vadd.f32 %v1099_v34, %v1092_v32  ;;  %v1110_v40 = vmax.f32 %v1106_v36, 0.0 }
 0x1ee   : > { %v1109_v39 = vadd.f32 %v1103_v35, %v1093_v33  ;;  %v1111_v41 = vmax.f32 %v1107_v37, 0.0 }
 0x1ef   : > { %v1112_v42 = vmax.f32 %v1108_v38, 0.0 }
 0x1f0   : > { %v1113_v43 = vmax.f32 %v1109_v39, 0.0  ;;  %v1382_v44 = vpack.c.bf16 %v1111_v41, %v1110_v40 }
 0x1f2   : > { %v1383_v45 = vpack.c.bf16 %v1113_v43, %v1112_v42  ;;  %1126 = vst [vmem:[%s2211_s17] sm:$0xff] %v1382_v44 }
 0x1f4   : > { %1127 = vst [vmem:[%s2211_s17 + $0x8] sm:$0xff] %v1383_v45 }
 0x1f5 PF: > { %s2411_s15 = sld [smem:[#allocation15_spill]]  ;;  %s2412_s20 = sld [smem:[#allocation21_spill]] }
 0x1f6   : > { %s2413_s30 = sld [smem:[#allocation24_spill]]  ;;  %s1145_s0 = sshll.u32 %s2211_s17, 4  ;;  %s2293_s0 = int_to_ptr.vmem [resolvable:$true] %s1145_s0 }
 0x1f7   : > { %s1129_s4 = scalar_lea.sflag [#allocation5], %s2198_s11  ;;  %s1669_s6 = scalar_lea.vmem %s2293_s0, 256 }
 0x1f8   : > { %p1670_p7 = scmp.ne.s32.totalorder %s2293_s0, %s1669_s6  ;;  %s1819_s29 = smov [#allocation9]  }
 0x1f9   : > { %s1673_s10 = sshll.u32 %s1819_s29, 4  ;;  %s1674_s10 = int_to_ptr.vmem [resolvable:$false] %s1673_s10 }
 0x1fa   : > { %s1675_s12 = scalar_lea.vmem %s1674_s10, 512  ;;  %p1676_p3 = scmp.lt.s32.totalorder %s2293_s0, %s1674_s10 }
 0x1fb   : > { %s1384_s9 = sshll.u32 %s2411_s15, 7  ;;  %p2414_p11 = scmp.ne.s32.totalorder %s2412_s20, 0 }
 0x1fc   : > { %s2290_s26 = scalar_lea.hbm %s2413_s30, %s1384_s9  ;;  %p1677_p12 = scmp.lt.s32.totalorder %s1675_s12, %s1669_s6 }
 0x1fd   : > { %p1671_p1 = pnand %p1670_p7, %p2414_p11 }
 0x1fe   : > { %p1678_p6 = por %p1677_p12, %p1676_p3 }
 0x1ff   : > { %p1672_p4 = pneg %p1671_p1 }
 0x201   : > { %p1679_p0 = pnand %p1678_p6, %p1672_p4 }
 0x203   : > { %1682 = shalt.err (!%p1679_p0)
}
 0x204   : > { %s1683_s25 = scalar_lea.hbm %s2290_s26, 256  ;;  %s1687_s27 = scalar_lea.hbm %s2413_s30, 4096 }
 0x205   : > { %p1684_p9 = scmp.ne.s32.totalorder %s2290_s26, %s1683_s25  ;;  %p1688_p8 = scmp.lt.u32.totalorder %s2290_s26, %s2413_s30 }
 0x206   : > { %p1689_p5 = scmp.lt.u32.totalorder %s1687_s27, %s1683_s25  ;;  %p1691_p7 = scmp.lt.u32.totalorder %s1683_s25, %s2290_s26 }
 0x207   : > { %p1685_p10 = pnand %p1684_p9, %p2414_p11 }
 0x208   : > { %p1690_p2 = por %p1689_p5, %p1688_p8 }
 0x209   : > { %p1686_p13 = pneg %p1685_p10 }
 0x20a   : > { %p1692_p1 = por %p1691_p7, %p1690_p2 }
 0x20c   : > { %p1693_p4 = pnand %p1692_p1, %p1686_p13 }
 0x20e   : > { %1696 = shalt.err (!%p1693_p4)
}
 0x20f   : > { %s1820_s7 = smov 128   ;;  %s1821_s17 = smov 2048  }
 0x210   : > { %s1822_s15 = smov 8  }
 0x211   : > { %1393 = dma.vmem_to_hbm [thread:$0]  (%p2414_p11), %s2293_s0, 256, %s2290_s26, %s1129_s4, %s1820_s7, %s1821_s17, %s1822_s15  }
 0x212 PF: > { %s2415_s9 = sld [smem:[#allocation13_spill]]  ;;  %s2416_s3 = sld [smem:[#allocation22_spill]] }
 0x213   : > { %p1399_p3 = scmp.ge.s32.totalorder %s1811_s24, 2 }
 0x218   : > { %s1160_s19 = sand.u32 1, %s2415_s9   ;;  %p2417_p12 = scmp.ne.s32.totalorder %s2416_s3, 0 }
 0x219   : > { %s1161_s6 = scalar_lea.sflag [#allocation5], %s1160_s19 }
 0x21a   : > { %p1396_p6 = pnand %p1399_p3, %p2417_p12 }
 0x21c   : > { %1758 = dma.done.wait (!%p1396_p6), %s1161_s6, 256  }
 0x21d   : > { %1760 = vsyncadd (!%p1396_p6), %s1161_s6, 4294967040  ;;  %s22_s24 = sadd.s32 1, %s1811_s24   ;;  %s2419_s11 = sld [smem:[#allocation20_spill]] }
 0x21e   : > { %p2324_p0 = scmp.ge.s32.totalorder %s22_s24, 130   ;;  %s2420_s20 = sld [smem:[#allocation19_spill]] }
 0x21f   : > { %s2421_s26 = sld [smem:[#allocation14_spill]]  ;;  %s2422_s19 = sld [smem:[#allocation18_spill]] }
 0x220   : > { %s2423_s0 = sld [smem:[#allocation16_spill]]  ;;  %s2424_s4 = sld [smem:[#allocation17_spill]] }
 0x221   : > { %s2425_s12 = smov %s1767_s13  ;;  %s2426_s13 = smov %s1771_s14 }
 0x222   : > { %s2428_s15 = smov %s1779_s16  ;;  %s2430_s17 = smov %s1787_s18 }
 0x223   : > { %s2427_s14 = smov %s2419_s11  ;;  %s2433_s21 = smov %s1807_s23 }
 0x224   : > { %s2429_s16 = smov %s2420_s20  ;;  %s2432_s20 = smov %s1803_s22 }
 0x225   : > { %s2431_s18 = smov %s2421_s26  ;;  %21 = sbr.rel (!%p2324_p0) target bundleno = 15 (0xf), region = 144 }
 0x226   : > { %s2434_s22 = smov %s2423_s0  ;;  %s2435_s23 = smov %s2424_s4 }
 0x22c   :  { %1166 = vsyncpa [#allocation4], 1 }
 0x22d   :  { %1168 = vsyncpa [#allocation4 + $0x1], 1 }
 0x22e   :  { %1169 = vsyncpa [#allocation8], 1 }
 0x22f   :  { %1171 = vsyncpa [#allocation8 + $0x1], 1 }
 0x230   :  { %1172 = vsyncpa [#allocation5], 1 }
 0x231   :  { %1174 = vsyncpa [#allocation5 + $0x1], 1 }

// kernel: alexnet_forward.23
= control target key start
LH: loop header
LB: loop body
LE: loop exit
PB: predicated region body
PF: predicated region fallthrough
CT: control target
= control target key end

     0   :  { %s2024_s0 = inlined_call_operand.vmem [shape: bf16[16,4096], index: 0, kind: input, shape index: {}]   ;;  %s2025_s1 = inlined_call_operand.vmem [shape: bf16[4096,1024], index: 1, kind: input, shape index: {}]   ;;  %s2026_s2 = inlined_call_operand.vmem [shape: f32[1,1024], index: 2, kind: input, shape index: {}]   ;;  %s2027_s3 = inlined_call_operand.vmem [shape: f32[16,1024], index: 3, kind: output, shape index: {}]  }
   0x1   :  { %2029 = sst [smem:[#allocation7_spill]] %s2024_s0 }
   0x2   :  { %2030 = sst [smem:[#allocation8_spill]] %s2025_s1 }
   0x3   :  { %s1638_s12 = smov 0   ;;  %s1640_s13 = smov 0  }
   0x4   :  { %s1642_s14 = smov 0   ;;  %s1644_s15 = smov 0  }
   0x5   :  { %s1646_s16 = smov 0   ;;  %s1648_s17 = smov 0  }
   0x6   :  { %s1650_s18 = smov 0   ;;  %s1652_s19 = smov 0  }
   0x7   :  { %s1654_s20 = smov 0   ;;  %s1656_s21 = smov 0  }
   0x8   :  { %s1658_s22 = smov 0  }
   0x9 LB: > { %s1239_s23 = sadd.s32 4294967295, %s1615_s22   ;;  %s25_s24 = sadd.s32 1, %s1607_s20  ;;  %s1615_s22 = sphi %s1658_s22, %s13_s22   ;;  %s1611_s21 = sphi %s1656_s21, %s2047_s21   ;;  %s1607_s20 = sphi %s1654_s20, %s2046_s20   ;;  %s1603_s19 = sphi %s1652_s19, %s2045_s19   ;;  %s1599_s18 = sphi %s1650_s18, %s2044_s18   ;;  %s1595_s17 = sphi %s1648_s17, %s2043_s17   ;;  %s1591_s16 = sphi %s1646_s16, %s2042_s16   ;;  %s1587_s15 = sphi %s1644_s15, %s2041_s15   ;;  %s1583_s14 = sphi %s1642_s14, %s2040_s14   ;;  %s1579_s13 = sphi %s1640_s13, %s2039_s13   ;;  %s1575_s12 = sphi %s1638_s12, %s2038_s12  }
   0xa   : > { %p26_p0 = scmp.ge.s32.totalorder %s25_s24, 8  ;;  %s28_s25 = sadd.s32 1, %s1611_s21 }
   0xb   : > { %s41_s26 = sadd.s32 1, %s1595_s17  ;;  %p48_p1 = scmp.ne.s32.totalorder %s1595_s17, %s1591_s16 }
   0xc   : > { %s2049_s24 = smov (%p26_p0, %s25_s24), 0  ;;  %s2051_s25 = smov (!%p26_p0, %s28_s25), %s1611_s21 }
   0xd   : > { %s37_s27 = ssub.s32 %s1607_s20, %s2049_s24  ;;  %p49_p2 = scmp.eq.s32.totalorder %s1615_s22, 0 }
   0xe   : > { %p30_p3 = scmp.ge.s32.totalorder %s2051_s25, 4  ;;  %p39_p4 = scmp.eq.s32.totalorder %s37_s27, 0 }
   0xf   : > { %p1705_p5 = por %p49_p2, %p48_p1  ;;  %s69_s29 = sadd.s32 1, %s1587_s15 }
  0x10   : > { %s2053_s25 = smov (%p30_p3, %s2051_s25), 0  ;;  %p76_p6 = scmp.ne.s32.totalorder %s1587_s15, %s1583_s14 }
  0x11   : > { %2032 = sst [smem:[#allocation6_spill]] %s2053_s25  ;;  %s65_s4 = ssub.s32 %s1611_s21, %s2053_s25 }
  0x12   : > { %s1713_s30 = scalar_select %p39_p4, %s1595_s17, %s41_s26  }
  0x13   : > { %s66_s5 = sor.u32 %s65_s4, %s37_s27  ;;  %p121_p7 = scmp.eq.s32.totalorder %s65_s4, 0 }
  0x14   : > { %p67_p8 = scmp.eq.s32.totalorder %s66_s5, 0  ;;  %p1719_p9 = por %p76_p6, %p49_p2 }
  0x15   : > { %s123_s7 = sadd.s32 1, %s1579_s13  ;;  %p133_p10 = scmp.ne.s32.totalorder %s1579_s13, %s1575_s12 }
  0x16   : > { %s1727_s8 = scalar_select %p67_p8, %s1587_s15, %s69_s29  }
  0x17   : > { %s1730_s9 = scalar_select %p121_p7, %s1579_s13, %s123_s7  }
  0x18   : > { %p134_p11 = scmp.eq.s32.totalorder %s1239_s23, 31  ;;  %p1242_p13 = scmp.ge.s32.totalorder %s1615_s22, 32 }
  0x1a   : > { %p1732_p12 = por %p134_p11, %p133_p10  ;;  %156 = sbr.rel (%p1242_p13) target bundleno = 119 (0x77), region = 16 }
  0x21   : > { %159 = sbr.rel (!%p1705_p5) target bundleno = 45 (0x2d), region = 20  ;;  %s161_s11 = sand.u32 (%p1705_p5), 1, %s1595_s17  }
  0x22   : > { %s1331_s26 = sshll.u32 (%p1705_p5), %s1607_s20, 4  ;;  %s1243_s27 = sshll.u32 (%p1705_p5), %s161_s11, 5 }
  0x23   : > { %s2035_s0 = sld [smem:[#allocation7_spill]] (%p1705_p5)  ;;  %s163_s23 = scalar_lea.vmem (%p1705_p5), [#allocation3], %s1243_s27 }
  0x29   : > { %s169_s5 = scalar_lea.vmem %s2035_s0, %s1331_s26 }
  0x2a   : > { %v182_v0 = vld [vmem:[%s169_s5] sm:$0xff]  ;;  %v184_v1 = vld [vmem:[%s169_s5 + $0x8] sm:$0xff] }
  0x2b   : > { %v186_v2 = vld [vmem:[%s169_s5 + $0x80] sm:$0xff]  ;;  %183 = vst [vmem:[%s163_s23] sm:$0xff] %v182_v0  ;;  %185 = vst [vmem:[%s163_s23 + $0x8] sm:$0xff] %v184_v1  ;;  %v188_v3 = vld [vmem:[%s169_s5 + $0x88] sm:$0xff] }
  0x2c   : > { %187 = vst [vmem:[%s163_s23 + $0x10] sm:$0xff] %v186_v2  ;;  %189 = vst [vmem:[%s163_s23 + $0x18] sm:$0xff] %v188_v3 }
  0x2d PF: > { %195 = sbr.rel (!%p1719_p9) target bundleno = 119 (0x77), region = 43  ;;  %s197_s28 = sand.u32 (%p1719_p9), 1, %s1587_s15  }
  0x2e   : > { %s1248_s7 = sshll.u32 (%p1719_p9), %s1611_s21, 1  ;;  %s1246_s11 = sshll.u32 (%p1719_p9), %s197_s28, 9 }
  0x2f   : > { %s1332_s26 = sshll.u32 (%p1719_p9), %s1607_s20, 9  ;;  %s2036_s1 = sld [smem:[#allocation8_spill]] (%p1719_p9) }
  0x30   : > { %s203_s29 = sadd.s32 (%p1719_p9), %s1332_s26, %s1248_s7  ;;  %s1757_s6 = scalar_lea.vmem (%p1719_p9), [#allocation4], %s1246_s11 }
  0x31   : > { %s1250_s4 = sshll.u32 (%p1719_p9), %s203_s29, 2 }
  0x35   : > { %s1752_s25 = scalar_lea.vmem %s2036_s1, %s1250_s4 }
  0x36   : > { %v359_v4 = vld [vmem:[%s1752_s25] sm:$0xff] }
  0x37   : > { %v361_v5 = vld [vmem:[%s1752_s25 + $0x20] sm:$0xff]  ;;  %360 = vst [vmem:[%s1757_s6] sm:$0xff] %v359_v4 }
  0x38   : > { %v363_v6 = vld [vmem:[%s1752_s25 + $0x40] sm:$0xff]  ;;  %362 = vst [vmem:[%s1757_s6 + $0x8] sm:$0xff] %v361_v5 }
  0x39   : > { %364 = vst [vmem:[%s1757_s6 + $0x10] sm:$0xff] %v363_v6  ;;  %v365_v7 = vld [vmem:[%s1752_s25 + $0x60] sm:$0xff] }
  0x3a   : > { %v367_v8 = vld [vmem:[%s1752_s25 + $0x80] sm:$0xff]  ;;  %366 = vst [vmem:[%s1757_s6 + $0x18] sm:$0xff] %v365_v7 }
  0x3b   : > { %v369_v9 = vld [vmem:[%s1752_s25 + $0xa0] sm:$0xff]  ;;  %368 = vst [vmem:[%s1757_s6 + $0x20] sm:$0xff] %v367_v8 }
  0x3c   : > { %370 = vst [vmem:[%s1757_s6 + $0x28] sm:$0xff] %v369_v9  ;;  %v371_v10 = vld [vmem:[%s1752_s25 + $0xc0] sm:$0xff] }
  0x3d   : > { %v373_v11 = vld [vmem:[%s1752_s25 + $0xe0] sm:$0xff]  ;;  %372 = vst [vmem:[%s1757_s6 + $0x30] sm:$0xff] %v371_v10 }
  0x3e   : > { %v375_v12 = vld [vmem:[%s1752_s25 + $0x100] sm:$0xff]  ;;  %374 = vst [vmem:[%s1757_s6 + $0x38] sm:$0xff] %v373_v11 }
  0x3f   : > { %376 = vst [vmem:[%s1757_s6 + $0x40] sm:$0xff] %v375_v12  ;;  %v377_v13 = vld [vmem:[%s1752_s25 + $0x120] sm:$0xff] }
  0x40   : > { %v379_v14 = vld [vmem:[%s1752_s25 + $0x140] sm:$0xff]  ;;  %378 = vst [vmem:[%s1757_s6 + $0x48] sm:$0xff] %v377_v13 }
  0x41   : > { %v381_v15 = vld [vmem:[%s1752_s25 + $0x160] sm:$0xff]  ;;  %380 = vst [vmem:[%s1757_s6 + $0x50] sm:$0xff] %v379_v14 }
  0x42   : > { %382 = vst [vmem:[%s1757_s6 + $0x58] sm:$0xff] %v381_v15  ;;  %v383_v16 = vld [vmem:[%s1752_s25 + $0x180] sm:$0xff] }
  0x43   : > { %v385_v17 = vld [vmem:[%s1752_s25 + $0x1a0] sm:$0xff]  ;;  %384 = vst [vmem:[%s1757_s6 + $0x60] sm:$0xff] %v383_v16 }
  0x44   : > { %v387_v18 = vld [vmem:[%s1752_s25 + $0x1c0] sm:$0xff]  ;;  %386 = vst [vmem:[%s1757_s6 + $0x68] sm:$0xff] %v385_v17 }
  0x45   : > { %388 = vst [vmem:[%s1757_s6 + $0x70] sm:$0xff] %v387_v18  ;;  %v389_v19 = vld [vmem:[%s1752_s25 + $0x1e0] sm:$0xff] }
  0x46   : > { %v391_v20 = vld [vmem:[%s1752_s25 + $0x200] sm:$0xff]  ;;  %390 = vst [vmem:[%s1757_s6 + $0x78] sm:$0xff] %v389_v19 }
  0x47   : > { %v393_v21 = vld [vmem:[%s1752_s25 + $0x220] sm:$0xff]  ;;  %392 = vst [vmem:[%s1757_s6 + $0x80] sm:$0xff] %v391_v20 }
  0x48   : > { %394 = vst [vmem:[%s1757_s6 + $0x88] sm:$0xff] %v393_v21  ;;  %v395_v22 = vld [vmem:[%s1752_s25 + $0x240] sm:$0xff] }
  0x49   : > { %v397_v23 = vld [vmem:[%s1752_s25 + $0x260] sm:$0xff]  ;;  %396 = vst [vmem:[%s1757_s6 + $0x90] sm:$0xff] %v395_v22 }
  0x4a   : > { %v399_v24 = vld [vmem:[%s1752_s25 + $0x280] sm:$0xff]  ;;  %398 = vst [vmem:[%s1757_s6 + $0x98] sm:$0xff] %v397_v23 }
  0x4b   : > { %400 = vst [vmem:[%s1757_s6 + $0xa0] sm:$0xff] %v399_v24  ;;  %v401_v25 = vld [vmem:[%s1752_s25 + $0x2a0] sm:$0xff] }
  0x4c   : > { %v403_v26 = vld [vmem:[%s1752_s25 + $0x2c0] sm:$0xff]  ;;  %402 = vst [vmem:[%s1757_s6 + $0xa8] sm:$0xff] %v401_v25 }
  0x4d   : > { %v405_v27 = vld [vmem:[%s1752_s25 + $0x2e0] sm:$0xff]  ;;  %404 = vst [vmem:[%s1757_s6 + $0xb0] sm:$0xff] %v403_v26 }
  0x4e   : > { %406 = vst [vmem:[%s1757_s6 + $0xb8] sm:$0xff] %v405_v27  ;;  %v407_v28 = vld [vmem:[%s1752_s25 + $0x300] sm:$0xff] }
  0x4f   : > { %v409_v29 = vld [vmem:[%s1752_s25 + $0x320] sm:$0xff]  ;;  %408 = vst [vmem:[%s1757_s6 + $0xc0] sm:$0xff] %v407_v28 }
  0x50   : > { %v411_v30 = vld [vmem:[%s1752_s25 + $0x340] sm:$0xff]  ;;  %410 = vst [vmem:[%s1757_s6 + $0xc8] sm:$0xff] %v409_v29 }
  0x51   : > { %412 = vst [vmem:[%s1757_s6 + $0xd0] sm:$0xff] %v411_v30  ;;  %v413_v31 = vld [vmem:[%s1752_s25 + $0x360] sm:$0xff] }
  0x52   : > { %v415_v32 = vld [vmem:[%s1752_s25 + $0x380] sm:$0xff]  ;;  %414 = vst [vmem:[%s1757_s6 + $0xd8] sm:$0xff] %v413_v31 }
  0x53   : > { %v417_v33 = vld [vmem:[%s1752_s25 + $0x3a0] sm:$0xff]  ;;  %416 = vst [vmem:[%s1757_s6 + $0xe0] sm:$0xff] %v415_v32 }
  0x54   : > { %418 = vst [vmem:[%s1757_s6 + $0xe8] sm:$0xff] %v417_v33  ;;  %v419_v34 = vld [vmem:[%s1752_s25 + $0x3c0] sm:$0xff] }
  0x55   : > { %v421_v35 = vld [vmem:[%s1752_s25 + $0x3e0] sm:$0xff]  ;;  %420 = vst [vmem:[%s1757_s6 + $0xf0] sm:$0xff] %v419_v34 }
  0x56   : > { %v423_v36 = vld [vmem:[%s1752_s25 + $0x400] sm:$0xff]  ;;  %422 = vst [vmem:[%s1757_s6 + $0xf8] sm:$0xff] %v421_v35 }
  0x57   : > { %424 = vst [vmem:[%s1757_s6 + $0x100] sm:$0xff] %v423_v36  ;;  %v425_v37 = vld [vmem:[%s1752_s25 + $0x420] sm:$0xff] }
  0x58   : > { %v427_v38 = vld [vmem:[%s1752_s25 + $0x440] sm:$0xff]  ;;  %426 = vst [vmem:[%s1757_s6 + $0x108] sm:$0xff] %v425_v37 }
  0x59   : > { %v429_v39 = vld [vmem:[%s1752_s25 + $0x460] sm:$0xff]  ;;  %428 = vst [vmem:[%s1757_s6 + $0x110] sm:$0xff] %v427_v38 }
  0x5a   : > { %430 = vst [vmem:[%s1757_s6 + $0x118] sm:$0xff] %v429_v39  ;;  %v431_v40 = vld [vmem:[%s1752_s25 + $0x480] sm:$0xff] }
  0x5b   : > { %v433_v41 = vld [vmem:[%s1752_s25 + $0x4a0] sm:$0xff]  ;;  %432 = vst [vmem:[%s1757_s6 + $0x120] sm:$0xff] %v431_v40 }
  0x5c   : > { %v435_v42 = vld [vmem:[%s1752_s25 + $0x4c0] sm:$0xff]  ;;  %434 = vst [vmem:[%s1757_s6 + $0x128] sm:$0xff] %v433_v41 }
  0x5d   : > { %436 = vst [vmem:[%s1757_s6 + $0x130] sm:$0xff] %v435_v42  ;;  %v437_v43 = vld [vmem:[%s1752_s25 + $0x4e0] sm:$0xff] }
  0x5e   : > { %v439_v44 = vld [vmem:[%s1752_s25 + $0x500] sm:$0xff]  ;;  %438 = vst [vmem:[%s1757_s6 + $0x138] sm:$0xff] %v437_v43 }
  0x5f   : > { %v441_v45 = vld [vmem:[%s1752_s25 + $0x520] sm:$0xff]  ;;  %440 = vst [vmem:[%s1757_s6 + $0x140] sm:$0xff] %v439_v44 }
  0x60   : > { %442 = vst [vmem:[%s1757_s6 + $0x148] sm:$0xff] %v441_v45  ;;  %v443_v46 = vld [vmem:[%s1752_s25 + $0x540] sm:$0xff] }
  0x61   : > { %v445_v47 = vld [vmem:[%s1752_s25 + $0x560] sm:$0xff]  ;;  %444 = vst [vmem:[%s1757_s6 + $0x150] sm:$0xff] %v443_v46 }
  0x62   : > { %v447_v48 = vld [vmem:[%s1752_s25 + $0x580] sm:$0xff]  ;;  %446 = vst [vmem:[%s1757_s6 + $0x158] sm:$0xff] %v445_v47 }
  0x63   : > { %448 = vst [vmem:[%s1757_s6 + $0x160] sm:$0xff] %v447_v48  ;;  %v449_v49 = vld [vmem:[%s1752_s25 + $0x5a0] sm:$0xff] }
  0x64   : > { %v451_v50 = vld [vmem:[%s1752_s25 + $0x5c0] sm:$0xff]  ;;  %450 = vst [vmem:[%s1757_s6 + $0x168] sm:$0xff] %v449_v49 }
  0x65   : > { %v453_v51 = vld [vmem:[%s1752_s25 + $0x5e0] sm:$0xff]  ;;  %452 = vst [vmem:[%s1757_s6 + $0x170] sm:$0xff] %v451_v50 }
  0x66   : > { %454 = vst [vmem:[%s1757_s6 + $0x178] sm:$0xff] %v453_v51  ;;  %v455_v52 = vld [vmem:[%s1752_s25 + $0x600] sm:$0xff] }
  0x67   : > { %v457_v53 = vld [vmem:[%s1752_s25 + $0x620] sm:$0xff]  ;;  %456 = vst [vmem:[%s1757_s6 + $0x180] sm:$0xff] %v455_v52 }
  0x68   : > { %v459_v54 = vld [vmem:[%s1752_s25 + $0x640] sm:$0xff]  ;;  %458 = vst [vmem:[%s1757_s6 + $0x188] sm:$0xff] %v457_v53 }
  0x69   : > { %460 = vst [vmem:[%s1757_s6 + $0x190] sm:$0xff] %v459_v54  ;;  %v461_v55 = vld [vmem:[%s1752_s25 + $0x660] sm:$0xff] }
  0x6a   : > { %v463_v56 = vld [vmem:[%s1752_s25 + $0x680] sm:$0xff]  ;;  %462 = vst [vmem:[%s1757_s6 + $0x198] sm:$0xff] %v461_v55 }
  0x6b   : > { %v465_v57 = vld [vmem:[%s1752_s25 + $0x6a0] sm:$0xff]  ;;  %464 = vst [vmem:[%s1757_s6 + $0x1a0] sm:$0xff] %v463_v56 }
  0x6c   : > { %466 = vst [vmem:[%s1757_s6 + $0x1a8] sm:$0xff] %v465_v57  ;;  %v467_v58 = vld [vmem:[%s1752_s25 + $0x6c0] sm:$0xff] }
  0x6d   : > { %v469_v59 = vld [vmem:[%s1752_s25 + $0x6e0] sm:$0xff]  ;;  %468 = vst [vmem:[%s1757_s6 + $0x1b0] sm:$0xff] %v467_v58 }
  0x6e   : > { %v471_v60 = vld [vmem:[%s1752_s25 + $0x700] sm:$0xff]  ;;  %470 = vst [vmem:[%s1757_s6 + $0x1b8] sm:$0xff] %v469_v59 }
  0x6f   : > { %472 = vst [vmem:[%s1757_s6 + $0x1c0] sm:$0xff] %v471_v60  ;;  %v473_v61 = vld [vmem:[%s1752_s25 + $0x720] sm:$0xff] }
  0x70   : > { %v475_v62 = vld [vmem:[%s1752_s25 + $0x740] sm:$0xff]  ;;  %474 = vst [vmem:[%s1757_s6 + $0x1c8] sm:$0xff] %v473_v61 }
  0x71   : > { %v477_v63 = vld [vmem:[%s1752_s25 + $0x760] sm:$0xff]  ;;  %476 = vst [vmem:[%s1757_s6 + $0x1d0] sm:$0xff] %v475_v62 }
  0x72   : > { %478 = vst [vmem:[%s1757_s6 + $0x1d8] sm:$0xff] %v477_v63  ;;  %v479_v0 = vld [vmem:[%s1752_s25 + $0x780] sm:$0xff] }
  0x73   : > { %v481_v1 = vld [vmem:[%s1752_s25 + $0x7a0] sm:$0xff]  ;;  %480 = vst [vmem:[%s1757_s6 + $0x1e0] sm:$0xff] %v479_v0 }
  0x74   : > { %v483_v2 = vld [vmem:[%s1752_s25 + $0x7c0] sm:$0xff]  ;;  %482 = vst [vmem:[%s1757_s6 + $0x1e8] sm:$0xff] %v481_v1 }
  0x75   : > { %484 = vst [vmem:[%s1757_s6 + $0x1f0] sm:$0xff] %v483_v2  ;;  %v485_v3 = vld [vmem:[%s1752_s25 + $0x7e0] sm:$0xff] }
  0x76   : > { %486 = vst [vmem:[%s1757_s6 + $0x1f8] sm:$0xff] %v485_v3 }
  0x77 PF: > { %p1251_p0 = scmp.ge.s32.totalorder %s1615_s22, 1  ;;  %p499_p1 = scmp.lt.s32.totalorder %s1615_s22, 33 }
  0x79   : > { %p500_p2 = pnand %p1251_p0, %p499_p1 }
  0x7a   : > { %s506_s0 = sand.u32 (!%p500_p2), 1, %s1591_s16   ;;  %s513_s5 = sand.u32 (!%p500_p2), 1, %s1583_s14  }
  0x7b   : > { %503 = sbr.rel (%p500_p2) target bundleno = 441 (0x1b9), region = 85  ;;  %s1252_s23 = sshll.u32 (!%p500_p2), %s506_s0, 5 }
  0x7c   : > { %s1253_s28 = sshll.u32 (!%p500_p2), %s513_s5, 9  ;;  %s540_s7 = sand.u32 (!%p500_p2), 1, %s1575_s12  }
  0x7d   : > { %s1255_s11 = sshll.u32 (!%p500_p2), %s1603_s19, 1  ;;  %s1254_s25 = sshll.u32 (!%p500_p2), %s540_s7, 5 }
  0x7e   : > { %p548_p3 = scmp.lt.s32.totalorder (!%p500_p2), %s1255_s11, 7  ;;  %s1896_s27 = scalar_lea.vmem (!%p500_p2), [#allocation3], %s1252_s23 }
  0x7f   : > { %s1898_s6 = scalar_lea.vmem (!%p500_p2), [#allocation4], %s1253_s28  ;;  %s1900_s1 = scalar_lea.vmem (!%p500_p2), [#allocation5], %s1254_s25 }
  0x80   : > { %p1256_p4 = scmp.ne.s32.totalorder (!%p500_p2), %s1599_s18, 0 }
  0x82   : > { %s2055_s11 = smov (!%p548_p3, %s1255_s11), 7  ;;  %557 = sbr.rel (%p1256_p4) target bundleno = 137 (0x89), region = 97 }
  0x83   : > { %s550_s4 = scalar_lea.vmem %s2026_s2, %s2055_s11  ;;  %v1617_v4 = vmov (!%p1256_p4), 0.0  }
  0x84   : > { %558 = vst [vmem:[#allocation2] sm:$0xff] (!%p1256_p4), %v1617_v4  ;;  %559 = vst [vmem:[#allocation2 + $0x8] sm:$0xff] (!%p1256_p4), %v1617_v4 }
  0x85   : > { %560 = vst [vmem:[#allocation2 + $0x10] sm:$0xff] (!%p1256_p4), %v1617_v4  ;;  %561 = vst [vmem:[#allocation2 + $0x18] sm:$0xff] (!%p1256_p4), %v1617_v4 }
  0x89 PF: > { %v1427_v5 = vld [vmem:[%s1898_s6 + $0x4] ss:$8 sps:$4 sm:$0xff]   ;;  %v1431_v7 = vld [vmem:[%s1898_s6] ss:$8 sps:$4 sm:$0xff]   ;;  %v1433_v9 = vld [vmem:[%s1898_s6 + $0x14] ss:$8 sps:$4 sm:$0xff]  }
  0x8a   : > { %v1429_v6 = vld [vmem:[%s1898_s6 + $0x104] ss:$8 sps:$4 sm:$0xff]   ;;  %974 = vmatprep.subr.bf16.mxu1 %v1427_v5  ;;  %v1432_v8 = vld [vmem:[%s1898_s6 + $0x100] ss:$8 sps:$4 sm:$0xff]   ;;  %v1435_v10 = vld [vmem:[%s1898_s6 + $0x114] ss:$8 sps:$4 sm:$0xff]  }
  0x8b   : > { %1017 = vmatprep.subr.bf16.mxu0 %v1429_v6  ;;  %975 = vmatpush1.bf16.msra.mxu1 %v1431_v7  ;;  %v1437_v11 = vld [vmem:[%s1898_s6 + $0x10] ss:$8 sps:$4 sm:$0xff]   ;;  %v1439_v13 = vld [vmem:[%s1898_s6 + $0x24] ss:$8 sps:$4 sm:$0xff]   ;;  %v1443_v15 = vld [vmem:[%s1898_s6 + $0x20] ss:$8 sps:$4 sm:$0xff]  }
  0x8c   : > { %1018 = vmatpush1.bf16.msra.mxu0 %v1432_v8  ;;  %976 = vmatprep.subr.bf16.mxu1 %v1433_v9  ;;  %v1438_v12 = vld [vmem:[%s1898_s6 + $0x110] ss:$8 sps:$4 sm:$0xff]   ;;  %v1441_v14 = vld [vmem:[%s1898_s6 + $0x124] ss:$8 sps:$4 sm:$0xff]   ;;  %v1444_v16 = vld [vmem:[%s1898_s6 + $0x120] ss:$8 sps:$4 sm:$0xff]  }
  0x8d   : > { %1019 = vmatprep.subr.bf16.mxu0 %v1435_v10  ;;  %v1445_v17 = vld [vmem:[%s1898_s6 + $0x34] ss:$8 sps:$4 sm:$0xff]   ;;  %v1449_v19 = vld [vmem:[%s1898_s6 + $0x30] ss:$8 sps:$4 sm:$0xff]   ;;  %v1451_v21 = vld [vmem:[%s1898_s6 + $0x44] ss:$8 sps:$4 sm:$0xff]  }
  0x8e   : > { %v1447_v18 = vld [vmem:[%s1898_s6 + $0x134] ss:$8 sps:$4 sm:$0xff]   ;;  %v1450_v20 = vld [vmem:[%s1898_s6 + $0x130] ss:$8 sps:$4 sm:$0xff]   ;;  %v1453_v22 = vld [vmem:[%s1898_s6 + $0x144] ss:$8 sps:$4 sm:$0xff]  }
  0x8f   : > { %977 = vmatpush1.bf16.msra.mxu1 %v1437_v11  ;;  %v1455_v23 = vld [vmem:[%s1898_s6 + $0x40] ss:$8 sps:$4 sm:$0xff]   ;;  %v1457_v25 = vld [vmem:[%s1898_s6 + $0x54] ss:$8 sps:$4 sm:$0xff]   ;;  %v1461_v27 = vld [vmem:[%s1898_s6 + $0x50] ss:$8 sps:$4 sm:$0xff]  }
  0x90   : > { %1020 = vmatpush1.bf16.msra.mxu0 %v1438_v12  ;;  %978 = vmatprep.subr.bf16.mxu1 %v1439_v13  ;;  %v1456_v24 = vld [vmem:[%s1898_s6 + $0x140] ss:$8 sps:$4 sm:$0xff]   ;;  %v1459_v26 = vld [vmem:[%s1898_s6 + $0x154] ss:$8 sps:$4 sm:$0xff]   ;;  %v1462_v28 = vld [vmem:[%s1898_s6 + $0x150] ss:$8 sps:$4 sm:$0xff]  }
  0x91   : > { %1021 = vmatprep.subr.bf16.mxu0 %v1441_v14  ;;  %v1463_v29 = vld [vmem:[%s1898_s6 + $0x64] ss:$8 sps:$4 sm:$0xff]   ;;  %v1467_v31 = vld [vmem:[%s1898_s6 + $0x60] ss:$8 sps:$4 sm:$0xff]   ;;  %v1469_v33 = vld [vmem:[%s1898_s6 + $0x74] ss:$8 sps:$4 sm:$0xff]  }
  0x92   : > { %v1465_v30 = vld [vmem:[%s1898_s6 + $0x164] ss:$8 sps:$4 sm:$0xff]   ;;  %v1468_v32 = vld [vmem:[%s1898_s6 + $0x160] ss:$8 sps:$4 sm:$0xff]   ;;  %v1471_v34 = vld [vmem:[%s1898_s6 + $0x174] ss:$8 sps:$4 sm:$0xff]  }
  0x93   : > { %979 = vmatpush1.bf16.msra.mxu1 %v1443_v15  ;;  %v1473_v35 = vld [vmem:[%s1898_s6 + $0x70] ss:$8 sps:$4 sm:$0xff]   ;;  %v1475_v37 = vld [vmem:[%s1898_s6 + $0x84] ss:$8 sps:$4 sm:$0xff]   ;;  %v1479_v39 = vld [vmem:[%s1898_s6 + $0x80] ss:$8 sps:$4 sm:$0xff]  }
  0x94   : > { %1022 = vmatpush1.bf16.msra.mxu0 %v1444_v16  ;;  %980 = vmatprep.subr.bf16.mxu1 %v1445_v17  ;;  %v1474_v36 = vld [vmem:[%s1898_s6 + $0x170] ss:$8 sps:$4 sm:$0xff]   ;;  %v1477_v38 = vld [vmem:[%s1898_s6 + $0x184] ss:$8 sps:$4 sm:$0xff]   ;;  %v1480_v40 = vld [vmem:[%s1898_s6 + $0x180] ss:$8 sps:$4 sm:$0xff]  }
  0x95   : > { %1023 = vmatprep.subr.bf16.mxu0 %v1447_v18  ;;  %v1481_v41 = vld [vmem:[%s1898_s6 + $0x94] ss:$8 sps:$4 sm:$0xff]   ;;  %v1485_v43 = vld [vmem:[%s1898_s6 + $0x90] ss:$8 sps:$4 sm:$0xff]   ;;  %v1487_v45 = vld [vmem:[%s1898_s6 + $0xa4] ss:$8 sps:$4 sm:$0xff]  }
  0x96   : > { %v1483_v42 = vld [vmem:[%s1898_s6 + $0x194] ss:$8 sps:$4 sm:$0xff]   ;;  %v1486_v44 = vld [vmem:[%s1898_s6 + $0x190] ss:$8 sps:$4 sm:$0xff]   ;;  %v1489_v46 = vld [vmem:[%s1898_s6 + $0x1a4] ss:$8 sps:$4 sm:$0xff]  }
  0x97   : > { %981 = vmatpush1.bf16.msra.mxu1 %v1449_v19  ;;  %v1491_v47 = vld [vmem:[%s1898_s6 + $0xa0] ss:$8 sps:$4 sm:$0xff]   ;;  %v1493_v49 = vld [vmem:[%s1898_s6 + $0xb4] ss:$8 sps:$4 sm:$0xff]   ;;  %v1497_v51 = vld [vmem:[%s1898_s6 + $0xb0] ss:$8 sps:$4 sm:$0xff]  }
  0x98   : > { %1024 = vmatpush1.bf16.msra.mxu0 %v1450_v20  ;;  %982 = vmatprep.subr.bf16.mxu1 %v1451_v21  ;;  %v1492_v48 = vld [vmem:[%s1898_s6 + $0x1a0] ss:$8 sps:$4 sm:$0xff]   ;;  %v1495_v50 = vld [vmem:[%s1898_s6 + $0x1b4] ss:$8 sps:$4 sm:$0xff]   ;;  %v1498_v53 = vld [vmem:[%s1898_s6 + $0x1b0] ss:$8 sps:$4 sm:$0xff]  }
  0x99   : > { %1025 = vmatprep.subr.bf16.mxu0 %v1453_v22  ;;  %v1525_v52 = vld [vmem:[%s1896_s27 + $0x4] ss:$16 sps:$4 sm:$0xff]   ;;  %v1528_v56 = vld [vmem:[%s1896_s27 + $0xc] ss:$16 sps:$4 sm:$0xff]   ;;  %v1503_v57 = vld [vmem:[%s1898_s6 + $0xc0] ss:$8 sps:$4 sm:$0xff]  }
  0x9a   : > { %v1499_v54 = vld [vmem:[%s1898_s6 + $0xc4] ss:$8 sps:$4 sm:$0xff]   ;;  %1006 = vmatprep.mubr.bf16.mxu1 %v1525_v52  ;;  %1049 = vmatprep.mubr.bf16.mxu0 %v1528_v56  ;;  %v1504_v58 = vld [vmem:[%s1898_s6 + $0x1c0] ss:$8 sps:$4 sm:$0xff]   ;;  %v1505_v59 = vld [vmem:[%s1898_s6 + $0xd4] ss:$8 sps:$4 sm:$0xff]  }
  0x9b   : > { %983 = vmatpush1.bf16.msra.mxu1 %v1455_v23  ;;  %v1501_v55 = vld [vmem:[%s1898_s6 + $0x1c4] ss:$8 sps:$4 sm:$0xff]   ;;  %v1507_v60 = vld [vmem:[%s1898_s6 + $0x1d4] ss:$8 sps:$4 sm:$0xff]   ;;  %v1509_v61 = vld [vmem:[%s1898_s6 + $0xd0] ss:$8 sps:$4 sm:$0xff]  }
  0x9c   : > { %1026 = vmatpush1.bf16.msra.mxu0 %v1456_v24  ;;  %984 = vmatprep.subr.bf16.mxu1 %v1457_v25  ;;  %v1510_v62 = vld [vmem:[%s1898_s6 + $0x1d0] ss:$8 sps:$4 sm:$0xff]   ;;  %v1511_v63 = vld [vmem:[%s1898_s6 + $0xe4] ss:$8 sps:$4 sm:$0xff]   ;;  %v1515_v1 = vld [vmem:[%s1898_s6 + $0xe0] ss:$8 sps:$4 sm:$0xff]  }
  0x9d   : > { %1027 = vmatprep.subr.bf16.mxu0 %v1459_v26  ;;  %v1513_v0 = vld [vmem:[%s1898_s6 + $0x1e4] ss:$8 sps:$4 sm:$0xff]   ;;  %v1516_v2 = vld [vmem:[%s1898_s6 + $0x1e0] ss:$8 sps:$4 sm:$0xff]   ;;  %v1517_v3 = vld [vmem:[%s1898_s6 + $0xf4] ss:$8 sps:$4 sm:$0xff]  }
  0x9e   : > { %v1519_v4 = vld [vmem:[%s1898_s6 + $0x1f4] ss:$8 sps:$4 sm:$0xff]   ;;  %v1521_v5 = vld [vmem:[%s1898_s6 + $0xf0] ss:$8 sps:$4 sm:$0xff]   ;;  %v562_v10 = vld [vmem:[#allocation2] sm:$0xff]  ;;  %p1325_p5 = scmp.ne.s32.totalorder %s1599_s18, 7 }
  0x9f   : > { %985 = vmatpush1.bf16.msra.mxu1 %v1461_v27  ;;  %v1522_v6 = vld [vmem:[%s1898_s6 + $0x1f0] ss:$8 sps:$4 sm:$0xff]   ;;  %v563_v14 = vld [vmem:[#allocation2 + $0x8] sm:$0xff] }
  0xa0   : > { %1028 = vmatpush1.bf16.msra.mxu0 %v1462_v28  ;;  %986 = vmatprep.subr.bf16.mxu1 %v1463_v29  ;;  %v1523_v7 = vld [vmem:[%s1896_s27] ss:$16 sps:$4 sm:$0xff]   ;;  %v1526_v8 = vld [vmem:[%s1896_s27 + $0x8] ss:$16 sps:$4 sm:$0xff]   ;;  %v1078_v29 = vlaneseq (!%p1325_p5) }
  0xa1   : > { %1029 = vmatprep.subr.bf16.mxu0 %v1465_v30  ;;  %v564_v18 = vld [vmem:[#allocation2 + $0x10] sm:$0xff]  ;;  %v565_v23 = vld [vmem:[#allocation2 + $0x18] sm:$0xff] }
  0xa2   : > { %v1079_v30 = vshrl.u32 (!%p1325_p5), %v1078_v29, 7 }
  0xa3   : > { %987 = vmatpush1.bf16.msra.mxu1 %v1467_v31  ;;  %v1076_v31 = vld [vmem:[%s550_s4] sm:$0x3] (!%p1325_p5) }
  0xa4   : > { %1030 = vmatpush1.bf16.msra.mxu0 %v1468_v32  ;;  %988 = vmatprep.subr.bf16.mxu1 %v1469_v33  ;;  %v1080_v33 = vsub.s32 (!%p1325_p5), 0, %v1079_v30 }
  0xa5   : > { %1031 = vmatprep.subr.bf16.mxu0 %v1471_v34  ;;  %v1084_v34 = vsub.s32 (!%p1325_p5), 1, %v1079_v30 }
  0xa7   : > { %989 = vmatpush1.bf16.msra.mxu1 %v1473_v35 }
  0xa8   : > { %1032 = vmatpush1.bf16.msra.mxu0 %v1474_v36  ;;  %990 = vmatprep.subr.bf16.mxu1 %v1475_v37 }
  0xa9   : > { %1033 = vmatprep.subr.bf16.mxu0 %v1477_v38  ;;  %v1081_v38 = vrot.slane (!%p1325_p5), %v1076_v31, %v1080_v33 }
  0xab   : > { %991 = vmatpush1.bf16.msra.mxu1 %v1479_v39  ;;  %v1085_v39 = vrot.slane (!%p1325_p5), %v1076_v31, %v1084_v34 }
  0xac   : > { %1034 = vmatpush1.bf16.msra.mxu0 %v1480_v40  ;;  %992 = vmatprep.subr.bf16.mxu1 %v1481_v41 }
  0xad   : > { %1035 = vmatprep.subr.bf16.mxu0 %v1483_v42 }
  0xaf   : > { %993 = vmatpush1.bf16.msra.mxu1 %v1485_v43 }
  0xb0   : > { %1036 = vmatpush1.bf16.msra.mxu0 %v1486_v44  ;;  %994 = vmatprep.subr.bf16.mxu1 %v1487_v45 }
  0xb1   : > { %1037 = vmatprep.subr.bf16.mxu0 %v1489_v46 }
  0xb3   : > { %995 = vmatpush1.bf16.msra.mxu1 %v1491_v47 }
  0xb4   : > { %1038 = vmatpush1.bf16.msra.mxu0 %v1492_v48  ;;  %996 = vmatprep.subr.bf16.mxu1 %v1493_v49 }
  0xb5   : > { %1039 = vmatprep.subr.bf16.mxu0 %v1495_v50 }
  0xb7   : > { %997 = vmatpush1.bf16.msra.mxu1 %v1497_v51 }
  0xb8   : > { %1040 = vmatpush1.bf16.msra.mxu0 %v1498_v53  ;;  %998 = vmatprep.subr.bf16.mxu1 %v1499_v54 }
  0xb9   : > { %1041 = vmatprep.subr.bf16.mxu0 %v1501_v55 }
  0xbb   : > { %999 = vmatpush1.bf16.msra.mxu1 %v1503_v57 }
  0xbc   : > { %1042 = vmatpush1.bf16.msra.mxu0 %v1504_v58  ;;  %1000 = vmatprep.subr.bf16.mxu1 %v1505_v59 }
  0xbd   : > { %1043 = vmatprep.subr.bf16.mxu0 %v1507_v60 }
  0xbf   : > { %1001 = vmatpush1.bf16.msra.mxu1 %v1509_v61 }
  0xc0   : > { %1044 = vmatpush1.bf16.msra.mxu0 %v1510_v62  ;;  %1002 = vmatprep.subr.bf16.mxu1 %v1511_v63 }
  0xc1   : > { %1045 = vmatprep.subr.bf16.mxu0 %v1513_v0 }
  0xc3   : > { %1003 = vmatpush1.bf16.msra.mxu1 %v1515_v1 }
  0xc4   : > { %1046 = vmatpush1.bf16.msra.mxu0 %v1516_v2  ;;  %1004 = vmatprep.subr.bf16.mxu1 %v1517_v3 }
  0xc5   : > { %1047 = vmatprep.subr.bf16.mxu0 %v1519_v4 }
  0xc7   : > { %1005 = vmatpush1.bf16.msra.mxu1 %v1521_v5 }
  0xc8   : > { %1048 = vmatpush1.bf16.msra.mxu0 %v1522_v6 }
  0xca   : > { %1007 = vmatmul.mubr.bf16.vlgmr.msra.gmra.mrb[0].mxu1 %v1523_v7 }
  0xcb   : > { %1050 = vmatmul.mubr.bf16.vlgmr.msra.gmra.mrb[0].mxu0 %v1526_v8 }
 0x19d   : > { %v1008_v9 = vpop.f32.mrb[0].mxu1 }
 0x19e   : > { %v1051_v11 = vpop.f32.mrb[0].mxu0  ;;  %v1010_v13 = vpop.f32.mrb[1].mxu1 }
 0x19f   : > { %v1052_v12 = vadd.f32 %v1051_v11, %v1008_v9  ;;  %v1053_v15 = vpop.f32.mrb[1].mxu0  ;;  %v1012_v17 = vpop.f32.mrb[2].mxu1 }
 0x1a0   : > { %v1054_v16 = vadd.f32 %v1053_v15, %v1010_v13  ;;  %v1055_v19 = vpop.f32.mrb[2].mxu0  ;;  %v1014_v22 = vpop.f32.mrb[3].mxu1  ;;  %1071 = sbr.rel (%p1325_p5) target bundleno = 433 (0x1b1), region = 101 }
 0x1a1   : > { %v1060_v20 = vadd.f32 %v1052_v12, %v562_v10  ;;  %v1056_v21 = vadd.f32 %v1055_v19, %v1012_v17  ;;  %v1057_v24 = vpop.f32.mrb[3].mxu0 }
 0x1a2   : > { %v1061_v25 = vadd.f32 %v1054_v16, %v563_v14  ;;  %v1058_v26 = vadd.f32 %v1057_v24, %v1014_v22 }
 0x1a3   : > { %1064 = vst [vmem:[#allocation2] sm:$0xff] %v1060_v20  ;;  %v1062_v27 = vadd.f32 %v1056_v21, %v564_v18 }
 0x1a4   : > { %1065 = vst [vmem:[#allocation2 + $0x8] sm:$0xff] %v1061_v25  ;;  %v1063_v28 = vadd.f32 %v1058_v26, %v565_v23 }
 0x1a5   : > { %1066 = vst [vmem:[#allocation2 + $0x10] sm:$0xff] %v1062_v27 }
 0x1a6   : > { %1067 = vst [vmem:[#allocation2 + $0x18] sm:$0xff] %v1063_v28 }
 0x1aa   : > { %v1072_v32 = vld [vmem:[#allocation2] sm:$0xff] }
 0x1ab   : > { %v1073_v35 = vld [vmem:[#allocation2 + $0x8] sm:$0xff]  ;;  %v1088_v40 = vadd.f32 %v1081_v38, %v1072_v32 }
 0x1ac   : > { %v1074_v36 = vld [vmem:[#allocation2 + $0x10] sm:$0xff]  ;;  %v1089_v41 = vadd.f32 %v1085_v39, %v1073_v35 }
 0x1ad   : > { %v1075_v37 = vld [vmem:[#allocation2 + $0x18] sm:$0xff]  ;;  %v1090_v42 = vadd.f32 %v1081_v38, %v1074_v36  ;;  %1092 = vst [vmem:[%s1900_s1] sm:$0xff] %v1088_v40 }
 0x1ae   : > { %v1091_v43 = vadd.f32 %v1085_v39, %v1075_v37  ;;  %1093 = vst [vmem:[%s1900_s1 + $0x8] sm:$0xff] %v1089_v41 }
 0x1af   : > { %1094 = vst [vmem:[%s1900_s1 + $0x10] sm:$0xff] %v1090_v42 }
 0x1b0   : > { %1095 = vst [vmem:[%s1900_s1 + $0x18] sm:$0xff] %v1091_v43 }
 0x1b1 PF: > { %1102 = sbr.rel (!%p1732_p12) target bundleno = 441 (0x1b9), region = 105  ;;  %s1333_s16 = sshll.u32 (%p1732_p12), %s1603_s19, 4 }
 0x1b2   : > { %s1108_s5 = scalar_lea.vmem (%p1732_p12), %s2027_s3, %s1333_s16 }
 0x1b4   : > { %v1121_v44 = vld [vmem:[%s1900_s1] sm:$0xff] (%p1732_p12) }
 0x1b5   : > { %v1123_v45 = vld [vmem:[%s1900_s1 + $0x8] sm:$0xff] (%p1732_p12)  ;;  %1122 = vst [vmem:[%s1108_s5] sm:$0xff] (%p1732_p12), %v1121_v44 }
 0x1b6   : > { %v1125_v46 = vld [vmem:[%s1900_s1 + $0x10] sm:$0xff] (%p1732_p12)  ;;  %1124 = vst [vmem:[%s1108_s5 + $0x8] sm:$0xff] (%p1732_p12), %v1123_v45 }
 0x1b7   : > { %v1127_v47 = vld [vmem:[%s1900_s1 + $0x18] sm:$0xff] (%p1732_p12)  ;;  %1126 = vst [vmem:[%s1108_s5 + $0x40] sm:$0xff] (%p1732_p12), %v1125_v46 }
 0x1b8   : > { %1128 = vst [vmem:[%s1108_s5 + $0x48] sm:$0xff] %v1127_v47 }
 0x1b9 PF: > { %s13_s22 = sadd.s32 1, %s1615_s22   ;;  %s2037_s10 = sld [smem:[#allocation6_spill]] }
 0x1ba   : > { %p10_p6 = scmp.ge.s32.totalorder %s13_s22, 34   ;;  %s2038_s12 = smov %s1579_s13 }
 0x1bb   : > { %s2039_s13 = smov %s1730_s9  ;;  %s2040_s14 = smov %s1587_s15 }
 0x1bc   : > { %s2041_s15 = smov %s1727_s8  ;;  %s2042_s16 = smov %s1595_s17 }
 0x1bd   : > { %s2043_s17 = smov %s1713_s30  ;;  %s2044_s18 = smov %s1607_s20 }
 0x1be   : > { %s2045_s19 = smov %s1611_s21  ;;  %s2046_s20 = smov %s2049_s24 }
 0x1bf   : > { %s2047_s21 = smov %s2037_s10  ;;  %12 = sbr.rel (!%p10_p6) target bundleno = 9 (0x9), region = 170 }

</bundles_post_ra>
